<compile_context>
chip_gen: v5e
topology: v5e:2x2
jax: 0.10.0
libtpu: 0.0.40
codegen_flags: <defaults>
</compile_context>

<pallas_src>
import functools

import jax
import jax.numpy as jnp
import numpy as np
from jax.experimental import pallas as pl
from jax.experimental.pallas import tpu as pltpu


def _round_up(x, m):
    return (x + m - 1) // m * m


def _make_mlp_kernel(num_layers, out_dim, probablities, mode, normalize):
    """Fused MLP kernel: (x_ref, w0, b0, ..., w_{L-1}, b_{L-1}, out_ref)."""

    def kernel(x_ref, *refs):
        out_ref = refs[-1]
        h = x_ref[...].astype(jnp.float32)

        for i in range(num_layers):
            w = refs[2 * i][...]                     # bf16 [in_pad, out_pad]
            b = refs[2 * i + 1][...]                 # f32  [1, out_pad]
            h = jnp.dot(h.astype(w.dtype), w,
                        preferred_element_type=jnp.float32) + b
            if i < num_layers - 1:                   # ReLU between hidden layers
                h = jnp.maximum(h, 0.0)

        logits = h                                   # [tile_n, out_pad] f32

        # The output width is padded to a multiple of 128; mask padded lanes
        # out of any row-wise reduction in the epilogues.
        if probablities or normalize:
            col = jax.lax.broadcasted_iota(jnp.int32, logits.shape, 1)
            valid = col < out_dim

        if probablities:
            if mode == "softmax":
                lm = jnp.where(valid, logits, jnp.full_like(logits, -1e30))
                m = jnp.max(lm, axis=1, keepdims=True)
                e = jnp.where(valid, jnp.exp(lm - m), jnp.zeros_like(logits))
                logits = e * pl.reciprocal(
                    jnp.sum(e, axis=1, keepdims=True), approx=True)
            elif mode == "cauchy":
                c = 1.0 / (1.0 + logits * logits)
                c = jnp.where(valid, c, jnp.zeros_like(c))
                denom = jnp.maximum(
                    jnp.sum(jnp.abs(c), axis=1, keepdims=True), 1e-12)
                logits = c * pl.reciprocal(denom, approx=True)   # F.normalize p=1

        if normalize:
            logits = jnp.where(valid, logits, jnp.zeros_like(logits))
            nrm = jnp.maximum(
                jnp.sqrt(jnp.sum(logits * logits, axis=1, keepdims=True)), 1e-12)
            logits = logits * pl.reciprocal(nrm, approx=True)     # F.normalize p=2

        out_ref[...] = logits.astype(out_ref.dtype)

    return kernel


def init_mlp_params(key, input_dim, hidden_dims, output_dim):
    """PyTorch nn.Linear-style init: U(-1/sqrt(fan_in), 1/sqrt(fan_in))."""
    dims = [input_dim] + list(hidden_dims) + [output_dim]
    params = []
    for i in range(len(dims) - 1):
        key, kw, kb = jax.random.split(key, 3)
        bound = 1.0 / np.sqrt(dims[i])
        w = jax.random.uniform(kw, (dims[i], dims[i + 1]), jnp.float32,
                               minval=-bound, maxval=bound)
        b = jax.random.uniform(kb, (1, dims[i + 1]), jnp.float32,
                               minval=-bound, maxval=bound)
        params.append((w, b))
    return params


def prepare_params(params):
    """One-time prep: zero-pad every layer's output width (and the next layer's
    input width) to a multiple of 128, cast weights to bf16.  Zero padding keeps
    the math exact.  Returns a flat tuple (w0, b0, w1, b1, ...)."""
    flat = []
    in_pad = params[0][0].shape[0]          # input feature dim left unpadded
    for (w, b) in params:
        out_pad = _round_up(w.shape[1], 128)
        w_p = jnp.pad(w, ((0, in_pad - w.shape[0]), (0, out_pad - w.shape[1])))
        b_p = jnp.pad(b, ((0, 0), (0, out_pad - b.shape[1])))
        flat.extend((w_p.astype(jnp.bfloat16), b_p.astype(jnp.float32)))
        in_pad = out_pad
    return tuple(flat)


@functools.partial(
    jax.jit,
    static_argnames=("out_dim", "probablities", "mode", "normalize"))
def mlp_mapper_forward(x, prepared, out_dim, probablities=False,
                       mode="softmax", normalize=False):
    num_layers = len(prepared) // 2
    out_pad = prepared[-1].shape[1]
    n, in_dim = x.shape

    # Batch tiling: cap the tile at 256 rows (VMEM-friendly on v7x, fills the
    # 256-wide MXU on v6e/v7x); weights stay resident across tiles.
    if n <= 256:
        tile_n = max(8, _round_up(n, 8))
    else:
        tile_n = 256
    n_pad = _round_up(n, tile_n)
    x_p = jnp.pad(x, ((0, n_pad - n), (0, 0))) if n_pad != n else x

    in_specs = [pl.BlockSpec((tile_n, in_dim), lambda i: (i, 0))]
    for a in prepared:  # weights/biases: constant index map -> fetched once
        in_specs.append(pl.BlockSpec(a.shape, lambda i: (0, 0)))
    out_specs = pl.BlockSpec((tile_n, out_pad), lambda i: (i, 0))

    kernel = _make_mlp_kernel(num_layers, out_dim, probablities, mode, normalize)

    out = pl.pallas_call(
        kernel,
        out_shape=jax.ShapeDtypeStruct((n_pad, out_pad), jnp.float32),
        grid=(n_pad // tile_n,),
        in_specs=in_specs,
        out_specs=out_specs,
        compiler_params=pltpu.CompilerParams(
            dimension_semantics=("parallel",),   # shard batch tiles on v7x TCs
            vmem_limit_bytes=24 << 20),          # ~4MB bf16 weights + tiles + headroom
    )(x_p, *prepared)

    return out[:n, :out_dim]


def _reference_forward(x, params, probablities=False, mode="softmax",
                       normalize=False):
    """Pure-JAX reference mirroring the kernel's bf16-weight / f32-acc path."""
    h = x.astype(jnp.float32)
    for i, (w, b) in enumerate(params):
        h = jnp.dot(h.astype(jnp.bfloat16), w.astype(jnp.bfloat16),
                    preferred_element_type=jnp.float32) + b
        if i < len(params) - 1:
            h = jnp.maximum(h, 0.0)
    logits = h
    if probablities:
        if mode == "softmax":
            logits = jax.nn.softmax(logits, axis=1)
        elif mode == "cauchy":
            logits = 1.0 / (1.0 + logits ** 2)
            logits = logits / jnp.maximum(
                jnp.sum(jnp.abs(logits), axis=1, keepdims=True), 1e-12)
    if normalize:
        logits = logits / jnp.maximum(
            jnp.sqrt(jnp.sum(logits ** 2, axis=1, keepdims=True)), 1e-12)
    return logits


if __name__ == "__main__":
    # MLPMapper defaults: 784 -> 512 -> 512 -> 2000 -> 2.
    input_dim = 28 * 28
    hidden_dims = (512, 512, 2000)
    output_dim = 2

    key = jax.random.PRNGKey(0)
    key_x, key_x2, key_p = jax.random.split(key, 3)
    params = init_mlp_params(key_p, input_dim, hidden_dims, output_dim)
    prepared = prepare_params(params)

    # Small batch, default config (no epilogue).
    x = jax.random.normal(key_x, (8, input_dim), dtype=jnp.float32)
    out = jax.block_until_ready(mlp_mapper_forward(x, prepared, out_dim=output_dim))
    ref = _reference_forward(x, params)
    np.testing.assert_allclose(np.asarray(out), np.asarray(ref), rtol=2e-2, atol=2e-2)

    # Softmax probabilities epilogue.
    out_sm = jax.block_until_ready(
        mlp_mapper_forward(x, prepared, out_dim=output_dim,
                           probablities=True, mode="softmax"))
    ref_sm = _reference_forward(x, params, probablities=True, mode="softmax")
    np.testing.assert_allclose(np.asarray(out_sm), np.asarray(ref_sm),
                               rtol=2e-2, atol=2e-2)

    # Cauchy probabilities + L2 normalize epilogue.
    out_cn = jax.block_until_ready(
        mlp_mapper_forward(x, prepared, out_dim=output_dim,
                           probablities=True, mode="cauchy", normalize=True))
    ref_cn = _reference_forward(x, params, probablities=True, mode="cauchy",
                                normalize=True)
    np.testing.assert_allclose(np.asarray(out_cn), np.asarray(ref_cn),
                               rtol=2e-2, atol=2e-2)

    # Larger batch: exercises the batch grid (multiple tiles, weights resident).
    xl = jax.random.normal(key_x2, (384, input_dim), dtype=jnp.float32)
    out_l = jax.block_until_ready(mlp_mapper_forward(xl, prepared, out_dim=output_dim))
    ref_l = _reference_forward(xl, params)
    np.testing.assert_allclose(np.asarray(out_l), np.asarray(ref_l),
                               rtol=2e-2, atol=2e-2)

    print("KERNEL_OK")
</pallas_src>

<mosaic_0001>
module attributes {stable_mosaic.version = 11 : i64} {
  func.func @kernel(%arg0: i32, %arg1: memref<8x784xf32, #tpu.memory_space<vmem>>, %arg2: memref<784x512xbf16, #tpu.memory_space<vmem>>, %arg3: memref<1x512xf32, #tpu.memory_space<vmem>>, %arg4: memref<512x512xbf16, #tpu.memory_space<vmem>>, %arg5: memref<1x512xf32, #tpu.memory_space<vmem>>, %arg6: memref<512x2048xbf16, #tpu.memory_space<vmem>>, %arg7: memref<1x2048xf32, #tpu.memory_space<vmem>>, %arg8: memref<2048x128xbf16, #tpu.memory_space<vmem>>, %arg9: memref<1x128xf32, #tpu.memory_space<vmem>>, %arg10: memref<8x128xf32, #tpu.memory_space<vmem>>) attributes {dimension_semantics = [#tpu.dimension_semantics<parallel>], iteration_bounds = array<i64: 1>, scalar_prefetch = 0 : i64, scratch_operands = 0 : i64, tpu.core_type = #tpu.core_type<tc>, window_params = [{transform_indices = @transform_0, window_bounds = array<i64: 8, 784>}, {pipeline_mode = #tpu.pipeline_mode<synchronous>, transform_indices = @transform_1, window_bounds = array<i64: 784, 512>}, {pipeline_mode = #tpu.pipeline_mode<synchronous>, transform_indices = @transform_2, window_bounds = array<i64: 1, 512>}, {pipeline_mode = #tpu.pipeline_mode<synchronous>, transform_indices = @transform_3, window_bounds = array<i64: 512, 512>}, {pipeline_mode = #tpu.pipeline_mode<synchronous>, transform_indices = @transform_4, window_bounds = array<i64: 1, 512>}, {pipeline_mode = #tpu.pipeline_mode<synchronous>, transform_indices = @transform_5, window_bounds = array<i64: 512, 2048>}, {pipeline_mode = #tpu.pipeline_mode<synchronous>, transform_indices = @transform_6, window_bounds = array<i64: 1, 2048>}, {pipeline_mode = #tpu.pipeline_mode<synchronous>, transform_indices = @transform_7, window_bounds = array<i64: 2048, 128>}, {pipeline_mode = #tpu.pipeline_mode<synchronous>, transform_indices = @transform_8, window_bounds = array<i64: 1, 128>}, {transform_indices = @transform_9, window_bounds = array<i64: 8, 128>}]} {
    %c0 = arith.constant 0 : index
    %c0_0 = arith.constant 0 : index
    %0 = vector.load %arg1[%c0, %c0_0] : memref<8x784xf32, #tpu.memory_space<vmem>>, vector<8x784xf32>
    %c0_1 = arith.constant 0 : index
    %c0_2 = arith.constant 0 : index
    %1 = vector.load %arg2[%c0_1, %c0_2] : memref<784x512xbf16, #tpu.memory_space<vmem>>, vector<784x512xbf16>
    %c0_3 = arith.constant 0 : index
    %c0_4 = arith.constant 0 : index
    %2 = vector.load %arg3[%c0_3, %c0_4] : memref<1x512xf32, #tpu.memory_space<vmem>>, vector<1x512xf32>
    %3 = arith.truncf %0 : vector<8x784xf32> to vector<8x784xbf16>
    %cst = arith.constant dense<0.000000e+00> : vector<8x512xf32>
    %4 = tpu.matmul %3, %1, %cst {dimension_numbers = #tpu.dot_dimension_numbers<[1], [0], [0], [1], [0, 0, 1, 1], [], []>} : vector<8x784xbf16>, vector<784x512xbf16>, vector<8x512xf32> -> vector<8x512xf32>
    %5 = vector.broadcast %2 : vector<1x512xf32> to vector<8x512xf32>
    %6 = arith.addf %4, %5 : vector<8x512xf32>
    %cst_5 = arith.constant 0.000000e+00 : f32
    %7 = vector.broadcast %cst_5 : f32 to vector<8x512xf32>
    %8 = arith.maximumf %6, %7 : vector<8x512xf32>
    %c0_6 = arith.constant 0 : index
    %c0_7 = arith.constant 0 : index
    %9 = vector.load %arg4[%c0_6, %c0_7] : memref<512x512xbf16, #tpu.memory_space<vmem>>, vector<512x512xbf16>
    %c0_8 = arith.constant 0 : index
    %c0_9 = arith.constant 0 : index
    %10 = vector.load %arg5[%c0_8, %c0_9] : memref<1x512xf32, #tpu.memory_space<vmem>>, vector<1x512xf32>
    %11 = arith.truncf %8 : vector<8x512xf32> to vector<8x512xbf16>
    %cst_10 = arith.constant dense<0.000000e+00> : vector<8x512xf32>
    %12 = tpu.matmul %11, %9, %cst_10 {dimension_numbers = #tpu.dot_dimension_numbers<[1], [0], [0], [1], [0, 0, 1, 1], [], []>} : vector<8x512xbf16>, vector<512x512xbf16>, vector<8x512xf32> -> vector<8x512xf32>
    %13 = vector.broadcast %10 : vector<1x512xf32> to vector<8x512xf32>
    %14 = arith.addf %12, %13 : vector<8x512xf32>
    %cst_11 = arith.constant 0.000000e+00 : f32
    %15 = vector.broadcast %cst_11 : f32 to vector<8x512xf32>
    %16 = arith.maximumf %14, %15 : vector<8x512xf32>
    %c0_12 = arith.constant 0 : index
    %c0_13 = arith.constant 0 : index
    %17 = vector.load %arg6[%c0_12, %c0_13] : memref<512x2048xbf16, #tpu.memory_space<vmem>>, vector<512x2048xbf16>
    %c0_14 = arith.constant 0 : index
    %c0_15 = arith.constant 0 : index
    %18 = vector.load %arg7[%c0_14, %c0_15] : memref<1x2048xf32, #tpu.memory_space<vmem>>, vector<1x2048xf32>
    %19 = arith.truncf %16 : vector<8x512xf32> to vector<8x512xbf16>
    %cst_16 = arith.constant dense<0.000000e+00> : vector<8x2048xf32>
    %20 = tpu.matmul %19, %17, %cst_16 {dimension_numbers = #tpu.dot_dimension_numbers<[1], [0], [0], [1], [0, 0, 1, 1], [], []>} : vector<8x512xbf16>, vector<512x2048xbf16>, vector<8x2048xf32> -> vector<8x2048xf32>
    %21 = vector.broadcast %18 : vector<1x2048xf32> to vector<8x2048xf32>
    %22 = arith.addf %20, %21 : vector<8x2048xf32>
    %cst_17 = arith.constant 0.000000e+00 : f32
    %23 = vector.broadcast %cst_17 : f32 to vector<8x2048xf32>
    %24 = arith.maximumf %22, %23 : vector<8x2048xf32>
    %c0_18 = arith.constant 0 : index
    %c0_19 = arith.constant 0 : index
    %25 = vector.load %arg8[%c0_18, %c0_19] : memref<2048x128xbf16, #tpu.memory_space<vmem>>, vector<2048x128xbf16>
    %c0_20 = arith.constant 0 : index
    %c0_21 = arith.constant 0 : index
    %26 = vector.load %arg9[%c0_20, %c0_21] : memref<1x128xf32, #tpu.memory_space<vmem>>, vector<1x128xf32>
    %27 = arith.truncf %24 : vector<8x2048xf32> to vector<8x2048xbf16>
    %cst_22 = arith.constant dense<0.000000e+00> : vector<8x128xf32>
    %28 = tpu.matmul %27, %25, %cst_22 {dimension_numbers = #tpu.dot_dimension_numbers<[1], [0], [0], [1], [0, 0, 1, 1], [], []>} : vector<8x2048xbf16>, vector<2048x128xbf16>, vector<8x128xf32> -> vector<8x128xf32>
    %29 = vector.broadcast %26 : vector<1x128xf32> to vector<8x128xf32>
    %30 = arith.addf %28, %29 : vector<8x128xf32>
    %c0_23 = arith.constant 0 : index
    %c0_24 = arith.constant 0 : index
    %31 = vector.load %arg10[%c0_23, %c0_24] : memref<8x128xf32, #tpu.memory_space<vmem>>, vector<8x128xf32>
    tpu.vector_store %arg10[%c0_23, %c0_24], %30 {strides = array<i32>} : memref<8x128xf32, #tpu.memory_space<vmem>>, vector<8x128xf32>,
    return
  }
  func.func @transform_0(%arg0: i32) -> (i32, i32) {
    %c0_i32 = arith.constant 0 : i32
    %c0_i32_0 = arith.constant 0 : i32
    return %arg0, %c0_i32 : i32, i32
  }
  func.func @transform_1(%arg0: i32) -> (i32, i32) {
    %c0_i32 = arith.constant 0 : i32
    %c0_i32_0 = arith.constant 0 : i32
    %c0_i32_1 = arith.constant 0 : i32
    return %c0_i32, %c0_i32_0 : i32, i32
  }
  func.func @transform_2(%arg0: i32) -> (i32, i32) {
    %c0_i32 = arith.constant 0 : i32
    %c0_i32_0 = arith.constant 0 : i32
    %c0_i32_1 = arith.constant 0 : i32
    return %c0_i32, %c0_i32_0 : i32, i32
  }
  func.func @transform_3(%arg0: i32) -> (i32, i32) {
    %c0_i32 = arith.constant 0 : i32
    %c0_i32_0 = arith.constant 0 : i32
    %c0_i32_1 = arith.constant 0 : i32
    return %c0_i32, %c0_i32_0 : i32, i32
  }
  func.func @transform_4(%arg0: i32) -> (i32, i32) {
    %c0_i32 = arith.constant 0 : i32
    %c0_i32_0 = arith.constant 0 : i32
    %c0_i32_1 = arith.constant 0 : i32
    return %c0_i32, %c0_i32_0 : i32, i32
  }
  func.func @transform_5(%arg0: i32) -> (i32, i32) {
    %c0_i32 = arith.constant 0 : i32
    %c0_i32_0 = arith.constant 0 : i32
    %c0_i32_1 = arith.constant 0 : i32
    return %c0_i32, %c0_i32_0 : i32, i32
  }
  func.func @transform_6(%arg0: i32) -> (i32, i32) {
    %c0_i32 = arith.constant 0 : i32
    %c0_i32_0 = arith.constant 0 : i32
    %c0_i32_1 = arith.constant 0 : i32
    return %c0_i32, %c0_i32_0 : i32, i32
  }
  func.func @transform_7(%arg0: i32) -> (i32, i32) {
    %c0_i32 = arith.constant 0 : i32
    %c0_i32_0 = arith.constant 0 : i32
    %c0_i32_1 = arith.constant 0 : i32
    return %c0_i32, %c0_i32_0 : i32, i32
  }
  func.func @transform_8(%arg0: i32) -> (i32, i32) {
    %c0_i32 = arith.constant 0 : i32
    %c0_i32_0 = arith.constant 0 : i32
    %c0_i32_1 = arith.constant 0 : i32
    return %c0_i32, %c0_i32_0 : i32, i32
  }
  func.func @transform_9(%arg0: i32) -> (i32, i32) {
    %c0_i32 = arith.constant 0 : i32
    %c0_i32_0 = arith.constant 0 : i32
    return %arg0, %c0_i32 : i32, i32
  }
}

</mosaic_0001>

<bundles_post_ra>
// kernel: mlp_mapper_forward.1
= control target key start
LH: loop header
LB: loop body
LE: loop exit
PB: predicated region body
PF: predicated region fallthrough
CT: control target
= control target key end

     0   :  { %14 = vsyncpa [#allocation3], 0  ;;  %s13482_s0 = inlined_call_operand.hbm [shape: f32[8,784], index: 0, kind: input, shape index: {}]   ;;  %s13483_s1 = inlined_call_operand.hbm [shape: bf16[784,512], index: 1, kind: input, shape index: {}]   ;;  %s13484_s2 = inlined_call_operand.hbm [shape: f32[1,512], index: 2, kind: input, shape index: {}]   ;;  %s13485_s3 = inlined_call_operand.hbm [shape: bf16[512,512], index: 3, kind: input, shape index: {}]   ;;  %s13486_s4 = inlined_call_operand.hbm [shape: f32[1,512], index: 4, kind: input, shape index: {}]   ;;  %s13487_s5 = inlined_call_operand.hbm [shape: bf16[512,2048], index: 5, kind: input, shape index: {}]   ;;  %s13488_s6 = inlined_call_operand.hbm [shape: f32[1,2048], index: 6, kind: input, shape index: {}]   ;;  %s13489_s7 = inlined_call_operand.hbm [shape: bf16[2048,128], index: 7, kind: input, shape index: {}]   ;;  %s13490_s8 = inlined_call_operand.hbm [shape: f32[1,128], index: 8, kind: input, shape index: {}]   ;;  %s13491_s9 = inlined_call_operand.vmem [shape: f32[8,128], index: 9, kind: output, shape index: {}]  }
   0x1   :  { %15 = vsyncpa [#allocation5], 0 }
   0x2   :  { %16 = vsyncpa [#allocation8], 0 }
   0x3   :  { %17 = vsyncpa [#allocation11], 0  ;;  %s34_s11 = sshll.u32 %s13483_s1, 4  ;;  %s35_s11 = int_to_ptr.hbm [resolvable:$true] %s34_s11 }
   0x4   :  { %18 = vsyncpa [#allocation14], 0  ;;  %s13018_s12 = smov [#allocation4]   ;;  %s58_s16 = sshll.u32 %s13485_s3, 4  ;;  %s59_s16 = int_to_ptr.hbm [resolvable:$true] %s58_s16 }
   0x5   :  { %s36_s13 = sshll.u32 %s13018_s12, 4  ;;  %s13019_s17 = smov 256   ;;  %s37_s13 = int_to_ptr.vmem [resolvable:$true] %s36_s13 }
   0x6   :  { %s13020_s18 = smov 16   ;;  %s13021_s19 = smov [#allocation7]  }
   0x7   :  { %42 = dma.hbm_to_vmem [thread:$0]  %s35_s11, 25088, %s37_s13, [#allocation5], %s13019_s17, %s13019_s17, %s13020_s18  }
   0x8   :  { %s60_s20 = sshll.u32 %s13021_s19, 4  ;;  %s82_s23 = sshll.u32 %s13487_s5, 4  ;;  %s61_s20 = int_to_ptr.vmem [resolvable:$true] %s60_s20  ;;  %s83_s23 = int_to_ptr.hbm [resolvable:$true] %s82_s23 }
   0x9   :  { %66 = dma.hbm_to_vmem [thread:$0]  %s59_s16, 16384, %s61_s20, [#allocation8], %s13019_s17, %s13019_s17, %s13020_s18  }
   0xa   :  { %s13022_s1 = smov [#allocation10]   ;;  %s106_s3 = sshll.u32 %s13489_s7, 4  ;;  %s107_s3 = int_to_ptr.hbm [resolvable:$true] %s106_s3 }
   0xb   :  { %s84_s24 = sshll.u32 %s13022_s1, 4  ;;  %s13023_s27 = smov 1024   ;;  %s85_s24 = int_to_ptr.vmem [resolvable:$true] %s84_s24 }
   0xc   :  { %s13024_s28 = smov 64   ;;  %s13025_s29 = smov [#allocation13]  }
   0xd   :  { %90 = dma.hbm_to_vmem [thread:$0]  %s83_s23, 65536, %s85_s24, [#allocation11], %s13023_s27, %s13023_s27, %s13024_s28  }
   0xe   :  { %s108_s30 = sshll.u32 %s13025_s29, 4  ;;  %s24_s5 = sshll.u32 %s13482_s0, 4  ;;  %s109_s30 = int_to_ptr.vmem [resolvable:$true] %s108_s30  ;;  %s25_s5 = int_to_ptr.hbm [resolvable:$true] %s24_s5 }
   0xf   :  { %s13026_s12 = smov 4   ;;  %s13027_s13 = smov [#allocation2]  }
  0x10   :  { %114 = dma.hbm_to_vmem [thread:$0]  %s107_s3, 16384, %s109_s30, [#allocation14], %s13024_s28, %s13024_s28, %s13026_s12  }
  0x11   :  { %s26_s14 = sshll.u32 %s13027_s13, 4  ;;  %s48_s7 = sshll.u32 %s13484_s2, 4  ;;  %s27_s14 = int_to_ptr.vmem [resolvable:$true] %s26_s14  ;;  %s49_s7 = int_to_ptr.hbm [resolvable:$true] %s48_s7 }
  0x12   :  { %29 = dma.hbm_to_vmem [thread:$0]  %s25_s5, 896, %s27_s14, [#allocation3]  }
  0x13   :  { %s72_s19 = sshll.u32 %s13486_s4, 4  ;;  %s13028_s20 = smov [#allocation6]   ;;  %s73_s19 = int_to_ptr.hbm [resolvable:$true] %s72_s19 }
  0x14   :  { %s50_s21 = sshll.u32 %s13028_s20, 4  ;;  %s13029_s0 = smov [#allocation9]   ;;  %s51_s21 = int_to_ptr.vmem [resolvable:$true] %s50_s21 }
  0x15   :  { %53 = dma.hbm_to_vmem [thread:$0]  %s49_s7, 64, %s51_s21, [#allocation5]  }
  0x16   :  { %s74_s22 = sshll.u32 %s13029_s0, 4  ;;  %s96_s24 = sshll.u32 %s13488_s6, 4  ;;  %s75_s22 = int_to_ptr.vmem [resolvable:$true] %s74_s22  ;;  %s97_s24 = int_to_ptr.hbm [resolvable:$true] %s96_s24 }
  0x17   :  { %77 = dma.hbm_to_vmem [thread:$0]  %s73_s19, 64, %s75_s22, [#allocation8]  }
  0x18   :  { %s120_s26 = sshll.u32 %s13490_s8, 4  ;;  %s13030_s3 = smov [#allocation12]   ;;  %s121_s26 = int_to_ptr.hbm [resolvable:$true] %s120_s26 }
  0x19   :  { %s98_s4 = sshll.u32 %s13030_s3, 4  ;;  %s13031_s27 = smov [#allocation15]   ;;  %s99_s4 = int_to_ptr.vmem [resolvable:$true] %s98_s4 }
  0x1a   :  { %101 = dma.hbm_to_vmem [thread:$0]  %s97_s24, 256, %s99_s4, [#allocation11]  }
  0x1b   :  { %s122_s28 = sshll.u32 %s13031_s27, 4  ;;  %s123_s28 = int_to_ptr.vmem [resolvable:$true] %s122_s28 }
  0x1c   :  { %125 = dma.hbm_to_vmem [thread:$0]  %s121_s26, 16, %s123_s28, [#allocation14]  }
  0x1d   :  { %13008 = dma.done.wait [#allocation3], 896  }
  0x1e   :  { %13009 = vsyncadd [#allocation3], 4294966400 }
  0x1f   :  { %13010 = dma.done.wait [#allocation5], 25152  }
  0x20   :  { %13011 = vsyncadd [#allocation5], 4294942144 }
  0x21   :  { %13012 = dma.done.wait [#allocation8], 16448  }
  0x22   :  { %13013 = vsyncadd [#allocation8], 4294950848 }
  0x23   :  { %13014 = dma.done.wait [#allocation11], 65792  }
  0x24   :  { %13015 = vsyncadd [#allocation11], 4294901504 }
  0x25   :  { %13016 = dma.done.wait [#allocation14], 16400  }
  0x26   :  { %13017 = vsyncadd [#allocation14], 4294950896  ;;  %v8065_v0 = vld [vmem:[#allocation4 + $0xe0] sm:$0xf]  ;;  %v11841_v1 = vld [vmem:[#allocation4 + $0xec] sm:$0xf0] }
  0x27   :  { %v8193_v2 = vld [vmem:[#allocation4 + $0x1e0] sm:$0xf]  ;;  %v8066_v3 = vor.u32 %v11841_v1, %v8065_v0  ;;  %v11873_v4 = vld [vmem:[#allocation4 + $0x1ec] sm:$0xf0]  ;;  %vm1363_vm0 = vcmask 130048  }
  0x28   :  { %v8321_v5 = vld [vmem:[#allocation4 + $0x2e0] sm:$0xf]  ;;  %v11905_v6 = vld [vmem:[#allocation4 + $0x2ec] sm:$0xf0]  ;;  %v8194_v7 = vor.u32 %v11873_v4, %v8193_v2 }
  0x29   :  { %v8322_v8 = vor.u32 %v11905_v6, %v8321_v5  ;;  %v8449_v9 = vld [vmem:[#allocation4 + $0x3e0] sm:$0xf]  ;;  %v11937_v10 = vld [vmem:[#allocation4 + $0x3ec] sm:$0xf0]  ;;  %1367 = vmatpush.bf16.msra.mxu0 %v8066_v3 }
  0x2a   :  { %v8049_v11 = vld [vmem:[#allocation4 + $0xc0] sm:$0xf]  ;;  %v8450_v12 = vor.u32 %v11937_v10, %v8449_v9  ;;  %v11837_v13 = vld [vmem:[#allocation4 + $0xcc] sm:$0xf0]  ;;  %1380 = vmatpush.bf16.msra.mxu1 %v8194_v7 }
  0x2b   :  { %v8177_v14 = vld [vmem:[#allocation4 + $0x1c0] sm:$0xf]  ;;  %v11869_v15 = vld [vmem:[#allocation4 + $0x1cc] sm:$0xf0]  ;;  %1393 = vmatpush.bf16.msra.mxu2 %v8322_v8  ;;  %v8050_v16 = vor.u32 %v11837_v13, %v8049_v11 }
  0x2c   :  { %v8178_v17 = vor.u32 %v11869_v15, %v8177_v14  ;;  %v8305_v18 = vld [vmem:[#allocation4 + $0x2c0] sm:$0xf]  ;;  %v11901_v19 = vld [vmem:[#allocation4 + $0x2cc] sm:$0xf0]  ;;  %1406 = vmatpush.bf16.msra.mxu3 %v8450_v12 }
  0x2d   :  { %v8433_v20 = vld [vmem:[#allocation4 + $0x3c0] sm:$0xf]  ;;  %v8306_v21 = vor.u32 %v11901_v19, %v8305_v18  ;;  %v11933_v22 = vld [vmem:[#allocation4 + $0x3cc] sm:$0xf0]  ;;  %1368 = vmatpush.bf16.msra.mxu0 %v8050_v16 }
  0x2e   :  { %v8033_v23 = vld [vmem:[#allocation4 + $0xa0] sm:$0xf]  ;;  %v11833_v24 = vld [vmem:[#allocation4 + $0xac] sm:$0xf0]  ;;  %v8434_v25 = vor.u32 %v11933_v22, %v8433_v20  ;;  %1381 = vmatpush.bf16.msra.mxu1 %v8178_v17 }
  0x2f   :  { %v8161_v26 = vld [vmem:[#allocation4 + $0x1a0] sm:$0xf]  ;;  %v11865_v27 = vld [vmem:[#allocation4 + $0x1ac] sm:$0xf0]  ;;  %v8034_v29 = vor.u32 %v11833_v24, %v8033_v23  ;;  %1394 = vmatpush.bf16.msra.mxu2 %v8306_v21 }
  0x30   :  { %v8289_v28 = vld [vmem:[#allocation4 + $0x2a0] sm:$0xf]  ;;  %v11897_v30 = vld [vmem:[#allocation4 + $0x2ac] sm:$0xf0]  ;;  %v8162_v33 = vor.u32 %v11865_v27, %v8161_v26  ;;  %1407 = vmatpush.bf16.msra.mxu3 %v8434_v25 }
  0x31   :  { %v8417_v31 = vld [vmem:[#allocation4 + $0x3a0] sm:$0xf]  ;;  %v11929_v32 = vld [vmem:[#allocation4 + $0x3ac] sm:$0xf0]  ;;  %v8290_v34 = vor.u32 %v11897_v30, %v8289_v28  ;;  %1369 = vmatpush.bf16.msra.mxu0 %v8034_v29 }
  0x32   :  { %v8017_v35 = vld [vmem:[#allocation4 + $0x80] sm:$0xf]  ;;  %v11829_v36 = vld [vmem:[#allocation4 + $0x8c] sm:$0xf0]  ;;  %v8418_v38 = vor.u32 %v11929_v32, %v8417_v31  ;;  %1382 = vmatpush.bf16.msra.mxu1 %v8162_v33  ;;  %v11839_v33 = vld [vmem:[#allocation4 + $0xe4] sm:$0xf] }
  0x33   :  { %v8145_v37 = vld [vmem:[#allocation4 + $0x180] sm:$0xf]  ;;  %v11861_v39 = vld [vmem:[#allocation4 + $0x18c] sm:$0xf0]  ;;  %v8018_v44 = vor.u32 %v11829_v36, %v8017_v35  ;;  %1395 = vmatpush.bf16.msra.mxu2 %v8290_v34  ;;  %v8067_v34 = vld [vmem:[#allocation4 + $0xf0] sm:$0xf0] }
  0x34   :  { %v8273_v40 = vld [vmem:[#allocation4 + $0x280] sm:$0xf]  ;;  %v11893_v41 = vld [vmem:[#allocation4 + $0x28c] sm:$0xf0]  ;;  %v8146_v45 = vor.u32 %v11861_v39, %v8145_v37  ;;  %1408 = vmatpush.bf16.msra.mxu3 %v8418_v38  ;;  %v165_v35 = vld [vmem:[#allocation2 + $0x10] sm:$0xff] }
  0x35   :  { %v8401_v42 = vld [vmem:[#allocation4 + $0x380] sm:$0xf]  ;;  %v11925_v43 = vld [vmem:[#allocation4 + $0x38c] sm:$0xf0]  ;;  %v8274_v46 = vor.u32 %v11893_v41, %v8273_v40  ;;  %1370 = vmatpush.bf16.msra.mxu0 %v8018_v44  ;;  %v163_v40 = vld [vmem:[#allocation2] sm:$0xff] }
  0x36   :  { %v8001_v47 = vld [vmem:[#allocation4 + $0x60] sm:$0xf]  ;;  %v11825_v48 = vld [vmem:[#allocation4 + $0x6c] sm:$0xf0]  ;;  %v8402_v50 = vor.u32 %v11925_v43, %v8401_v42  ;;  %1383 = vmatpush.bf16.msra.mxu1 %v8146_v45  ;;  %v11871_v43 = vld [vmem:[#allocation4 + $0x1e4] sm:$0xf] }
  0x37   :  { %v8129_v49 = vld [vmem:[#allocation4 + $0x160] sm:$0xf]  ;;  %v11857_v51 = vld [vmem:[#allocation4 + $0x16c] sm:$0xf0]  ;;  %v8002_v56 = vor.u32 %v11825_v48, %v8001_v47  ;;  %1396 = vmatpush.bf16.msra.mxu2 %v8274_v46  ;;  %v8195_v44 = vld [vmem:[#allocation4 + $0x1f0] sm:$0xf0]  ;;  %v8070_v47 = vor.u32 %v11839_v33, %v8067_v34 }
  0x38   :  { %v8257_v52 = vld [vmem:[#allocation4 + $0x260] sm:$0xf]  ;;  %v11889_v53 = vld [vmem:[#allocation4 + $0x26c] sm:$0xf0]  ;;  %v8130_v57 = vor.u32 %v11857_v51, %v8129_v49  ;;  %1409 = vmatpush.bf16.msra.mxu3 %v8402_v50  ;;  %v13109_v51 = vpack.c.bf16 %v165_v35, %v165_v35  ;;  %v11855_v35 = vld [vmem:[#allocation4 + $0x164] sm:$0xf] }
  0x39   :  { %v8385_v54 = vld [vmem:[#allocation4 + $0x360] sm:$0xf]  ;;  %v11921_v55 = vld [vmem:[#allocation4 + $0x36c] sm:$0xf0]  ;;  %v8258_v58 = vor.u32 %v11889_v53, %v8257_v52  ;;  %1371 = vmatpush.bf16.msra.mxu0 %v8002_v56  ;;  %v11835_v53 = vld [vmem:[#allocation4 + $0xc4] sm:$0xf] }
  0x3a   :  { %v7985_v59 = vld [vmem:[#allocation4 + $0x40] sm:$0xf]  ;;  %v11821_v60 = vld [vmem:[#allocation4 + $0x4c] sm:$0xf0]  ;;  %v8386_v62 = vor.u32 %v11921_v55, %v8385_v54  ;;  %1384 = vmatpush.bf16.msra.mxu1 %v8130_v57  ;;  %v8051_v54 = vld [vmem:[#allocation4 + $0xd0] sm:$0xf0]  ;;  %v13111_v55 = vpack.c.bf16 %v163_v40, %v163_v40 }
  0x3b   :  { %v8113_v61 = vld [vmem:[#allocation4 + $0x140] sm:$0xf]  ;;  %v11853_v63 = vld [vmem:[#allocation4 + $0x14c] sm:$0xf0]  ;;  %v7986_v4 = vor.u32 %v11821_v60, %v7985_v59  ;;  %1397 = vmatpush.bf16.msra.mxu2 %v8258_v58  ;;  %v8198_v59 = vor.u32 %v11871_v43, %v8195_v44  ;;  %v11819_v43 = vld [vmem:[#allocation4 + $0x44] sm:$0xf] }
  0x3c   :  { %v8241_v0 = vld [vmem:[#allocation4 + $0x240] sm:$0xf]  ;;  %v11885_v1 = vld [vmem:[#allocation4 + $0x24c] sm:$0xf0]  ;;  %v8114_v5 = vor.u32 %v11853_v63, %v8113_v61  ;;  %1410 = vmatpush.bf16.msra.mxu3 %v8386_v62  ;;  %v11867_v61 = vld [vmem:[#allocation4 + $0x1c4] sm:$0xf] }
  0x3d   :  { %v8369_v2 = vld [vmem:[#allocation4 + $0x340] sm:$0xf]  ;;  %v11917_v3 = vld [vmem:[#allocation4 + $0x34c] sm:$0xf0]  ;;  %v8242_v6 = vor.u32 %v11885_v1, %v8241_v0  ;;  %1372 = vmatpush.bf16.msra.mxu0 %v7986_v4  ;;  %v8179_v62 = vld [vmem:[#allocation4 + $0x1d0] sm:$0xf0]  ;;  %v8054_v0 = vor.u32 %v11835_v53, %v8051_v54 }
  0x3e   :  { %v7969_v7 = vld [vmem:[#allocation4 + $0x20] sm:$0xf]  ;;  %v11817_v8 = vld [vmem:[#allocation4 + $0x2c] sm:$0xf0]  ;;  %v8370_v10 = vor.u32 %v11917_v3, %v8369_v2  ;;  %1385 = vmatpush.bf16.msra.mxu1 %v8114_v5  ;;  %v11831_v5 = vld [vmem:[#allocation4 + $0xa4] sm:$0xf] }
  0x3f   :  { %v8097_v9 = vld [vmem:[#allocation4 + $0x120] sm:$0xf]  ;;  %v11849_v11 = vld [vmem:[#allocation4 + $0x12c] sm:$0xf0]  ;;  %v7970_v16 = vor.u32 %v11817_v8, %v7969_v7  ;;  %1398 = vmatpush.bf16.msra.mxu2 %v8242_v6  ;;  %v8035_v6 = vld [vmem:[#allocation4 + $0xb0] sm:$0xf0]  ;;  %v8182_v8 = vor.u32 %v11867_v61, %v8179_v62 }
  0x40   :  { %v8225_v12 = vld [vmem:[#allocation4 + $0x220] sm:$0xf]  ;;  %v11881_v13 = vld [vmem:[#allocation4 + $0x22c] sm:$0xf0]  ;;  %v8098_v20 = vor.u32 %v11849_v11, %v8097_v9  ;;  %1411 = vmatpush.bf16.msra.mxu3 %v8370_v10  ;;  %v11863_v10 = vld [vmem:[#allocation4 + $0x1a4] sm:$0xf] }
  0x41   :  { %v8353_v14 = vld [vmem:[#allocation4 + $0x320] sm:$0xf]  ;;  %v11913_v15 = vld [vmem:[#allocation4 + $0x32c] sm:$0xf0]  ;;  %v8226_v21 = vor.u32 %v11881_v13, %v8225_v12  ;;  %1373 = vmatpush.bf16.msra.mxu0 %v7970_v16  ;;  %v8163_v11 = vld [vmem:[#allocation4 + $0x1b0] sm:$0xf0]  ;;  %v8038_v13 = vor.u32 %v11831_v5, %v8035_v6 }
  0x42   :  { %v7953_v17 = vld [vmem:[#allocation4] sm:$0xf]  ;;  %v11813_v18 = vld [vmem:[#allocation4 + $0xc] sm:$0xf0]  ;;  %v8354_v25 = vor.u32 %v11913_v15, %v8353_v14  ;;  %1386 = vmatpush.bf16.msra.mxu1 %v8098_v20  ;;  %v8166_v20 = vor.u32 %v11863_v10, %v8163_v11  ;;  %v7987_v44 = vld [vmem:[#allocation4 + $0x50] sm:$0xf0] }
  0x43   :  { %v8081_v19 = vld [vmem:[#allocation4 + $0x100] sm:$0xf]  ;;  %v11845_v22 = vld [vmem:[#allocation4 + $0x10c] sm:$0xf0]  ;;  %v7954_v32 = vor.u32 %v11813_v18, %v7953_v17  ;;  %1399 = vmatpush.bf16.msra.mxu2 %v8226_v21  ;;  %v11827_v18 = vld [vmem:[#allocation4 + $0x84] sm:$0xf] }
  0x44   :  { %v8209_v23 = vld [vmem:[#allocation4 + $0x200] sm:$0xf]  ;;  %v11877_v24 = vld [vmem:[#allocation4 + $0x20c] sm:$0xf0]  ;;  %v8082_v36 = vor.u32 %v11845_v22, %v8081_v19  ;;  %1412 = vmatpush.bf16.msra.mxu3 %v8354_v25  ;;  %v8019_v19 = vld [vmem:[#allocation4 + $0x90] sm:$0xf0] }
  0x45   :  { %v8337_v26 = vld [vmem:[#allocation4 + $0x300] sm:$0xf]  ;;  %v11909_v27 = vld [vmem:[#allocation4 + $0x30c] sm:$0xf0]  ;;  %v8210_v37 = vor.u32 %v11877_v24, %v8209_v23  ;;  %1374 = vmatpush.bf16.msra.mxu0 %v7954_v32  ;;  %v11859_v22 = vld [vmem:[#allocation4 + $0x184] sm:$0xf]  ;;  %v8022_v25 = vor.u32 %v11827_v18, %v8019_v19 }
  0x46   :  { %v8577_v28 = vld [vmem:[#allocation4 + $0x4e0] sm:$0xf]  ;;  %v11969_v29 = vld [vmem:[#allocation4 + $0x4ec] sm:$0xf0]  ;;  %v8338_v41 = vor.u32 %v11909_v27, %v8337_v26  ;;  %1387 = vmatpush.bf16.msra.mxu1 %v8082_v36  ;;  %v8147_v23 = vld [vmem:[#allocation4 + $0x190] sm:$0xf0] }
  0x47   :  { %v8705_v30 = vld [vmem:[#allocation4 + $0x5e0] sm:$0xf]  ;;  %v12001_v31 = vld [vmem:[#allocation4 + $0x5ec] sm:$0xf0]  ;;  %v8578_v42 = vor.u32 %v11969_v29, %v8577_v28  ;;  %1400 = vmatpush.bf16.msra.mxu2 %v8210_v37  ;;  %v169_v32 = vld [vmem:[#allocation2 + $0x30] sm:$0xff]  ;;  %v8150_v33 = vor.u32 %v11859_v22, %v8147_v23 }
  0x48   :  { %v8721_v38 = vld [vmem:[#allocation4 + $0x600] sm:$0xf]  ;;  %v12005_v39 = vld [vmem:[#allocation4 + $0x60c] sm:$0xf0]  ;;  %v8706_v46 = vor.u32 %v12001_v31, %v8705_v30  ;;  %1413 = vmatpush.bf16.msra.mxu3 %v8338_v41  ;;  %1375 = vmatmul.bf16.vlgmr.msra.gmra.mxu0 %v13111_v55  ;;  %v11823_v30 = vld [vmem:[#allocation4 + $0x64] sm:$0xf] }
  0x49   :  { %v166_v45 = vld [vmem:[#allocation2 + $0x18] sm:$0xff]  ;;  %v11965_v49 = vld [vmem:[#allocation4 + $0x4cc] sm:$0xf0]  ;;  %v8722_v56 = vor.u32 %v12005_v39, %v8721_v38  ;;  %1419 = vmatpush.bf16.msrb.mxu0 %v8578_v42  ;;  %v8003_v31 = vld [vmem:[#allocation4 + $0x70] sm:$0xf0] }
  0x4a   :  { %v8561_v48 = vld [vmem:[#allocation4 + $0x4c0] sm:$0xf]  ;;  %v11997_v52 = vld [vmem:[#allocation4 + $0x5cc] sm:$0xf0]  ;;  %v13113_v57 = vpack.c.bf16 %v166_v45, %v166_v45  ;;  %1432 = vmatpush.bf16.msrb.mxu1 %v8706_v46  ;;  %1401 = vmatmul.bf16.vlgmr.msra.gmra.mxu2 %v13109_v51  ;;  %v8131_v36 = vld [vmem:[#allocation4 + $0x170] sm:$0xf0]  ;;  %v8006_v38 = vor.u32 %v11823_v30, %v8003_v31  ;;  %v13121_v45 = vpack.c.bf16 %v169_v32, %v169_v32 }
  0x4b   :  { %v8689_v50 = vld [vmem:[#allocation4 + $0x5c0] sm:$0xf]  ;;  %v164_v58 = vld [vmem:[#allocation2 + $0x8] sm:$0xff]  ;;  %v8562_v60 = vor.u32 %v11965_v49, %v8561_v48  ;;  %1452 = vmatpush.bf16.msrb.mxu2 %v8722_v56  ;;  %v8134_v46 = vor.u32 %v11855_v35, %v8131_v36  ;;  %v11851_v48 = vld [vmem:[#allocation4 + $0x144] sm:$0xf] }
  0x4c   :  { %1458 = vmatpush.bf16.msrb.mxu3 %v8070_v47  ;;  %v8690_v63 = vor.u32 %v11997_v52, %v8689_v50  ;;  %v8545_v1 = vld [vmem:[#allocation4 + $0x4a0] sm:$0xf]  ;;  %v11961_v2 = vld [vmem:[#allocation4 + $0x4ac] sm:$0xf0]  ;;  %v13117_v7 = vpack.c.bf16 %v164_v58, %v164_v58  ;;  %v8115_v49 = vld [vmem:[#allocation4 + $0x150] sm:$0xf0]  ;;  %v7990_v52 = vor.u32 %v11819_v43, %v7987_v44 }
  0x4d   :  { %v8673_v3 = vld [vmem:[#allocation4 + $0x5a0] sm:$0xf]  ;;  %v11993_v4 = vld [vmem:[#allocation4 + $0x5ac] sm:$0xf0]  ;;  %1414 = vmatmul.bf16.vlgmr.msra.gmra.mxu3 %v13113_v57  ;;  %1420 = vmatpush.bf16.msrb.mxu0 %v8562_v60  ;;  %v8546_v9 = vor.u32 %v11961_v2, %v8545_v1  ;;  %v7971_v60 = vld [vmem:[#allocation4 + $0x30] sm:$0xf0]  ;;  %v8118_v61 = vor.u32 %v11851_v48, %v8115_v49 }
  0x4e   :  { %1433 = vmatpush.bf16.msrb.mxu1 %v8690_v63  ;;  %v8674_v12 = vor.u32 %v11993_v4, %v8673_v3  ;;  %v8529_v14 = vld [vmem:[#allocation4 + $0x480] sm:$0xf]  ;;  %v11957_v15 = vld [vmem:[#allocation4 + $0x48c] sm:$0xf0]  ;;  %v11847_v63 = vld [vmem:[#allocation4 + $0x124] sm:$0xf] }
  0x4f   :  { %1471 = vmatpush.bf16.msra.mxu2 %v8198_v59  ;;  %v8657_v16 = vld [vmem:[#allocation4 + $0x580] sm:$0xf]  ;;  %1388 = vmatmul.bf16.vlgmr.msra.gmra.mxu1 %v13117_v7  ;;  %v11989_v17 = vld [vmem:[#allocation4 + $0x58c] sm:$0xf0]  ;;  %v8530_v21 = vor.u32 %v11957_v15, %v8529_v14  ;;  %v11815_v59 = vld [vmem:[#allocation4 + $0x24] sm:$0xf] }
  0x50   :  { %1459 = vmatpush.bf16.msrb.mxu3 %v8054_v0  ;;  %v8658_v24 = vor.u32 %v11989_v17, %v8657_v16  ;;  %v8513_v26 = vld [vmem:[#allocation4 + $0x460] sm:$0xf]  ;;  %v11953_v27 = vld [vmem:[#allocation4 + $0x46c] sm:$0xf0]  ;;  %v8099_v0 = vld [vmem:[#allocation4 + $0x130] sm:$0xf0]  ;;  %v7974_v3 = vor.u32 %v11815_v59, %v7971_v60 }
  0x51   :  { %1421 = vmatpush.bf16.msrb.mxu0 %v8546_v9  ;;  %v8641_v28 = vld [vmem:[#allocation4 + $0x560] sm:$0xf]  ;;  %v11985_v29 = vld [vmem:[#allocation4 + $0x56c] sm:$0xf0]  ;;  %v8514_v34 = vor.u32 %v11953_v27, %v8513_v26  ;;  %v7955_v9 = vld [vmem:[#allocation4 + $0x10] sm:$0xf0]  ;;  %v8102_v14 = vor.u32 %v11847_v63, %v8099_v0 }
  0x52   :  { %1434 = vmatpush.bf16.msrb.mxu1 %v8674_v12  ;;  %v8642_v37 = vor.u32 %v11985_v29, %v8641_v28  ;;  %v8497_v39 = vld [vmem:[#allocation4 + $0x440] sm:$0xf]  ;;  %v11949_v40 = vld [vmem:[#allocation4 + $0x44c] sm:$0xf0]  ;;  %v11903_v10 = vld [vmem:[#allocation4 + $0x2e4] sm:$0xf] }
  0x53   :  { %1472 = vmatpush.bf16.msra.mxu2 %v8182_v8  ;;  %v8625_v41 = vld [vmem:[#allocation4 + $0x540] sm:$0xf]  ;;  %v11981_v42 = vld [vmem:[#allocation4 + $0x54c] sm:$0xf0]  ;;  %v8498_v47 = vor.u32 %v11949_v40, %v8497_v39  ;;  %v11811_v8 = vld [vmem:[#allocation4 + $0x4] sm:$0xf] }
  0x54   :  { %1460 = vmatpush.bf16.msrb.mxu3 %v8038_v13  ;;  %v8626_v50 = vor.u32 %v11981_v42, %v8625_v41  ;;  %v8481_v53 = vld [vmem:[#allocation4 + $0x420] sm:$0xf]  ;;  %v11945_v54 = vld [vmem:[#allocation4 + $0x42c] sm:$0xf0]  ;;  %v8323_v11 = vld [vmem:[#allocation4 + $0x2f0] sm:$0xf0] }
  0x55   :  { %1422 = vmatpush.bf16.msrb.mxu0 %v8530_v21  ;;  %v8609_v56 = vld [vmem:[#allocation4 + $0x520] sm:$0xf]  ;;  %v11977_v58 = vld [vmem:[#allocation4 + $0x52c] sm:$0xf0]  ;;  %v8482_v62 = vor.u32 %v11945_v54, %v8481_v53  ;;  %v11935_v12 = vld [vmem:[#allocation4 + $0x3e4] sm:$0xf] }
  0x56   :  { %1435 = vmatpush.bf16.msrb.mxu1 %v8658_v24  ;;  %v8465_v1 = vld [vmem:[#allocation4 + $0x400] sm:$0xf]  ;;  %v8610_v2 = vor.u32 %v11977_v58, %v8609_v56  ;;  %v11941_v4 = vld [vmem:[#allocation4 + $0x40c] sm:$0xf0]  ;;  %v8451_v13 = vld [vmem:[#allocation4 + $0x3f0] sm:$0xf0]  ;;  %v8326_v24 = vor.u32 %v11903_v10, %v8323_v11 }
  0x57   :  { %1473 = vmatpush.bf16.msra.mxu2 %v8166_v20  ;;  %v8593_v5 = vld [vmem:[#allocation4 + $0x500] sm:$0xf]  ;;  %v11973_v6 = vld [vmem:[#allocation4 + $0x50c] sm:$0xf0]  ;;  %v8466_v15 = vor.u32 %v11941_v4, %v8465_v1  ;;  %v11967_v16 = vld [vmem:[#allocation4 + $0x4e4] sm:$0xf]  ;;  %v7958_v20 = vor.u32 %v11811_v8, %v7955_v9 }
  0x58   :  { %1461 = vmatpush.bf16.msrb.mxu3 %v8022_v25  ;;  %v8579_v17 = vld [vmem:[#allocation4 + $0x4f0] sm:$0xf0]  ;;  %v167_v18 = vld [vmem:[#allocation2 + $0x20] sm:$0xff]  ;;  %v8594_v19 = vor.u32 %v11973_v6, %v8593_v5  ;;  %v11843_v21 = vld [vmem:[#allocation4 + $0x104] sm:$0xf]  ;;  %v8454_v25 = vor.u32 %v11935_v12, %v8451_v13 }
  0x59   :  { %1423 = vmatpush.bf16.msrb.mxu0 %v8514_v34  ;;  %v8083_v22 = vld [vmem:[#allocation4 + $0x110] sm:$0xf0]  ;;  %v11999_v26 = vld [vmem:[#allocation4 + $0x5e4] sm:$0xf]  ;;  %v8582_v29 = vor.u32 %v11967_v16, %v8579_v17  ;;  %v13125_v30 = vpack.c.bf16 %v167_v18, %v167_v18 }
  0x5a   :  { %1436 = vmatpush.bf16.msrb.mxu1 %v8642_v37  ;;  %8735 = vmatmul.msk.bf16.vlgmr.msrb.gmra.mxu2 %vm1363_vm0, %v13121_v45  ;;  %v168_v23 = vld [vmem:[#allocation2 + $0x28] sm:$0xff]  ;;  %v11899_v28 = vld [vmem:[#allocation4 + $0x2c4] sm:$0xf]  ;;  %v8086_v34 = vor.u32 %v11843_v21, %v8083_v22 }
  0x5b   :  { %1474 = vmatpush.bf16.msra.mxu2 %v8150_v33  ;;  %v8707_v27 = vld [vmem:[#allocation4 + $0x5f0] sm:$0xf0]  ;;  %v11931_v32 = vld [vmem:[#allocation4 + $0x3c4] sm:$0xf]  ;;  %v13127_v35 = vpack.c.bf16 %v168_v23, %v168_v23 }
  0x5c   :  { %1462 = vmatpush.bf16.msrb.mxu3 %v8006_v38  ;;  %v8307_v31 = vld [vmem:[#allocation4 + $0x2d0] sm:$0xf0]  ;;  %v11963_v36 = vld [vmem:[#allocation4 + $0x4c4] sm:$0xf]  ;;  %v8710_v38 = vor.u32 %v11999_v26, %v8707_v27 }
  0x5d   :  { %1424 = vmatpush.bf16.msrb.mxu0 %v8498_v47  ;;  %v8435_v33 = vld [vmem:[#allocation4 + $0x3d0] sm:$0xf0]  ;;  %v8310_v39 = vor.u32 %v11899_v28, %v8307_v31  ;;  %v11995_v41 = vld [vmem:[#allocation4 + $0x5c4] sm:$0xf] }
  0x5e   :  { %1437 = vmatpush.bf16.msrb.mxu1 %v8626_v50  ;;  %v8563_v37 = vld [vmem:[#allocation4 + $0x4d0] sm:$0xf0]  ;;  %v8438_v40 = vor.u32 %v11931_v32, %v8435_v33  ;;  %v11895_v43 = vld [vmem:[#allocation4 + $0x2a4] sm:$0xf] }
  0x5f   :  { %1475 = vmatpush.bf16.msra.mxu2 %v8134_v46  ;;  %v8691_v42 = vld [vmem:[#allocation4 + $0x5d0] sm:$0xf0]  ;;  %v8566_v44 = vor.u32 %v11963_v36, %v8563_v37  ;;  %v11927_v47 = vld [vmem:[#allocation4 + $0x3a4] sm:$0xf] }
  0x60   :  { %1463 = vmatpush.bf16.msrb.mxu3 %v7990_v52  ;;  %v8291_v46 = vld [vmem:[#allocation4 + $0x2b0] sm:$0xf0]  ;;  %v11959_v49 = vld [vmem:[#allocation4 + $0x4a4] sm:$0xf]  ;;  %v8694_v52 = vor.u32 %v11995_v41, %v8691_v42 }
  0x61   :  { %1425 = vmatpush.bf16.msrb.mxu0 %v8482_v62  ;;  %v8419_v48 = vld [vmem:[#allocation4 + $0x3b0] sm:$0xf0]  ;;  %v8294_v53 = vor.u32 %v11895_v43, %v8291_v46  ;;  %v11991_v56 = vld [vmem:[#allocation4 + $0x5a4] sm:$0xf] }
  0x62   :  { %1438 = vmatpush.bf16.msrb.mxu1 %v8610_v2  ;;  %v8547_v50 = vld [vmem:[#allocation4 + $0x4b0] sm:$0xf0]  ;;  %v8422_v54 = vor.u32 %v11927_v47, %v8419_v48  ;;  %v11891_v59 = vld [vmem:[#allocation4 + $0x284] sm:$0xf] }
  0x63   :  { %1476 = vmatpush.bf16.msra.mxu2 %v8118_v61  ;;  %v8675_v58 = vld [vmem:[#allocation4 + $0x5b0] sm:$0xf0]  ;;  %v8550_v60 = vor.u32 %v11959_v49, %v8547_v50  ;;  %v11923_v62 = vld [vmem:[#allocation4 + $0x384] sm:$0xf] }
  0x64   :  { %1464 = vmatpush.bf16.msrb.mxu3 %v7974_v3  ;;  %v8275_v61 = vld [vmem:[#allocation4 + $0x290] sm:$0xf0]  ;;  %v11955_v0 = vld [vmem:[#allocation4 + $0x484] sm:$0xf]  ;;  %v8678_v2 = vor.u32 %v11991_v56, %v8675_v58  ;;  %v8073_v56 = vld [vmem:[#allocation4 + $0xe8] sm:$0xf] }
  0x65   :  { %1426 = vmatpush.bf16.msrb.mxu0 %v8466_v15  ;;  %v8403_v63 = vld [vmem:[#allocation4 + $0x390] sm:$0xf0]  ;;  %v8278_v3 = vor.u32 %v11891_v59, %v8275_v61  ;;  %v11987_v5 = vld [vmem:[#allocation4 + $0x584] sm:$0xf]  ;;  %v11842_v58 = vld [vmem:[#allocation4 + $0xf4] sm:$0xf0] }
  0x66   :  { %1439 = vmatpush.bf16.msrb.mxu1 %v8594_v19  ;;  %v8531_v1 = vld [vmem:[#allocation4 + $0x490] sm:$0xf0]  ;;  %v8406_v4 = vor.u32 %v11923_v62, %v8403_v63  ;;  %v11887_v8 = vld [vmem:[#allocation4 + $0x264] sm:$0xf]  ;;  %v8329_v62 = vld [vmem:[#allocation4 + $0x2e8] sm:$0xf] }
  0x67   :  { %1477 = vmatpush.bf16.msra.mxu2 %v8102_v14  ;;  %v8659_v6 = vld [vmem:[#allocation4 + $0x590] sm:$0xf0]  ;;  %v8534_v9 = vor.u32 %v11955_v0, %v8531_v1  ;;  %v11919_v11 = vld [vmem:[#allocation4 + $0x364] sm:$0xf]  ;;  %v11906_v63 = vld [vmem:[#allocation4 + $0x2f4] sm:$0xf0] }
  0x68   :  { %1465 = vmatpush.bf16.msrb.mxu3 %v7958_v20  ;;  %1427 = vmatmul.bf16.vlgmr.msrb.gmra.mxu0 %v13125_v30  ;;  %v8259_v10 = vld [vmem:[#allocation4 + $0x270] sm:$0xf0]  ;;  %v11951_v13 = vld [vmem:[#allocation4 + $0x464] sm:$0xf]  ;;  %v8662_v15 = vor.u32 %v11987_v5, %v8659_v6  ;;  %v8074_v5 = vor.u32 %v11842_v58, %v8073_v56  ;;  %v8457_v6 = vld [vmem:[#allocation4 + $0x3e8] sm:$0xf] }
  0x69   :  { %1484 = vmatpush.bf16.msra.mxu0 %v8326_v24  ;;  %1440 = vmatmul.bf16.vlgmr.msrb.gmra.mxu1 %v13127_v35  ;;  %v8387_v12 = vld [vmem:[#allocation4 + $0x370] sm:$0xf0]  ;;  %v8262_v16 = vor.u32 %v11887_v8, %v8259_v10  ;;  %v11983_v18 = vld [vmem:[#allocation4 + $0x564] sm:$0xf]  ;;  %v11938_v8 = vld [vmem:[#allocation4 + $0x3f4] sm:$0xf0] }
  0x6a   :  { %1497 = vmatpush.bf16.msra.mxu1 %v8454_v25  ;;  %v8515_v14 = vld [vmem:[#allocation4 + $0x470] sm:$0xf0]  ;;  %v8390_v17 = vor.u32 %v11919_v11, %v8387_v12  ;;  %v11883_v20 = vld [vmem:[#allocation4 + $0x244] sm:$0xf]  ;;  %v8201_v10 = vld [vmem:[#allocation4 + $0x1e8] sm:$0xf]  ;;  %v8330_v12 = vor.u32 %v11906_v63, %v8329_v62 }
  0x6b   :  { %1478 = vmatpush.bf16.msra.mxu2 %v8086_v34  ;;  %1466 = vmatmul.bf16.vlgmr.msrb.gmra.mxu3 %v13111_v55  ;;  %v8643_v19 = vld [vmem:[#allocation4 + $0x570] sm:$0xf0]  ;;  %v8518_v21 = vor.u32 %v11951_v13, %v8515_v14  ;;  %v11915_v23 = vld [vmem:[#allocation4 + $0x344] sm:$0xf]  ;;  %v11874_v11 = vld [vmem:[#allocation4 + $0x1f4] sm:$0xf0] }
  0x6c   :  { %1510 = vmatpush.bf16.msra.mxu3 %v8582_v29  ;;  %v8243_v22 = vld [vmem:[#allocation4 + $0x250] sm:$0xf0]  ;;  %v11947_v25 = vld [vmem:[#allocation4 + $0x444] sm:$0xf]  ;;  %v8646_v27 = vor.u32 %v11983_v18, %v8643_v19  ;;  %v8057_v14 = vld [vmem:[#allocation4 + $0xc8] sm:$0xf]  ;;  %v8202_v19 = vor.u32 %v11874_v11, %v8201_v10 }
  0x6d   :  { %1485 = vmatpush.bf16.msra.mxu0 %v8310_v39  ;;  %v8371_v24 = vld [vmem:[#allocation4 + $0x350] sm:$0xf0]  ;;  %v8246_v28 = vor.u32 %v11883_v20, %v8243_v22  ;;  %v11979_v31 = vld [vmem:[#allocation4 + $0x544] sm:$0xf]  ;;  %v11902_v18 = vld [vmem:[#allocation4 + $0x2d4] sm:$0xf0] }
  0x6e   :  { %1498 = vmatpush.bf16.msra.mxu1 %v8438_v40  ;;  %1479 = vmatmul.bf16.vlgmr.msra.gmra.mxu2 %v13117_v7  ;;  %v8499_v26 = vld [vmem:[#allocation4 + $0x450] sm:$0xf0]  ;;  %v8374_v29 = vor.u32 %v11915_v23, %v8371_v24  ;;  %v11879_v33 = vld [vmem:[#allocation4 + $0x224] sm:$0xf]  ;;  %v8441_v20 = vld [vmem:[#allocation4 + $0x3c8] sm:$0xf] }
  0x6f   :  { %1523 = vmatpush.bf16.msrb.mxu2 %v8710_v38  ;;  %v8627_v32 = vld [vmem:[#allocation4 + $0x550] sm:$0xf0]  ;;  %v8502_v34 = vor.u32 %v11947_v25, %v8499_v26  ;;  %v11911_v37 = vld [vmem:[#allocation4 + $0x324] sm:$0xf]  ;;  %v8185_v23 = vld [vmem:[#allocation4 + $0x1c8] sm:$0xf] }
  0x70   :  { %1511 = vmatpush.bf16.msra.mxu3 %v8566_v44  ;;  %v8227_v36 = vld [vmem:[#allocation4 + $0x230] sm:$0xf0]  ;;  %v11943_v39 = vld [vmem:[#allocation4 + $0x424] sm:$0xf]  ;;  %v8630_v41 = vor.u32 %v11979_v31, %v8627_v32  ;;  %v11870_v24 = vld [vmem:[#allocation4 + $0x1d4] sm:$0xf0] }
  0x71   :  { %1486 = vmatpush.bf16.msra.mxu0 %v8294_v53  ;;  %v8355_v38 = vld [vmem:[#allocation4 + $0x330] sm:$0xf0]  ;;  %v11975_v42 = vld [vmem:[#allocation4 + $0x524] sm:$0xf]  ;;  %v8230_v46 = vor.u32 %v11879_v33, %v8227_v36  ;;  %v8041_v26 = vld [vmem:[#allocation4 + $0xa8] sm:$0xf]  ;;  %v8186_v32 = vor.u32 %v11870_v24, %v8185_v23 }
  0x72   :  { %1499 = vmatpush.bf16.msra.mxu1 %v8422_v54  ;;  %v8483_v40 = vld [vmem:[#allocation4 + $0x430] sm:$0xf0]  ;;  %v11875_v44 = vld [vmem:[#allocation4 + $0x204] sm:$0xf]  ;;  %v8358_v47 = vor.u32 %v11911_v37, %v8355_v38  ;;  %v11898_v31 = vld [vmem:[#allocation4 + $0x2b4] sm:$0xf0] }
  0x73   :  { %1524 = vmatpush.bf16.msrb.mxu2 %v8694_v52  ;;  %v8611_v43 = vld [vmem:[#allocation4 + $0x530] sm:$0xf0]  ;;  %v11907_v49 = vld [vmem:[#allocation4 + $0x304] sm:$0xf]  ;;  %v8486_v52 = vor.u32 %v11943_v39, %v8483_v40  ;;  %v8425_v33 = vld [vmem:[#allocation4 + $0x3a8] sm:$0xf] }
  0x74   :  { %1512 = vmatpush.bf16.msra.mxu3 %v8550_v60  ;;  %v8211_v48 = vld [vmem:[#allocation4 + $0x210] sm:$0xf0]  ;;  %v11939_v53 = vld [vmem:[#allocation4 + $0x404] sm:$0xf]  ;;  %v8614_v60 = vor.u32 %v11975_v42, %v8611_v43  ;;  %v8169_v37 = vld [vmem:[#allocation4 + $0x1a8] sm:$0xf] }
  0x75   :  { %1487 = vmatpush.bf16.msra.mxu0 %v8278_v3  ;;  %v8339_v50 = vld [vmem:[#allocation4 + $0x310] sm:$0xf0]  ;;  %v12003_v59 = vld [vmem:[#allocation4 + $0x604] sm:$0xf]  ;;  %v8214_v0 = vor.u32 %v11875_v44, %v8211_v48  ;;  %v11866_v38 = vld [vmem:[#allocation4 + $0x1b4] sm:$0xf0] }
  0x76   :  { %1500 = vmatpush.bf16.msra.mxu1 %v8406_v4  ;;  %v8467_v54 = vld [vmem:[#allocation4 + $0x410] sm:$0xf0]  ;;  %v8342_v1 = vor.u32 %v11907_v49, %v8339_v50  ;;  %v8025_v40 = vld [vmem:[#allocation4 + $0x88] sm:$0xf]  ;;  %v11894_v44 = vld [vmem:[#allocation4 + $0x294] sm:$0xf0] }
  0x77   :  { %1525 = vmatpush.bf16.msrb.mxu2 %v8678_v2  ;;  %v8723_v61 = vld [vmem:[#allocation4 + $0x610] sm:$0xf0]  ;;  %v11971_v2 = vld [vmem:[#allocation4 + $0x504] sm:$0xf]  ;;  %v8470_v4 = vor.u32 %v11939_v53, %v8467_v54  ;;  %v8281_v43 = vld [vmem:[#allocation4 + $0x288] sm:$0xf] }
  0x78   :  { %1513 = vmatpush.bf16.msra.mxu3 %v8534_v9  ;;  %v8595_v3 = vld [vmem:[#allocation4 + $0x510] sm:$0xf0]  ;;  %v8726_v9 = vor.u32 %v12003_v59, %v8723_v61  ;;  %v11926_v48 = vld [vmem:[#allocation4 + $0x394] sm:$0xf0]  ;;  %v8153_v50 = vld [vmem:[#allocation4 + $0x188] sm:$0xf]  ;;  %v8282_v53 = vor.u32 %v11894_v44, %v8281_v43 }
  0x79   :  { %1488 = vmatpush.bf16.msra.mxu0 %v8262_v16  ;;  %v8598_v13 = vor.u32 %v11971_v2, %v8595_v3  ;;  %v8458_v16 = vor.u32 %v11938_v8, %v8457_v6  ;;  %v8009_v54 = vld [vmem:[#allocation4 + $0x68] sm:$0xf]  ;;  %v11826_v56 = vld [vmem:[#allocation4 + $0x74] sm:$0xf0] }
  0x7a   :  { %1501 = vmatpush.bf16.msra.mxu1 %v8390_v17  ;;  %v8313_v17 = vld [vmem:[#allocation4 + $0x2c8] sm:$0xf]  ;;  %v11922_v63 = vld [vmem:[#allocation4 + $0x374] sm:$0xf0] }
  0x7b   :  { %1526 = vmatpush.bf16.msrb.mxu2 %v8662_v15  ;;  %v11838_v15 = vld [vmem:[#allocation4 + $0xd4] sm:$0xf0]  ;;  %v8314_v25 = vor.u32 %v11902_v18, %v8313_v17  ;;  %v8265_v59 = vld [vmem:[#allocation4 + $0x268] sm:$0xf] }
  0x7c   :  { %1514 = vmatpush.bf16.msra.mxu3 %v8518_v21  ;;  %v11934_v21 = vld [vmem:[#allocation4 + $0x3d4] sm:$0xf0]  ;;  %v8058_v22 = vor.u32 %v11838_v15, %v8057_v14  ;;  %v8393_v62 = vld [vmem:[#allocation4 + $0x368] sm:$0xf] }
  0x7d   :  { %1489 = vmatpush.bf16.msra.mxu0 %v8246_v28  ;;  %v8442_v28 = vor.u32 %v11934_v21, %v8441_v20  ;;  %v11858_v2 = vld [vmem:[#allocation4 + $0x174] sm:$0xf0]  ;;  %v8394_v6 = vor.u32 %v11922_v63, %v8393_v62  ;;  %v8249_v8 = vld [vmem:[#allocation4 + $0x248] sm:$0xf] }
  0x7e   :  { %1502 = vmatpush.bf16.msra.mxu1 %v8374_v29  ;;  %v8297_v29 = vld [vmem:[#allocation4 + $0x2a8] sm:$0xf]  ;;  %v11854_v15 = vld [vmem:[#allocation4 + $0x154] sm:$0xf0] }
  0x7f   :  { %1527 = vmatpush.bf16.msrb.mxu2 %v8646_v27  ;;  %v11834_v27 = vld [vmem:[#allocation4 + $0xb4] sm:$0xf0]  ;;  %v8298_v39 = vor.u32 %v11898_v31, %v8297_v29  ;;  %v8377_v11 = vld [vmem:[#allocation4 + $0x348] sm:$0xf] }
  0x80   :  { %1515 = vmatpush.bf16.msra.mxu3 %v8502_v34  ;;  %v11930_v34 = vld [vmem:[#allocation4 + $0x3b4] sm:$0xf0]  ;;  %v8042_v36 = vor.u32 %v11834_v27, %v8041_v26  ;;  %v8121_v14 = vld [vmem:[#allocation4 + $0x148] sm:$0xf] }
  0x81   :  { %1490 = vmatpush.bf16.msra.mxu0 %v8230_v46  ;;  %v8426_v42 = vor.u32 %v11930_v34, %v8425_v33  ;;  %v8170_v46 = vor.u32 %v11866_v38, %v8169_v37  ;;  %v7977_v17 = vld [vmem:[#allocation4 + $0x28] sm:$0xf]  ;;  %v11818_v18 = vld [vmem:[#allocation4 + $0x34] sm:$0xf0] }
  0x82   :  { %1503 = vmatpush.bf16.msra.mxu1 %v8358_v47  ;;  %v8409_v47 = vld [vmem:[#allocation4 + $0x388] sm:$0xf]  ;;  %v11882_v21 = vld [vmem:[#allocation4 + $0x234] sm:$0xf0] }
  0x83   :  { %1528 = vmatpush.bf16.msrb.mxu2 %v8630_v41  ;;  %v11830_v41 = vld [vmem:[#allocation4 + $0x94] sm:$0xf0]  ;;  %v8410_v58 = vor.u32 %v11926_v48, %v8409_v47  ;;  %v8233_v20 = vld [vmem:[#allocation4 + $0x228] sm:$0xf]  ;;  %v11840_v47 = vld [vmem:[#allocation4 + $0xec] sm:$0xf] }
  0x84   :  { %1516 = vmatpush.bf16.msra.mxu3 %v8486_v52  ;;  %v8026_v49 = vor.u32 %v11830_v41, %v8025_v40  ;;  %v11862_v52 = vld [vmem:[#allocation4 + $0x194] sm:$0xf0]  ;;  %v8361_v23 = vld [vmem:[#allocation4 + $0x328] sm:$0xf]  ;;  %v8234_v29 = vor.u32 %v11882_v21, %v8233_v20  ;;  %v8075_v48 = vld [vmem:[#allocation4 + $0xf8] sm:$0xf0] }
  0x85   :  { %1491 = vmatpush.bf16.msra.mxu0 %v8214_v0  ;;  %v8154_v61 = vor.u32 %v11862_v52, %v8153_v50  ;;  %v8010_v0 = vor.u32 %v11826_v56, %v8009_v54  ;;  %v11914_v24 = vld [vmem:[#allocation4 + $0x334] sm:$0xf0]  ;;  %v8105_v26 = vld [vmem:[#allocation4 + $0x128] sm:$0xf]  ;;  %v8078_v63 = vor.u32 %v11840_v47, %v8075_v48 }
  0x86   :  { %1504 = vmatpush.bf16.msra.mxu1 %v8342_v1  ;;  %v8137_v1 = vld [vmem:[#allocation4 + $0x168] sm:$0xf]  ;;  %v11850_v27 = vld [vmem:[#allocation4 + $0x134] sm:$0xf0]  ;;  %v8362_v34 = vor.u32 %v11914_v24, %v8361_v23  ;;  %v8171_v23 = vld [vmem:[#allocation4 + $0x1b8] sm:$0xf0] }
  0x87   :  { %1529 = vmatpush.bf16.msrb.mxu2 %v8614_v60  ;;  %v11890_v60 = vld [vmem:[#allocation4 + $0x274] sm:$0xf0]  ;;  %v8138_v10 = vor.u32 %v11858_v2, %v8137_v1  ;;  %v8217_v37 = vld [vmem:[#allocation4 + $0x208] sm:$0xf]  ;;  %v8106_v40 = vor.u32 %v11850_v27, %v8105_v26  ;;  %v11836_v1 = vld [vmem:[#allocation4 + $0xcc] sm:$0xf] }
  0x88   :  { %1517 = vmatpush.bf16.msra.mxu3 %v8470_v4  ;;  %1492 = vmatmul.bf16.vlgmr.msra.gmra.mxu0 %v13109_v51  ;;  %v8266_v3 = vor.u32 %v11890_v60, %v8265_v59  ;;  %v7993_v4 = vld [vmem:[#allocation4 + $0x48] sm:$0xf]  ;;  %v11814_v31 = vld [vmem:[#allocation4 + $0x14] sm:$0xf0]  ;;  %v11872_v60 = vld [vmem:[#allocation4 + $0x1ec] sm:$0xf] }
  0x89   :  { %1575 = vmatpush.bf16.msrb.mxu0 %v8330_v12  ;;  %1505 = vmatmul.bf16.vlgmr.msra.gmra.mxu1 %v13113_v57  ;;  %v11918_v12 = vld [vmem:[#allocation4 + $0x354] sm:$0xf0]  ;;  %v8713_v52 = vld [vmem:[#allocation4 + $0x5e8] sm:$0xf]  ;;  %v8059_v2 = vld [vmem:[#allocation4 + $0xd8] sm:$0xf0] }
  0x8a   :  { %1549 = vmatpush.bf16.msrb.mxu1 %v8074_v5  ;;  %v11822_v5 = vld [vmem:[#allocation4 + $0x54] sm:$0xf0]  ;;  %v8569_v54 = vld [vmem:[#allocation4 + $0x4c8] sm:$0xf]  ;;  %v11828_v26 = vld [vmem:[#allocation4 + $0x8c] sm:$0xf] }
  0x8b   :  { %1530 = vmatpush.bf16.msrb.mxu2 %v8598_v13  ;;  %1518 = vmatmul.bf16.vlgmr.msra.gmra.mxu3 %v13125_v30  ;;  %v7994_v13 = vor.u32 %v11822_v5, %v7993_v4  ;;  %v11970_v33 = vld [vmem:[#allocation4 + $0x4f4] sm:$0xf0]  ;;  %v8697_v5 = vld [vmem:[#allocation4 + $0x5c8] sm:$0xf]  ;;  %v8027_v27 = vld [vmem:[#allocation4 + $0x98] sm:$0xf0] }
  0x8c   :  { %1543 = vmatpush.bf16.msrb.mxu3 %v8726_v9  ;;  %v11886_v9 = vld [vmem:[#allocation4 + $0x254] sm:$0xf0]  ;;  %v8537_v20 = vld [vmem:[#allocation4 + $0x488] sm:$0xf] }
  0x8d   :  { %1576 = vmatpush.bf16.msrb.mxu0 %v8314_v25  ;;  %v7978_v25 = vor.u32 %v11818_v18, %v7977_v17  ;;  %v11878_v38 = vld [vmem:[#allocation4 + $0x214] sm:$0xf0]  ;;  %v8681_v18 = vld [vmem:[#allocation4 + $0x5a8] sm:$0xf] }
  0x8e   :  { %1550 = vmatpush.bf16.msrb.mxu1 %v8058_v22  ;;  %1531 = vmatmul.bf16.vlgmr.msrb.gmra.mxu2 %v13127_v35  ;;  %v8122_v22 = vor.u32 %v11854_v15, %v8121_v14  ;;  %v11910_v41 = vld [vmem:[#allocation4 + $0x314] sm:$0xf0]  ;;  %v8218_v50 = vor.u32 %v11878_v38, %v8217_v37  ;;  %v11832_v14 = vld [vmem:[#allocation4 + $0xac] sm:$0xf]  ;;  %v8043_v15 = vld [vmem:[#allocation4 + $0xb8] sm:$0xf0]  ;;  %v8030_v38 = vor.u32 %v11828_v26, %v8027_v27 }
  0x8f   :  { %1588 = vmatpush.bf16.msra.mxu2 %v8458_v16  ;;  %v8250_v16 = vor.u32 %v11886_v9, %v8249_v8  ;;  %v12006_v43 = vld [vmem:[#allocation4 + $0x614] sm:$0xf0]  ;;  %v8553_v8 = vld [vmem:[#allocation4 + $0x4a8] sm:$0xf]  ;;  %v8046_v24 = vor.u32 %v11832_v14, %v8043_v15  ;;  %v8155_v37 = vld [vmem:[#allocation4 + $0x198] sm:$0xf0] }
  0x90   :  { %1562 = vmatpush.bf16.msra.mxu3 %v8202_v19  ;;  %v8378_v19 = vor.u32 %v11918_v12, %v8377_v11  ;;  %v11962_v9 = vld [vmem:[#allocation4 + $0x4b4] sm:$0xf0]  ;;  %v8187_v11 = vld [vmem:[#allocation4 + $0x1d8] sm:$0xf0]  ;;  %v8062_v12 = vor.u32 %v11836_v1, %v8059_v2  ;;  %v8505_v47 = vld [vmem:[#allocation4 + $0x448] sm:$0xf] }
  0x91   :  { %1577 = vmatpush.bf16.msrb.mxu0 %v8298_v39  ;;  %v8345_v39 = vld [vmem:[#allocation4 + $0x308] sm:$0xf]  ;;  %v11958_v21 = vld [vmem:[#allocation4 + $0x494] sm:$0xf0]  ;;  %v8123_v1 = vld [vmem:[#allocation4 + $0x158] sm:$0xf0] }
  0x92   :  { %1551 = vmatpush.bf16.msrb.mxu1 %v8042_v36  ;;  %v8089_v36 = vld [vmem:[#allocation4 + $0x108] sm:$0xf]  ;;  %v8346_v56 = vor.u32 %v11910_v41, %v8345_v39  ;;  %v8011_v41 = vld [vmem:[#allocation4 + $0x78] sm:$0xf0]  ;;  %v11950_v48 = vld [vmem:[#allocation4 + $0x454] sm:$0xf0] }
  0x93   :  { %1589 = vmatpush.bf16.msra.mxu2 %v8442_v28  ;;  %v7961_v28 = vld [vmem:[#allocation4 + $0x8] sm:$0xf]  ;;  %v8107_v14 = vld [vmem:[#allocation4 + $0x138] sm:$0xf0] }
  0x94   :  { %1563 = vmatpush.bf16.msra.mxu3 %v8186_v32  ;;  %v8585_v32 = vld [vmem:[#allocation4 + $0x4e8] sm:$0xf]  ;;  %v7962_v44 = vor.u32 %v11814_v31, %v7961_v28  ;;  %v8538_v28 = vor.u32 %v11958_v21, %v8537_v20  ;;  %v11812_v20 = vld [vmem:[#allocation4 + $0xc] sm:$0xf]  ;;  %v7963_v21 = vld [vmem:[#allocation4 + $0x18] sm:$0xf0] }
  0x95   :  { %1578 = vmatpush.bf16.msrb.mxu0 %v8282_v53  ;;  %v12002_v53 = vld [vmem:[#allocation4 + $0x5f4] sm:$0xf0]  ;;  %v8665_v31 = vld [vmem:[#allocation4 + $0x588] sm:$0xf]  ;;  %v8459_v26 = vld [vmem:[#allocation4 + $0x3f8] sm:$0xf0] }
  0x96   :  { %1552 = vmatpush.bf16.msrb.mxu1 %v8026_v49  ;;  %v8586_v49 = vor.u32 %v11970_v33, %v8585_v32  ;;  %v11990_v32 = vld [vmem:[#allocation4 + $0x594] sm:$0xf0]  ;;  %v8521_v33 = vld [vmem:[#allocation4 + $0x468] sm:$0xf] }
  0x97   :  { %1590 = vmatpush.bf16.msra.mxu2 %v8426_v42  ;;  %v8729_v42 = vld [vmem:[#allocation4 + $0x608] sm:$0xf]  ;;  %v8666_v39 = vor.u32 %v11990_v32, %v8665_v31  ;;  %v11900_v31 = vld [vmem:[#allocation4 + $0x2cc] sm:$0xf]  ;;  %v7966_v32 = vor.u32 %v11812_v20, %v7963_v21 }
  0x98   :  { %1564 = vmatpush.bf16.msra.mxu3 %v8170_v46  ;;  %v11846_v46 = vld [vmem:[#allocation4 + $0x114] sm:$0xf0]  ;;  %v8730_v59 = vor.u32 %v12006_v43, %v8729_v42  ;;  %v11920_v20 = vld [vmem:[#allocation4 + $0x36c] sm:$0xf] }
  0x99   :  { %1579 = vmatpush.bf16.msrb.mxu0 %v8266_v3  ;;  %v8090_v62 = vor.u32 %v11846_v46, %v8089_v36  ;;  %v11860_v36 = vld [vmem:[#allocation4 + $0x18c] sm:$0xf]  ;;  %v11986_v46 = vld [vmem:[#allocation4 + $0x574] sm:$0xf0] }
  0x9a   :  { %1553 = vmatpush.bf16.msrb.mxu1 %v8010_v0  ;;  %v8714_v0 = vor.u32 %v12002_v53, %v8713_v52  ;;  %v8158_v43 = vor.u32 %v11860_v36, %v8155_v37  ;;  %v8091_v36 = vld [vmem:[#allocation4 + $0x118] sm:$0xf0] }
  0x9b   :  { %1591 = vmatpush.bf16.msra.mxu2 %v8410_v58  ;;  %8736 = vmatmul.msk.bf16.vlgmr.msrb.gmra.mxu3 %vm1363_vm0, %v13121_v45  ;;  %v11966_v58 = vld [vmem:[#allocation4 + $0x4d4] sm:$0xf0] }
  0x9c   :  { %1565 = vmatpush.bf16.msra.mxu3 %v8154_v61  ;;  %v8203_v61 = vld [vmem:[#allocation4 + $0x1f8] sm:$0xf0]  ;;  %v8570_v3 = vor.u32 %v11966_v58, %v8569_v54  ;;  %v11820_v54 = vld [vmem:[#allocation4 + $0x4c] sm:$0xf]  ;;  %v8506_v58 = vor.u32 %v11950_v48, %v8505_v47 }
  0x9d   :  { %1580 = vmatpush.bf16.msrb.mxu0 %v8250_v16  ;;  %v8206_v4 = vor.u32 %v11872_v60, %v8203_v61  ;;  %v8554_v16 = vor.u32 %v11962_v9, %v8553_v8  ;;  %v8633_v60 = vld [vmem:[#allocation4 + $0x548] sm:$0xf]  ;;  %v11982_v61 = vld [vmem:[#allocation4 + $0x554] sm:$0xf0]  ;;  %v11964_v47 = vld [vmem:[#allocation4 + $0x4cc] sm:$0xf] }
  0x9e   :  { %1554 = vmatpush.bf16.msrb.mxu1 %v7994_v13  ;;  %v8617_v9 = vld [vmem:[#allocation4 + $0x528] sm:$0xf]  ;;  %v8571_v48 = vld [vmem:[#allocation4 + $0x4d8] sm:$0xf0] }
  0x9f   :  { %1592 = vmatpush.bf16.msra.mxu2 %v8394_v6  ;;  %v11998_v6 = vld [vmem:[#allocation4 + $0x5d4] sm:$0xf0] }
  0xa0   :  { %1566 = vmatpush.bf16.msra.mxu3 %v8138_v10  ;;  %v11868_v10 = vld [vmem:[#allocation4 + $0x1cc] sm:$0xf]  ;;  %v8698_v13 = vor.u32 %v11998_v6, %v8697_v5  ;;  %v7979_v5 = vld [vmem:[#allocation4 + $0x38] sm:$0xf0] }
  0xa1   :  { %1581 = vmatpush.bf16.msrb.mxu0 %v8234_v29  ;;  %v8190_v17 = vor.u32 %v11868_v10, %v8187_v11  ;;  %v11978_v10 = vld [vmem:[#allocation4 + $0x534] sm:$0xf0]  ;;  %v8473_v11 = vld [vmem:[#allocation4 + $0x408] sm:$0xf] }
  0xa2   :  { %1555 = vmatpush.bf16.msrb.mxu1 %v7978_v25 }
  0xa3   :  { %1593 = vmatpush.bf16.msra.mxu2 %v8378_v19  ;;  %v11994_v19 = vld [vmem:[#allocation4 + $0x5b4] sm:$0xf0] }
  0xa4   :  { %1567 = vmatpush.bf16.msra.mxu3 %v8122_v22  ;;  %v11864_v22 = vld [vmem:[#allocation4 + $0x1ac] sm:$0xf]  ;;  %v8682_v25 = vor.u32 %v11994_v19, %v8681_v18  ;;  %v8618_v18 = vor.u32 %v11978_v10, %v8617_v9  ;;  %v8601_v19 = vld [vmem:[#allocation4 + $0x508] sm:$0xf]  ;;  %v8411_v10 = vld [vmem:[#allocation4 + $0x398] sm:$0xf0] }
  0xa5   :  { %1582 = vmatpush.bf16.msrb.mxu0 %v8218_v50  ;;  %v8174_v29 = vor.u32 %v11864_v22, %v8171_v23  ;;  %v8139_v50 = vld [vmem:[#allocation4 + $0x178] sm:$0xf0] }
  0xa6   :  { %1556 = vmatpush.bf16.msrb.mxu1 %v7962_v44  ;;  %v8649_v44 = vld [vmem:[#allocation4 + $0x568] sm:$0xf] }
  0xa7   :  { %1594 = vmatpush.bf16.msra.mxu2 %v8362_v34  ;;  %v11954_v34 = vld [vmem:[#allocation4 + $0x474] sm:$0xf0]  ;;  %v8650_v53 = vor.u32 %v11986_v46, %v8649_v44  ;;  %v8443_v46 = vld [vmem:[#allocation4 + $0x3d8] sm:$0xf0] }
  0xa8   :  { %1568 = vmatpush.bf16.msra.mxu3 %v8106_v40  ;;  %1583 = vmatmul.bf16.vlgmr.msrb.gmra.mxu0 %v13109_v51  ;;  %v11824_v40 = vld [vmem:[#allocation4 + $0x6c] sm:$0xf]  ;;  %v8522_v42 = vor.u32 %v11954_v34, %v8521_v33  ;;  %v8315_v33 = vld [vmem:[#allocation4 + $0x2d8] sm:$0xf0] }
  0xa9   :  { %1634 = vmatpush.bf16.msra.mxu0 %v8730_v59  ;;  %1557 = vmatmul.bf16.vlgmr.msrb.gmra.mxu1 %v13111_v55  ;;  %v8014_v52 = vor.u32 %v11824_v40, %v8011_v41  ;;  %v11844_v34 = vld [vmem:[#allocation4 + $0x10c] sm:$0xf] }
  0xaa   :  { %1601 = vmatpush.bf16.msra.mxu1 %v8586_v49  ;;  %v11856_v49 = vld [vmem:[#allocation4 + $0x16c] sm:$0xf]  ;;  %v8094_v44 = vor.u32 %v11844_v34, %v8091_v36 }
  0xab   :  { %1595 = vmatpush.bf16.msra.mxu2 %v8346_v56  ;;  %v7995_v56 = vld [vmem:[#allocation4 + $0x58] sm:$0xf0]  ;;  %v8142_v59 = vor.u32 %v11856_v49, %v8139_v50  ;;  %v11896_v50 = vld [vmem:[#allocation4 + $0x2ac] sm:$0xf] }
  0xac   :  { %1569 = vmatpush.bf16.msra.mxu3 %v8090_v62  ;;  %v8489_v62 = vld [vmem:[#allocation4 + $0x428] sm:$0xf]  ;;  %v7998_v2 = vor.u32 %v11820_v54, %v7995_v56  ;;  %v8699_v54 = vld [vmem:[#allocation4 + $0x5d8] sm:$0xf0]  ;;  %v11916_v34 = vld [vmem:[#allocation4 + $0x34c] sm:$0xf] }
  0xad   :  { %1653 = vmatpush.bf16.msrb.mxu0 %v8206_v4  ;;  %v11816_v4 = vld [vmem:[#allocation4 + $0x2c] sm:$0xf] }
  0xae   :  { %1602 = vmatpush.bf16.msra.mxu1 %v8570_v3  ;;  %1596 = vmatmul.bf16.vlgmr.msra.gmra.mxu2 %v13113_v57  ;;  %v8634_v3 = vor.u32 %v11982_v61, %v8633_v60  ;;  %v7982_v15 = vor.u32 %v11816_v4, %v7979_v5  ;;  %v8427_v61 = vld [vmem:[#allocation4 + $0x3b8] sm:$0xf0] }
  0xaf   :  { %1640 = vmatpush.bf16.msrb.mxu2 %v8078_v63  ;;  %1570 = vmatmul.bf16.vlgmr.msra.gmra.mxu3 %v13117_v7  ;;  %v11946_v63 = vld [vmem:[#allocation4 + $0x434] sm:$0xf0]  ;;  %v8683_v4 = vld [vmem:[#allocation4 + $0x5b8] sm:$0xf0] }
  0xb0   :  { %1614 = vmatpush.bf16.msrb.mxu3 %v8714_v0  ;;  %v11852_v0 = vld [vmem:[#allocation4 + $0x14c] sm:$0xf]  ;;  %v8490_v6 = vor.u32 %v11946_v63, %v8489_v62  ;;  %v8555_v63 = vld [vmem:[#allocation4 + $0x4b8] sm:$0xf0] }
  0xb1   :  { %1654 = vmatpush.bf16.msrb.mxu0 %v8190_v17  ;;  %v8126_v8 = vor.u32 %v11852_v0, %v8123_v1  ;;  %v8331_v17 = vld [vmem:[#allocation4 + $0x2f8] sm:$0xf0]  ;;  %v11960_v62 = vld [vmem:[#allocation4 + $0x4ac] sm:$0xf] }
  0xb2   :  { %1603 = vmatpush.bf16.msra.mxu1 %v8554_v16  ;;  %v11904_v16 = vld [vmem:[#allocation4 + $0x2ec] sm:$0xf] }
  0xb3   :  { %1641 = vmatpush.bf16.msrb.mxu2 %v8062_v12  ;;  %v11942_v12 = vld [vmem:[#allocation4 + $0x414] sm:$0xf0]  ;;  %v8334_v27 = vor.u32 %v11904_v16, %v8331_v17  ;;  %v11892_v1 = vld [vmem:[#allocation4 + $0x28c] sm:$0xf]  ;;  %v8667_v17 = vld [vmem:[#allocation4 + $0x598] sm:$0xf0] }
  0xb4   :  { %1615 = vmatpush.bf16.msrb.mxu3 %v8698_v13  ;;  %v11848_v13 = vld [vmem:[#allocation4 + $0x12c] sm:$0xf]  ;;  %v8474_v22 = vor.u32 %v11942_v12, %v8473_v11  ;;  %v8539_v12 = vld [vmem:[#allocation4 + $0x498] sm:$0xf0] }
  0xb5   :  { %1655 = vmatpush.bf16.msrb.mxu0 %v8174_v29  ;;  %v8110_v23 = vor.u32 %v11848_v13, %v8107_v14  ;;  %v8587_v29 = vld [vmem:[#allocation4 + $0x4f8] sm:$0xf0]  ;;  %v11956_v11 = vld [vmem:[#allocation4 + $0x48c] sm:$0xf] }
  0xb6   :  { %1604 = vmatpush.bf16.msra.mxu1 %v8538_v28  ;;  %v11968_v28 = vld [vmem:[#allocation4 + $0x4ec] sm:$0xf] }
  0xb7   :  { %1642 = vmatpush.bf16.msrb.mxu2 %v8046_v24  ;;  %v11974_v24 = vld [vmem:[#allocation4 + $0x514] sm:$0xf0]  ;;  %v8590_v41 = vor.u32 %v11968_v28, %v8587_v29  ;;  %v11888_v14 = vld [vmem:[#allocation4 + $0x26c] sm:$0xf]  ;;  %v8651_v29 = vld [vmem:[#allocation4 + $0x578] sm:$0xf0] }
  0xb8   :  { %1616 = vmatpush.bf16.msrb.mxu3 %v8682_v25  ;;  %8737 = vmatmul.msk.bf16.vlgmr.msra.gmra.mxu0 %vm1363_vm0, %v13121_v45  ;;  %v11936_v25 = vld [vmem:[#allocation4 + $0x3ec] sm:$0xf]  ;;  %v8602_v37 = vor.u32 %v11974_v24, %v8601_v19  ;;  %v8542_v19 = vor.u32 %v11956_v11, %v8539_v12  ;;  %v8523_v24 = vld [vmem:[#allocation4 + $0x478] sm:$0xf0] }
  0xb9   :  { %1656 = vmatpush.bf16.msrb.mxu0 %v8158_v43  ;;  %v8462_v40 = vor.u32 %v11936_v25, %v8459_v26  ;;  %v8318_v43 = vor.u32 %v11900_v31, %v8315_v33  ;;  %v11884_v26 = vld [vmem:[#allocation4 + $0x24c] sm:$0xf]  ;;  %v8475_v11 = vld [vmem:[#allocation4 + $0x418] sm:$0xf0] }
  0xba   :  { %1605 = vmatpush.bf16.msra.mxu1 %v8522_v42  ;;  %v11932_v42 = vld [vmem:[#allocation4 + $0x3cc] sm:$0xf] }
  0xbb   :  { %1643 = vmatpush.bf16.msrb.mxu2 %v8030_v38  ;;  %v12000_v38 = vld [vmem:[#allocation4 + $0x5ec] sm:$0xf]  ;;  %v8446_v56 = vor.u32 %v11932_v42, %v8443_v46 }
  0xbc   :  { %1617 = vmatpush.bf16.msrb.mxu3 %v8666_v39  ;;  %v8715_v39 = vld [vmem:[#allocation4 + $0x5f8] sm:$0xf0]  ;;  %v11984_v28 = vld [vmem:[#allocation4 + $0x56c] sm:$0xf] }
  0xbd   :  { %1657 = vmatpush.bf16.msrb.mxu0 %v8142_v59  ;;  %v8718_v49 = vor.u32 %v12000_v38, %v8715_v39  ;;  %v11928_v59 = vld [vmem:[#allocation4 + $0x3ac] sm:$0xf]  ;;  %v8379_v38 = vld [vmem:[#allocation4 + $0x358] sm:$0xf0] }
  0xbe   :  { %1606 = vmatpush.bf16.msra.mxu1 %v8506_v58  ;;  %v8574_v58 = vor.u32 %v11964_v47, %v8571_v48  ;;  %v8430_v5 = vor.u32 %v11928_v59, %v8427_v61  ;;  %v11948_v39 = vld [vmem:[#allocation4 + $0x44c] sm:$0xf]  ;;  %v8635_v47 = vld [vmem:[#allocation4 + $0x558] sm:$0xf0]  ;;  %v8382_v48 = vor.u32 %v11916_v34, %v8379_v38  ;;  %v8821_v38 = vld [vmem:[#allocation7 + $0xa0] sm:$0xf] }
  0xbf   :  { %1644 = vmatpush.bf16.msrb.mxu2 %v8014_v52  ;;  %v8299_v52 = vld [vmem:[#allocation4 + $0x2b8] sm:$0xf0]  ;;  %v11880_v42 = vld [vmem:[#allocation4 + $0x22c] sm:$0xf] }
  0xc0   :  { %1618 = vmatpush.bf16.msrb.mxu3 %v8650_v53  ;;  %v11996_v53 = vld [vmem:[#allocation4 + $0x5cc] sm:$0xf]  ;;  %v8302_v60 = vor.u32 %v11896_v50, %v8299_v52 }
  0xc1   :  { %1658 = vmatpush.bf16.msrb.mxu0 %v8126_v8  ;;  %v8702_v0 = vor.u32 %v11996_v53, %v8699_v54  ;;  %v11924_v8 = vld [vmem:[#allocation4 + $0x38c] sm:$0xf]  ;;  %v8363_v53 = vld [vmem:[#allocation4 + $0x338] sm:$0xf0] }
  0xc2   :  { %1607 = vmatpush.bf16.msra.mxu1 %v8490_v6  ;;  %v8558_v6 = vor.u32 %v11960_v62, %v8555_v63  ;;  %v11980_v46 = vld [vmem:[#allocation4 + $0x54c] sm:$0xf]  ;;  %v8619_v63 = vld [vmem:[#allocation4 + $0x538] sm:$0xf0] }
  0xc3   :  { %1645 = vmatpush.bf16.msrb.mxu2 %v7998_v2  ;;  %v8283_v2 = vld [vmem:[#allocation4 + $0x298] sm:$0xf0]  ;;  %v11912_v50 = vld [vmem:[#allocation4 + $0x32c] sm:$0xf] }
  0xc4   :  { %1619 = vmatpush.bf16.msrb.mxu3 %v8634_v3  ;;  %v11992_v3 = vld [vmem:[#allocation4 + $0x5ac] sm:$0xf]  ;;  %v8286_v9 = vor.u32 %v11892_v1, %v8283_v2  ;;  %v8731_v1 = vld [vmem:[#allocation4 + $0x618] sm:$0xf0]  ;;  %v13157_v2 = vld [vmem:[#allocation6] sm:$0xf] }
  0xc5   :  { %1659 = vmatpush.bf16.msrb.mxu0 %v8110_v23  ;;  %v8686_v13 = vor.u32 %v11992_v3, %v8683_v4  ;;  %v13149_v16 = vpop.f32.mrf.mxu0  ;;  %v11952_v23 = vld [vmem:[#allocation4 + $0x46c] sm:$0xf]  ;;  %v8366_v4 = vor.u32 %v11912_v50, %v8363_v53 }
  0xc6   :  { %1608 = vmatpush.bf16.msra.mxu1 %v8474_v22  ;;  %v8395_v22 = vld [vmem:[#allocation4 + $0x378] sm:$0xf0]  ;;  %v8526_v33 = vor.u32 %v11952_v23, %v8523_v24  ;;  %v11944_v54 = vld [vmem:[#allocation4 + $0x42c] sm:$0xf] }
  0xc7   :  { %1646 = vmatpush.bf16.msrb.mxu2 %v7982_v15  ;;  %v8267_v15 = vld [vmem:[#allocation4 + $0x278] sm:$0xf0]  ;;  %v11876_v59 = vld [vmem:[#allocation4 + $0x20c] sm:$0xf] }
  0xc8   :  { %1620 = vmatpush.bf16.msrb.mxu3 %v8618_v18  ;;  %v8414_v18 = vor.u32 %v11924_v8, %v8411_v10  ;;  %v8270_v21 = vor.u32 %v11888_v14, %v8267_v15  ;;  %v11976_v61 = vld [vmem:[#allocation4 + $0x52c] sm:$0xf]  ;;  %v8853_v14 = vld [vmem:[#allocation7 + $0xe0] sm:$0xf]  ;;  %v12037_v15 = vld [vmem:[#allocation7 + $0xec] sm:$0xf0] }
  0xc9   :  { %1609 = vmatmul.bf16.vlgmr.msra.gmra.mxu1 %v13125_v30  ;;  %1660 = vmatpush.bf16.msrb.mxu0 %v8094_v44  ;;  %v11940_v10 = vld [vmem:[#allocation4 + $0x40c] sm:$0xf]  ;;  %v8854_v24 = vor.u32 %v12037_v15, %v8853_v14  ;;  %v8741_v14 = vld [vmem:[#allocation7] sm:$0xf]  ;;  %v12009_v15 = vld [vmem:[#allocation7 + $0xc] sm:$0xf0] }
  0xca   :  { %1666 = vmatpush.bf16.msrb.mxu1 %v8334_v27  ;;  %v8251_v27 = vld [vmem:[#allocation4 + $0x258] sm:$0xf0]  ;;  %v8478_v23 = vor.u32 %v11940_v10, %v8475_v11  ;;  %v8885_v11 = vld [vmem:[#allocation7 + $0x120] sm:$0xf] }
  0xcb   :  { %1647 = vmatpush.bf16.msrb.mxu2 %v7966_v32  ;;  %v8398_v32 = vor.u32 %v11920_v20, %v8395_v22  ;;  %v8254_v36 = vor.u32 %v11884_v26, %v8251_v27  ;;  %v12069_v20 = vld [vmem:[#allocation7 + $0x1ec] sm:$0xf0]  ;;  %v8837_v26 = vld [vmem:[#allocation7 + $0xc0] sm:$0xf] }
  0xcc   :  { %1621 = vmatpush.bf16.msrb.mxu3 %v8602_v37  ;;  %1661 = vmatmul.bf16.vlgmr.msrb.gmra.mxu0 %v13117_v7  ;;  %v13151_v25 = vpop.f32.mrf.mxu1  ;;  %v12033_v27 = vld [vmem:[#allocation7 + $0xcc] sm:$0xf0] }
  0xcd   :  { %1705 = vmatpush.bf16.msra.mxu0 %v8718_v49  ;;  %v13153_v31 = vpop.f32.mrf.mxu2  ;;  %v1378_v44 = vpop.f32.mrf.mxu0 }
  0xce   :  { %1667 = vmatpush.bf16.msrb.mxu1 %v8318_v43  ;;  %1648 = vmatmul.bf16.vlgmr.msrb.gmra.mxu2 %v13111_v55  ;;  %v11988_v55 = vld [vmem:[#allocation4 + $0x58c] sm:$0xf]  ;;  %v8235_v43 = vld [vmem:[#allocation4 + $0x238] sm:$0xf0]  ;;  %v12025_v44 = vld [vmem:[#allocation7 + $0x8c] sm:$0xf0] }
  0xcf   :  { %1692 = vmatpush.bf16.msra.mxu2 %v8590_v41  ;;  %1622 = vmatmul.bf16.vlgmr.msrb.gmra.mxu3 %v13127_v35  ;;  %v8670_v7 = vor.u32 %v11988_v55, %v8667_v17  ;;  %v8654_v41 = vor.u32 %v11984_v28, %v8651_v29  ;;  %v8238_v52 = vor.u32 %v11880_v42, %v8235_v43  ;;  %v11972_v55 = vld [vmem:[#allocation4 + $0x50c] sm:$0xf]  ;;  %v8965_v29 = vld [vmem:[#allocation7 + $0x1c0] sm:$0xf]  ;;  %v12061_v42 = vld [vmem:[#allocation7 + $0x1ac] sm:$0xf0] }
  0xd0   :  { %1679 = vmatpush.bf16.msra.mxu3 %v8462_v40  ;;  %v13155_v37 = vpop.f32.mrf.mxu3  ;;  %v8507_v40 = vld [vmem:[#allocation4 + $0x458] sm:$0xf0] }
  0xd1   :  { %1706 = vmatpush.bf16.msra.mxu0 %v8702_v0  ;;  %v8510_v49 = vor.u32 %v11948_v39, %v8507_v40  ;;  %v12004_v0 = vld [vmem:[#allocation4 + $0x60c] sm:$0xf]  ;;  %v12029_v39 = vld [vmem:[#allocation7 + $0xac] sm:$0xf0] }
  0xd2   :  { %1668 = vmatpush.bf16.msrb.mxu1 %v8302_v60  ;;  %v8219_v60 = vld [vmem:[#allocation4 + $0x218] sm:$0xf0]  ;;  %v8734_v17 = vor.u32 %v12004_v0, %v8731_v1  ;;  %v8901_v0 = vld [vmem:[#allocation7 + $0x140] sm:$0xf]  ;;  %v12049_v1 = vld [vmem:[#allocation7 + $0x14c] sm:$0xf0] }
  0xd3   :  { %1693 = vmatpush.bf16.msra.mxu2 %v8574_v58  ;;  %v8638_v58 = vor.u32 %v11980_v46, %v8635_v47  ;;  %v8222_v8 = vor.u32 %v11876_v59, %v8219_v60  ;;  %v8902_v10 = vor.u32 %v12049_v1, %v8901_v0  ;;  %v12085_v0 = vld [vmem:[#allocation7 + $0x26c] sm:$0xf0]  ;;  %v376_v1 = vperm.slane %v13157_v2, 1 }
  0xd4   :  { %1680 = vmatpush.bf16.msra.mxu3 %v8446_v56  ;;  %v8491_v56 = vld [vmem:[#allocation4 + $0x438] sm:$0xf0]  ;;  %v1391_v62 = vpop.f32.mrf.mxu1 }
  0xd5   :  { %1707 = vmatpush.bf16.msra.mxu0 %v8686_v13  ;;  %v1404_v3 = vpop.f32.mrf.mxu2  ;;  %v8622_v13 = vor.u32 %v11976_v61, %v8619_v63  ;;  %v8773_v61 = vld [vmem:[#allocation7 + $0x40] sm:$0xf]  ;;  %v12017_v62 = vld [vmem:[#allocation7 + $0x4c] sm:$0xf0] }
  0xd6   :  { %1669 = vmatpush.bf16.msrb.mxu1 %v8286_v9  ;;  %v8347_v9 = vld [vmem:[#allocation4 + $0x318] sm:$0xf0] }
  0xd7   :  { %1694 = vmatpush.bf16.msra.mxu2 %v8558_v6  ;;  %v11908_v6 = vld [vmem:[#allocation4 + $0x30c] sm:$0xf] }
  0xd8   :  { %1681 = vmatpush.bf16.msra.mxu3 %v8430_v5  ;;  %v8494_v5 = vor.u32 %v11944_v54, %v8491_v56  ;;  %v1417_v12 = vpop.f32.mrf.mxu3  ;;  %v8350_v22 = vor.u32 %v11908_v6, %v8347_v9  ;;  %v12021_v54 = vld [vmem:[#allocation7 + $0x6c] sm:$0xf0]  ;;  %v8917_v56 = vld [vmem:[#allocation7 + $0x160] sm:$0xf] }
  0xd9   :  { %1708 = vmatpush.bf16.msra.mxu0 %v8670_v7  ;;  %v12013_v9 = vld [vmem:[#allocation7 + $0x2c] sm:$0xf0] }
  0xda   :  { %1670 = vmatpush.bf16.msrb.mxu1 %v8270_v21  ;;  %v375_v21 = vperm.slane %v13157_v2, 0  ;;  %v12045_v12 = vld [vmem:[#allocation7 + $0x12c] sm:$0xf0] }
  0xdb   :  { %1695 = vmatpush.bf16.msra.mxu2 %v8542_v19  ;;  %v8981_v19 = vld [vmem:[#allocation7 + $0x1e0] sm:$0xf] }
  0xdc   :  { %1682 = vmatpush.bf16.msra.mxu3 %v8414_v18  ;;  %v8603_v18 = vld [vmem:[#allocation4 + $0x518] sm:$0xf0]  ;;  %v8982_v28 = vor.u32 %v12069_v20, %v8981_v19  ;;  %v12101_v19 = vld [vmem:[#allocation7 + $0x2ec] sm:$0xf0] }
  0xdd   :  { %1709 = vmatpush.bf16.msra.mxu0 %v8654_v41  ;;  %v8606_v7 = vor.u32 %v11972_v55, %v8603_v18  ;;  %v13162_v34 = vpop.f32.mrf.mxu2  ;;  %v8949_v41 = vld [vmem:[#allocation7 + $0x1a0] sm:$0xf] }
  0xde   :  { %1671 = vmatpush.bf16.msrb.mxu1 %v8254_v36  ;;  %v8838_v36 = vor.u32 %v12033_v27, %v8837_v26  ;;  %v8950_v46 = vor.u32 %v12061_v42, %v8949_v41  ;;  %v9109_v18 = vld [vmem:[#allocation7 + $0x2e0] sm:$0xf]  ;;  %v8983_v26 = vld [vmem:[#allocation7 + $0x1f0] sm:$0xf0]  ;;  %v8742_v27 = vor.u32 %v12009_v15, %v8741_v14  ;;  %v12063_v42 = vld [vmem:[#allocation7 + $0x1c4] sm:$0xf] }
  0xdf   :  { %1696 = vmatpush.bf16.msra.mxu2 %v8526_v33  ;;  %v1377_v33 = vadd.f32 %v13149_v16, %v375_v21  ;;  %v8805_v16 = vld [vmem:[#allocation7 + $0x80] sm:$0xf]  ;;  %v8855_v21 = vld [vmem:[#allocation7 + $0xf0] sm:$0xf0]  ;;  %v12015_v15 = vld [vmem:[#allocation7 + $0x44] sm:$0xf] }
  0xe0   :  { %1683 = vmatpush.bf16.msra.mxu3 %v8398_v32  ;;  %v12065_v32 = vld [vmem:[#allocation7 + $0x1cc] sm:$0xf0]  ;;  %v8806_v53 = vor.u32 %v12025_v44, %v8805_v16  ;;  %v9077_v44 = vld [vmem:[#allocation7 + $0x2a0] sm:$0xf] }
  0xe1   :  { %1710 = vmatpush.bf16.msra.mxu0 %v8638_v58  ;;  %v8966_v40 = vor.u32 %v12065_v32, %v8965_v29  ;;  %v1390_v43 = vadd.f32 %v13151_v25, %v1377_v33  ;;  %v8789_v25 = vld [vmem:[#allocation7 + $0x60] sm:$0xf] }
  0xe2   :  { %1672 = vmatpush.bf16.msrb.mxu1 %v8238_v52  ;;  %v8790_v59 = vor.u32 %v12021_v54, %v8789_v25  ;;  %v9061_v25 = vld [vmem:[#allocation7 + $0x280] sm:$0xf]  ;;  %v12089_v54 = vld [vmem:[#allocation7 + $0x28c] sm:$0xf0] }
  0xe3   :  { %1697 = vmatpush.bf16.msra.mxu2 %v8510_v49  ;;  %v12057_v49 = vld [vmem:[#allocation7 + $0x18c] sm:$0xf0]  ;;  %v1403_v50 = vadd.f32 %v13153_v31, %v1390_v43  ;;  %v8967_v43 = vld [vmem:[#allocation7 + $0x1d0] sm:$0xf0] }
  0xe4   :  { %1684 = vmatpush.bf16.msra.mxu3 %v8382_v48  ;;  %v8933_v48 = vld [vmem:[#allocation7 + $0x180] sm:$0xf] }
  0xe5   :  { %1711 = vmatpush.bf16.msra.mxu0 %v8622_v13  ;;  %v1428_v47 = vpop.f32.mrf.mxu0  ;;  %v1456_v52 = vpop.f32.mrf.mxu2  ;;  %v1416_v58 = vadd.f32 %v13155_v37, %v1403_v50 }
  0xe6   :  { %1673 = vmatpush.bf16.msrb.mxu1 %v8222_v8  ;;  %v8757_v8 = vld [vmem:[#allocation7 + $0x20] sm:$0xf]  ;;  %v8951_v52 = vld [vmem:[#allocation7 + $0x1b0] sm:$0xf0] }
  0xe7   :  { %1698 = vmatpush.bf16.msra.mxu2 %v8494_v5  ;;  %v1429_v60 = vadd.f32 %v1428_v47, %v1416_v58  ;;  %v8774_v5 = vor.u32 %v12017_v62, %v8773_v61  ;;  %v8758_v13 = vor.u32 %v12013_v9, %v8757_v8  ;;  %v12027_v47 = vld [vmem:[#allocation7 + $0xa4] sm:$0xf]  ;;  %v9062_v58 = vor.u32 %v12089_v54, %v9061_v25 }
  0xe8   :  { %1685 = vmatpush.bf16.msra.mxu3 %v8366_v4  ;;  %v12051_v9 = vld [vmem:[#allocation7 + $0x164] sm:$0xf] }
  0xe9   :  { %1674 = vmatmul.bf16.vlgmr.msrb.gmra.mxu1 %v13109_v51  ;;  %1712 = vmatpush.bf16.msra.mxu0 %v8606_v7  ;;  %v8822_v51 = vor.u32 %v12029_v39, %v8821_v38  ;;  %v12067_v7 = vld [vmem:[#allocation7 + $0x1e4] sm:$0xf]  ;;  %v8839_v39 = vld [vmem:[#allocation7 + $0xd0] sm:$0xf0] }
  0xea   :  { %1725 = vmatpush.bf16.msra.mxu1 %v8734_v17  ;;  %v8886_v17 = vor.u32 %v12045_v12, %v8885_v11  ;;  %v12031_v38 = vld [vmem:[#allocation7 + $0xc4] sm:$0xf]  ;;  %v9029_v12 = vld [vmem:[#allocation7 + $0x240] sm:$0xf] }
  0xeb   :  { %1699 = vmatpush.bf16.msra.mxu2 %v8478_v23  ;;  %v12041_v23 = vld [vmem:[#allocation7 + $0x10c] sm:$0xf0]  ;;  %v8842_v16 = vor.u32 %v12031_v38, %v8839_v39  ;;  %v12007_v38 = vld [vmem:[#allocation7 + $0x4] sm:$0xf] }
  0xec   :  { %1686 = vmatpush.bf16.msra.mxu3 %v8350_v22  ;;  %1713 = vmatmul.bf16.vlgmr.msra.gmra.mxu0 %v13127_v35  ;;  %v12053_v35 = vld [vmem:[#allocation7 + $0x16c] sm:$0xf0]  ;;  %v8869_v22 = vld [vmem:[#allocation7 + $0x100] sm:$0xf] }
  0xed   :  { %v8918_v63 = vor.u32 %v12053_v35, %v8917_v56  ;;  %v1430_v3 = vpop.f32.mrf.mxu0  ;;  %v8870_v33 = vor.u32 %v12041_v23, %v8869_v22  ;;  %v8807_v56 = vld [vmem:[#allocation7 + $0x90] sm:$0xf0] }
  0xee   :  { %2530 = vmatpush.bf16.msrb.mxu1 %v8982_v28  ;;  %1700 = vmatmul.bf16.vlgmr.msra.gmra.mxu2 %v13125_v30  ;;  %v8934_v30 = vor.u32 %v12057_v49, %v8933_v48  ;;  %v13170_v31 = vpop.f32.mrf.mxu3  ;;  %v8823_v48 = vld [vmem:[#allocation7 + $0xb0] sm:$0xf0]  ;;  %v8970_v49 = vor.u32 %v12063_v42, %v8967_v43  ;;  %v12073_v42 = vld [vmem:[#allocation7 + $0x20c] sm:$0xf0]  ;;  %v8861_v43 = vld [vmem:[#allocation7 + $0xe8] sm:$0xf] }
  0xef   :  { %1687 = vmatmul.bf16.vlgmr.msra.gmra.mxu3 %v13113_v57  ;;  %v1441_v57 = vpop.f32.mrf.mxu1  ;;  %v1468_v14 = vadd.f32 %v13170_v31, %v376_v1 }
  0xf0   :  { %2517 = vmatpush.bf16.msrb.mxu3 %v8854_v24  ;;  %v1442_v37 = vadd.f32 %v1441_v57, %v1429_v60  ;;  %v9110_v24 = vor.u32 %v12101_v19, %v9109_v18  ;;  %v12059_v57 = vld [vmem:[#allocation7 + $0x1a4] sm:$0xf]  ;;  %v8935_v60 = vld [vmem:[#allocation7 + $0x190] sm:$0xf0] }
  0xf1   :  { %v13174_v6 = vpop.f32.mrf.mxu2  ;;  %v8954_v35 = vor.u32 %v12059_v57, %v8951_v52  ;;  %v12047_v19 = vld [vmem:[#allocation7 + $0x144] sm:$0xf] }
  0xf2   :  { %2531 = vmatpush.bf16.msrb.mxu1 %v8966_v40  ;;  %v1455_v55 = vadd.f32 %v13162_v34, %v1442_v37  ;;  %2543 = vmatpush.bf16.msrb.mxu2 %v9110_v24  ;;  %v9093_v34 = vld [vmem:[#allocation7 + $0x2c0] sm:$0xf]  ;;  %v8986_v40 = vor.u32 %v12067_v7, %v8983_v26  ;;  %v12077_v7 = vld [vmem:[#allocation7 + $0x22c] sm:$0xf0]  ;;  %v1481_v26 = vadd.f32 %v13174_v6, %v1468_v14  ;;  %v8989_v14 = vld [vmem:[#allocation7 + $0x1e8] sm:$0xf] }
  0xf3   :  { %v9013_v24 = vld [vmem:[#allocation7 + $0x220] sm:$0xf] }
  0xf4   :  { %2518 = vmatpush.bf16.msrb.mxu3 %v8838_v36  ;;  %v1731_v29 = vmax.f32 %v1455_v55, 0.0  ;;  %v12097_v36 = vld [vmem:[#allocation7 + $0x2cc] sm:$0xf0]  ;;  %v8775_v55 = vld [vmem:[#allocation7 + $0x50] sm:$0xf0] }
  0xf5   :  { %v9094_v41 = vor.u32 %v12097_v36, %v9093_v34  ;;  %v8778_v23 = vor.u32 %v12015_v15, %v8775_v55  ;;  %v8887_v34 = vld [vmem:[#allocation7 + $0x130] sm:$0xf0]  ;;  %v12070_v15 = vld [vmem:[#allocation7 + $0x1f4] sm:$0xf0] }
  0xf6   :  { %2532 = vmatpush.bf16.msrb.mxu1 %v8950_v46  ;;  %v1469_v20 = vpop.f32.mrf.mxu3  ;;  %v12093_v46 = vld [vmem:[#allocation7 + $0x2ac] sm:$0xf0] }
  0xf7   :  { %v1443_v4 = vpop.f32.mrf.mxu1  ;;  %2544 = vmatpush.bf16.msrb.mxu2 %v9094_v41  ;;  %v9078_v50 = vor.u32 %v12093_v46, %v9077_v44  ;;  %v8903_v20 = vld [vmem:[#allocation7 + $0x150] sm:$0xf0]  ;;  %v8997_v41 = vld [vmem:[#allocation7 + $0x200] sm:$0xf]  ;;  %v12099_v44 = vld [vmem:[#allocation7 + $0x2e4] sm:$0xf] }
  0xf8   :  { %2519 = vmatpush.bf16.msrb.mxu3 %v8822_v51  ;;  %v13177_v51 = vpack.c.bf16 %v1731_v29, %v1731_v29  ;;  %v12019_v4 = vld [vmem:[#allocation7 + $0x64] sm:$0xf]  ;;  %v8906_v31 = vor.u32 %v12047_v19, %v8903_v20  ;;  %v8998_v6 = vor.u32 %v12073_v42, %v8997_v41  ;;  %v9111_v46 = vld [vmem:[#allocation7 + $0x2f0] sm:$0xf0]  ;;  %v12026_v19 = vld [vmem:[#allocation7 + $0x94] sm:$0xf0] }
  0xf9   :  { %8738 = vmatmul.msk.bf16.vlgmr.msra.gmra.mxu1 %vm1363_vm0, %v13121_v45  ;;  %v12035_v45 = vld [vmem:[#allocation7 + $0xe4] sm:$0xf]  ;;  %v1482_v28 = vpop.f32.mrf.mxu2  ;;  %v9114_v57 = vor.u32 %v12099_v44, %v9111_v46  ;;  %v9189_v42 = vld [vmem:[#allocation7 + $0x380] sm:$0xf] }
  0xfa   :  { %2533 = vmatpush.bf16.msrb.mxu1 %v8934_v30  ;;  %v8858_v32 = vor.u32 %v12035_v45, %v8855_v21  ;;  %v12023_v30 = vld [vmem:[#allocation7 + $0x84] sm:$0xf]  ;;  %v8759_v28 = vld [vmem:[#allocation7 + $0x30] sm:$0xf0] }
  0xfb   :  { %2545 = vmatpush.bf16.msrb.mxu2 %v9078_v50  ;;  %v8810_v62 = vor.u32 %v12023_v30, %v8807_v56  ;;  %v8871_v50 = vld [vmem:[#allocation7 + $0x110] sm:$0xf0]  ;;  %v8845_v56 = vld [vmem:[#allocation7 + $0xc8] sm:$0xf]  ;;  %v12087_v20 = vld [vmem:[#allocation7 + $0x284] sm:$0xf] }
  0xfc   :  { %2520 = vmatpush.bf16.msrb.mxu3 %v8806_v53  ;;  %v8826_v53 = vor.u32 %v12027_v47, %v8823_v48  ;;  %v12038_v48 = vld [vmem:[#allocation7 + $0xf4] sm:$0xf0] }
  0xfd   :  { %v8862_v30 = vor.u32 %v12038_v48, %v8861_v43  ;;  %v12121_v43 = vld [vmem:[#allocation7 + $0x38c] sm:$0xf0]  ;;  %v8781_v48 = vld [vmem:[#allocation7 + $0x48] sm:$0xf] }
  0xfe   :  { %2534 = vmatpush.bf16.msrb.mxu1 %v8918_v63  ;;  %v9045_v63 = vld [vmem:[#allocation7 + $0x260] sm:$0xf]  ;;  %v9190_v44 = vor.u32 %v12121_v43, %v9189_v42  ;;  %v12131_v42 = vld [vmem:[#allocation7 + $0x3e4] sm:$0xf]  ;;  %v9239_v43 = vld [vmem:[#allocation7 + $0x3f0] sm:$0xf0] }
  0xff   :  { %2546 = vmatpush.bf16.msrb.mxu2 %v9062_v58  ;;  %v9046_v8 = vor.u32 %v12085_v0, %v9045_v63  ;;  %v12095_v58 = vld [vmem:[#allocation7 + $0x2c4] sm:$0xf]  ;;  %v12133_v63 = vld [vmem:[#allocation7 + $0x3ec] sm:$0xf0] }
 0x100   :  { %2521 = vmatpush.bf16.msrb.mxu3 %v8790_v59  ;;  %v12055_v59 = vld [vmem:[#allocation7 + $0x184] sm:$0xf] }
 0x101   :  { %v8938_v37 = vor.u32 %v12055_v59, %v8935_v60  ;;  %v9095_v59 = vld [vmem:[#allocation7 + $0x2d0] sm:$0xf0]  ;;  %v12034_v60 = vld [vmem:[#allocation7 + $0xd4] sm:$0xf0] }
 0x102   :  { %2535 = vmatpush.bf16.msrb.mxu1 %v8902_v10  ;;  %v8919_v10 = vld [vmem:[#allocation7 + $0x170] sm:$0xf0] }
 0x103   :  { %2547 = vmatpush.bf16.msrb.mxu2 %v9046_v8  ;;  %v8922_v45 = vor.u32 %v12051_v9, %v8919_v10  ;;  %v12030_v9 = vld [vmem:[#allocation7 + $0xb4] sm:$0xf0] }
 0x104   :  { %2522 = vmatpush.bf16.msrb.mxu3 %v8774_v5  ;;  %v8791_v5 = vld [vmem:[#allocation7 + $0x70] sm:$0xf0] }
 0x105   :  { %v1493_v61 = vpop.f32.mrf.mxu0  ;;  %v8794_v11 = vor.u32 %v12019_v4, %v8791_v5  ;;  %v8829_v4 = vld [vmem:[#allocation7 + $0xa8] sm:$0xf]  ;;  %v12091_v5 = vld [vmem:[#allocation7 + $0x2a4] sm:$0xf] }
 0x106   :  { %2536 = vmatpush.bf16.msrb.mxu1 %v8886_v17  ;;  %v1506_v3 = vpop.f32.mrf.mxu1  ;;  %v1494_v36 = vadd.f32 %v1493_v61, %v1481_v26  ;;  %v9098_v61 = vor.u32 %v12095_v58, %v9095_v59  ;;  %v8973_v26 = vld [vmem:[#allocation7 + $0x1c8] sm:$0xf] }
 0x107   :  { %v8765_v59 = vld [vmem:[#allocation7 + $0x28] sm:$0xf] }
 0x108   :  { %2523 = vmatpush.bf16.msrb.mxu3 %v8758_v13  ;;  %v12081_v13 = vld [vmem:[#allocation7 + $0x24c] sm:$0xf0]  ;;  %v1507_v52 = vadd.f32 %v1506_v3, %v1494_v36  ;;  %v8846_v3 = vor.u32 %v12034_v60, %v8845_v56  ;;  %v12058_v56 = vld [vmem:[#allocation7 + $0x194] sm:$0xf0]  ;;  %v12075_v60 = vld [vmem:[#allocation7 + $0x224] sm:$0xf] }
 0x109   :  { %v9030_v17 = vor.u32 %v12081_v13, %v9029_v12  ;;  %v12129_v12 = vld [vmem:[#allocation7 + $0x3cc] sm:$0xf0] }
 0x10a   :  { %2537 = vmatpush.bf16.msrb.mxu1 %v8870_v33  ;;  %v12043_v33 = vld [vmem:[#allocation7 + $0x124] sm:$0xf] }
 0x10b   :  { %2548 = vmatpush.bf16.msrb.mxu2 %v9030_v17 }
 0x10c   :  { %2524 = vmatpush.bf16.msrb.mxu3 %v8742_v27  ;;  %v12011_v27 = vld [vmem:[#allocation7 + $0x24] sm:$0xf] }
 0x10d   :  { %v1495_v21 = vpop.f32.mrf.mxu0  ;;  %v8762_v39 = vor.u32 %v12011_v27, %v8759_v28  ;;  %v12066_v27 = vld [vmem:[#allocation7 + $0x1d4] sm:$0xf0] }
 0x10e   :  { %2582 = vmatpush.bf16.msra.mxu1 %v8986_v40  ;;  %v1519_v18 = vpop.f32.mrf.mxu3  ;;  %v1508_v29 = vpop.f32.mrf.mxu1  ;;  %v8743_v40 = vld [vmem:[#allocation7 + $0x10] sm:$0xf0]  ;;  %v8990_v21 = vor.u32 %v12070_v15, %v8989_v14  ;;  %v12010_v14 = vld [vmem:[#allocation7 + $0x14] sm:$0xf0]  ;;  %v12071_v15 = vld [vmem:[#allocation7 + $0x204] sm:$0xf] }
 0x10f   :  { %2525 = vmatmul.bf16.vlgmr.msrb.gmra.mxu3 %v13177_v51  ;;  %v1520_v54 = vadd.f32 %v1519_v18, %v1507_v52  ;;  %v8830_v18 = vor.u32 %v12030_v9, %v8829_v4  ;;  %v12018_v52 = vld [vmem:[#allocation7 + $0x54] sm:$0xf0]  ;;  %v9157_v4 = vld [vmem:[#allocation7 + $0x340] sm:$0xf] }
 0x110   :  { %2569 = vmatpush.bf16.msra.mxu3 %v8858_v32  ;;  %v9014_v32 = vor.u32 %v12077_v7, %v9013_v24  ;;  %v12125_v24 = vld [vmem:[#allocation7 + $0x3ac] sm:$0xf0]  ;;  %v8782_v58 = vor.u32 %v12018_v52, %v8781_v48  ;;  %v8831_v52 = vld [vmem:[#allocation7 + $0xb8] sm:$0xf0] }
 0x111   :  { %v1532_v22 = vpop.f32.mrf.mxu2 }
 0x112   :  { %2583 = vmatpush.bf16.msra.mxu1 %v8970_v49  ;;  %2549 = vmatpush.bf16.msrb.mxu2 %v9014_v32  ;;  %v12039_v49 = vld [vmem:[#allocation7 + $0x104] sm:$0xf]  ;;  %v1533_v1 = vadd.f32 %v1532_v22, %v1520_v54  ;;  %v9063_v22 = vld [vmem:[#allocation7 + $0x290] sm:$0xf0]  ;;  %v8797_v32 = vld [vmem:[#allocation7 + $0x68] sm:$0xf] }
 0x113   :  { %v9066_v28 = vor.u32 %v12087_v20, %v9063_v22  ;;  %v12117_v54 = vld [vmem:[#allocation7 + $0x36c] sm:$0xf0]  ;;  %v12036_v22 = vld [vmem:[#allocation7 + $0xec] sm:$0xf] }
 0x114   :  { %2570 = vmatpush.bf16.msra.mxu3 %v8842_v16  ;;  %v8890_v16 = vor.u32 %v12043_v33, %v8887_v34  ;;  %v12083_v33 = vld [vmem:[#allocation7 + $0x264] sm:$0xf]  ;;  %v9047_v34 = vld [vmem:[#allocation7 + $0x270] sm:$0xf0]  ;;  %v12109_v20 = vld [vmem:[#allocation7 + $0x32c] sm:$0xf0] }
 0x115   :  { %v9050_v41 = vor.u32 %v12083_v33, %v9047_v34 }
 0x116   :  { %2584 = vmatpush.bf16.msra.mxu1 %v8954_v35  ;;  %v1521_v47 = vpop.f32.mrf.mxu3  ;;  %2550 = vmatpush.bf16.msrb.mxu2 %v8998_v6  ;;  %v8874_v35 = vor.u32 %v12039_v49, %v8871_v50  ;;  %v12062_v6 = vld [vmem:[#allocation7 + $0x1b4] sm:$0xf0]  ;;  %v12079_v49 = vld [vmem:[#allocation7 + $0x244] sm:$0xf]  ;;  %v9031_v50 = vld [vmem:[#allocation7 + $0x250] sm:$0xf0] }
 0x118   :  { %2571 = vmatpush.bf16.msra.mxu3 %v8826_v53  ;;  %v8746_v53 = vor.u32 %v12007_v38, %v8743_v40  ;;  %v12022_v40 = vld [vmem:[#allocation7 + $0x74] sm:$0xf0] }
 0x119   :  { %v1534_v25 = vpop.f32.mrf.mxu2  ;;  %v8798_v47 = vor.u32 %v12022_v40, %v8797_v32  ;;  %v12032_v32 = vld [vmem:[#allocation7 + $0xcc] sm:$0xf]  ;;  %v8847_v40 = vld [vmem:[#allocation7 + $0xd8] sm:$0xf0] }
 0x11a   :  { %2585 = vmatpush.bf16.msra.mxu1 %v8938_v37  ;;  %2595 = vmatpush.bf16.msra.mxu2 %v9114_v57  ;;  %v9079_v37 = vld [vmem:[#allocation7 + $0x2b0] sm:$0xf0]  ;;  %v9173_v25 = vld [vmem:[#allocation7 + $0x360] sm:$0xf]  ;;  %v8850_v48 = vor.u32 %v12032_v32, %v8847_v40  ;;  %v8767_v40 = vld [vmem:[#allocation7 + $0x38] sm:$0xf0] }
 0x11b   :  { %v9082_v10 = vor.u32 %v12091_v5, %v9079_v37  ;;  %v12113_v5 = vld [vmem:[#allocation7 + $0x34c] sm:$0xf0]  ;;  %v8925_v37 = vld [vmem:[#allocation7 + $0x168] sm:$0xf] }
 0x11c   :  { %2572 = vmatpush.bf16.msra.mxu3 %v8810_v62  ;;  %v9237_v62 = vld [vmem:[#allocation7 + $0x3e0] sm:$0xf]  ;;  %v9158_v9 = vor.u32 %v12113_v5, %v9157_v4  ;;  %v12064_v5 = vld [vmem:[#allocation7 + $0x1cc] sm:$0xf] }
 0x11d   :  { %v9238_v0 = vor.u32 %v12133_v63, %v9237_v62 }
 0x11e   :  { %2586 = vmatpush.bf16.msra.mxu1 %v8922_v45  ;;  %2596 = vmatpush.bf16.msra.mxu2 %v9098_v61  ;;  %v1545_v8 = vpop.f32.mrf.mxu3  ;;  %v8813_v45 = vld [vmem:[#allocation7 + $0x88] sm:$0xf]  ;;  %v9015_v61 = vld [vmem:[#allocation7 + $0x230] sm:$0xf0] }
 0x11f   :  { %2556 = vmatpush.bf16.msrb.mxu0 %v9238_v0  ;;  %v1546_v13 = vadd.f32 %v1545_v8, %v1533_v1  ;;  %v8814_v29 = vor.u32 %v12026_v19, %v8813_v45  ;;  %v12014_v1 = vld [vmem:[#allocation7 + $0x34] sm:$0xf0]  ;;  %v9141_v19 = vld [vmem:[#allocation7 + $0x320] sm:$0xf] }
 0x120   :  { %2573 = vmatpush.bf16.msra.mxu3 %v8794_v11  ;;  %v9221_v11 = vld [vmem:[#allocation7 + $0x3c0] sm:$0xf]  ;;  %v12054_v8 = vld [vmem:[#allocation7 + $0x174] sm:$0xf0] }
 0x121   :  { %v9222_v55 = vor.u32 %v12129_v12, %v9221_v11  ;;  %v1732_v17 = vmax.f32 %v1546_v13, 0.0  ;;  %v8749_v11 = vld [vmem:[#allocation7 + $0x8] sm:$0xf]  ;;  %v8766_v13 = vor.u32 %v12014_v1, %v8765_v59  ;;  %v8926_v45 = vor.u32 %v12054_v8, %v8925_v37  ;;  %v12123_v1 = vld [vmem:[#allocation7 + $0x3a4] sm:$0xf] }
 0x122   :  { %2587 = vmatpush.bf16.msra.mxu1 %v8906_v31  ;;  %2597 = vmatpush.bf16.msra.mxu2 %v9082_v10 }
 0x123   :  { %2557 = vmatpush.bf16.msrb.mxu0 %v9222_v55  ;;  %v13184_v7 = vpack.c.bf16 %v1732_v17, %v1732_v17  ;;  %v8999_v55 = vld [vmem:[#allocation7 + $0x210] sm:$0xf0]  ;;  %v8909_v17 = vld [vmem:[#allocation7 + $0x148] sm:$0xf] }
 0x124   :  { %2574 = vmatpush.bf16.msra.mxu3 %v8778_v23  ;;  %v9205_v23 = vld [vmem:[#allocation7 + $0x3a0] sm:$0xf] }
 0x125   :  { %v9206_v31 = vor.u32 %v12125_v24, %v9205_v23  ;;  %2538 = vmatmul.bf16.vlgmr.msrb.gmra.mxu1 %v13184_v7  ;;  %v13187_v38 = vpop.f32.mrf.mxu0  ;;  %v8863_v23 = vld [vmem:[#allocation7 + $0xf8] sm:$0xf0]  ;;  %v9142_v24 = vor.u32 %v12109_v20, %v9141_v19  ;;  %v12016_v19 = vld [vmem:[#allocation7 + $0x4c] sm:$0xf] }
 0x126   :  { %2588 = vmatpush.bf16.msra.mxu1 %v8890_v16  ;;  %v1547_v36 = vpop.f32.mrf.mxu3  ;;  %2598 = vmatpush.bf16.msra.mxu2 %v9066_v28  ;;  %v8957_v16 = vld [vmem:[#allocation7 + $0x1a8] sm:$0xf]  ;;  %v13189_v46 = vpop.f32.mrf.mxu1  ;;  %v12046_v28 = vld [vmem:[#allocation7 + $0x134] sm:$0xf0] }
 0x127   :  { %2558 = vmatpush.bf16.msrb.mxu0 %v9206_v31  ;;  %v8958_v57 = vor.u32 %v12062_v6, %v8957_v16  ;;  %v9125_v36 = vld [vmem:[#allocation7 + $0x300] sm:$0xf]  ;;  %v377_v16 = vperm.slane %v13157_v2, 2 }
 0x128   :  { %2575 = vmatpush.bf16.msra.mxu3 %v8762_v39  ;;  %v8974_v39 = vor.u32 %v12066_v27, %v8973_v26  ;;  %v8750_v26 = vor.u32 %v12010_v14, %v8749_v11  ;;  %v8893_v27 = vld [vmem:[#allocation7 + $0x128] sm:$0xf]  ;;  %v12020_v11 = vld [vmem:[#allocation7 + $0x6c] sm:$0xf]  ;;  %v12119_v14 = vld [vmem:[#allocation7 + $0x384] sm:$0xf] }
 0x12a   :  { %2589 = vmatpush.bf16.msra.mxu1 %v8874_v35  ;;  %2599 = vmatpush.bf16.msra.mxu2 %v9050_v41  ;;  %v9174_v35 = vor.u32 %v12117_v54, %v9173_v25  ;;  %v9223_v25 = vld [vmem:[#allocation7 + $0x3d0] sm:$0xf0]  ;;  %v1559_v54 = vadd.f32 %v13189_v46, %v377_v16  ;;  %v8975_v46 = vld [vmem:[#allocation7 + $0x1d8] sm:$0xf0]  ;;  %v12052_v16 = vld [vmem:[#allocation7 + $0x16c] sm:$0xf] }
 0x12b   :  { %2559 = vmatpush.bf16.msrb.mxu0 %v9190_v44  ;;  %v9242_v44 = vor.u32 %v12131_v42, %v9239_v43  ;;  %v9159_v42 = vld [vmem:[#allocation7 + $0x350] sm:$0xf0] }
 0x12c   :  { %2576 = vmatpush.bf16.msra.mxu3 %v8746_v53  ;;  %v9034_v53 = vor.u32 %v12079_v49, %v9031_v50  ;;  %v8877_v49 = vld [vmem:[#allocation7 + $0x108] sm:$0xf]  ;;  %v12042_v50 = vld [vmem:[#allocation7 + $0x114] sm:$0xf0] }
 0x12d   :  { %v1586_v63 = vpop.f32.mrf.mxu0 }
 0x12e   :  { %2634 = vmatpush.bf16.msrb.mxu1 %v8990_v21  ;;  %2600 = vmatpush.bf16.msra.mxu2 %v9034_v53  ;;  %v1560_v12 = vpop.f32.mrf.mxu1  ;;  %v12050_v21 = vld [vmem:[#allocation7 + $0x154] sm:$0xf0]  ;;  %v12127_v53 = vld [vmem:[#allocation7 + $0x3c4] sm:$0xf] }
 0x12f   :  { %2577 = vmatmul.bf16.vlgmr.msra.gmra.mxu3 %v13177_v51  ;;  %2560 = vmatpush.bf16.msrb.mxu0 %v9174_v35  ;;  %v8910_v31 = vor.u32 %v12050_v21, %v8909_v17  ;;  %v9226_v35 = vor.u32 %v12127_v53, %v9223_v25  ;;  %v8978_v12 = vor.u32 %v12064_v5, %v8975_v46  ;;  %v8959_v17 = vld [vmem:[#allocation7 + $0x1b8] sm:$0xf0]  ;;  %v12107_v25 = vld [vmem:[#allocation7 + $0x324] sm:$0xf]  ;;  %v9127_v5 = vld [vmem:[#allocation7 + $0x310] sm:$0xf0] }
 0x130   :  { %2621 = vmatpush.bf16.msrb.mxu3 %v8862_v30  ;;  %v8941_v30 = vld [vmem:[#allocation7 + $0x188] sm:$0xf]  ;;  %v8783_v21 = vld [vmem:[#allocation7 + $0x58] sm:$0xf0]  ;;  %v12044_v46 = vld [vmem:[#allocation7 + $0x12c] sm:$0xf] }
 0x131   :  { %v8942_v0 = vor.u32 %v12058_v56, %v8941_v30  ;;  %v13193_v10 = vpop.f32.mrf.mxu2  ;;  %v12068_v30 = vld [vmem:[#allocation7 + $0x1ec] sm:$0xf]  ;;  %v8991_v56 = vld [vmem:[#allocation7 + $0x1f8] sm:$0xf0] }
 0x132   :  { %2635 = vmatpush.bf16.msrb.mxu1 %v8974_v39  ;;  %v13191_v62 = vpop.f32.mrf.mxu3  ;;  %v12105_v39 = vld [vmem:[#allocation7 + $0x30c] sm:$0xf0]  ;;  %v8994_v63 = vor.u32 %v12068_v30, %v8991_v56  ;;  %v8751_v53 = vld [vmem:[#allocation7 + $0x18] sm:$0xf0]  ;;  %v12048_v56 = vld [vmem:[#allocation7 + $0x14c] sm:$0xf] }
 0x133   :  { %2561 = vmatpush.bf16.msrb.mxu0 %v9158_v9  ;;  %v9126_v41 = vor.u32 %v12105_v39, %v9125_v36  ;;  %v1572_v4 = vadd.f32 %v13191_v62, %v1559_v54  ;;  %v9143_v54 = vld [vmem:[#allocation7 + $0x330] sm:$0xf0] }
 0x134   :  { %2622 = vmatpush.bf16.msrb.mxu3 %v8846_v3  ;;  %v9018_v3 = vor.u32 %v12075_v60, %v9015_v61  ;;  %v12024_v60 = vld [vmem:[#allocation7 + $0x8c] sm:$0xf] }
 0x135   :  { %2590 = vmatmul.bf16.vlgmr.msra.gmra.mxu1 %v13184_v7  ;;  %v13196_v34 = vpop.f32.mrf.mxu0 }
 0x136   :  { %2636 = vmatpush.bf16.msrb.mxu1 %v8958_v57  ;;  %2601 = vmatpush.bf16.msra.mxu2 %v9018_v3  ;;  %v12028_v57 = vld [vmem:[#allocation7 + $0xac] sm:$0xf]  ;;  %v9207_v3 = vld [vmem:[#allocation7 + $0x3b0] sm:$0xf0] }
 0x137   :  { %2562 = vmatpush.bf16.msrb.mxu0 %v9142_v24  ;;  %v8834_v59 = vor.u32 %v12028_v57, %v8831_v52  ;;  %v9210_v37 = vor.u32 %v12123_v1, %v9207_v3  ;;  %v12008_v57 = vld [vmem:[#allocation7 + $0xc] sm:$0xf] }
 0x138   :  { %2623 = vmatpush.bf16.msrb.mxu3 %v8830_v18  ;;  %v9002_v18 = vor.u32 %v12071_v15, %v8999_v55  ;;  %v9191_v15 = vld [vmem:[#allocation7 + $0x390] sm:$0xf0]  ;;  %v1585_v55 = vadd.f32 %v13187_v38, %v1572_v4  ;;  %v12103_v4 = vld [vmem:[#allocation7 + $0x304] sm:$0xf] }
 0x139   :  { %v1599_v6 = vpop.f32.mrf.mxu2  ;;  %v9194_v62 = vor.u32 %v12119_v14, %v9191_v15  ;;  %v12040_v15 = vld [vmem:[#allocation7 + $0x10c] sm:$0xf] }
 0x13a   :  { %2637 = vmatpush.bf16.msrb.mxu1 %v8942_v0  ;;  %v1573_v33 = vpop.f32.mrf.mxu3  ;;  %2602 = vmatpush.bf16.msra.mxu2 %v9002_v18  ;;  %v8815_v0 = vld [vmem:[#allocation7 + $0x98] sm:$0xf0]  ;;  %v1598_v24 = vadd.f32 %v13193_v10, %v1585_v55 }
 0x13b   :  { %2563 = vmatpush.bf16.msrb.mxu0 %v9126_v41  ;;  %v8818_v9 = vor.u32 %v12024_v60, %v8815_v0  ;;  %v12012_v33 = vld [vmem:[#allocation7 + $0x2c] sm:$0xf]  ;;  %v12111_v41 = vld [vmem:[#allocation7 + $0x344] sm:$0xf]  ;;  %v8927_v10 = vld [vmem:[#allocation7 + $0x178] sm:$0xf0] }
 0x13c   :  { %2624 = vmatpush.bf16.msrb.mxu3 %v8814_v29  ;;  %v8866_v29 = vor.u32 %v12036_v22, %v8863_v23  ;;  %v12115_v22 = vld [vmem:[#allocation7 + $0x364] sm:$0xf]  ;;  %v9175_v23 = vld [vmem:[#allocation7 + $0x370] sm:$0xf0]  ;;  %v8930_v52 = vor.u32 %v12052_v16, %v8927_v10  ;;  %v12098_v0 = vld [vmem:[#allocation7 + $0x2d4] sm:$0xf0] }
 0x13d   :  { %v1638_v61 = vpop.f32.mrf.mxu0  ;;  %v9178_v38 = vor.u32 %v12115_v22, %v9175_v23  ;;  %v8879_v55 = vld [vmem:[#allocation7 + $0x118] sm:$0xf0]  ;;  %v12086_v22 = vld [vmem:[#allocation7 + $0x274] sm:$0xf0]  ;;  %v12100_v10 = vld [vmem:[#allocation7 + $0x2ec] sm:$0xf] }
 0x13e   :  { %2638 = vmatpush.bf16.msrb.mxu1 %v8926_v45  ;;  %v12060_v45 = vld [vmem:[#allocation7 + $0x1ac] sm:$0xf] }
 0x13f   :  { %2608 = vmatpush.bf16.msra.mxu0 %v9242_v44  ;;  %v8962_v20 = vor.u32 %v12060_v45, %v8959_v17  ;;  %v9162_v44 = vor.u32 %v12111_v41, %v9159_v42  ;;  %v9069_v17 = vld [vmem:[#allocation7 + $0x288] sm:$0xf] }
 0x140   :  { %2625 = vmatpush.bf16.msrb.mxu3 %v8798_v47  ;;  %v8894_v47 = vor.u32 %v12046_v28, %v8893_v27  ;;  %v8943_v27 = vld [vmem:[#allocation7 + $0x198] sm:$0xf0] }
 0x142   :  { %2639 = vmatpush.bf16.msrb.mxu1 %v8910_v31 }
 0x143   :  { %2609 = vmatpush.bf16.msra.mxu0 %v9226_v35  ;;  %v8911_v35 = vld [vmem:[#allocation7 + $0x158] sm:$0xf0] }
 0x144   :  { %2626 = vmatpush.bf16.msrb.mxu3 %v8782_v58  ;;  %v8878_v58 = vor.u32 %v12042_v50, %v8877_v49  ;;  %v9117_v49 = vld [vmem:[#allocation7 + $0x2e8] sm:$0xf]  ;;  %v12102_v50 = vld [vmem:[#allocation7 + $0x2f4] sm:$0xf0]  ;;  %v8914_v1 = vor.u32 %v12048_v56, %v8911_v35 }
 0x145   :  { %v9118_v60 = vor.u32 %v12102_v50, %v9117_v49  ;;  %v12096_v50 = vld [vmem:[#allocation7 + $0x2cc] sm:$0xf] }
 0x146   :  { %2640 = vmatpush.bf16.msrb.mxu1 %v8894_v47  ;;  %v1610_v8 = vpop.f32.mrf.mxu1 }
 0x147   :  { %2610 = vmatpush.bf16.msra.mxu0 %v9210_v37  ;;  %v1611_v31 = vadd.f32 %v1610_v8, %v1598_v24  ;;  %v8895_v37 = vld [vmem:[#allocation7 + $0x138] sm:$0xf0] }
 0x148   :  { %2627 = vmatpush.bf16.msrb.mxu3 %v8766_v13  ;;  %v8799_v13 = vld [vmem:[#allocation7 + $0x78] sm:$0xf0]  ;;  %v8898_v14 = vor.u32 %v12044_v46, %v8895_v37  ;;  %v9213_v37 = vld [vmem:[#allocation7 + $0x3a8] sm:$0xf] }
 0x149   :  { %v8802_v18 = vor.u32 %v12020_v11, %v8799_v13  ;;  %v13205_v28 = vpop.f32.mrf.mxu0  ;;  %v12094_v13 = vld [vmem:[#allocation7 + $0x2b4] sm:$0xf0]  ;;  %v9071_v46 = vld [vmem:[#allocation7 + $0x298] sm:$0xf0] }
 0x14a   :  { %2641 = vmatpush.bf16.msrb.mxu1 %v8878_v58 }
 0x14b   :  { %2611 = vmatpush.bf16.msra.mxu0 %v9194_v62  ;;  %v12090_v62 = vld [vmem:[#allocation7 + $0x294] sm:$0xf0] }
 0x14c   :  { %2628 = vmatpush.bf16.msrb.mxu3 %v8750_v26  ;;  %v12056_v26 = vld [vmem:[#allocation7 + $0x18c] sm:$0xf] }
 0x14d   :  { %2642 = vmatmul.bf16.vlgmr.msrb.gmra.mxu1 %v13184_v7  ;;  %v8946_v39 = vor.u32 %v12056_v26, %v8943_v27  ;;  %v9037_v27 = vld [vmem:[#allocation7 + $0x248] sm:$0xf] }
 0x14e   :  { %2686 = vmatpush.bf16.msra.mxu1 %v8994_v63  ;;  %v1612_v32 = vpop.f32.mrf.mxu1  ;;  %v9101_v63 = vld [vmem:[#allocation7 + $0x2c8] sm:$0xf] }
 0x14f   :  { %2629 = vmatmul.bf16.vlgmr.msrb.gmra.mxu3 %v13177_v51  ;;  %2612 = vmatpush.bf16.msra.mxu0 %v9178_v38  ;;  %v9102_v11 = vor.u32 %v12098_v0, %v9101_v63  ;;  %v12078_v32 = vld [vmem:[#allocation7 + $0x234] sm:$0xf0]  ;;  %v9229_v63 = vld [vmem:[#allocation7 + $0x3c8] sm:$0xf] }
 0x150   :  { %2673 = vmatpush.bf16.msra.mxu3 %v8866_v29  ;;  %v8786_v29 = vor.u32 %v12016_v19, %v8783_v21  ;;  %v8882_v19 = vor.u32 %v12040_v15, %v8879_v55  ;;  %v9053_v21 = vld [vmem:[#allocation7 + $0x268] sm:$0xf]  ;;  %v12130_v0 = vld [vmem:[#allocation7 + $0x3d4] sm:$0xf0] }
 0x151   :  { %v1649_v6 = vpop.f32.mrf.mxu2  ;;  %v1664_v58 = vpop.f32.mrf.mxu0  ;;  %v9054_v26 = vor.u32 %v12086_v22, %v9053_v21  ;;  %v12122_v15 = vld [vmem:[#allocation7 + $0x394] sm:$0xf0]  ;;  %v12076_v22 = vld [vmem:[#allocation7 + $0x22c] sm:$0xf] }
 0x152   :  { %2687 = vmatpush.bf16.msra.mxu1 %v8978_v12  ;;  %v1623_v36 = vpop.f32.mrf.mxu3  ;;  %v9085_v12 = vld [vmem:[#allocation7 + $0x2a8] sm:$0xf] }
 0x153   :  { %v1624_v43 = vadd.f32 %v1623_v36, %v1611_v31  ;;  %2613 = vmatpush.bf16.msra.mxu0 %v9162_v44  ;;  %v9086_v45 = vor.u32 %v12094_v13, %v9085_v12  ;;  %v12084_v12 = vld [vmem:[#allocation7 + $0x26c] sm:$0xf]  ;;  %v9055_v13 = vld [vmem:[#allocation7 + $0x278] sm:$0xf0] }
 0x154   :  { %2674 = vmatpush.bf16.msra.mxu3 %v8850_v48  ;;  %v8770_v48 = vor.u32 %v12012_v33, %v8767_v40  ;;  %v9058_v55 = vor.u32 %v12084_v12, %v9055_v13 }
 0x155   :  { %v1637_v47 = vadd.f32 %v13196_v34, %v1624_v43  ;;  %v8754_v34 = vor.u32 %v12008_v57, %v8751_v53  ;;  %v9005_v43 = vld [vmem:[#allocation7 + $0x208] sm:$0xf]  ;;  %v9103_v57 = vld [vmem:[#allocation7 + $0x2d8] sm:$0xf0] }
 0x156   :  { %2688 = vmatpush.bf16.msra.mxu1 %v8962_v20  ;;  %v9070_v20 = vor.u32 %v12090_v62, %v9069_v17  ;;  %v9106_v35 = vor.u32 %v12096_v50, %v9103_v57  ;;  %v12080_v17 = vld [vmem:[#allocation7 + $0x24c] sm:$0xf]  ;;  %v9039_v62 = vld [vmem:[#allocation7 + $0x258] sm:$0xf0]  ;;  %v13223_v57 = vld [vmem:[#allocation9] sm:$0xf] }
 0x157   :  { %v1733_v30 = vmax.f32 %v1637_v47, 0.0  ;;  %v9199_v50 = vld [vmem:[#allocation7 + $0x398] sm:$0xf0] }
 0x158   :  { %2675 = vmatpush.bf16.msra.mxu3 %v8834_v59  ;;  %v9146_v59 = vor.u32 %v12107_v25, %v9143_v54  ;;  %v9245_v25 = vld [vmem:[#allocation7 + $0x3e8] sm:$0xf]  ;;  %v12134_v54 = vld [vmem:[#allocation7 + $0x3f4] sm:$0xf0] }
 0x159   :  { %v13208_v61 = vpack.c.bf16 %v1733_v30, %v1733_v30  ;;  %v1651_v8 = vpop.f32.mrf.mxu2  ;;  %v9246_v58 = vor.u32 %v12134_v54, %v9245_v25  ;;  %v9183_v25 = vld [vmem:[#allocation7 + $0x378] sm:$0xf0]  ;;  %v9701_v54 = vld [vmem:[#allocation10 + $0x380] sm:$0xf] }
 0x15a   :  { %2689 = vmatpush.bf16.msra.mxu1 %v8946_v39  ;;  %v1625_v3 = vpop.f32.mrf.mxu3  ;;  %2614 = vmatpush.bf16.msra.mxu0 %v9146_v59  ;;  %v12092_v59 = vld [vmem:[#allocation7 + $0x2ac] sm:$0xf]  ;;  %v12126_v8 = vld [vmem:[#allocation7 + $0x3b4] sm:$0xf0] }
 0x15b   :  { %2551 = vmatmul.bf16.vlgmr.msrb.gmra.mxu2 %v13208_v61 }
 0x15c   :  { %2676 = vmatpush.bf16.msra.mxu3 %v8818_v9  ;;  %v9130_v9 = vor.u32 %v12103_v4, %v9127_v5  ;;  %2647 = vmatpush.bf16.msrb.mxu2 %v9118_v60  ;;  %v9087_v60 = vld [vmem:[#allocation7 + $0x2b8] sm:$0xf0]  ;;  %v9230_v4 = vor.u32 %v12130_v0, %v9229_v63  ;;  %v12088_v5 = vld [vmem:[#allocation7 + $0x28c] sm:$0xf] }
 0x15e   :  { %2690 = vmatpush.bf16.msra.mxu1 %v8930_v52  ;;  %2615 = vmatpush.bf16.msra.mxu0 %v9130_v9  ;;  %v9074_v9 = vor.u32 %v12088_v5, %v9071_v46 }
 0x160   :  { %2677 = vmatpush.bf16.msra.mxu3 %v8802_v18  ;;  %2648 = vmatpush.bf16.msrb.mxu2 %v9102_v11  ;;  %v378_v18 = vperm.slane %v13157_v2, 3  ;;  %v9214_v11 = vor.u32 %v12126_v8, %v9213_v37  ;;  %v12108_v37 = vld [vmem:[#allocation7 + $0x32c] sm:$0xf]  ;;  %v9151_v8 = vld [vmem:[#allocation7 + $0x338] sm:$0xf0] }
 0x161   :  { %v9154_v13 = vor.u32 %v12108_v37, %v9151_v8 }
 0x162   :  { %2691 = vmatpush.bf16.msra.mxu1 %v8914_v1  ;;  %v1650_v23 = vadd.f32 %v1649_v6, %v378_v18  ;;  %v9119_v6 = vld [vmem:[#allocation7 + $0x2f8] sm:$0xf0]  ;;  %v9090_v1 = vor.u32 %v12092_v59, %v9087_v60  ;;  %v9181_v18 = vld [vmem:[#allocation7 + $0x368] sm:$0xf]  ;;  %v12112_v59 = vld [vmem:[#allocation7 + $0x34c] sm:$0xf] }
 0x163   :  { %v9167_v60 = vld [vmem:[#allocation7 + $0x358] sm:$0xf0] }
 0x164   :  { %2678 = vmatpush.bf16.msra.mxu3 %v8786_v29  ;;  %2649 = vmatpush.bf16.msrb.mxu2 %v9086_v45  ;;  %v1663_v38 = vadd.f32 %v13205_v28, %v1650_v23  ;;  %v9021_v29 = vld [vmem:[#allocation7 + $0x228] sm:$0xf]  ;;  %v9023_v23 = vld [vmem:[#allocation7 + $0x238] sm:$0xf0]  ;;  %v9170_v46 = vor.u32 %v12112_v59, %v9167_v60 }
 0x165   :  { %v9022_v42 = vor.u32 %v12078_v32, %v9021_v29  ;;  %v9149_v29 = vld [vmem:[#allocation7 + $0x328] sm:$0xf]  ;;  %v12110_v32 = vld [vmem:[#allocation7 + $0x334] sm:$0xf0] }
 0x166   :  { %2692 = vmatpush.bf16.msra.mxu1 %v8898_v14  ;;  %v1675_v24 = vpop.f32.mrf.mxu1  ;;  %v9197_v14 = vld [vmem:[#allocation7 + $0x388] sm:$0xf] }
 0x167   :  { %v1676_v33 = vadd.f32 %v1675_v24, %v1663_v38  ;;  %v9198_v45 = vor.u32 %v12122_v15, %v9197_v14  ;;  %v9165_v24 = vld [vmem:[#allocation7 + $0x348] sm:$0xf]  ;;  %v12104_v14 = vld [vmem:[#allocation7 + $0x30c] sm:$0xf]  ;;  %v9135_v15 = vld [vmem:[#allocation7 + $0x318] sm:$0xf0] }
 0x168   :  { %2679 = vmatpush.bf16.msra.mxu3 %v8770_v48  ;;  %2650 = vmatpush.bf16.msrb.mxu2 %v9070_v20  ;;  %v9122_v48 = vor.u32 %v12100_v10, %v9119_v6  ;;  %v9042_v20 = vor.u32 %v12080_v17, %v9039_v62  ;;  %v12128_v10 = vld [vmem:[#allocation7 + $0x3cc] sm:$0xf]  ;;  %v9231_v6 = vld [vmem:[#allocation7 + $0x3d8] sm:$0xf0]  ;;  %v9509_v17 = vld [vmem:[#allocation10 + $0x200] sm:$0xf] }
 0x169   :  { %v1714_v2 = vpop.f32.mrf.mxu0  ;;  %v12207_v62 = vld [vmem:[#allocation10 + $0x23c] sm:$0xf0]  ;;  %v9639_v59 = vld [vmem:[#allocation10 + $0x340] sm:$0xf0] }
 0x16a   :  { %2693 = vmatpush.bf16.msra.mxu1 %v8882_v19  ;;  %v12118_v19 = vld [vmem:[#allocation7 + $0x374] sm:$0xf0] }
 0x16b   :  { %2603 = vmatmul.bf16.vlgmr.msra.gmra.mxu2 %v13208_v61  ;;  %v9182_v21 = vor.u32 %v12118_v19, %v9181_v18  ;;  %v9445_v18 = vld [vmem:[#allocation10 + $0x180] sm:$0xf]  ;;  %v9510_v19 = vor.u32 %v12207_v62, %v9509_v17 }
 0x16c   :  { %2680 = vmatpush.bf16.msra.mxu3 %v8754_v34  ;;  %2651 = vmatpush.bf16.msrb.mxu2 %v9054_v26  ;;  %v12114_v26 = vld [vmem:[#allocation7 + $0x354] sm:$0xf0] }
 0x16d   :  { %2694 = vmatmul.bf16.vlgmr.msra.gmra.mxu1 %v13184_v7  ;;  %v12074_v7 = vld [vmem:[#allocation7 + $0x214] sm:$0xf0]  ;;  %v9166_v38 = vor.u32 %v12114_v26, %v9165_v24  ;;  %v10149_v26 = vld [vmem:[#allocation10 + $0x700] sm:$0xf] }
 0x16e   :  { %v1677_v36 = vpop.f32.mrf.mxu1  ;;  %v9006_v47 = vor.u32 %v12074_v7, %v9005_v43  ;;  %v9247_v43 = vld [vmem:[#allocation7 + $0x3f8] sm:$0xf0] }
 0x16f   :  { %2681 = vmatmul.bf16.vlgmr.msra.gmra.mxu3 %v13177_v51  ;;  %v12082_v51 = vld [vmem:[#allocation7 + $0x254] sm:$0xf0]  ;;  %v9150_v36 = vor.u32 %v12110_v32, %v9149_v29 }
 0x170   :  { %v9038_v31 = vor.u32 %v12082_v51, %v9037_v27  ;;  %v9026_v51 = vor.u32 %v12076_v22, %v9023_v23  ;;  %v12383_v22 = vld [vmem:[#allocation10 + $0x7bc] sm:$0xf0]  ;;  %v9138_v23 = vor.u32 %v12104_v14, %v9135_v15 }
 0x171   :  { %v1701_v41 = vpop.f32.mrf.mxu2  ;;  %v1716_v28 = vpop.f32.mrf.mxu0  ;;  %v9829_v15 = vld [vmem:[#allocation10 + $0x480] sm:$0xf] }
 0x172   :  { %v1688_v39 = vpop.f32.mrf.mxu3  ;;  %2652 = vmatpush.bf16.msrb.mxu2 %v9038_v31  ;;  %v9007_v31 = vld [vmem:[#allocation7 + $0x218] sm:$0xf0]  ;;  %v9234_v28 = vor.u32 %v12128_v10, %v9231_v6  ;;  %v9253_v6 = vld [vmem:[#allocation10] sm:$0xf] }
 0x173   :  { %v1689_v40 = vadd.f32 %v1688_v39, %v1676_v33  ;;  %v9133_v39 = vld [vmem:[#allocation7 + $0x308] sm:$0xf] }
 0x175   :  { %v1702_v16 = vadd.f32 %v1701_v41, %v1689_v40  ;;  %v12106_v40 = vld [vmem:[#allocation7 + $0x314] sm:$0xf0] }
 0x176   :  { %2653 = vmatpush.bf16.msrb.mxu2 %v9022_v42  ;;  %v1727_v49 = vpop.f32.mrf.mxu1  ;;  %v12132_v42 = vld [vmem:[#allocation7 + $0x3ec] sm:$0xf]  ;;  %v9134_v7 = vor.u32 %v12106_v40, %v9133_v39  ;;  %v9317_v40 = vld [vmem:[#allocation10 + $0x80] sm:$0xf] }
 0x177   :  { %v1715_v44 = vadd.f32 %v1714_v2, %v1702_v16  ;;  %v12072_v2 = vld [vmem:[#allocation7 + $0x20c] sm:$0xf]  ;;  %v9250_v16 = vor.u32 %v12132_v42, %v9247_v43  ;;  %v10085_v42 = vld [vmem:[#allocation10 + $0x680] sm:$0xf] }
 0x178   :  { %v9010_v33 = vor.u32 %v12072_v2, %v9007_v31  ;;  %v9381_v2 = vld [vmem:[#allocation10 + $0x100] sm:$0xf] }
 0x179   :  { %v1728_v52 = vadd.f32 %v1727_v49, %v1715_v44  ;;  %v1703_v30 = vpop.f32.mrf.mxu2  ;;  %v12124_v44 = vld [vmem:[#allocation7 + $0x3ac] sm:$0xf]  ;;  %v12175_v31 = vld [vmem:[#allocation10 + $0x13c] sm:$0xf0] }
 0x17a   :  { %v1690_v53 = vpop.f32.mrf.mxu3  ;;  %2654 = vmatpush.bf16.msrb.mxu2 %v9006_v47  ;;  %v9215_v47 = vld [vmem:[#allocation7 + $0x3b8] sm:$0xf0]  ;;  %v12120_v49 = vld [vmem:[#allocation7 + $0x38c] sm:$0xf]  ;;  %v12255_v30 = vld [vmem:[#allocation10 + $0x3bc] sm:$0xf0] }
 0x17b   :  { %v1734_v56 = vmax.f32 %v1728_v52, 0.0  ;;  %v9202_v52 = vor.u32 %v12120_v49, %v9199_v50  ;;  %v1869_v53 = vperm.slane %v13223_v57, 0  ;;  %v12247_v49 = vld [vmem:[#allocation10 + $0x384] sm:$0xf] }
 0x17c   :  { %v9703_v50 = vld [vmem:[#allocation10 + $0x3c0] sm:$0xf0] }
 0x17d   :  { %v13216_v34 = vpack.c.bf16 %v1734_v56, %v1734_v56  ;;  %2655 = vmatmul.bf16.vlgmr.msrb.gmra.mxu2 %v13208_v61  ;;  %v9702_v56 = vor.u32 %v12255_v30, %v9701_v54  ;;  %v10725_v54 = vld [vmem:[#allocation10 + $0xb80] sm:$0xf] }
 0x17e   :  { %2699 = vmatpush.bf16.msra.mxu2 %v9122_v48  ;;  %v1729_v3 = vpop.f32.mrf.mxu1  ;;  %v9218_v48 = vor.u32 %v12124_v44, %v9215_v47  ;;  %v10021_v44 = vld [vmem:[#allocation10 + $0x600] sm:$0xf] }
 0x17f   :  { %2564 = vmatmul.bf16.vlgmr.msrb.gmra.mxu0 %v13216_v34  ;;  %5841 = vmatpush.bf16.msrb.mxu3 %v9702_v56  ;;  %v12239_v3 = vld [vmem:[#allocation10 + $0x33c] sm:$0xf0] }
 0x180   :  { %2660 = vmatpush.bf16.msrb.mxu0 %v9246_v58 }
 0x182   :  { %2700 = vmatpush.bf16.msra.mxu2 %v9106_v35 }
 0x184   :  { %2661 = vmatpush.bf16.msrb.mxu0 %v9230_v4 }
 0x186   :  { %2701 = vmatpush.bf16.msra.mxu2 %v9090_v1  ;;  %v9637_v1 = vld [vmem:[#allocation10 + $0x300] sm:$0xf] }
 0x187   :  { %v9638_v5 = vor.u32 %v12239_v3, %v9637_v1  ;;  %v9893_v3 = vld [vmem:[#allocation10 + $0x500] sm:$0xf] }
 0x188   :  { %2662 = vmatpush.bf16.msrb.mxu0 %v9214_v11  ;;  %v12223_v11 = vld [vmem:[#allocation10 + $0x2bc] sm:$0xf0] }
 0x189   :  { %5842 = vmatpush.bf16.msrb.mxu3 %v9638_v5  ;;  %v12303_v5 = vld [vmem:[#allocation10 + $0x53c] sm:$0xf0] }
 0x18a   :  { %2702 = vmatpush.bf16.msra.mxu2 %v9074_v9  ;;  %v9573_v9 = vld [vmem:[#allocation10 + $0x280] sm:$0xf]  ;;  %v9894_v8 = vor.u32 %v12303_v5, %v9893_v3 }
 0x18b   :  { %v9574_v12 = vor.u32 %v12223_v11, %v9573_v9  ;;  %v12495_v9 = vld [vmem:[#allocation10 + $0xb3c] sm:$0xf0]  ;;  %v12215_v11 = vld [vmem:[#allocation10 + $0x284] sm:$0xf] }
 0x18c   :  { %2663 = vmatpush.bf16.msrb.mxu0 %v9198_v45  ;;  %v10277_v5 = vld [vmem:[#allocation10 + $0x800] sm:$0xf] }
 0x18d   :  { %5843 = vmatpush.bf16.msrb.mxu3 %v9574_v12  ;;  %v9575_v12 = vld [vmem:[#allocation10 + $0x2c0] sm:$0xf0] }
 0x18e   :  { %2703 = vmatpush.bf16.msra.mxu2 %v9058_v55  ;;  %v9578_v14 = vor.u32 %v12215_v11, %v9575_v12  ;;  %v12639_v11 = vld [vmem:[#allocation10 + $0xfbc] sm:$0xf0]  ;;  %v12311_v12 = vld [vmem:[#allocation10 + $0x584] sm:$0xf] }
 0x18f   :  { %2616 = vmatmul.bf16.vlgmr.msra.gmra.mxu0 %v13216_v34 }
 0x190   :  { %2664 = vmatpush.bf16.msrb.mxu0 %v9182_v21  ;;  %v10213_v21 = vld [vmem:[#allocation10 + $0x780] sm:$0xf] }
 0x191   :  { %v10214_v24 = vor.u32 %v12383_v22, %v10213_v21  ;;  %5844 = vmatpush.bf16.msrb.mxu3 %v9510_v19  ;;  %v12199_v19 = vld [vmem:[#allocation10 + $0x204] sm:$0xf] }
 0x192   :  { %v2526_v27 = vpop.f32.mrf.mxu3  ;;  %2704 = vmatpush.bf16.msra.mxu2 %v9042_v20  ;;  %v12191_v20 = vld [vmem:[#allocation10 + $0x1bc] sm:$0xf0] }
 0x193   :  { %v2527_v58 = vadd.f32 %v2526_v27, %v1869_v53  ;;  %v1870_v27 = vperm.slane %v13223_v57, 1  ;;  %5854 = vmatpush.bf16.msrb.mxu1 %v10214_v24  ;;  %v9706_v53 = vor.u32 %v12247_v49, %v9703_v50  ;;  %v12271_v24 = vld [vmem:[#allocation10 + $0x43c] sm:$0xf0]  ;;  %v12151_v50 = vld [vmem:[#allocation10 + $0x84] sm:$0xf] }
 0x194   :  { %2665 = vmatpush.bf16.msrb.mxu0 %v9166_v38  ;;  %v12367_v38 = vld [vmem:[#allocation10 + $0x73c] sm:$0xf0] }
 0x195   :  { %v10150_v29 = vor.u32 %v12367_v38, %v10149_v26  ;;  %v10533_v26 = vld [vmem:[#allocation10 + $0xa00] sm:$0xf]  ;;  %v9447_v38 = vld [vmem:[#allocation10 + $0x1c0] sm:$0xf0] }
 0x196   :  { %2705 = vmatpush.bf16.msra.mxu2 %v9026_v51  ;;  %v9446_v51 = vor.u32 %v12191_v20, %v9445_v18  ;;  %v12479_v18 = vld [vmem:[#allocation10 + $0xabc] sm:$0xf0]  ;;  %v9511_v20 = vld [vmem:[#allocation10 + $0x240] sm:$0xf0] }
 0x197   :  { %5855 = vmatpush.bf16.msrb.mxu1 %v10150_v29  ;;  %v9514_v22 = vor.u32 %v12199_v19, %v9511_v20  ;;  %v12623_v19 = vld [vmem:[#allocation10 + $0xf3c] sm:$0xf0] }
 0x198   :  { %2666 = vmatpush.bf16.msrb.mxu0 %v9150_v36  ;;  %5845 = vmatpush.bf16.msrb.mxu3 %v9446_v51  ;;  %v12183_v51 = vld [vmem:[#allocation10 + $0x184] sm:$0xf] }
 0x19a   :  { %v2528_v41 = vpop.f32.mrf.mxu3  ;;  %2706 = vmatpush.bf16.msra.mxu2 %v9010_v33  ;;  %v9382_v33 = vor.u32 %v12175_v31, %v9381_v2 }
 0x19b   :  { %v12159_v41 = vld [vmem:[#allocation10 + $0xbc] sm:$0xf0] }
 0x19c   :  { %2667 = vmatpush.bf16.msrb.mxu0 %v9134_v7  ;;  %5846 = vmatpush.bf16.msrb.mxu3 %v9382_v33  ;;  %v9318_v43 = vor.u32 %v12159_v41, %v9317_v40  ;;  %v12351_v7 = vld [vmem:[#allocation10 + $0x6bc] sm:$0xf0]  ;;  %v10215_v33 = vld [vmem:[#allocation10 + $0x7c0] sm:$0xf0] }
 0x19d   :  { %2707 = vmatmul.bf16.vlgmr.msra.gmra.mxu2 %v13208_v61  ;;  %v12116_v61 = vld [vmem:[#allocation7 + $0x36c] sm:$0xf]  ;;  %v10469_v41 = vld [vmem:[#allocation10 + $0x980] sm:$0xf] }
 0x19e   :  { %v9186_v35 = vor.u32 %v12116_v61, %v9183_v25  ;;  %v9957_v61 = vld [vmem:[#allocation10 + $0x580] sm:$0xf] }
 0x19f   :  { %2668 = vmatmul.bf16.vlgmr.msrb.gmra.mxu0 %v13216_v34  ;;  %v12319_v25 = vld [vmem:[#allocation10 + $0x5bc] sm:$0xf0] }
 0x1a0   :  { %2712 = vmatpush.bf16.msra.mxu0 %v9250_v16  ;;  %v10086_v16 = vor.u32 %v12351_v7, %v10085_v42  ;;  %5847 = vmatpush.bf16.msrb.mxu3 %v9318_v43  ;;  %v9958_v56 = vor.u32 %v12319_v25, %v9957_v61  ;;  %v12447_v42 = vld [vmem:[#allocation10 + $0x9bc] sm:$0xf0]  ;;  %v12167_v7 = vld [vmem:[#allocation10 + $0x104] sm:$0xf] }
 0x1a1   :  { %v10470_v43 = vor.u32 %v12447_v42, %v10469_v41  ;;  %v10087_v61 = vld [vmem:[#allocation10 + $0x6c0] sm:$0xf0] }
 0x1a2   :  { %v2539_v63 = vpop.f32.mrf.mxu1  ;;  %5856 = vmatpush.bf16.msrb.mxu1 %v10086_v16  ;;  %v9383_v16 = vld [vmem:[#allocation10 + $0x140] sm:$0xf0] }
 0x1a3   :  { %v13226_v4 = vadd.f32 %v2539_v63, %v2527_v58  ;;  %v12231_v58 = vld [vmem:[#allocation10 + $0x304] sm:$0xf] }
 0x1a4   :  { %2713 = vmatpush.bf16.msra.mxu0 %v9234_v28  ;;  %v12143_v28 = vld [vmem:[#allocation10 + $0x3c] sm:$0xf0] }
 0x1a5   :  { %v9254_v47 = vor.u32 %v12143_v28, %v9253_v6  ;;  %v9386_v6 = vor.u32 %v12167_v7, %v9383_v16  ;;  %v10151_v28 = vld [vmem:[#allocation10 + $0x740] sm:$0xf0]  ;;  %v11045_v16 = vld [vmem:[#allocation10 + $0xe00] sm:$0xf] }
 0x1a7   :  { %5848 = vmatpush.bf16.msrb.mxu3 %v9254_v47  ;;  %v10405_v47 = vld [vmem:[#allocation10 + $0x900] sm:$0xf] }
 0x1a8   :  { %2714 = vmatpush.bf16.msra.mxu0 %v9218_v48  ;;  %v12335_v48 = vld [vmem:[#allocation10 + $0x63c] sm:$0xf0] }
 0x1aa   :  { %v2541_v55 = vpop.f32.mrf.mxu1 }
 0x1ab   :  { %5893 = vmatpush.bf16.msra.mxu3 %v9706_v53  ;;  %v12287_v55 = vld [vmem:[#allocation10 + $0x4bc] sm:$0xf0] }
 0x1ac   :  { %2715 = vmatpush.bf16.msra.mxu0 %v9202_v52  ;;  %v1871_v52 = vperm.slane %v13223_v57, 2  ;;  %v9830_v62 = vor.u32 %v12287_v55, %v9829_v15 }
 0x1b0   :  { %2716 = vmatpush.bf16.msra.mxu0 %v9186_v35  ;;  %v12511_v35 = vld [vmem:[#allocation10 + $0xbbc] sm:$0xf0] }
 0x1b1   :  { %v10726_v63 = vor.u32 %v12511_v35, %v10725_v54  ;;  %v10341_v54 = vld [vmem:[#allocation10 + $0x880] sm:$0xf] }
 0x1b2   :  { %v2578_v0 = vpop.f32.mrf.mxu3  ;;  %v2591_v36 = vpop.f32.mrf.mxu1 }
 0x1b3   :  { %v2579_v32 = vadd.f32 %v2578_v0, %v1870_v27  ;;  %v9642_v0 = vor.u32 %v12231_v58, %v9639_v59  ;;  %5867 = vmatpush.bf16.msrb.mxu2 %v10726_v63  ;;  %v12463_v27 = vld [vmem:[#allocation10 + $0xa3c] sm:$0xf0]  ;;  %v12135_v58 = vld [vmem:[#allocation10 + $0x4] sm:$0xf] }
 0x1b4   :  { %2717 = vmatpush.bf16.msra.mxu0 %v9170_v46  ;;  %v10661_v46 = vld [vmem:[#allocation10 + $0xb00] sm:$0xf]  ;;  %v10534_v29 = vor.u32 %v12463_v27, %v10533_v26  ;;  %v9255_v59 = vld [vmem:[#allocation10 + $0x40] sm:$0xf0] }
 0x1b5   :  { %v13229_v39 = vadd.f32 %v2591_v36, %v2579_v32  ;;  %5894 = vmatpush.bf16.msra.mxu3 %v9642_v0  ;;  %v12375_v32 = vld [vmem:[#allocation10 + $0x784] sm:$0xf]  ;;  %v9450_v36 = vor.u32 %v12183_v51, %v9447_v38  ;;  %v9258_v63 = vor.u32 %v12135_v58, %v9255_v59  ;;  %v10917_v58 = vld [vmem:[#allocation10 + $0xd00] sm:$0xf] }
 0x1b6   :  { %v10218_v40 = vor.u32 %v12375_v32, %v10215_v33  ;;  %v10023_v0 = vld [vmem:[#allocation10 + $0x640] sm:$0xf0]  ;;  %v12559_v59 = vld [vmem:[#allocation10 + $0xd3c] sm:$0xf0] }
 0x1b7   :  { %v12487_v26 = vld [vmem:[#allocation10 + $0xb04] sm:$0xf] }
 0x1b8   :  { %2718 = vmatpush.bf16.msra.mxu0 %v9154_v13  ;;  %v10662_v13 = vor.u32 %v12495_v9, %v10661_v46  ;;  %v12399_v46 = vld [vmem:[#allocation10 + $0x83c] sm:$0xf0]  ;;  %v10663_v38 = vld [vmem:[#allocation10 + $0xb40] sm:$0xf0] }
 0x1b9   :  { %5895 = vmatpush.bf16.msra.mxu3 %v9578_v14  ;;  %v10278_v9 = vor.u32 %v12399_v46, %v10277_v5  ;;  %v12279_v33 = vld [vmem:[#allocation10 + $0x484] sm:$0xf]  ;;  %v10853_v46 = vld [vmem:[#allocation10 + $0xc80] sm:$0xf] }
 0x1ba   :  { %v2580_v45 = vpop.f32.mrf.mxu3  ;;  %v2593_v10 = vpop.f32.mrf.mxu1  ;;  %5868 = vmatpush.bf16.msrb.mxu2 %v10662_v13  ;;  %v9959_v13 = vld [vmem:[#allocation10 + $0x5c0] sm:$0xf0] }
 0x1bb   :  { %v10597_v45 = vld [vmem:[#allocation10 + $0xa80] sm:$0xf]  ;;  %v12359_v10 = vld [vmem:[#allocation10 + $0x704] sm:$0xf]  ;;  %v9962_v55 = vor.u32 %v12311_v12, %v9959_v13 }
 0x1bc   :  { %2719 = vmatpush.bf16.msra.mxu0 %v9138_v23  ;;  %v10598_v21 = vor.u32 %v12479_v18, %v10597_v45  ;;  %v9765_v23 = vld [vmem:[#allocation10 + $0x400] sm:$0xf]  ;;  %v12503_v45 = vld [vmem:[#allocation10 + $0xb84] sm:$0xf] }
 0x1bd   :  { %v9766_v31 = vor.u32 %v12271_v24, %v9765_v23  ;;  %5896 = vmatpush.bf16.msra.mxu3 %v9514_v22  ;;  %v12295_v23 = vld [vmem:[#allocation10 + $0x504] sm:$0xf] }
 0x1be   :  { %5869 = vmatpush.bf16.msrb.mxu2 %v10598_v21  ;;  %v9895_v24 = vld [vmem:[#allocation10 + $0x540] sm:$0xf0] }
 0x1bf   :  { %2720 = vmatmul.bf16.vlgmr.msra.gmra.mxu0 %v13216_v34  ;;  %v10022_v34 = vor.u32 %v12335_v48, %v10021_v44  ;;  %v10154_v44 = vor.u32 %v12359_v10, %v10151_v28  ;;  %v12431_v48 = vld [vmem:[#allocation10 + $0x93c] sm:$0xf0]  ;;  %v9898_v51 = vor.u32 %v12295_v23, %v9895_v24  ;;  %v12407_v12 = vld [vmem:[#allocation10 + $0x884] sm:$0xf]  ;;  %v9645_v23 = vld [vmem:[#allocation10 + $0x308] sm:$0xf] }
 0x1c0   :  { %v10406_v49 = vor.u32 %v12431_v48, %v10405_v47  ;;  %v12591_v10 = vld [vmem:[#allocation10 + $0xe3c] sm:$0xf0]  ;;  %v12263_v47 = vld [vmem:[#allocation10 + $0x404] sm:$0xf]  ;;  %v12240_v24 = vld [vmem:[#allocation10 + $0x344] sm:$0xf0] }
 0x1c1   :  { %5857 = vmatpush.bf16.msrb.mxu1 %v10022_v34  ;;  %5897 = vmatpush.bf16.msra.mxu3 %v9450_v36  ;;  %v12343_v34 = vld [vmem:[#allocation10 + $0x684] sm:$0xf] }
 0x1c2   :  { %5870 = vmatpush.bf16.msrb.mxu2 %v10534_v29  ;;  %v10090_v25 = vor.u32 %v12343_v34, %v10087_v61  ;;  %v12607_v29 = vld [vmem:[#allocation10 + $0xebc] sm:$0xf0]  ;;  %v9831_v36 = vld [vmem:[#allocation10 + $0x4c0] sm:$0xf0] }
 0x1c3   :  { %v9834_v42 = vor.u32 %v12279_v33, %v9831_v36  ;;  %v9767_v48 = vld [vmem:[#allocation10 + $0x440] sm:$0xf0]  ;;  %v12575_v61 = vld [vmem:[#allocation10 + $0xdbc] sm:$0xf0] }
 0x1c4   :  { %v10343_v13 = vld [vmem:[#allocation10 + $0x8c0] sm:$0xf0] }
 0x1c5   :  { %5858 = vmatpush.bf16.msrb.mxu1 %v9958_v56  ;;  %5898 = vmatpush.bf16.msra.mxu3 %v9386_v6  ;;  %v12615_v33 = vld [vmem:[#allocation10 + $0xf04] sm:$0xf] }
 0x1c6   :  { %5871 = vmatpush.bf16.msrb.mxu2 %v10470_v43  ;;  %v10599_v43 = vld [vmem:[#allocation10 + $0xac0] sm:$0xf0] }
 0x1c7   :  { %v11175_v36 = vld [vmem:[#allocation10 + $0xf40] sm:$0xf0] }
 0x1c9   :  { %5859 = vmatpush.bf16.msrb.mxu1 %v9894_v8  ;;  %v11237_v8 = vld [vmem:[#allocation10 + $0xf80] sm:$0xf] }
 0x1ca   :  { %v2643_v1 = vpop.f32.mrf.mxu1  ;;  %5872 = vmatpush.bf16.msrb.mxu2 %v10406_v49  ;;  %v11238_v15 = vor.u32 %v12639_v11, %v11237_v8  ;;  %v12455_v49 = vld [vmem:[#allocation10 + $0xa04] sm:$0xf]  ;;  %v12543_v8 = vld [vmem:[#allocation10 + $0xcbc] sm:$0xf0] }
 0x1cb   :  { %v10854_v11 = vor.u32 %v12543_v8, %v10853_v46 }
 0x1cc   :  { %5880 = vmatpush.bf16.msrb.mxu0 %v11238_v15  ;;  %v9709_v15 = vld [vmem:[#allocation10 + $0x388] sm:$0xf] }
 0x1cd   :  { %5860 = vmatpush.bf16.msrb.mxu1 %v9830_v62 }
 0x1d1   :  { %5861 = vmatpush.bf16.msrb.mxu1 %v9766_v31  ;;  %v11109_v31 = vld [vmem:[#allocation10 + $0xe80] sm:$0xf] }
 0x1d2   :  { %v2630_v30 = vpop.f32.mrf.mxu3  ;;  %v2645_v2 = vpop.f32.mrf.mxu1  ;;  %v11110_v32 = vor.u32 %v12607_v29, %v11109_v31  ;;  %v9646_v31 = vor.u32 %v12240_v24, %v9645_v23  ;;  %v9581_v29 = vld [vmem:[#allocation10 + $0x288] sm:$0xf]  ;;  %v9711_v23 = vld [vmem:[#allocation10 + $0x3c8] sm:$0xf0] }
 0x1d3   :  { %v2631_v60 = vadd.f32 %v2630_v30, %v1871_v52  ;;  %v9319_v52 = vld [vmem:[#allocation10 + $0xc0] sm:$0xf0]  ;;  %v12415_v30 = vld [vmem:[#allocation10 + $0x8bc] sm:$0xf0]  ;;  %v10666_v2 = vor.u32 %v12487_v26, %v10663_v38 }
 0x1d4   :  { %v9322_v53 = vor.u32 %v12151_v50, %v9319_v52  ;;  %v10342_v35 = vor.u32 %v12415_v30, %v10341_v54  ;;  %v9770_v50 = vor.u32 %v12263_v47, %v9767_v48  ;;  %v10535_v52 = vld [vmem:[#allocation10 + $0xa40] sm:$0xf0] }
 0x1d5   :  { %v13233_v37 = vadd.f32 %v2643_v1, %v2631_v60  ;;  %5906 = vmatpush.bf16.msra.mxu1 %v10218_v40  ;;  %v12327_v60 = vld [vmem:[#allocation10 + $0x604] sm:$0xf]  ;;  %v1872_v1 = vperm.slane %v13223_v57, 3  ;;  %v11173_v57 = vld [vmem:[#allocation10 + $0xf00] sm:$0xf]  ;;  %v10538_v34 = vor.u32 %v12455_v49, %v10535_v52 }
 0x1d6   :  { %5899 = vmatpush.bf16.msra.mxu3 %v9322_v53  ;;  %v10026_v3 = vor.u32 %v12327_v60, %v10023_v0  ;;  %5873 = vmatpush.bf16.msrb.mxu2 %v10342_v35  ;;  %v11174_v22 = vor.u32 %v12623_v19, %v11173_v57  ;;  %v12471_v40 = vld [vmem:[#allocation10 + $0xa84] sm:$0xf]  ;;  %v10981_v53 = vld [vmem:[#allocation10 + $0xd80] sm:$0xf]  ;;  %v9453_v49 = vld [vmem:[#allocation10 + $0x188] sm:$0xf] }
 0x1d7   :  { %v10602_v7 = vor.u32 %v12471_v40, %v10599_v43  ;;  %v12439_v54 = vld [vmem:[#allocation10 + $0x984] sm:$0xf]  ;;  %v11178_v40 = vor.u32 %v12615_v33, %v11175_v36  ;;  %v9517_v43 = vld [vmem:[#allocation10 + $0x208] sm:$0xf] }
 0x1d8   :  { %5881 = vmatpush.bf16.msrb.mxu0 %v11174_v22  ;;  %v10471_v30 = vld [vmem:[#allocation10 + $0x9c0] sm:$0xf0]  ;;  %v10221_v52 = vld [vmem:[#allocation10 + $0x788] sm:$0xf] }
 0x1d9   :  { %5907 = vmatpush.bf16.msra.mxu1 %v10154_v44  ;;  %v11046_v44 = vor.u32 %v12591_v10, %v11045_v16  ;;  %v10474_v35 = vor.u32 %v12439_v54, %v10471_v30  ;;  %v12423_v0 = vld [vmem:[#allocation10 + $0x904] sm:$0xf] }
 0x1da   :  { %v2632_v17 = vpop.f32.mrf.mxu3  ;;  %5900 = vmatpush.bf16.msra.mxu3 %v9258_v63  ;;  %5874 = vmatpush.bf16.msrb.mxu2 %v10278_v9  ;;  %v10918_v63 = vor.u32 %v12559_v59, %v10917_v58  ;;  %v12599_v16 = vld [vmem:[#allocation10 + $0xe84] sm:$0xf]  ;;  %v9389_v59 = vld [vmem:[#allocation10 + $0x108] sm:$0xf] }
 0x1db   :  { %v10727_v17 = vld [vmem:[#allocation10 + $0xbc0] sm:$0xf0] }
 0x1dc   :  { %v10730_v18 = vor.u32 %v12503_v45, %v10727_v17  ;;  %5882 = vmatpush.bf16.msrb.mxu0 %v11110_v32  ;;  %v10346_v45 = vor.u32 %v12407_v12, %v10343_v13  ;;  %v12224_v32 = vld [vmem:[#allocation10 + $0x2c4] sm:$0xf0]  ;;  %v11111_v10 = vld [vmem:[#allocation10 + $0xec0] sm:$0xf0] }
 0x1dd   :  { %5908 = vmatpush.bf16.msra.mxu1 %v10090_v25  ;;  %v10982_v25 = vor.u32 %v12575_v61, %v10981_v53  ;;  %v12384_v53 = vld [vmem:[#allocation10 + $0x7c4] sm:$0xf0]  ;;  %v12583_v61 = vld [vmem:[#allocation10 + $0xe04] sm:$0xf] }
 0x1de   :  { %v13235_v56 = vpop.f32.mrf.mxu2  ;;  %5919 = vmatpush.bf16.msra.mxu2 %v10730_v18  ;;  %v12527_v18 = vld [vmem:[#allocation10 + $0xc3c] sm:$0xf0]  ;;  %v10222_v58 = vor.u32 %v12384_v53, %v10221_v52  ;;  %v10093_v12 = vld [vmem:[#allocation10 + $0x688] sm:$0xf]  ;;  %v9583_v53 = vld [vmem:[#allocation10 + $0x2c8] sm:$0xf0] }
 0x1df   :  { %v2553_v5 = vadd.f32 %v13235_v56, %v13226_v4  ;;  %v12391_v56 = vld [vmem:[#allocation10 + $0x804] sm:$0xf]  ;;  %v12352_v13 = vld [vmem:[#allocation10 + $0x6c4] sm:$0xf0] }
 0x1e0   :  { %5883 = vmatpush.bf16.msrb.mxu0 %v11046_v44  ;;  %v12496_v52 = vld [vmem:[#allocation10 + $0xb44] sm:$0xf0] }
 0x1e1   :  { %5909 = vmatpush.bf16.msra.mxu1 %v10026_v3 }
 0x1e2   :  { %5920 = vmatpush.bf16.msra.mxu2 %v10666_v2 }
 0x1e4   :  { %5884 = vmatpush.bf16.msrb.mxu0 %v10982_v25  ;;  %v11047_v25 = vld [vmem:[#allocation10 + $0xe40] sm:$0xf0] }
 0x1e5   :  { %5910 = vmatpush.bf16.msra.mxu1 %v9962_v55  ;;  %v12256_v55 = vld [vmem:[#allocation10 + $0x3c4] sm:$0xf0]  ;;  %v11050_v54 = vor.u32 %v12583_v61, %v11047_v25 }
 0x1e6   :  { %v2554_v21 = vpop.f32.mrf.mxu2  ;;  %5921 = vmatpush.bf16.msra.mxu2 %v10602_v7  ;;  %v9710_v19 = vor.u32 %v12256_v55, %v9709_v15  ;;  %v12208_v7 = vld [vmem:[#allocation10 + $0x244] sm:$0xf0]  ;;  %v10919_v15 = vld [vmem:[#allocation10 + $0xd40] sm:$0xf0] }
 0x1e7   :  { %v12631_v21 = vld [vmem:[#allocation10 + $0xf84] sm:$0xf]  ;;  %v9518_v48 = vor.u32 %v12208_v7, %v9517_v43  ;;  %v12512_v43 = vld [vmem:[#allocation10 + $0xbc4] sm:$0xf0]  ;;  %v12232_v7 = vld [vmem:[#allocation10 + $0x30c] sm:$0xf] }
 0x1e8   :  { %5885 = vmatpush.bf16.msrb.mxu0 %v10918_v63  ;;  %v10157_v63 = vld [vmem:[#allocation10 + $0x708] sm:$0xf] }
 0x1e9   :  { %5911 = vmatpush.bf16.msra.mxu1 %v9898_v51  ;;  %v11239_v51 = vld [vmem:[#allocation10 + $0xfc0] sm:$0xf0] }
 0x1ea   :  { %v2695_v20 = vpop.f32.mrf.mxu1  ;;  %5922 = vmatpush.bf16.msra.mxu2 %v10538_v34  ;;  %v11242_v38 = vor.u32 %v12631_v21, %v11239_v51  ;;  %v12248_v21 = vld [vmem:[#allocation10 + $0x38c] sm:$0xf] }
 0x1eb   :  { %v9714_v36 = vor.u32 %v12248_v21, %v9711_v23  ;;  %v10159_v21 = vld [vmem:[#allocation10 + $0x748] sm:$0xf0] }
 0x1ec   :  { %5886 = vmatpush.bf16.msrb.mxu0 %v10854_v11  ;;  %v12160_v11 = vld [vmem:[#allocation10 + $0xc4] sm:$0xf0] }
 0x1ed   :  { %5912 = vmatpush.bf16.msra.mxu1 %v9834_v42  ;;  %v9582_v42 = vor.u32 %v12224_v32, %v9581_v29  ;;  %v12320_v29 = vld [vmem:[#allocation10 + $0x5c4] sm:$0xf0] }
 0x1ee   :  { %v13240_v28 = vpop.f32.mrf.mxu2  ;;  %5923 = vmatpush.bf16.msra.mxu2 %v10474_v35 }
 0x1ef   :  { %v2605_v44 = vadd.f32 %v13240_v28, %v13229_v39  ;;  %v12368_v28 = vld [vmem:[#allocation10 + $0x744] sm:$0xf0] }
 0x1f0   :  { %v10158_v8 = vor.u32 %v12368_v28, %v10157_v63  ;;  %v12480_v63 = vld [vmem:[#allocation10 + $0xac4] sm:$0xf0]  ;;  %v12200_v28 = vld [vmem:[#allocation10 + $0x20c] sm:$0xf] }
 0x1f1   :  { %5913 = vmatpush.bf16.msra.mxu1 %v9770_v50  ;;  %v12192_v50 = vld [vmem:[#allocation10 + $0x1c4] sm:$0xf0] }
 0x1f2   :  { %v2682_v14 = vpop.f32.mrf.mxu3  ;;  %v2697_v6 = vpop.f32.mrf.mxu1  ;;  %v9454_v35 = vor.u32 %v12192_v50, %v9453_v49  ;;  %v12304_v49 = vld [vmem:[#allocation10 + $0x544] sm:$0xf0] }
 0x1f3   :  { %v2683_v62 = vadd.f32 %v2682_v14, %v1872_v1  ;;  %v10407_v1 = vld [vmem:[#allocation10 + $0x940] sm:$0xf0]  ;;  %v11114_v6 = vor.u32 %v12599_v16, %v11111_v10  ;;  %v9647_v16 = vld [vmem:[#allocation10 + $0x348] sm:$0xf0]  ;;  %v10669_v50 = vld [vmem:[#allocation10 + $0xb08] sm:$0xf] }
 0x1f4   :  { %v10410_v3 = vor.u32 %v12423_v0, %v10407_v1  ;;  %v12567_v0 = vld [vmem:[#allocation10 + $0xd84] sm:$0xf] }
 0x1f5   :  { %v13238_v27 = vadd.f32 %v2695_v20, %v2683_v62  ;;  %v10789_v62 = vld [vmem:[#allocation10 + $0xc00] sm:$0xf]  ;;  %v10279_v20 = vld [vmem:[#allocation10 + $0x840] sm:$0xf0] }
 0x1f6   :  { %v2606_v60 = vpop.f32.mrf.mxu2  ;;  %5924 = vmatpush.bf16.msra.mxu2 %v10410_v3  ;;  %v10790_v4 = vor.u32 %v12527_v18, %v10789_v62  ;;  %v10282_v26 = vor.u32 %v12391_v56, %v10279_v20  ;;  %v10983_v1 = vld [vmem:[#allocation10 + $0xdc0] sm:$0xf0]  ;;  %v9261_v62 = vld [vmem:[#allocation10 + $0x8] sm:$0xf] }
 0x1f7   :  { %v12176_v60 = vld [vmem:[#allocation10 + $0x144] sm:$0xf0]  ;;  %v10986_v3 = vor.u32 %v12567_v0, %v10983_v1  ;;  %v12535_v56 = vld [vmem:[#allocation10 + $0xc84] sm:$0xf]  ;;  %v9519_v0 = vld [vmem:[#allocation10 + $0x248] sm:$0xf0] }
 0x1f8   :  { %5887 = vmatpush.bf16.msrb.mxu0 %v10790_v4  ;;  %v9390_v46 = vor.u32 %v12176_v60, %v9389_v59  ;;  %v12144_v18 = vld [vmem:[#allocation10 + $0x44] sm:$0xf0]  ;;  %v10855_v20 = vld [vmem:[#allocation10 + $0xcc0] sm:$0xf0] }
 0x1f9   :  { %v12336_v4 = vld [vmem:[#allocation10 + $0x644] sm:$0xf0]  ;;  %v10858_v24 = vor.u32 %v12535_v56, %v10855_v20  ;;  %v9391_v56 = vld [vmem:[#allocation10 + $0x148] sm:$0xf0] }
 0x1fa   :  { %v2684_v41 = vpop.f32.mrf.mxu3  ;;  %5925 = vmatpush.bf16.msra.mxu2 %v10346_v45  ;;  %v12288_v59 = vld [vmem:[#allocation10 + $0x4c4] sm:$0xf0]  ;;  %v12360_v20 = vld [vmem:[#allocation10 + $0x70c] sm:$0xf] }
 0x1fb   :  { %v10605_v60 = vld [vmem:[#allocation10 + $0xa88] sm:$0xf] }
 0x1fc   :  { %v2565_v9 = vpop.f32.mrf.mxu0  ;;  %5932 = vmatpush.bf16.msra.mxu0 %v11242_v38  ;;  %v9262_v38 = vor.u32 %v12144_v18, %v9261_v62  ;;  %v10477_v62 = vld [vmem:[#allocation10 + $0x988] sm:$0xf] }
 0x1fd   :  { %v2566_v14 = vadd.f32 %v2565_v9, %v2553_v5  ;;  %v9325_v9 = vld [vmem:[#allocation10 + $0x88] sm:$0xf] }
 0x1fe   :  { %5926 = vmatpush.bf16.msra.mxu2 %v10282_v26  ;;  %v9326_v45 = vor.u32 %v12160_v11, %v9325_v9  ;;  %v10541_v9 = vld [vmem:[#allocation10 + $0xa08] sm:$0xf] }
 0x1ff   :  { %v2725_v17 = vmax.f32 %v2566_v14, 0.0  ;;  %v12551_v14 = vld [vmem:[#allocation10 + $0xd04] sm:$0xf]  ;;  %v12464_v11 = vld [vmem:[#allocation10 + $0xa44] sm:$0xf0] }
 0x200   :  { %v13244_v57 = vpop.f32.mrf.mxu2  ;;  %5933 = vmatpush.bf16.msra.mxu0 %v11178_v40  ;;  %v10922_v55 = vor.u32 %v12551_v14, %v10919_v15  ;;  %v10733_v40 = vld [vmem:[#allocation10 + $0xb88] sm:$0xf]  ;;  %v12376_v14 = vld [vmem:[#allocation10 + $0x78c] sm:$0xf] }
 0x201   :  { %v13246_v22 = vpack.c.bf16 %v2725_v17, %v2725_v17  ;;  %v10094_v17 = vor.u32 %v12352_v13, %v10093_v12  ;;  %v2657_v26 = vadd.f32 %v13244_v57, %v13233_v37  ;;  %v12184_v12 = vld [vmem:[#allocation10 + $0x18c] sm:$0xf] }
 0x202   :  { %v9455_v13 = vld [vmem:[#allocation10 + $0x1c8] sm:$0xf0] }
 0x203   :  { %5849 = vmatmul.bf16.vlgmr.msrb.gmra.mxu3 %v13246_v22  ;;  %v10223_v15 = vld [vmem:[#allocation10 + $0x7c8] sm:$0xf0] }
 0x204   :  { %5945 = vmatpush.bf16.msrb.mxu3 %v9710_v19  ;;  %v2567_v2 = vpop.f32.mrf.mxu0  ;;  %5934 = vmatpush.bf16.msra.mxu0 %v11114_v6  ;;  %v10029_v19 = vld [vmem:[#allocation10 + $0x608] sm:$0xf]  ;;  %v10226_v18 = vor.u32 %v12376_v14, %v10223_v15  ;;  %v10671_v14 = vld [vmem:[#allocation10 + $0xb48] sm:$0xf0]  ;;  %v9589_v15 = vld [vmem:[#allocation10 + $0x290] sm:$0xf] }
 0x205   :  { %v10030_v2 = vor.u32 %v12336_v4, %v10029_v19  ;;  %v12448_v19 = vld [vmem:[#allocation10 + $0x9c4] sm:$0xf0]  ;;  %v12168_v4 = vld [vmem:[#allocation10 + $0x10c] sm:$0xf] }
 0x206   :  { %v10478_v23 = vor.u32 %v12448_v19, %v10477_v62  ;;  %v11117_v19 = vld [vmem:[#allocation10 + $0xe88] sm:$0xf] }
 0x208   :  { %5946 = vmatpush.bf16.msrb.mxu3 %v9646_v31  ;;  %v2658_v41 = vpop.f32.mrf.mxu2  ;;  %5935 = vmatpush.bf16.msra.mxu0 %v11050_v54  ;;  %v9965_v31 = vld [vmem:[#allocation10 + $0x588] sm:$0xf] }
 0x209   :  { %v12519_v41 = vld [vmem:[#allocation10 + $0xc04] sm:$0xf]  ;;  %v9966_v57 = vor.u32 %v12320_v29, %v9965_v31  ;;  %v9327_v31 = vld [vmem:[#allocation10 + $0xc8] sm:$0xf0] }
 0x20a   :  { %v12344_v29 = vld [vmem:[#allocation10 + $0x68c] sm:$0xf] }
 0x20c   :  { %5947 = vmatpush.bf16.msrb.mxu3 %v9582_v42  ;;  %v2617_v47 = vpop.f32.mrf.mxu0  ;;  %5936 = vmatpush.bf16.msra.mxu0 %v10986_v3  ;;  %v10791_v42 = vld [vmem:[#allocation10 + $0xc40] sm:$0xf0]  ;;  %v10606_v3 = vor.u32 %v12480_v63, %v10605_v60  ;;  %v10735_v60 = vld [vmem:[#allocation10 + $0xbc8] sm:$0xf0] }
 0x20d   :  { %v2618_v34 = vadd.f32 %v2617_v47, %v2605_v44  ;;  %v10794_v10 = vor.u32 %v12519_v41, %v10791_v42  ;;  %v10734_v44 = vor.u32 %v12512_v43, %v10733_v40  ;;  %v9650_v47 = vor.u32 %v12232_v7, %v9647_v16  ;;  %v10349_v41 = vld [vmem:[#allocation10 + $0x888] sm:$0xf]  ;;  %v12136_v7 = vld [vmem:[#allocation10 + $0xc] sm:$0xf] }
 0x20e   :  { %v12416_v42 = vld [vmem:[#allocation10 + $0x8c4] sm:$0xf0]  ;;  %v9263_v16 = vld [vmem:[#allocation10 + $0x48] sm:$0xf0] }
 0x20f   :  { %v2726_v30 = vmax.f32 %v2618_v34, 0.0  ;;  %v12216_v34 = vld [vmem:[#allocation10 + $0x28c] sm:$0xf] }
 0x210   :  { %5948 = vmatpush.bf16.msrb.mxu3 %v9518_v48  ;;  %5937 = vmatpush.bf16.msra.mxu0 %v10922_v55  ;;  %v9901_v48 = vld [vmem:[#allocation10 + $0x508] sm:$0xf] }
 0x211   :  { %v13251_v39 = vpack.c.bf16 %v2726_v30, %v2726_v30  ;;  %v9902_v25 = vor.u32 %v12304_v49, %v9901_v48  ;;  %v10670_v30 = vor.u32 %v12496_v52, %v10669_v50  ;;  %v10350_v49 = vor.u32 %v12416_v42, %v10349_v41  ;;  %v10285_v52 = vld [vmem:[#allocation10 + $0x808] sm:$0xf]  ;;  %v12456_v42 = vld [vmem:[#allocation10 + $0xa0c] sm:$0xf] }
 0x212   :  { %v9266_v50 = vor.u32 %v12136_v7, %v9263_v16  ;;  %v9461_v7 = vld [vmem:[#allocation10 + $0x190] sm:$0xf] }
 0x213   :  { %5862 = vmatmul.bf16.vlgmr.msrb.gmra.mxu1 %v13251_v39  ;;  %5901 = vmatmul.bf16.vlgmr.msra.gmra.mxu3 %v13246_v22  ;;  %v12193_v16 = vld [vmem:[#allocation10 + $0x1cc] sm:$0xf0] }
 0x214   :  { %5949 = vmatpush.bf16.msrb.mxu3 %v9454_v35  ;;  %5958 = vmatpush.bf16.msrb.mxu1 %v10222_v58  ;;  %v2619_v5 = vpop.f32.mrf.mxu0  ;;  %v9586_v35 = vor.u32 %v12216_v34, %v9583_v53  ;;  %v9837_v58 = vld [vmem:[#allocation10 + $0x488] sm:$0xf] }
 0x215   :  { %5938 = vmatpush.bf16.msra.mxu0 %v10858_v24  ;;  %v9838_v1 = vor.u32 %v12288_v59, %v9837_v58  ;;  %v9522_v5 = vor.u32 %v12200_v28, %v9519_v0  ;;  %v9394_v24 = vor.u32 %v12168_v4, %v9391_v56  ;;  %v12400_v34 = vld [vmem:[#allocation10 + $0x844] sm:$0xf0]  ;;  %v9967_v58 = vld [vmem:[#allocation10 + $0x5c8] sm:$0xf0]  ;;  %v9653_v28 = vld [vmem:[#allocation10 + $0x310] sm:$0xf] }
 0x216   :  { %v12504_v59 = vld [vmem:[#allocation10 + $0xb8c] sm:$0xf]  ;;  %v12608_v4 = vld [vmem:[#allocation10 + $0xec4] sm:$0xf0] }
 0x217   :  { %v12280_v56 = vld [vmem:[#allocation10 + $0x48c] sm:$0xf] }
 0x218   :  { %5950 = vmatpush.bf16.msrb.mxu3 %v9390_v46  ;;  %5959 = vmatpush.bf16.msrb.mxu1 %v10158_v8  ;;  %v9773_v46 = vld [vmem:[#allocation10 + $0x408] sm:$0xf] }
 0x219   :  { %5939 = vmatpush.bf16.msra.mxu0 %v10794_v10  ;;  %v12272_v8 = vld [vmem:[#allocation10 + $0x444] sm:$0xf0]  ;;  %v12328_v10 = vld [vmem:[#allocation10 + $0x60c] sm:$0xf] }
 0x21a   :  { %v9774_v55 = vor.u32 %v12272_v8, %v9773_v46  ;;  %v11181_v46 = vld [vmem:[#allocation10 + $0xf08] sm:$0xf] }
 0x21b   :  { %v12624_v8 = vld [vmem:[#allocation10 + $0xf44] sm:$0xf0] }
 0x21c   :  { %5951 = vmatpush.bf16.msrb.mxu3 %v9326_v45  ;;  %5960 = vmatpush.bf16.msrb.mxu1 %v10094_v17  ;;  %v2669_v51 = vpop.f32.mrf.mxu0  ;;  %v10542_v45 = vor.u32 %v12464_v11, %v10541_v9  ;;  %v9458_v17 = vor.u32 %v12184_v12, %v9455_v13  ;;  %v12296_v9 = vld [vmem:[#allocation10 + $0x50c] sm:$0xf] }
 0x21d   :  { %v2670_v32 = vadd.f32 %v2669_v51, %v2657_v26  ;;  %v10413_v26 = vld [vmem:[#allocation10 + $0x908] sm:$0xf]  ;;  %v10162_v51 = vor.u32 %v12360_v20, %v10159_v21  ;;  %v9903_v12 = vld [vmem:[#allocation10 + $0x548] sm:$0xf0] }
 0x21e   :  { %v12488_v13 = vld [vmem:[#allocation10 + $0xb0c] sm:$0xf]  ;;  %v9906_v62 = vor.u32 %v12296_v9, %v9903_v12  ;;  %v12544_v12 = vld [vmem:[#allocation10 + $0xcc4] sm:$0xf0] }
 0x21f   :  { %v2727_v37 = vmax.f32 %v2670_v32, 0.0  ;;  %v10095_v32 = vld [vmem:[#allocation10 + $0x6c8] sm:$0xf0] }
 0x220   :  { %v13257_v33 = vpop.f32.mrf.mxu2  ;;  %5952 = vmatpush.bf16.msrb.mxu3 %v9262_v38  ;;  %5961 = vmatpush.bf16.msrb.mxu1 %v10030_v2  ;;  %v12432_v38 = vld [vmem:[#allocation10 + $0x944] sm:$0xf0]  ;;  %v12152_v2 = vld [vmem:[#allocation10 + $0x8c] sm:$0xf]  ;;  %v10098_v43 = vor.u32 %v12344_v29, %v10095_v32 }
 0x221   :  { %v13259_v6 = vpack.c.bf16 %v2727_v37, %v2727_v37  ;;  %v9330_v40 = vor.u32 %v12152_v2, %v9327_v31  ;;  %v10031_v37 = vld [vmem:[#allocation10 + $0x648] sm:$0xf0]  ;;  %v11053_v2 = vld [vmem:[#allocation10 + $0xe08] sm:$0xf] }
 0x222   :  { %v9839_v21 = vld [vmem:[#allocation10 + $0x4c8] sm:$0xf0]  ;;  %v12592_v32 = vld [vmem:[#allocation10 + $0xe44] sm:$0xf0] }
 0x223   :  { %5875 = vmatmul.bf16.vlgmr.msrb.gmra.mxu2 %v13259_v6  ;;  %5914 = vmatmul.bf16.vlgmr.msra.gmra.mxu1 %v13251_v39  ;;  %v9842_v31 = vor.u32 %v12280_v56, %v9839_v21  ;;  %v9719_v56 = vld [vmem:[#allocation10 + $0x3d0] sm:$0xf0]  ;;  %v10797_v21 = vld [vmem:[#allocation10 + $0xc08] sm:$0xf] }
 0x224   :  { %5997 = vmatpush.bf16.msra.mxu3 %v9714_v36  ;;  %5962 = vmatpush.bf16.msrb.mxu1 %v9966_v57  ;;  %v2671_v61 = vpop.f32.mrf.mxu0  ;;  %v10414_v36 = vor.u32 %v12432_v38, %v10413_v26  ;;  %v9717_v57 = vld [vmem:[#allocation10 + $0x390] sm:$0xf]  ;;  %v11118_v38 = vor.u32 %v12608_v4, %v11117_v19  ;;  %v12249_v4 = vld [vmem:[#allocation10 + $0x394] sm:$0xf] }
 0x225   :  { %5953 = vmatmul.bf16.vlgmr.msrb.gmra.mxu3 %v13246_v22  ;;  %5971 = vmatpush.bf16.msrb.mxu2 %v10734_v44  ;;  %v12257_v44 = vld [vmem:[#allocation10 + $0x3cc] sm:$0xf0]  ;;  %v10034_v61 = vor.u32 %v12328_v10, %v10031_v37 }
 0x226   :  { %v9525_v26 = vld [vmem:[#allocation10 + $0x210] sm:$0xf] }
 0x227   :  { %v10229_v10 = vld [vmem:[#allocation10 + $0x790] sm:$0xf] }
 0x228   :  { %v2710_v54 = vpop.f32.mrf.mxu2  ;;  %5998 = vmatpush.bf16.msra.mxu3 %v9650_v47  ;;  %5963 = vmatpush.bf16.msrb.mxu1 %v9902_v25  ;;  %v2709_v47 = vadd.f32 %v13257_v33, %v13238_v27  ;;  %v9718_v25 = vor.u32 %v12257_v44, %v9717_v57  ;;  %v12241_v27 = vld [vmem:[#allocation10 + $0x34c] sm:$0xf0]  ;;  %v10286_v33 = vor.u32 %v12400_v34, %v10285_v52  ;;  %v12440_v34 = vld [vmem:[#allocation10 + $0x98c] sm:$0xf] }
 0x229   :  { %5972 = vmatpush.bf16.msrb.mxu2 %v10670_v30  ;;  %v11245_v54 = vld [vmem:[#allocation10 + $0xf88] sm:$0xf]  ;;  %v9654_v11 = vor.u32 %v12241_v27, %v9653_v28  ;;  %v12385_v37 = vld [vmem:[#allocation10 + $0x7cc] sm:$0xf0]  ;;  %v11054_v57 = vor.u32 %v12592_v32, %v11053_v2  ;;  %v12424_v27 = vld [vmem:[#allocation10 + $0x90c] sm:$0xf] }
 0x22a   :  { %v12640_v30 = vld [vmem:[#allocation10 + $0xfc4] sm:$0xf0]  ;;  %v10230_v52 = vor.u32 %v12385_v37, %v10229_v10  ;;  %v12632_v2 = vld [vmem:[#allocation10 + $0xf8c] sm:$0xf]  ;;  %v9973_v32 = vld [vmem:[#allocation10 + $0x590] sm:$0xf] }
 0x22b   :  { %v11246_v0 = vor.u32 %v12640_v30, %v11245_v54  ;;  %v10165_v54 = vld [vmem:[#allocation10 + $0x710] sm:$0xf] }
 0x22c   :  { %5999 = vmatpush.bf16.msra.mxu3 %v9586_v35  ;;  %5964 = vmatpush.bf16.msrb.mxu1 %v9838_v1  ;;  %v12312_v35 = vld [vmem:[#allocation10 + $0x58c] sm:$0xf]  ;;  %v12369_v30 = vld [vmem:[#allocation10 + $0x74c] sm:$0xf0] }
 0x22d   :  { %5973 = vmatpush.bf16.msrb.mxu2 %v10606_v3  ;;  %v9970_v3 = vor.u32 %v12312_v35, %v9967_v58  ;;  %v10166_v28 = vor.u32 %v12369_v30, %v10165_v54  ;;  %v12600_v30 = vld [vmem:[#allocation10 + $0xe8c] sm:$0xf] }
 0x230   :  { %6000 = vmatpush.bf16.msra.mxu3 %v9522_v5  ;;  %5965 = vmatpush.bf16.msrb.mxu1 %v9774_v55  ;;  %v10738_v5 = vor.u32 %v12504_v59, %v10735_v60  ;;  %v12225_v55 = vld [vmem:[#allocation10 + $0x2cc] sm:$0xf0]  ;;  %v10925_v59 = vld [vmem:[#allocation10 + $0xd08] sm:$0xf] }
 0x231   :  { %5974 = vmatpush.bf16.msrb.mxu2 %v10542_v45  ;;  %v9590_v20 = vor.u32 %v12225_v55, %v9589_v15  ;;  %v12560_v60 = vld [vmem:[#allocation10 + $0xd44] sm:$0xf0]  ;;  %v12408_v15 = vld [vmem:[#allocation10 + $0x88c] sm:$0xf] }
 0x232   :  { %v10351_v55 = vld [vmem:[#allocation10 + $0x8c8] sm:$0xf0] }
 0x233   :  { %5927 = vmatmul.bf16.vlgmr.msra.gmra.mxu2 %v13259_v6  ;;  %5966 = vmatmul.bf16.vlgmr.msrb.gmra.mxu1 %v13251_v39 }
 0x234   :  { %6001 = vmatpush.bf16.msra.mxu3 %v9458_v17  ;;  %6010 = vmatpush.bf16.msra.mxu1 %v10226_v18  ;;  %v11182_v17 = vor.u32 %v12624_v8, %v11181_v46  ;;  %v10674_v18 = vor.u32 %v12488_v13, %v10671_v14  ;;  %v12353_v46 = vld [vmem:[#allocation10 + $0x6cc] sm:$0xf0]  ;;  %v10926_v8 = vor.u32 %v12560_v60, %v10925_v59 }
 0x235   :  { %5975 = vmatpush.bf16.msrb.mxu2 %v10478_v23  ;;  %v12472_v23 = vld [vmem:[#allocation10 + $0xa8c] sm:$0xf]  ;;  %v9845_v60 = vld [vmem:[#allocation10 + $0x490] sm:$0xf] }
 0x238   :  { %6002 = vmatpush.bf16.msra.mxu3 %v9394_v24  ;;  %6011 = vmatpush.bf16.msra.mxu1 %v10162_v51  ;;  %v10607_v24 = vld [vmem:[#allocation10 + $0xac8] sm:$0xf0]  ;;  %v12209_v51 = vld [vmem:[#allocation10 + $0x24c] sm:$0xf0] }
 0x239   :  { %5976 = vmatpush.bf16.msrb.mxu2 %v10414_v36  ;;  %v10610_v29 = vor.u32 %v12472_v23, %v10607_v24  ;;  %v12264_v36 = vld [vmem:[#allocation10 + $0x40c] sm:$0xf]  ;;  %v9526_v41 = vor.u32 %v12209_v51, %v9525_v26  ;;  %v12528_v23 = vld [vmem:[#allocation10 + $0xc44] sm:$0xf0] }
 0x23a   :  { %v12392_v24 = vld [vmem:[#allocation10 + $0x80c] sm:$0xf] }
 0x23c   :  { %v2721_v48 = vpop.f32.mrf.mxu0  ;;  %6003 = vmatpush.bf16.msra.mxu3 %v9330_v40  ;;  %6012 = vmatpush.bf16.msra.mxu1 %v10098_v43  ;;  %v9775_v40 = vld [vmem:[#allocation10 + $0x448] sm:$0xf0] }
 0x23d   :  { %v2722_v53 = vadd.f32 %v2721_v48, %v2709_v47  ;;  %5977 = vmatpush.bf16.msrb.mxu2 %v10350_v49  ;;  %v10543_v43 = vld [vmem:[#allocation10 + $0xa48] sm:$0xf0]  ;;  %v9778_v44 = vor.u32 %v12264_v36, %v9775_v40  ;;  %v10989_v48 = vld [vmem:[#allocation10 + $0xd88] sm:$0xf]  ;;  %v12321_v36 = vld [vmem:[#allocation10 + $0x5cc] sm:$0xf0] }
 0x23e   :  { %v10546_v47 = vor.u32 %v12456_v42, %v10543_v43  ;;  %v12576_v49 = vld [vmem:[#allocation10 + $0xdc4] sm:$0xf0]  ;;  %v10741_v40 = vld [vmem:[#allocation10 + $0xb90] sm:$0xf]  ;;  %v12233_v43 = vld [vmem:[#allocation10 + $0x314] sm:$0xf]  ;;  %v9974_v37 = vor.u32 %v12321_v36, %v9973_v32 }
 0x23f   :  { %v2728_v63 = vmax.f32 %v2722_v53, 0.0  ;;  %v10479_v53 = vld [vmem:[#allocation10 + $0x9c8] sm:$0xf0]  ;;  %v10990_v35 = vor.u32 %v12576_v49, %v10989_v48  ;;  %v12513_v42 = vld [vmem:[#allocation10 + $0xbcc] sm:$0xf0] }
 0x240   :  { %6004 = vmatpush.bf16.msra.mxu3 %v9266_v50  ;;  %6013 = vmatpush.bf16.msra.mxu1 %v10034_v61  ;;  %v9462_v50 = vor.u32 %v12193_v16, %v9461_v7  ;;  %v9397_v61 = vld [vmem:[#allocation10 + $0x110] sm:$0xf]  ;;  %v10482_v58 = vor.u32 %v12440_v34, %v10479_v53  ;;  %v9655_v7 = vld [vmem:[#allocation10 + $0x350] sm:$0xf0]  ;;  %v12552_v32 = vld [vmem:[#allocation10 + $0xd0c] sm:$0xf] }
 0x241   :  { %v13268_v1 = vpack.c.bf16 %v2728_v63, %v2728_v63  ;;  %5978 = vmatpush.bf16.msrb.mxu2 %v10286_v33  ;;  %v10415_v33 = vld [vmem:[#allocation10 + $0x948] sm:$0xf0]  ;;  %v9658_v48 = vor.u32 %v12233_v43, %v9655_v7  ;;  %v9909_v49 = vld [vmem:[#allocation10 + $0x510] sm:$0xf]  ;;  %v12217_v53 = vld [vmem:[#allocation10 + $0x294] sm:$0xf] }
 0x242   :  { %v10418_v9 = vor.u32 %v12424_v27, %v10415_v33  ;;  %v12497_v34 = vld [vmem:[#allocation10 + $0xb4c] sm:$0xf0]  ;;  %v12201_v33 = vld [vmem:[#allocation10 + $0x214] sm:$0xf]  ;;  %v10927_v36 = vld [vmem:[#allocation10 + $0xd48] sm:$0xf0] }
 0x243   :  { %5888 = vmatmul.bf16.vlgmr.msrb.gmra.mxu0 %v13268_v1  ;;  %6005 = vmatmul.bf16.vlgmr.msra.gmra.mxu3 %v13246_v22  ;;  %v12481_v27 = vld [vmem:[#allocation10 + $0xacc] sm:$0xf0] }
 0x244   :  { %6049 = vmatpush.bf16.msrb.mxu3 %v9718_v25  ;;  %5984 = vmatpush.bf16.msrb.mxu0 %v11246_v0  ;;  %v2723_v45 = vpop.f32.mrf.mxu0  ;;  %v12177_v25 = vld [vmem:[#allocation10 + $0x14c] sm:$0xf0] }
 0x245   :  { %6014 = vmatpush.bf16.msra.mxu1 %v9970_v3  ;;  %6023 = vmatpush.bf16.msra.mxu2 %v10738_v5  ;;  %v9398_v63 = vor.u32 %v12177_v25, %v9397_v61  ;;  %v9333_v0 = vld [vmem:[#allocation10 + $0x90] sm:$0xf]  ;;  %v9591_v61 = vld [vmem:[#allocation10 + $0x2d0] sm:$0xf0] }
 0x246   :  { %5979 = vmatmul.bf16.vlgmr.msrb.gmra.mxu2 %v13259_v6  ;;  %v12161_v3 = vld [vmem:[#allocation10 + $0xcc] sm:$0xf0]  ;;  %v9594_v59 = vor.u32 %v12217_v53, %v9591_v61  ;;  %v12137_v61 = vld [vmem:[#allocation10 + $0x14] sm:$0xf] }
 0x247   :  { %v10101_v5 = vld [vmem:[#allocation10 + $0x690] sm:$0xf]  ;;  %v9334_v13 = vor.u32 %v12161_v3, %v9333_v0  ;;  %v9527_v0 = vld [vmem:[#allocation10 + $0x250] sm:$0xf0] }
 0x248   :  { %6050 = vmatpush.bf16.msrb.mxu3 %v9654_v11  ;;  %5985 = vmatpush.bf16.msrb.mxu0 %v11182_v17  ;;  %v10861_v11 = vld [vmem:[#allocation10 + $0xc88] sm:$0xf]  ;;  %v10102_v14 = vor.u32 %v12353_v46, %v10101_v5  ;;  %v9269_v45 = vld [vmem:[#allocation10 + $0x10] sm:$0xf]  ;;  %v12584_v46 = vld [vmem:[#allocation10 + $0xe0c] sm:$0xf] }
 0x249   :  { %6015 = vmatpush.bf16.msra.mxu1 %v9906_v62  ;;  %6024 = vmatpush.bf16.msra.mxu2 %v10674_v18  ;;  %v12145_v17 = vld [vmem:[#allocation10 + $0x4c] sm:$0xf0]  ;;  %v10862_v19 = vor.u32 %v12544_v12, %v10861_v11  ;;  %v9530_v11 = vor.u32 %v12201_v33, %v9527_v0 }
 0x24a   :  { %v10037_v62 = vld [vmem:[#allocation10 + $0x610] sm:$0xf]  ;;  %v9270_v26 = vor.u32 %v12145_v17, %v9269_v45  ;;  %v9463_v45 = vld [vmem:[#allocation10 + $0x1d0] sm:$0xf0] }
 0x24b   :  { %v12337_v18 = vld [vmem:[#allocation10 + $0x64c] sm:$0xf0] }
 0x24c   :  { %6051 = vmatpush.bf16.msrb.mxu3 %v9590_v20  ;;  %5986 = vmatpush.bf16.msrb.mxu0 %v11118_v38  ;;  %v10354_v20 = vor.u32 %v12408_v15, %v10351_v55  ;;  %v10038_v51 = vor.u32 %v12337_v18, %v10037_v62  ;;  %v10287_v38 = vld [vmem:[#allocation10 + $0x848] sm:$0xf0]  ;;  %v9781_v12 = vld [vmem:[#allocation10 + $0x410] sm:$0xf]  ;;  %v12185_v55 = vld [vmem:[#allocation10 + $0x194] sm:$0xf] }
 0x24d   :  { %6016 = vmatpush.bf16.msra.mxu1 %v9842_v31  ;;  %6025 = vmatpush.bf16.msra.mxu2 %v10610_v29  ;;  %v11247_v31 = vld [vmem:[#allocation10 + $0xfc8] sm:$0xf0]  ;;  %v9722_v29 = vor.u32 %v12249_v4, %v9719_v56  ;;  %v10290_v16 = vor.u32 %v12392_v24, %v10287_v38  ;;  %v12465_v15 = vld [vmem:[#allocation10 + $0xa4c] sm:$0xf0]  ;;  %v12377_v62 = vld [vmem:[#allocation10 + $0x794] sm:$0xf] }
 0x24e   :  { %v11250_v10 = vor.u32 %v12632_v2, %v11247_v31  ;;  %v10231_v18 = vld [vmem:[#allocation10 + $0x7d0] sm:$0xf0]  ;;  %v12568_v4 = vld [vmem:[#allocation10 + $0xd8c] sm:$0xf]  ;;  %v12433_v7 = vld [vmem:[#allocation10 + $0x94c] sm:$0xf0] }
 0x24f   :  { %v10991_v56 = vld [vmem:[#allocation10 + $0xdc8] sm:$0xf0]  ;;  %v10234_v24 = vor.u32 %v12377_v62, %v10231_v18  ;;  %v9399_v38 = vld [vmem:[#allocation10 + $0x150] sm:$0xf0]  ;;  %v11253_v33 = vld [vmem:[#allocation10 + $0xf90] sm:$0xf] }
 0x250   :  { %6052 = vmatpush.bf16.msrb.mxu3 %v9526_v41  ;;  %5987 = vmatpush.bf16.msrb.mxu0 %v11054_v57  ;;  %v10798_v41 = vor.u32 %v12528_v23, %v10797_v21  ;;  %v12616_v57 = vld [vmem:[#allocation10 + $0xf0c] sm:$0xf]  ;;  %v9466_v21 = vor.u32 %v12185_v55, %v9463_v45  ;;  %v10485_v23 = vld [vmem:[#allocation10 + $0x990] sm:$0xf]  ;;  %v10994_v2 = vor.u32 %v12568_v4, %v10991_v56  ;;  %v12361_v31 = vld [vmem:[#allocation10 + $0x714] sm:$0xf] }
 0x251   :  { %6017 = vmatpush.bf16.msra.mxu1 %v9778_v44  ;;  %6026 = vmatpush.bf16.msra.mxu2 %v10546_v47  ;;  %v11183_v44 = vld [vmem:[#allocation10 + $0xf48] sm:$0xf0]  ;;  %v10742_v47 = vor.u32 %v12513_v42, %v10741_v40  ;;  %v10421_v42 = vld [vmem:[#allocation10 + $0x910] sm:$0xf]  ;;  %v9661_v55 = vld [vmem:[#allocation10 + $0x318] sm:$0xf] }
 0x252   :  { %v11186_v25 = vor.u32 %v12616_v57, %v11183_v44  ;;  %v12345_v57 = vld [vmem:[#allocation10 + $0x694] sm:$0xf]  ;;  %v12641_v0 = vld [vmem:[#allocation10 + $0xfcc] sm:$0xf0]  ;;  %v12242_v45 = vld [vmem:[#allocation10 + $0x354] sm:$0xf0] }
 0x253   :  { %5940 = vmatmul.bf16.vlgmr.msra.gmra.mxu0 %v13268_v1  ;;  %v10103_v44 = vld [vmem:[#allocation10 + $0x6d0] sm:$0xf0]  ;;  %v11189_v62 = vld [vmem:[#allocation10 + $0xf10] sm:$0xf] }
 0x254   :  { %6053 = vmatpush.bf16.msrb.mxu3 %v9462_v50  ;;  %5988 = vmatpush.bf16.msrb.mxu0 %v10990_v35  ;;  %v12305_v50 = vld [vmem:[#allocation10 + $0x54c] sm:$0xf0]  ;;  %v11119_v35 = vld [vmem:[#allocation10 + $0xec8] sm:$0xf0]  ;;  %v10106_v53 = vor.u32 %v12345_v57, %v10103_v44  ;;  %v12297_v56 = vld [vmem:[#allocation10 + $0x514] sm:$0xf] }
 0x255   :  { %6062 = vmatpush.bf16.msrb.mxu1 %v10230_v52  ;;  %6027 = vmatpush.bf16.msra.mxu2 %v10482_v58  ;;  %v10677_v52 = vld [vmem:[#allocation10 + $0xb10] sm:$0xf]  ;;  %v9910_v54 = vor.u32 %v12305_v50, %v9909_v49  ;;  %v11122_v3 = vor.u32 %v12600_v30, %v11119_v35  ;;  %v10422_v49 = vor.u32 %v12433_v7, %v10421_v42  ;;  %v10039_v35 = vld [vmem:[#allocation10 + $0x650] sm:$0xf0] }
 0x256   :  { %6018 = vmatmul.bf16.vlgmr.msra.gmra.mxu1 %v13251_v39  ;;  %v10678_v58 = vor.u32 %v12497_v34, %v10677_v52  ;;  %v10357_v52 = vld [vmem:[#allocation10 + $0x890] sm:$0xf]  ;;  %v12473_v42 = vld [vmem:[#allocation10 + $0xa94] sm:$0xf] }
 0x257   :  { %v12417_v34 = vld [vmem:[#allocation10 + $0x8cc] sm:$0xf0] }
 0x258   :  { %6054 = vmatpush.bf16.msrb.mxu3 %v9398_v63  ;;  %5989 = vmatpush.bf16.msrb.mxu0 %v10926_v8  ;;  %v12289_v63 = vld [vmem:[#allocation10 + $0x4cc] sm:$0xf0]  ;;  %v11055_v8 = vld [vmem:[#allocation10 + $0xe48] sm:$0xf0] }
 0x259   :  { %6063 = vmatpush.bf16.msrb.mxu1 %v10166_v28  ;;  %6028 = vmatpush.bf16.msra.mxu2 %v10418_v9  ;;  %v10613_v28 = vld [vmem:[#allocation10 + $0xa90] sm:$0xf]  ;;  %v9846_v5 = vor.u32 %v12289_v63, %v9845_v60  ;;  %v11058_v17 = vor.u32 %v12584_v46, %v11055_v8  ;;  %v12520_v60 = vld [vmem:[#allocation10 + $0xc0c] sm:$0xf] }
 0x25a   :  { %v10614_v9 = vor.u32 %v12481_v27, %v10613_v28  ;;  %v10799_v63 = vld [vmem:[#allocation10 + $0xc48] sm:$0xf0]  ;;  %v10358_v28 = vor.u32 %v12417_v34, %v10357_v52  ;;  %v10293_v46 = vld [vmem:[#allocation10 + $0x810] sm:$0xf]  ;;  %v12457_v52 = vld [vmem:[#allocation10 + $0xa14] sm:$0xf] }
 0x25b   :  { %v12401_v8 = vld [vmem:[#allocation10 + $0x84c] sm:$0xf0]  ;;  %v10551_v34 = vld [vmem:[#allocation10 + $0xa50] sm:$0xf0] }
 0x25c   :  { %6055 = vmatpush.bf16.msrb.mxu3 %v9334_v13  ;;  %5990 = vmatpush.bf16.msrb.mxu0 %v10862_v19  ;;  %v12273_v13 = vld [vmem:[#allocation10 + $0x44c] sm:$0xf0] }
 0x25d   :  { %6064 = vmatpush.bf16.msrb.mxu1 %v10102_v14  ;;  %6029 = vmatpush.bf16.msra.mxu2 %v10354_v20  ;;  %v10549_v14 = vld [vmem:[#allocation10 + $0xa10] sm:$0xf]  ;;  %v9782_v19 = vor.u32 %v12273_v13, %v9781_v12  ;;  %v9975_v12 = vld [vmem:[#allocation10 + $0x5d0] sm:$0xf0] }
 0x25e   :  { %v10550_v20 = vor.u32 %v12465_v15, %v10549_v14  ;;  %v12505_v13 = vld [vmem:[#allocation10 + $0xb94] sm:$0xf]  ;;  %v11254_v15 = vor.u32 %v12641_v0, %v11253_v33  ;;  %v12625_v18 = vld [vmem:[#allocation10 + $0xf4c] sm:$0xf0] }
 0x25f   :  { %v10743_v14 = vld [vmem:[#allocation10 + $0xbd0] sm:$0xf0]  ;;  %v12593_v57 = vld [vmem:[#allocation10 + $0xe4c] sm:$0xf0] }
 0x260   :  { %6056 = vmatpush.bf16.msrb.mxu3 %v9270_v26  ;;  %5991 = vmatpush.bf16.msrb.mxu0 %v10798_v41  ;;  %v12449_v26 = vld [vmem:[#allocation10 + $0x9cc] sm:$0xf0]  ;;  %v10746_v4 = vor.u32 %v12505_v13, %v10743_v14  ;;  %v12441_v0 = vld [vmem:[#allocation10 + $0x994] sm:$0xf] }
 0x261   :  { %6065 = vmatpush.bf16.msrb.mxu1 %v10038_v51  ;;  %6030 = vmatpush.bf16.msra.mxu2 %v10290_v16  ;;  %v12169_v51 = vld [vmem:[#allocation10 + $0x114] sm:$0xf]  ;;  %v10486_v40 = vor.u32 %v12449_v26, %v10485_v23  ;;  %v11190_v26 = vor.u32 %v12625_v18, %v11189_v62  ;;  %v12561_v13 = vld [vmem:[#allocation10 + $0xd4c] sm:$0xf0]  ;;  %v9341_v18 = vld [vmem:[#allocation10 + $0x98] sm:$0xf] }
 0x262   :  { %v9402_v41 = vor.u32 %v12169_v51, %v9399_v38  ;;  %v12153_v16 = vld [vmem:[#allocation10 + $0x94] sm:$0xf]  ;;  %v9597_v51 = vld [vmem:[#allocation10 + $0x298] sm:$0xf] }
 0x263   :  { %6057 = vmatmul.bf16.vlgmr.msrb.gmra.mxu3 %v13246_v22  ;;  %5992 = vmatmul.bf16.vlgmr.msrb.gmra.mxu0 %v13268_v1  ;;  %v12489_v23 = vld [vmem:[#allocation10 + $0xb14] sm:$0xf]  ;;  %v12226_v38 = vld [vmem:[#allocation10 + $0x2d4] sm:$0xf0] }
 0x264   :  { %6101 = vmatpush.bf16.msra.mxu3 %v9722_v29  ;;  %6036 = vmatpush.bf16.msra.mxu0 %v11250_v10  ;;  %v10167_v29 = vld [vmem:[#allocation10 + $0x750] sm:$0xf0] }
 0x265   :  { %6066 = vmatpush.bf16.msrb.mxu1 %v9974_v37  ;;  %6075 = vmatpush.bf16.msrb.mxu2 %v10742_v47  ;;  %v10170_v43 = vor.u32 %v12361_v31, %v10167_v29  ;;  %v9335_v10 = vld [vmem:[#allocation10 + $0xd0] sm:$0xf0]  ;;  %v10930_v37 = vor.u32 %v12552_v32, %v10927_v36  ;;  %v12536_v47 = vld [vmem:[#allocation10 + $0xc8c] sm:$0xf]  ;;  %v12609_v31 = vld [vmem:[#allocation10 + $0xecc] sm:$0xf0] }
 0x266   :  { %6031 = vmatmul.bf16.vlgmr.msra.gmra.mxu2 %v13259_v6  ;;  %v9338_v50 = vor.u32 %v12153_v16, %v9335_v10  ;;  %v12281_v36 = vld [vmem:[#allocation10 + $0x494] sm:$0xf]  ;;  %v9533_v16 = vld [vmem:[#allocation10 + $0x218] sm:$0xf] }
 0x267   :  { %v12210_v10 = vld [vmem:[#allocation10 + $0x254] sm:$0xf0]  ;;  %v10423_v62 = vld [vmem:[#allocation10 + $0x950] sm:$0xf0] }
 0x268   :  { %6102 = vmatpush.bf16.msra.mxu3 %v9658_v48  ;;  %6037 = vmatpush.bf16.msra.mxu0 %v11186_v25  ;;  %v10863_v48 = vld [vmem:[#allocation10 + $0xcc8] sm:$0xf0]  ;;  %v9271_v25 = vld [vmem:[#allocation10 + $0x50] sm:$0xf0] }
 0x269   :  { %6067 = vmatpush.bf16.msrb.mxu1 %v9910_v54  ;;  %6076 = vmatpush.bf16.msrb.mxu2 %v10678_v58  ;;  %v12329_v54 = vld [vmem:[#allocation10 + $0x614] sm:$0xf]  ;;  %v10866_v30 = vor.u32 %v12536_v47, %v10863_v48  ;;  %v9725_v58 = vld [vmem:[#allocation10 + $0x398] sm:$0xf]  ;;  %v9274_v27 = vor.u32 %v12137_v61, %v9271_v25 }
 0x26a   :  { %v12265_v48 = vld [vmem:[#allocation10 + $0x414] sm:$0xf]  ;;  %v12194_v25 = vld [vmem:[#allocation10 + $0x1d4] sm:$0xf0] }
 0x26c   :  { %6103 = vmatpush.bf16.msra.mxu3 %v9594_v59  ;;  %6038 = vmatpush.bf16.msra.mxu0 %v11122_v3  ;;  %v12258_v59 = vld [vmem:[#allocation10 + $0x3d4] sm:$0xf0]  ;;  %v10042_v3 = vor.u32 %v12329_v54, %v10039_v35  ;;  %v10997_v35 = vld [vmem:[#allocation10 + $0xd90] sm:$0xf] }
 0x26d   :  { %6068 = vmatpush.bf16.msrb.mxu1 %v9846_v5  ;;  %6077 = vmatpush.bf16.msrb.mxu2 %v10614_v9  ;;  %v9726_v5 = vor.u32 %v12258_v59, %v9725_v58  ;;  %v12313_v9 = vld [vmem:[#allocation10 + $0x594] sm:$0xf]  ;;  %v10237_v54 = vld [vmem:[#allocation10 + $0x798] sm:$0xf]  ;;  %v12577_v58 = vld [vmem:[#allocation10 + $0xdcc] sm:$0xf0] }
 0x26e   :  { %v13282_v59 = vld [vmem:[#allocation12] sm:$0xff] }
 0x26f   :  { %v3249_v14 = vperm.slane %v13282_v59, 0 }
 0x270   :  { %6104 = vmatpush.bf16.msra.mxu3 %v9530_v11  ;;  %6039 = vmatpush.bf16.msra.mxu0 %v11058_v17  ;;  %v10802_v11 = vor.u32 %v12520_v60, %v10799_v63  ;;  %v10294_v17 = vor.u32 %v12401_v8, %v10293_v46  ;;  %v10554_v63 = vor.u32 %v12457_v52, %v10551_v34  ;;  %v12178_v8 = vld [vmem:[#allocation10 + $0x154] sm:$0xf0]  ;;  %v12393_v52 = vld [vmem:[#allocation10 + $0x814] sm:$0xf] }
 0x271   :  { %6069 = vmatpush.bf16.msrb.mxu1 %v9782_v19  ;;  %6078 = vmatpush.bf16.msrb.mxu2 %v10550_v20  ;;  %v9978_v19 = vor.u32 %v12313_v9, %v9975_v12  ;;  %v9662_v20 = vor.u32 %v12242_v45, %v9661_v55  ;;  %v10998_v46 = vor.u32 %v12577_v58, %v10997_v35  ;;  %v10173_v9 = vld [vmem:[#allocation10 + $0x718] sm:$0xf]  ;;  %v10933_v12 = vld [vmem:[#allocation10 + $0xd10] sm:$0xf]  ;;  %v10295_v34 = vld [vmem:[#allocation10 + $0x850] sm:$0xf0] }
 0x272   :  { %v12514_v35 = vld [vmem:[#allocation10 + $0xbd4] sm:$0xf0] }
 0x274   :  { %6105 = vmatpush.bf16.msra.mxu3 %v9466_v21  ;;  %6040 = vmatpush.bf16.msra.mxu0 %v10994_v2  ;;  %v9911_v21 = vld [vmem:[#allocation10 + $0x550] sm:$0xf0]  ;;  %v11125_v2 = vld [vmem:[#allocation10 + $0xe90] sm:$0xf] }
 0x275   :  { %6114 = vmatpush.bf16.msra.mxu1 %v10234_v24  ;;  %6079 = vmatpush.bf16.msrb.mxu2 %v10486_v40  ;;  %v10679_v24 = vld [vmem:[#allocation10 + $0xb50] sm:$0xf0]  ;;  %v9914_v29 = vor.u32 %v12297_v56, %v9911_v21  ;;  %v9598_v40 = vor.u32 %v12226_v38, %v9597_v51  ;;  %v11126_v7 = vor.u32 %v12609_v31, %v11125_v2  ;;  %v10109_v56 = vld [vmem:[#allocation10 + $0x698] sm:$0xf]  ;;  %v10869_v21 = vld [vmem:[#allocation10 + $0xc90] sm:$0xf] }
 0x276   :  { %6070 = vmatmul.bf16.vlgmr.msrb.gmra.mxu1 %v13251_v39  ;;  %v10682_v32 = vor.u32 %v12489_v23, %v10679_v24  ;;  %v12545_v23 = vld [vmem:[#allocation10 + $0xccc] sm:$0xf0]  ;;  %v10359_v31 = vld [vmem:[#allocation10 + $0x8d0] sm:$0xf0] }
 0x278   :  { %6106 = vmatpush.bf16.msra.mxu3 %v9402_v41  ;;  %6041 = vmatpush.bf16.msra.mxu0 %v10930_v37  ;;  %v9847_v41 = vld [vmem:[#allocation10 + $0x4d0] sm:$0xf0]  ;;  %v11061_v37 = vld [vmem:[#allocation10 + $0xe10] sm:$0xf] }
 0x279   :  { %6115 = vmatpush.bf16.msra.mxu1 %v10170_v43  ;;  %6080 = vmatpush.bf16.msrb.mxu2 %v10422_v49  ;;  %v10615_v43 = vld [vmem:[#allocation10 + $0xad0] sm:$0xf0]  ;;  %v9850_v44 = vor.u32 %v12281_v36, %v9847_v41  ;;  %v11062_v61 = vor.u32 %v12593_v57, %v11061_v37  ;;  %v10045_v41 = vld [vmem:[#allocation10 + $0x618] sm:$0xf]  ;;  %v12529_v37 = vld [vmem:[#allocation10 + $0xc4c] sm:$0xf0] }
 0x27a   :  { %v10618_v47 = vor.u32 %v12473_v42, %v10615_v43  ;;  %v9783_v49 = vld [vmem:[#allocation10 + $0x450] sm:$0xf0]  ;;  %v12338_v42 = vld [vmem:[#allocation10 + $0x654] sm:$0xf0]  ;;  %v12250_v43 = vld [vmem:[#allocation10 + $0x39c] sm:$0xf] }
 0x27b   :  { %v9786_v60 = vor.u32 %v12265_v48, %v9783_v49  ;;  %v11255_v48 = vld [vmem:[#allocation10 + $0xfd0] sm:$0xf0] }
 0x27c   :  { %6107 = vmatpush.bf16.msra.mxu3 %v9338_v50  ;;  %6042 = vmatpush.bf16.msra.mxu0 %v10866_v30  ;;  %v9534_v50 = vor.u32 %v12210_v10, %v9533_v16  ;;  %v12386_v30 = vld [vmem:[#allocation10 + $0x7d4] sm:$0xf0]  ;;  %v9727_v16 = vld [vmem:[#allocation10 + $0x3d8] sm:$0xf0]  ;;  %v10805_v10 = vld [vmem:[#allocation10 + $0xc10] sm:$0xf] }
 0x27d   :  { %6116 = vmatpush.bf16.msra.mxu1 %v10106_v53  ;;  %6081 = vmatpush.bf16.msrb.mxu2 %v10358_v28  ;;  %v9469_v53 = vld [vmem:[#allocation10 + $0x198] sm:$0xf]  ;;  %v10238_v33 = vor.u32 %v12386_v30, %v10237_v54 }
 0x27e   :  { %v12322_v54 = vld [vmem:[#allocation10 + $0x5d4] sm:$0xf0] }
 0x27f   :  { %v10749_v30 = vld [vmem:[#allocation10 + $0xb98] sm:$0xf] }
 0x280   :  { %6108 = vmatpush.bf16.msra.mxu3 %v9274_v27  ;;  %6043 = vmatpush.bf16.msra.mxu0 %v10802_v11  ;;  %v9470_v27 = vor.u32 %v12194_v25, %v9469_v53  ;;  %v12370_v11 = vld [vmem:[#allocation10 + $0x754] sm:$0xf0]  ;;  %v10806_v25 = vor.u32 %v12529_v37, %v10805_v10 }
 0x281   :  { %6117 = vmatpush.bf16.msra.mxu1 %v10042_v3  ;;  %6082 = vmatpush.bf16.msrb.mxu2 %v10294_v17  ;;  %v10487_v3 = vld [vmem:[#allocation10 + $0x9d0] sm:$0xf0]  ;;  %v10174_v45 = vor.u32 %v12370_v11, %v10173_v9  ;;  %v9981_v53 = vld [vmem:[#allocation10 + $0x598] sm:$0xf] }
 0x282   :  { %v12425_v17 = vld [vmem:[#allocation10 + $0x914] sm:$0xf]  ;;  %v12306_v9 = vld [vmem:[#allocation10 + $0x554] sm:$0xf0] }
 0x283   :  { %6109 = vmatmul.bf16.vlgmr.msra.gmra.mxu3 %v13246_v22  ;;  %6044 = vmatmul.bf16.vlgmr.msra.gmra.mxu0 %v13268_v1  ;;  %v10426_v24 = vor.u32 %v12425_v17, %v10423_v62  ;;  %v10685_v11 = vld [vmem:[#allocation10 + $0xb18] sm:$0xf]  ;;  %v11127_v17 = vld [vmem:[#allocation10 + $0xed0] sm:$0xf0]  ;;  %v3250_v62 = vperm.slane %v13282_v59, 1 }
 0x284   :  { %6153 = vmatpush.bf16.msrb.mxu3 %v9726_v5  ;;  %6088 = vmatpush.bf16.msrb.mxu0 %v11254_v15  ;;  %v9405_v5 = vld [vmem:[#allocation10 + $0x118] sm:$0xf]  ;;  %v10490_v15 = vor.u32 %v12441_v0, %v10487_v3  ;;  %v9982_v3 = vor.u32 %v12322_v54, %v9981_v53 }
 0x285   :  { %6118 = vmatpush.bf16.msra.mxu1 %v9978_v19  ;;  %6127 = vmatpush.bf16.msra.mxu2 %v10746_v4  ;;  %v9406_v55 = vor.u32 %v12178_v8, %v9405_v5  ;;  %v10934_v19 = vor.u32 %v12561_v13, %v10933_v12  ;;  %v12162_v4 = vld [vmem:[#allocation10 + $0xd4] sm:$0xf0]  ;;  %v10750_v5 = vor.u32 %v12514_v35, %v10749_v30  ;;  %v12170_v35 = vld [vmem:[#allocation10 + $0x11c] sm:$0xf] }
 0x286   :  { %6083 = vmatmul.bf16.vlgmr.msrb.gmra.mxu2 %v13259_v6  ;;  %v5850_v28 = vpop.f32.mrf.mxu3  ;;  %v9342_v38 = vor.u32 %v12162_v4, %v9341_v18  ;;  %v12498_v12 = vld [vmem:[#allocation10 + $0xb54] sm:$0xf0] }
 0x287   :  { %v5851_v36 = vadd.f32 %v5850_v28, %v3249_v14  ;;  %v10298_v28 = vor.u32 %v12393_v52, %v10295_v34  ;;  %v9853_v4 = vld [vmem:[#allocation10 + $0x498] sm:$0xf]  ;;  %v10999_v52 = vld [vmem:[#allocation10 + $0xdd0] sm:$0xf0] }
 0x288   :  { %6154 = vmatpush.bf16.msrb.mxu3 %v9662_v20  ;;  %6089 = vmatpush.bf16.msrb.mxu0 %v11190_v26  ;;  %v12354_v20 = vld [vmem:[#allocation10 + $0x6d4] sm:$0xf0]  ;;  %v12409_v26 = vld [vmem:[#allocation10 + $0x894] sm:$0xf] }
 0x289   :  { %6119 = vmatpush.bf16.msra.mxu1 %v9914_v29  ;;  %6128 = vmatpush.bf16.msra.mxu2 %v10682_v32  ;;  %v10110_v2 = vor.u32 %v12354_v20, %v10109_v56  ;;  %v9277_v29 = vld [vmem:[#allocation10 + $0x18] sm:$0xf] }
 0x28a   :  { %v12146_v32 = vld [vmem:[#allocation10 + $0x54] sm:$0xf0] }
 0x28b   :  { %v9278_v49 = vor.u32 %v12146_v32, %v9277_v29  ;;  %v12290_v20 = vld [vmem:[#allocation10 + $0x4d4] sm:$0xf0] }
 0x28c   :  { %6155 = vmatpush.bf16.msrb.mxu3 %v9598_v40  ;;  %6090 = vmatpush.bf16.msrb.mxu0 %v11126_v7  ;;  %v10870_v40 = vor.u32 %v12545_v23, %v10869_v21  ;;  %v10621_v21 = vld [vmem:[#allocation10 + $0xa98] sm:$0xf]  ;;  %v9854_v29 = vor.u32 %v12290_v20, %v9853_v4 }
 0x28d   :  { %6120 = vmatpush.bf16.msra.mxu1 %v9850_v44  ;;  %6129 = vmatpush.bf16.msra.mxu2 %v10618_v47  ;;  %v10362_v44 = vor.u32 %v12409_v26, %v10359_v31  ;;  %v12633_v47 = vld [vmem:[#allocation10 + $0xf94] sm:$0xf]  ;;  %v12482_v23 = vld [vmem:[#allocation10 + $0xad4] sm:$0xf0]  ;;  %v12202_v26 = vld [vmem:[#allocation10 + $0x21c] sm:$0xf] }
 0x28e   :  { %v5852_v51 = vpop.f32.mrf.mxu3  ;;  %v11258_v58 = vor.u32 %v12633_v47, %v11255_v48  ;;  %v10622_v32 = vor.u32 %v12482_v23, %v10621_v21  ;;  %v12378_v47 = vld [vmem:[#allocation10 + $0x79c] sm:$0xf]  ;;  %v10493_v54 = vld [vmem:[#allocation10 + $0x998] sm:$0xf] }
 0x28f   :  { %v9535_v51 = vld [vmem:[#allocation10 + $0x258] sm:$0xf0]  ;;  %v12450_v30 = vld [vmem:[#allocation10 + $0x9d4] sm:$0xf0] }
 0x290   :  { %6156 = vmatpush.bf16.msrb.mxu3 %v9534_v50  ;;  %6091 = vmatpush.bf16.msrb.mxu0 %v11062_v61  ;;  %v5863_v7 = vpop.f32.mrf.mxu1  ;;  %v10046_v50 = vor.u32 %v12338_v42, %v10045_v41  ;;  %v9730_v61 = vor.u32 %v12250_v43, %v9727_v16  ;;  %v9538_v42 = vor.u32 %v12202_v26, %v9535_v51  ;;  %v10557_v43 = vld [vmem:[#allocation10 + $0xa18] sm:$0xf]  ;;  %v12186_v16 = vld [vmem:[#allocation10 + $0x19c] sm:$0xf] }
 0x291   :  { %6121 = vmatpush.bf16.msra.mxu1 %v9786_v60  ;;  %6130 = vmatpush.bf16.msra.mxu2 %v10554_v63  ;;  %v13286_v57 = vadd.f32 %v5863_v7, %v5851_v36  ;;  %v12234_v60 = vld [vmem:[#allocation10 + $0x31c] sm:$0xf]  ;;  %v9789_v36 = vld [vmem:[#allocation10 + $0x418] sm:$0xf] }
 0x292   :  { %v9663_v63 = vld [vmem:[#allocation10 + $0x358] sm:$0xf0]  ;;  %v12466_v7 = vld [vmem:[#allocation10 + $0xa54] sm:$0xf0] }
 0x293   :  { %v9666_v8 = vor.u32 %v12234_v60, %v9663_v63  ;;  %v10239_v48 = vld [vmem:[#allocation10 + $0x7d8] sm:$0xf0]  ;;  %v10558_v53 = vor.u32 %v12466_v7, %v10557_v43  ;;  %v10365_v4 = vld [vmem:[#allocation10 + $0x898] sm:$0xf] }
 0x294   :  { %6157 = vmatpush.bf16.msrb.mxu3 %v9470_v27  ;;  %6092 = vmatpush.bf16.msrb.mxu0 %v10998_v46  ;;  %v12617_v27 = vld [vmem:[#allocation10 + $0xf14] sm:$0xf]  ;;  %v9917_v46 = vld [vmem:[#allocation10 + $0x518] sm:$0xf]  ;;  %v9407_v60 = vld [vmem:[#allocation10 + $0x158] sm:$0xf0] }
 0x295   :  { %6166 = vmatpush.bf16.msrb.mxu1 %v10238_v33  ;;  %6131 = vmatpush.bf16.msra.mxu2 %v10490_v15  ;;  %v11191_v33 = vld [vmem:[#allocation10 + $0xf50] sm:$0xf0]  ;;  %v12218_v15 = vld [vmem:[#allocation10 + $0x29c] sm:$0xf]  ;;  %v9918_v18 = vor.u32 %v12306_v9, %v9917_v46  ;;  %v12418_v21 = vld [vmem:[#allocation10 + $0x8d4] sm:$0xf0] }
 0x296   :  { %6122 = vmatmul.bf16.vlgmr.msra.gmra.mxu1 %v13251_v39  ;;  %v5902_v0 = vpop.f32.mrf.mxu3  ;;  %v11194_v14 = vor.u32 %v12617_v27, %v11191_v33  ;;  %v12362_v63 = vld [vmem:[#allocation10 + $0x71c] sm:$0xf]  ;;  %v12553_v27 = vld [vmem:[#allocation10 + $0xd14] sm:$0xf] }
 0x297   :  { %v5903_v41 = vadd.f32 %v5902_v0, %v3250_v62  ;;  %v10935_v33 = vld [vmem:[#allocation10 + $0xd50] sm:$0xf0]  ;;  %v12138_v23 = vld [vmem:[#allocation10 + $0x1c] sm:$0xf] }
 0x298   :  { %6158 = vmatpush.bf16.msrb.mxu3 %v9406_v55  ;;  %6093 = vmatpush.bf16.msrb.mxu0 %v10934_v19  ;;  %v5865_v13 = vpop.f32.mrf.mxu1  ;;  %v9599_v55 = vld [vmem:[#allocation10 + $0x2d8] sm:$0xf0]  ;;  %v10686_v19 = vor.u32 %v12498_v12, %v10685_v11  ;;  %v10429_v11 = vld [vmem:[#allocation10 + $0x918] sm:$0xf]  ;;  %v12537_v62 = vld [vmem:[#allocation10 + $0xc94] sm:$0xf] }
 0x299   :  { %6167 = vmatpush.bf16.msrb.mxu1 %v10174_v45  ;;  %6132 = vmatpush.bf16.msra.mxu2 %v10426_v24  ;;  %v12601_v45 = vld [vmem:[#allocation10 + $0xe94] sm:$0xf]  ;;  %v9602_v56 = vor.u32 %v12218_v15, %v9599_v55  ;;  %v12434_v12 = vld [vmem:[#allocation10 + $0x954] sm:$0xf0]  ;;  %v12154_v13 = vld [vmem:[#allocation10 + $0x9c] sm:$0xf]  ;;  %v10938_v15 = vor.u32 %v12553_v27, %v10935_v33 }
 0x29a   :  { %v11130_v24 = vor.u32 %v12601_v45, %v11127_v17  ;;  %v9343_v55 = vld [vmem:[#allocation10 + $0xd8] sm:$0xf0] }
 0x29b   :  { %v12346_v45 = vld [vmem:[#allocation10 + $0x69c] sm:$0xf] }
 0x29c   :  { %6159 = vmatpush.bf16.msrb.mxu3 %v9342_v38  ;;  %6094 = vmatpush.bf16.msrb.mxu0 %v10870_v40  ;;  %v12585_v38 = vld [vmem:[#allocation10 + $0xe14] sm:$0xf]  ;;  %v12274_v40 = vld [vmem:[#allocation10 + $0x454] sm:$0xf0]  ;;  %v10111_v17 = vld [vmem:[#allocation10 + $0x6d8] sm:$0xf0] }
 0x29d   :  { %6168 = vmatpush.bf16.msrb.mxu1 %v10110_v2  ;;  %6133 = vmatpush.bf16.msra.mxu2 %v10362_v44  ;;  %v11063_v2 = vld [vmem:[#allocation10 + $0xe50] sm:$0xf0]  ;;  %v9471_v44 = vld [vmem:[#allocation10 + $0x1d8] sm:$0xf0]  ;;  %v9790_v34 = vor.u32 %v12274_v40, %v9789_v36  ;;  %v10114_v20 = vor.u32 %v12346_v45, %v10111_v17  ;;  %v10366_v40 = vor.u32 %v12418_v21, %v10365_v4  ;;  %v9541_v21 = vld [vmem:[#allocation10 + $0x220] sm:$0xf] }
 0x29e   :  { %v5904_v31 = vpop.f32.mrf.mxu3  ;;  %v11066_v37 = vor.u32 %v12585_v38, %v11063_v2  ;;  %v12330_v51 = vld [vmem:[#allocation10 + $0x61c] sm:$0xf]  ;;  %v9733_v2 = vld [vmem:[#allocation10 + $0x3a0] sm:$0xf] }
 0x29f   :  { %v10047_v38 = vld [vmem:[#allocation10 + $0x658] sm:$0xf0]  ;;  %v12259_v31 = vld [vmem:[#allocation10 + $0x3dc] sm:$0xf0] }
 0x2a0   :  { %6160 = vmatpush.bf16.msrb.mxu3 %v9278_v49  ;;  %6095 = vmatpush.bf16.msrb.mxu0 %v10806_v25  ;;  %v5915_v10 = vpop.f32.mrf.mxu1  ;;  %v10242_v25 = vor.u32 %v12378_v47, %v10239_v48  ;;  %v12314_v47 = vld [vmem:[#allocation10 + $0x59c] sm:$0xf] }
 0x2a1   :  { %6169 = vmatpush.bf16.msrb.mxu1 %v10046_v50  ;;  %6134 = vmatpush.bf16.msra.mxu2 %v10298_v28  ;;  %v13292_v49 = vadd.f32 %v5915_v10, %v5903_v41  ;;  %v12569_v50 = vld [vmem:[#allocation10 + $0xd94] sm:$0xf]  ;;  %v10175_v28 = vld [vmem:[#allocation10 + $0x758] sm:$0xf0]  ;;  %v11261_v41 = vld [vmem:[#allocation10 + $0xf98] sm:$0xf]  ;;  %v10050_v10 = vor.u32 %v12330_v51, %v10047_v38 }
 0x2a2   :  { %v10178_v9 = vor.u32 %v12362_v63, %v10175_v28  ;;  %v12626_v63 = vld [vmem:[#allocation10 + $0xf54] sm:$0xf0]  ;;  %v12298_v33 = vld [vmem:[#allocation10 + $0x51c] sm:$0xf] }
 0x2a3   :  { %6161 = vmatmul.bf16.vlgmr.msrb.gmra.mxu3 %v13246_v22  ;;  %6096 = vmatmul.bf16.vlgmr.msrb.gmra.mxu0 %v13268_v1  ;;  %v12474_v4 = vld [vmem:[#allocation10 + $0xa9c] sm:$0xf] }
 0x2a4   :  { %6205 = vmatpush.bf16.msra.mxu3 %v9730_v61  ;;  %6140 = vmatpush.bf16.msra.mxu0 %v11258_v58  ;;  %v9474_v61 = vor.u32 %v12186_v16, %v9471_v44  ;;  %v11002_v58 = vor.u32 %v12569_v50, %v10999_v52  ;;  %v12402_v44 = vld [vmem:[#allocation10 + $0x854] sm:$0xf0]  ;;  %v9734_v50 = vor.u32 %v12259_v31, %v9733_v2  ;;  %v12266_v38 = vld [vmem:[#allocation10 + $0x41c] sm:$0xf] }
 0x2a5   :  { %6170 = vmatpush.bf16.msrb.mxu1 %v9982_v3  ;;  %6179 = vmatpush.bf16.msrb.mxu2 %v10750_v5  ;;  %v10494_v3 = vor.u32 %v12450_v30, %v10493_v54  ;;  %v9669_v30 = vld [vmem:[#allocation10 + $0x320] sm:$0xf]  ;;  %v9791_v2 = vld [vmem:[#allocation10 + $0x458] sm:$0xf0] }
 0x2a6   :  { %6135 = vmatmul.bf16.vlgmr.msra.gmra.mxu2 %v13259_v6  ;;  %v5876_v0 = vpop.f32.mrf.mxu2 }
 0x2a7   :  { %v13295_v5 = vadd.f32 %v5876_v0, %v13286_v57  ;;  %v10430_v57 = vor.u32 %v12434_v12, %v10429_v11  ;;  %v9605_v11 = vld [vmem:[#allocation10 + $0x2a0] sm:$0xf] }
 0x2a8   :  { %6206 = vmatpush.bf16.msra.mxu3 %v9666_v8  ;;  %6141 = vmatpush.bf16.msra.mxu0 %v11194_v14  ;;  %v5954_v46 = vpop.f32.mrf.mxu3  ;;  %v9410_v8 = vor.u32 %v12170_v35, %v9407_v60  ;;  %v5917_v14 = vpop.f32.mrf.mxu1  ;;  %v12243_v35 = vld [vmem:[#allocation10 + $0x35c] sm:$0xf0]  ;;  %v11197_v60 = vld [vmem:[#allocation10 + $0xf18] sm:$0xf] }
 0x2a9   :  { %6171 = vmatpush.bf16.msrb.mxu1 %v9918_v18  ;;  %6180 = vmatpush.bf16.msrb.mxu2 %v10686_v19  ;;  %v10871_v18 = vld [vmem:[#allocation10 + $0xcd0] sm:$0xf0]  ;;  %v3251_v19 = vperm.slane %v13282_v59, 2  ;;  %v9670_v0 = vor.u32 %v12243_v35, %v9669_v30  ;;  %v12227_v12 = vld [vmem:[#allocation10 + $0x2dc] sm:$0xf0] }
 0x2aa   :  { %v10874_v26 = vor.u32 %v12537_v62, %v10871_v18  ;;  %v11133_v14 = vld [vmem:[#allocation10 + $0xe98] sm:$0xf]  ;;  %v12282_v62 = vld [vmem:[#allocation10 + $0x49c] sm:$0xf]  ;;  %v12179_v30 = vld [vmem:[#allocation10 + $0x15c] sm:$0xf0] }
 0x2ab   :  { %v5955_v43 = vadd.f32 %v5954_v46, %v3251_v19  ;;  %v12490_v46 = vld [vmem:[#allocation10 + $0xb1c] sm:$0xf]  ;;  %v9606_v19 = vor.u32 %v12227_v12, %v9605_v11  ;;  %v10181_v35 = vld [vmem:[#allocation10 + $0x720] sm:$0xf] }
 0x2ac   :  { %6207 = vmatpush.bf16.msra.mxu3 %v9602_v56  ;;  %6142 = vmatpush.bf16.msra.mxu0 %v11130_v24  ;;  %v9346_v56 = vor.u32 %v12154_v13, %v9343_v55  ;;  %v9279_v24 = vld [vmem:[#allocation10 + $0x58] sm:$0xf0]  ;;  %v12163_v11 = vld [vmem:[#allocation10 + $0xdc] sm:$0xf0] }
 0x2ad   :  { %6172 = vmatpush.bf16.msrb.mxu1 %v9854_v29  ;;  %6181 = vmatpush.bf16.msrb.mxu2 %v10622_v32  ;;  %v12521_v29 = vld [vmem:[#allocation10 + $0xc14] sm:$0xf]  ;;  %v9282_v16 = vor.u32 %v12138_v23, %v9279_v24  ;;  %v12211_v23 = vld [vmem:[#allocation10 + $0x25c] sm:$0xf0]  ;;  %v11069_v24 = vld [vmem:[#allocation10 + $0xe18] sm:$0xf] }
 0x2ae   :  { %v10807_v32 = vld [vmem:[#allocation10 + $0xc50] sm:$0xf0]  ;;  %v5878_v36 = vpop.f32.mrf.mxu2  ;;  %v9542_v31 = vor.u32 %v12211_v23, %v9541_v21  ;;  %v10117_v12 = vld [vmem:[#allocation10 + $0x6a0] sm:$0xf] }
 0x2af   :  { %v10810_v52 = vor.u32 %v12521_v29, %v10807_v32  ;;  %v12458_v29 = vld [vmem:[#allocation10 + $0xa1c] sm:$0xf]  ;;  %v9477_v36 = vld [vmem:[#allocation10 + $0x1a0] sm:$0xf] }
 0x2b0   :  { %6208 = vmatpush.bf16.msra.mxu3 %v9538_v42  ;;  %6143 = vmatpush.bf16.msra.mxu0 %v11066_v37  ;;  %v12642_v42 = vld [vmem:[#allocation10 + $0xfd4] sm:$0xf0]  ;;  %v5956_v7 = vpop.f32.mrf.mxu3  ;;  %v5967_v48 = vpop.f32.mrf.mxu1  ;;  %v10559_v32 = vld [vmem:[#allocation10 + $0xa58] sm:$0xf0]  ;;  %v12147_v21 = vld [vmem:[#allocation10 + $0x5c] sm:$0xf0] }
 0x2b1   :  { %6173 = vmatpush.bf16.msrb.mxu1 %v9790_v34  ;;  %6182 = vmatpush.bf16.msrb.mxu2 %v10558_v53  ;;  %v10301_v37 = vld [vmem:[#allocation10 + $0x818] sm:$0xf]  ;;  %v9983_v34 = vld [vmem:[#allocation10 + $0x5d8] sm:$0xf0]  ;;  %v11262_v54 = vor.u32 %v12642_v42, %v11261_v41  ;;  %v12195_v42 = vld [vmem:[#allocation10 + $0x1dc] sm:$0xf0] }
 0x2b2   :  { %v12506_v53 = vld [vmem:[#allocation10 + $0xb9c] sm:$0xf]  ;;  %v9986_v28 = vor.u32 %v12314_v47, %v9983_v34  ;;  %v12387_v7 = vld [vmem:[#allocation10 + $0x7dc] sm:$0xf0]  ;;  %v9794_v47 = vor.u32 %v12266_v38, %v9791_v2  ;;  %v10813_v38 = vld [vmem:[#allocation10 + $0xc18] sm:$0xf] }
 0x2b3   :  { %v12442_v34 = vld [vmem:[#allocation10 + $0x99c] sm:$0xf]  ;;  %v12530_v2 = vld [vmem:[#allocation10 + $0xc54] sm:$0xf0] }
 0x2b4   :  { %6209 = vmatpush.bf16.msra.mxu3 %v9474_v61  ;;  %6144 = vmatpush.bf16.msra.mxu0 %v11002_v58  ;;  %v10751_v61 = vld [vmem:[#allocation10 + $0xbd8] sm:$0xf0]  ;;  %v10302_v58 = vor.u32 %v12402_v44, %v10301_v37  ;;  %v11005_v37 = vld [vmem:[#allocation10 + $0xd98] sm:$0xf] }
 0x2b5   :  { %6218 = vmatpush.bf16.msra.mxu1 %v10242_v25  ;;  %6183 = vmatpush.bf16.msrb.mxu2 %v10494_v3  ;;  %v13299_v25 = vadd.f32 %v5967_v48, %v5955_v43  ;;  %v10754_v27 = vor.u32 %v12506_v53, %v10751_v61  ;;  %v9919_v3 = vld [vmem:[#allocation10 + $0x558] sm:$0xf0]  ;;  %v10245_v43 = vld [vmem:[#allocation10 + $0x7a0] sm:$0xf]  ;;  %v12578_v44 = vld [vmem:[#allocation10 + $0xdd4] sm:$0xf0]  ;;  %v10562_v48 = vor.u32 %v12458_v29, %v10559_v32 }
 0x2b6   :  { %6174 = vmatmul.bf16.vlgmr.msrb.gmra.mxu1 %v13251_v39  ;;  %v5928_v13 = vpop.f32.mrf.mxu2  ;;  %v9922_v45 = vor.u32 %v12298_v33, %v9919_v3  ;;  %v10495_v53 = vld [vmem:[#allocation10 + $0x9d8] sm:$0xf0]  ;;  %v9413_v61 = vld [vmem:[#allocation10 + $0x120] sm:$0xf] }
 0x2b7   :  { %v13303_v55 = vadd.f32 %v5928_v13, %v13292_v49  ;;  %v12594_v49 = vld [vmem:[#allocation10 + $0xe54] sm:$0xf0]  ;;  %v10431_v3 = vld [vmem:[#allocation10 + $0x958] sm:$0xf0]  ;;  %v12355_v13 = vld [vmem:[#allocation10 + $0x6dc] sm:$0xf0] }
 0x2b8   :  { %6210 = vmatpush.bf16.msra.mxu3 %v9410_v8  ;;  %6145 = vmatpush.bf16.msra.mxu0 %v10938_v15  ;;  %v10687_v8 = vld [vmem:[#allocation10 + $0xb58] sm:$0xf0]  ;;  %v12610_v15 = vld [vmem:[#allocation10 + $0xed4] sm:$0xf0]  ;;  %v5969_v18 = vpop.f32.mrf.mxu1  ;;  %v11070_v41 = vor.u32 %v12594_v49, %v11069_v24  ;;  %v10053_v24 = vld [vmem:[#allocation10 + $0x620] sm:$0xf] }
 0x2b9   :  { %6219 = vmatpush.bf16.msra.mxu1 %v10178_v9  ;;  %6184 = vmatpush.bf16.msrb.mxu2 %v10430_v57  ;;  %v11198_v9 = vor.u32 %v12626_v63, %v11197_v60  ;;  %v10690_v17 = vor.u32 %v12490_v46, %v10687_v8  ;;  %v9855_v57 = vld [vmem:[#allocation10 + $0x4d8] sm:$0xf0]  ;;  %v12562_v60 = vld [vmem:[#allocation10 + $0xd54] sm:$0xf0]  ;;  %v9349_v46 = vld [vmem:[#allocation10 + $0xa0] sm:$0xf] }
 0x2ba   :  { %v12410_v18 = vld [vmem:[#allocation10 + $0x89c] sm:$0xf]  ;;  %v12339_v49 = vld [vmem:[#allocation10 + $0x65c] sm:$0xf0] }
 0x2bb   :  { %v12634_v32 = vld [vmem:[#allocation10 + $0xf9c] sm:$0xf] }
 0x2bc   :  { %6211 = vmatpush.bf16.msra.mxu3 %v9346_v56  ;;  %6146 = vmatpush.bf16.msra.mxu0 %v10874_v26  ;;  %v10623_v56 = vld [vmem:[#allocation10 + $0xad8] sm:$0xf0]  ;;  %v9858_v26 = vor.u32 %v12282_v62, %v9855_v57  ;;  %v9350_v57 = vor.u32 %v12163_v11, %v9349_v46 }
 0x2bd   :  { %6220 = vmatpush.bf16.msra.mxu1 %v10114_v20  ;;  %6185 = vmatpush.bf16.msrb.mxu2 %v10366_v40  ;;  %v11134_v20 = vor.u32 %v12610_v15, %v11133_v14  ;;  %v10626_v51 = vor.u32 %v12474_v4, %v10623_v56  ;;  %v10877_v14 = vld [vmem:[#allocation10 + $0xc98] sm:$0xf]  ;;  %v10118_v4 = vor.u32 %v12355_v13, %v10117_v12  ;;  %v10367_v56 = vld [vmem:[#allocation10 + $0x8d8] sm:$0xf0] }
 0x2be   :  { %v12546_v15 = vld [vmem:[#allocation10 + $0xcd4] sm:$0xf0]  ;;  %v10370_v29 = vor.u32 %v12410_v18, %v10367_v56  ;;  %v12602_v11 = vld [vmem:[#allocation10 + $0xe9c] sm:$0xf]  ;;  %v10629_v18 = vld [vmem:[#allocation10 + $0xaa0] sm:$0xf] }
 0x2bf   :  { %v10878_v23 = vor.u32 %v12546_v15, %v10877_v14  ;;  %v11135_v12 = vld [vmem:[#allocation10 + $0xed8] sm:$0xf0]  ;;  %v9861_v15 = vld [vmem:[#allocation10 + $0x4a0] sm:$0xf] }
 0x2c0   :  { %6212 = vmatpush.bf16.msra.mxu3 %v9282_v16  ;;  %6147 = vmatpush.bf16.msra.mxu0 %v10810_v52  ;;  %v5889_v40 = vpop.f32.mrf.mxu0  ;;  %v10246_v52 = vor.u32 %v12387_v7, %v10245_v43  ;;  %v9989_v43 = vld [vmem:[#allocation10 + $0x5a0] sm:$0xf]  ;;  %v11138_v56 = vor.u32 %v12602_v11, %v11135_v12  ;;  %v10119_v11 = vld [vmem:[#allocation10 + $0x6e0] sm:$0xf0]  ;;  %v10879_v12 = vld [vmem:[#allocation10 + $0xcd8] sm:$0xf0] }
 0x2c1   :  { %6221 = vmatpush.bf16.msra.mxu1 %v10050_v10  ;;  %6186 = vmatpush.bf16.msrb.mxu2 %v10302_v58  ;;  %v13308_v16 = vadd.f32 %v5889_v40, %v13295_v5  ;;  %v5930_v10 = vpop.f32.mrf.mxu2  ;;  %v12371_v58 = vld [vmem:[#allocation10 + $0x75c] sm:$0xf0]  ;;  %v10941_v5 = vld [vmem:[#allocation10 + $0xd18] sm:$0xf]  ;;  %v10054_v40 = vor.u32 %v12339_v49, %v10053_v24  ;;  %v11071_v24 = vld [vmem:[#allocation10 + $0xe58] sm:$0xf0] }
 0x2c2   :  { %v10182_v33 = vor.u32 %v12371_v58, %v10181_v35 }
 0x2c3   :  { %6213 = vmatmul.bf16.vlgmr.msra.gmra.mxu3 %v13246_v22  ;;  %6148 = vmatmul.bf16.vlgmr.msra.gmra.mxu0 %v13268_v1 }
 0x2c4   :  { %6257 = vmatpush.bf16.msrb.mxu3 %v9734_v50  ;;  %6192 = vmatpush.bf16.msrb.mxu0 %v11262_v54  ;;  %v9478_v50 = vor.u32 %v12195_v42, %v9477_v36  ;;  %v11006_v54 = vor.u32 %v12578_v44, %v11005_v37  ;;  %v11263_v36 = vld [vmem:[#allocation10 + $0xfd8] sm:$0xf0]  ;;  %v10814_v44 = vor.u32 %v12530_v2, %v10813_v38  ;;  %v12275_v38 = vld [vmem:[#allocation10 + $0x45c] sm:$0xf0] }
 0x2c5   :  { %6222 = vmatpush.bf16.msra.mxu1 %v9986_v28  ;;  %6231 = vmatpush.bf16.msra.mxu2 %v10754_v27  ;;  %v10498_v28 = vor.u32 %v12442_v34, %v10495_v53  ;;  %v9414_v27 = vor.u32 %v12179_v30, %v9413_v61  ;;  %v10303_v42 = vld [vmem:[#allocation10 + $0x858] sm:$0xf0]  ;;  %v11266_v53 = vor.u32 %v12634_v32, %v11263_v36  ;;  %v12235_v61 = vld [vmem:[#allocation10 + $0x324] sm:$0xf] }
 0x2c6   :  { %6187 = vmatmul.bf16.vlgmr.msrb.gmra.mxu2 %v13259_v6  ;;  %v6006_v63 = vpop.f32.mrf.mxu3  ;;  %v12187_v32 = vld [vmem:[#allocation10 + $0x1a4] sm:$0xf] }
 0x2c8   :  { %6258 = vmatpush.bf16.msrb.mxu3 %v9670_v0  ;;  %6193 = vmatpush.bf16.msrb.mxu0 %v11198_v9  ;;  %v12426_v0 = vld [vmem:[#allocation10 + $0x91c] sm:$0xf]  ;;  %v5891_v8 = vpop.f32.mrf.mxu0  ;;  %v10942_v9 = vor.u32 %v12562_v60, %v10941_v5 }
 0x2c9   :  { %6223 = vmatpush.bf16.msra.mxu1 %v9922_v45  ;;  %6232 = vmatpush.bf16.msra.mxu2 %v10690_v17  ;;  %v3252_v45 = vperm.slane %v13282_v59, 3  ;;  %v5980_v17 = vpop.f32.mrf.mxu2  ;;  %v10434_v62 = vor.u32 %v12426_v0, %v10431_v3  ;;  %v12618_v5 = vld [vmem:[#allocation10 + $0xf1c] sm:$0xf]  ;;  %v10693_v0 = vld [vmem:[#allocation10 + $0xb20] sm:$0xf] }
 0x2ca   :  { %v11199_v60 = vld [vmem:[#allocation10 + $0xf58] sm:$0xf0]  ;;  %v12499_v3 = vld [vmem:[#allocation10 + $0xb5c] sm:$0xf0]  ;;  %v12219_v8 = vld [vmem:[#allocation10 + $0x2a4] sm:$0xf] }
 0x2cb   :  { %v6007_v7 = vadd.f32 %v6006_v63, %v3252_v45  ;;  %v11202_v46 = vor.u32 %v12618_v5, %v11199_v60  ;;  %v10694_v14 = vor.u32 %v12499_v3, %v10693_v0  ;;  %v12554_v5 = vld [vmem:[#allocation10 + $0xd1c] sm:$0xf]  ;;  %v12155_v0 = vld [vmem:[#allocation10 + $0xa4] sm:$0xf] }
 0x2cc   :  { %6259 = vmatpush.bf16.msrb.mxu3 %v9606_v19  ;;  %6194 = vmatpush.bf16.msrb.mxu0 %v11134_v20  ;;  %v13313_v19 = vadd.f32 %v5980_v17, %v13299_v25  ;;  %v9285_v20 = vld [vmem:[#allocation10 + $0x20] sm:$0xf]  ;;  %v10943_v60 = vld [vmem:[#allocation10 + $0xd58] sm:$0xf0] }
 0x2cd   :  { %6224 = vmatpush.bf16.msra.mxu1 %v9858_v26  ;;  %6233 = vmatpush.bf16.msra.mxu2 %v10626_v51  ;;  %v12251_v26 = vld [vmem:[#allocation10 + $0x3a4] sm:$0xf]  ;;  %v9286_v25 = vor.u32 %v12147_v21, %v9285_v20 }
 0x2ce   :  { %v9735_v51 = vld [vmem:[#allocation10 + $0x3e0] sm:$0xf0] }
 0x2cf   :  { %v9738_v37 = vor.u32 %v12251_v26, %v9735_v51  ;;  %v12203_v20 = vld [vmem:[#allocation10 + $0x224] sm:$0xf]  ;;  %v9797_v51 = vld [vmem:[#allocation10 + $0x420] sm:$0xf] }
 0x2d0   :  { %6260 = vmatpush.bf16.msrb.mxu3 %v9542_v31  ;;  %6195 = vmatpush.bf16.msrb.mxu0 %v11070_v41  ;;  %v6008_v31 = vpop.f32.mrf.mxu3  ;;  %v12394_v41 = vld [vmem:[#allocation10 + $0x81c] sm:$0xf]  ;;  %v5941_v10 = vpop.f32.mrf.mxu0  ;;  %v9543_v21 = vld [vmem:[#allocation10 + $0x260] sm:$0xf0] }
 0x2d1   :  { %6225 = vmatpush.bf16.msra.mxu1 %v9794_v47  ;;  %6234 = vmatpush.bf16.msra.mxu2 %v10562_v48  ;;  %v12323_v47 = vld [vmem:[#allocation10 + $0x5dc] sm:$0xf0]  ;;  %v5982_v35 = vpop.f32.mrf.mxu2  ;;  %v10306_v58 = vor.u32 %v12394_v41, %v10303_v42  ;;  %v9546_v2 = vor.u32 %v12203_v20, %v9543_v21  ;;  %v10247_v41 = vld [vmem:[#allocation10 + $0x7e0] sm:$0xf0]  ;;  %v12570_v42 = vld [vmem:[#allocation10 + $0xd9c] sm:$0xf] }
 0x2d2   :  { %v10757_v48 = vld [vmem:[#allocation10 + $0xba0] sm:$0xf]  ;;  %v9990_v63 = vor.u32 %v12323_v47, %v9989_v43  ;;  %v11007_v43 = vld [vmem:[#allocation10 + $0xdd8] sm:$0xf0]  ;;  %v10183_v35 = vld [vmem:[#allocation10 + $0x760] sm:$0xf0] }
 0x2d3   :  { %v6019_v34 = vpop.f32.mrf.mxu1  ;;  %v10565_v31 = vld [vmem:[#allocation10 + $0xa20] sm:$0xf] }
 0x2d4   :  { %6261 = vmatpush.bf16.msrb.mxu3 %v9478_v50  ;;  %6196 = vmatpush.bf16.msrb.mxu0 %v11006_v54  ;;  %v12515_v50 = vld [vmem:[#allocation10 + $0xbdc] sm:$0xf0]  ;;  %v9671_v54 = vld [vmem:[#allocation10 + $0x360] sm:$0xf0]  ;;  %v13318_v30 = vadd.f32 %v6019_v34, %v6007_v7  ;;  %v9798_v7 = vor.u32 %v12275_v38, %v9797_v51  ;;  %v10815_v51 = vld [vmem:[#allocation10 + $0xc58] sm:$0xf0] }
 0x2d5   :  { %6270 = vmatpush.bf16.msrb.mxu1 %v10246_v52  ;;  %6235 = vmatpush.bf16.msra.mxu2 %v10498_v28  ;;  %v13316_v52 = vadd.f32 %v5941_v10, %v13303_v55  ;;  %v10758_v28 = vor.u32 %v12515_v50, %v10757_v48  ;;  %v9674_v55 = vor.u32 %v12235_v61, %v9671_v54  ;;  %v10501_v47 = vld [vmem:[#allocation10 + $0x9a0] sm:$0xf]  ;;  %v12171_v50 = vld [vmem:[#allocation10 + $0x124] sm:$0xf] }
 0x2d6   :  { %6226 = vmatmul.bf16.vlgmr.msra.gmra.mxu1 %v13251_v39  ;;  %v12451_v48 = vld [vmem:[#allocation10 + $0x9dc] sm:$0xf0]  ;;  %v9415_v61 = vld [vmem:[#allocation10 + $0x160] sm:$0xf0] }
 0x2d7   :  { %v12363_v54 = vld [vmem:[#allocation10 + $0x724] sm:$0xf] }
 0x2d8   :  { %6262 = vmatpush.bf16.msrb.mxu3 %v9414_v27  ;;  %6197 = vmatpush.bf16.msrb.mxu0 %v10942_v9  ;;  %v9925_v27 = vld [vmem:[#allocation10 + $0x520] sm:$0xf]  ;;  %v9607_v9 = vld [vmem:[#allocation10 + $0x2e0] sm:$0xf0]  ;;  %v5943_v45 = vpop.f32.mrf.mxu0 }
 0x2d9   :  { %6271 = vmatpush.bf16.msrb.mxu1 %v10182_v33  ;;  %6236 = vmatpush.bf16.msra.mxu2 %v10434_v62  ;;  %v12307_v33 = vld [vmem:[#allocation10 + $0x55c] sm:$0xf0]  ;;  %v9610_v17 = vor.u32 %v12219_v8, %v9607_v9  ;;  %v9351_v8 = vld [vmem:[#allocation10 + $0xe0] sm:$0xf0] }
 0x2da   :  { %v9926_v13 = vor.u32 %v12307_v33, %v9925_v27  ;;  %v12291_v62 = vld [vmem:[#allocation10 + $0x4dc] sm:$0xf0]  ;;  %v10186_v27 = vor.u32 %v12363_v54, %v10183_v35  ;;  %v12347_v9 = vld [vmem:[#allocation10 + $0x6a4] sm:$0xf] }
 0x2db   :  { %v9862_v49 = vor.u32 %v12291_v62, %v9861_v15  ;;  %v12435_v33 = vld [vmem:[#allocation10 + $0x95c] sm:$0xf0]  ;;  %v9354_v62 = vor.u32 %v12155_v0, %v9351_v8 }
 0x2dc   :  { %6263 = vmatpush.bf16.msrb.mxu3 %v9350_v57  ;;  %6198 = vmatpush.bf16.msrb.mxu0 %v10878_v23  ;;  %v12483_v57 = vld [vmem:[#allocation10 + $0xadc] sm:$0xf0]  ;;  %v12586_v23 = vld [vmem:[#allocation10 + $0xe1c] sm:$0xf] }
 0x2dd   :  { %6272 = vmatpush.bf16.msrb.mxu1 %v10118_v4  ;;  %6237 = vmatpush.bf16.msra.mxu2 %v10370_v29  ;;  %v6021_v4 = vpop.f32.mrf.mxu1  ;;  %v10630_v26 = vor.u32 %v12483_v57, %v10629_v18  ;;  %v12467_v29 = vld [vmem:[#allocation10 + $0xa5c] sm:$0xf0]  ;;  %v11074_v36 = vor.u32 %v12586_v23, %v11071_v24  ;;  %v10122_v18 = vor.u32 %v12347_v9, %v10119_v11  ;;  %v12331_v23 = vld [vmem:[#allocation10 + $0x624] sm:$0xf] }
 0x2de   :  { %v10566_v10 = vor.u32 %v12467_v29, %v10565_v31  ;;  %v10373_v45 = vld [vmem:[#allocation10 + $0x8a0] sm:$0xf]  ;;  %v12139_v4 = vld [vmem:[#allocation10 + $0x24] sm:$0xf] }
 0x2df   :  { %v12419_v57 = vld [vmem:[#allocation10 + $0x8dc] sm:$0xf0]  ;;  %v10055_v24 = vld [vmem:[#allocation10 + $0x660] sm:$0xf0] }
 0x2e0   :  { %6264 = vmatpush.bf16.msrb.mxu3 %v9286_v25  ;;  %6199 = vmatpush.bf16.msrb.mxu0 %v10814_v44  ;;  %v9479_v25 = vld [vmem:[#allocation10 + $0x1e0] sm:$0xf0]  ;;  %v5993_v34 = vpop.f32.mrf.mxu0  ;;  %v10374_v38 = vor.u32 %v12419_v57, %v10373_v45  ;;  %v10058_v29 = vor.u32 %v12331_v23, %v10055_v24  ;;  %v11205_v54 = vld [vmem:[#allocation10 + $0xf20] sm:$0xf]  ;;  %v9549_v57 = vld [vmem:[#allocation10 + $0x228] sm:$0xf] }
 0x2e1   :  { %6273 = vmatpush.bf16.msrb.mxu1 %v10054_v40  ;;  %6238 = vmatpush.bf16.msra.mxu2 %v10306_v58  ;;  %v12379_v40 = vld [vmem:[#allocation10 + $0x7a4] sm:$0xf]  ;;  %v13324_v58 = vadd.f32 %v5993_v34, %v13313_v19  ;;  %v12538_v19 = vld [vmem:[#allocation10 + $0xc9c] sm:$0xf]  ;;  %v12627_v35 = vld [vmem:[#allocation10 + $0xf5c] sm:$0xf0] }
 0x2e2   :  { %v10250_v44 = vor.u32 %v12379_v40, %v10247_v41  ;;  %v10882_v21 = vor.u32 %v12538_v19, %v10879_v12  ;;  %v11206_v0 = vor.u32 %v12627_v35, %v11205_v54  ;;  %v11141_v8 = vld [vmem:[#allocation10 + $0xea0] sm:$0xf]  ;;  %v12283_v12 = vld [vmem:[#allocation10 + $0x4a4] sm:$0xf] }
 0x2e3   :  { %6265 = vmatmul.bf16.vlgmr.msrb.gmra.mxu3 %v13246_v22  ;;  %6200 = vmatmul.bf16.vlgmr.msrb.gmra.mxu0 %v13268_v1  ;;  %v12611_v9 = vld [vmem:[#allocation10 + $0xedc] sm:$0xf0]  ;;  %v10631_v45 = vld [vmem:[#allocation10 + $0xae0] sm:$0xf0] }
 0x2e4   :  { %6309 = vmatpush.bf16.msra.mxu3 %v9738_v37  ;;  %6244 = vmatpush.bf16.msra.mxu0 %v11266_v53  ;;  %v9482_v37 = vor.u32 %v12187_v32, %v9479_v25  ;;  %v11010_v53 = vor.u32 %v12570_v42, %v11007_v43  ;;  %v10309_v32 = vld [vmem:[#allocation10 + $0x820] sm:$0xf]  ;;  %v12315_v25 = vld [vmem:[#allocation10 + $0x5a4] sm:$0xf] }
 0x2e5   :  { %6274 = vmatpush.bf16.msrb.mxu1 %v9990_v63  ;;  %6283 = vmatpush.bf16.msrb.mxu2 %v10758_v28  ;;  %v10502_v63 = vor.u32 %v12451_v48, %v10501_v47  ;;  %v9418_v28 = vor.u32 %v12171_v50, %v9415_v61  ;;  %v9677_v48 = vld [vmem:[#allocation10 + $0x328] sm:$0xf]  ;;  %v12267_v24 = vld [vmem:[#allocation10 + $0x424] sm:$0xf]  ;;  %v12563_v54 = vld [vmem:[#allocation10 + $0xd5c] sm:$0xf0] }
 0x2e6   :  { %6239 = vmatmul.bf16.vlgmr.msra.gmra.mxu2 %v13259_v6  ;;  %v6058_v3 = vpop.f32.mrf.mxu3  ;;  %v12244_v50 = vld [vmem:[#allocation10 + $0x364] sm:$0xf0] }
 0x2e8   :  { %6310 = vmatpush.bf16.msra.mxu3 %v9674_v55  ;;  %6245 = vmatpush.bf16.msra.mxu0 %v11202_v46  ;;  %v10437_v55 = vld [vmem:[#allocation10 + $0x920] sm:$0xf]  ;;  %v10946_v46 = vor.u32 %v12554_v5, %v10943_v60  ;;  %v5995_v20 = vpop.f32.mrf.mxu0 }
 0x2e9   :  { %6275 = vmatpush.bf16.msrb.mxu1 %v9926_v13  ;;  %6284 = vmatpush.bf16.msrb.mxu2 %v10694_v14  ;;  %v3253_v13 = vperm.slane %v13282_v59, 4  ;;  %v6032_v14 = vpop.f32.mrf.mxu2  ;;  %v10438_v15 = vor.u32 %v12435_v33, %v10437_v55  ;;  %v9741_v59 = vld [vmem:[#allocation10 + $0x3a8] sm:$0xf]  ;;  %v12491_v55 = vld [vmem:[#allocation10 + $0xb24] sm:$0xf] }
 0x2ea   :  { %v10695_v33 = vld [vmem:[#allocation10 + $0xb60] sm:$0xf0]  ;;  %v12595_v20 = vld [vmem:[#allocation10 + $0xe5c] sm:$0xf0] }
 0x2eb   :  { %v6059_v40 = vadd.f32 %v6058_v3, %v3253_v13  ;;  %v9613_v3 = vld [vmem:[#allocation10 + $0x2a8] sm:$0xf]  ;;  %v10698_v19 = vor.u32 %v12491_v55, %v10695_v33 }
 0x2ec   :  { %6311 = vmatpush.bf16.msra.mxu3 %v9610_v17  ;;  %6246 = vmatpush.bf16.msra.mxu0 %v11138_v56  ;;  %v13329_v17 = vadd.f32 %v6032_v14, %v13318_v30  ;;  %v9287_v56 = vld [vmem:[#allocation10 + $0x60] sm:$0xf0]  ;;  %v11269_v30 = vld [vmem:[#allocation10 + $0xfa0] sm:$0xf]  ;;  %v9357_v55 = vld [vmem:[#allocation10 + $0xa8] sm:$0xf] }
 0x2ed   :  { %6276 = vmatpush.bf16.msrb.mxu1 %v9862_v49  ;;  %6285 = vmatpush.bf16.msrb.mxu2 %v10630_v26  ;;  %v12260_v49 = vld [vmem:[#allocation10 + $0x3e4] sm:$0xf0]  ;;  %v12522_v26 = vld [vmem:[#allocation10 + $0xc1c] sm:$0xf]  ;;  %v9290_v31 = vor.u32 %v12139_v4, %v9287_v56  ;;  %v9863_v14 = vld [vmem:[#allocation10 + $0x4e0] sm:$0xf0] }
 0x2ee   :  { %v6060_v41 = vpop.f32.mrf.mxu3  ;;  %v9742_v42 = vor.u32 %v12260_v49, %v9741_v59  ;;  %v10818_v43 = vor.u32 %v12522_v26, %v10815_v51  ;;  %v12212_v4 = vld [vmem:[#allocation10 + $0x264] sm:$0xf0]  ;;  %v11077_v56 = vld [vmem:[#allocation10 + $0xe20] sm:$0xf]  ;;  %v9799_v59 = vld [vmem:[#allocation10 + $0x460] sm:$0xf0] }
 0x2ef   :  { %v9550_v49 = vor.u32 %v12212_v4, %v9549_v57  ;;  %v12459_v26 = vld [vmem:[#allocation10 + $0xa24] sm:$0xf] }
 0x2f0   :  { %6312 = vmatpush.bf16.msra.mxu3 %v9546_v2  ;;  %6247 = vmatpush.bf16.msra.mxu0 %v11074_v36  ;;  %v12643_v2 = vld [vmem:[#allocation10 + $0xfdc] sm:$0xf0]  ;;  %v10567_v51 = vld [vmem:[#allocation10 + $0xa60] sm:$0xf0] }
 0x2f1   :  { %6277 = vmatpush.bf16.msrb.mxu1 %v9798_v7  ;;  %6286 = vmatpush.bf16.msrb.mxu2 %v10566_v10  ;;  %v12403_v36 = vld [vmem:[#allocation10 + $0x85c] sm:$0xf0]  ;;  %v9991_v7 = vld [vmem:[#allocation10 + $0x5e0] sm:$0xf0]  ;;  %v11270_v47 = vor.u32 %v12643_v2, %v11269_v30  ;;  %v11078_v30 = vor.u32 %v12595_v20, %v11077_v56  ;;  %v12196_v2 = vld [vmem:[#allocation10 + $0x1e4] sm:$0xf0] }
 0x2f2   :  { %v12507_v10 = vld [vmem:[#allocation10 + $0xba4] sm:$0xf]  ;;  %v10310_v61 = vor.u32 %v12403_v36, %v10309_v32  ;;  %v9994_v5 = vor.u32 %v12315_v25, %v9991_v7  ;;  %v11013_v32 = vld [vmem:[#allocation10 + $0xda0] sm:$0xf]  ;;  %v9802_v25 = vor.u32 %v12267_v24, %v9799_v59  ;;  %v10061_v20 = vld [vmem:[#allocation10 + $0x628] sm:$0xf] }
 0x2f3   :  { %v12579_v36 = vld [vmem:[#allocation10 + $0xddc] sm:$0xf0]  ;;  %v10503_v7 = vld [vmem:[#allocation10 + $0x9e0] sm:$0xf0]  ;;  %v9743_v24 = vld [vmem:[#allocation10 + $0x3e8] sm:$0xf0] }
 0x2f4   :  { %6313 = vmatpush.bf16.msra.mxu3 %v9482_v37  ;;  %6248 = vmatpush.bf16.msra.mxu0 %v11010_v53  ;;  %v10759_v37 = vld [vmem:[#allocation10 + $0xbe0] sm:$0xf0]  ;;  %v6034_v53 = vpop.f32.mrf.mxu2  ;;  %v10821_v59 = vld [vmem:[#allocation10 + $0xc20] sm:$0xf] }
 0x2f5   :  { %6322 = vmatpush.bf16.msra.mxu1 %v10250_v44  ;;  %6287 = vmatpush.bf16.msrb.mxu2 %v10502_v63  ;;  %v6071_v44 = vpop.f32.mrf.mxu1  ;;  %v10762_v60 = vor.u32 %v12507_v10, %v10759_v37  ;;  %v12299_v63 = vld [vmem:[#allocation10 + $0x524] sm:$0xf]  ;;  %v9421_v10 = vld [vmem:[#allocation10 + $0x128] sm:$0xf] }
 0x2f6   :  { %6278 = vmatmul.bf16.vlgmr.msrb.gmra.mxu1 %v13251_v39  ;;  %v13331_v34 = vadd.f32 %v6071_v44, %v6059_v40  ;;  %v10570_v40 = vor.u32 %v12459_v26, %v10567_v51  ;;  %v11014_v44 = vor.u32 %v12579_v36, %v11013_v32  ;;  %v12635_v51 = vld [vmem:[#allocation10 + $0xfa4] sm:$0xf]  ;;  %v9997_v32 = vld [vmem:[#allocation10 + $0x5a8] sm:$0xf] }
 0x2f8   :  { %6314 = vmatpush.bf16.msra.mxu3 %v9418_v28  ;;  %6249 = vmatpush.bf16.msra.mxu0 %v10946_v46  ;;  %v9678_v28 = vor.u32 %v12244_v50, %v9677_v48  ;;  %v12228_v46 = vld [vmem:[#allocation10 + $0x2e4] sm:$0xf0] }
 0x2f9   :  { %6323 = vmatpush.bf16.msra.mxu1 %v10186_v27  ;;  %6288 = vmatpush.bf16.msrb.mxu2 %v10438_v15  ;;  %v9927_v27 = vld [vmem:[#allocation10 + $0x560] sm:$0xf0]  ;;  %v9614_v13 = vor.u32 %v12228_v46, %v9613_v3  ;;  %v10189_v48 = vld [vmem:[#allocation10 + $0x728] sm:$0xf] }
 0x2fa   :  { %v9930_v11 = vor.u32 %v12299_v63, %v9927_v27  ;;  %v12475_v15 = vld [vmem:[#allocation10 + $0xaa4] sm:$0xf]  ;;  %v12372_v50 = vld [vmem:[#allocation10 + $0x764] sm:$0xf0] }
 0x2fb   :  { %v10634_v23 = vor.u32 %v12475_v15, %v10631_v45  ;;  %v10190_v63 = vor.u32 %v12372_v50, %v10189_v48  ;;  %v10439_v27 = vld [vmem:[#allocation10 + $0x960] sm:$0xf0]  ;;  %v10125_v3 = vld [vmem:[#allocation10 + $0x6a8] sm:$0xf] }
 0x2fc   :  { %6315 = vmatpush.bf16.msra.mxu3 %v9354_v62  ;;  %6250 = vmatpush.bf16.msra.mxu0 %v10882_v21  ;;  %v9866_v21 = vor.u32 %v12283_v12, %v9863_v14  ;;  %v12356_v46 = vld [vmem:[#allocation10 + $0x6e4] sm:$0xf0]  ;;  %v12411_v12 = vld [vmem:[#allocation10 + $0x8a4] sm:$0xf] }
 0x2fd   :  { %6324 = vmatpush.bf16.msra.mxu1 %v10122_v18  ;;  %6289 = vmatpush.bf16.msrb.mxu2 %v10374_v38  ;;  %v6073_v62 = vpop.f32.mrf.mxu1  ;;  %v11142_v18 = vor.u32 %v12611_v9, %v11141_v8  ;;  %v9485_v38 = vld [vmem:[#allocation10 + $0x1a8] sm:$0xf]  ;;  %v12547_v8 = vld [vmem:[#allocation10 + $0xcdc] sm:$0xf0]  ;;  %v10126_v15 = vor.u32 %v12356_v46, %v10125_v3  ;;  %v10375_v45 = vld [vmem:[#allocation10 + $0x8e0] sm:$0xf0] }
 0x2fe   :  { %v9486_v41 = vor.u32 %v12196_v2, %v9485_v38  ;;  %v13340_v9 = vld [vmem:[#allocation12] sm:$0xff]  ;;  %v9293_v62 = vld [vmem:[#allocation10 + $0x28] sm:$0xf]  ;;  %v10378_v26 = vor.u32 %v12411_v12, %v10375_v45  ;;  %v9615_v3 = vld [vmem:[#allocation10 + $0x2e8] sm:$0xf0] }
 0x2ff   :  { %v11271_v38 = vld [vmem:[#allocation10 + $0xfe0] sm:$0xf0] }
 0x300   :  { %6316 = vmatpush.bf16.msra.mxu3 %v9290_v31  ;;  %6251 = vmatpush.bf16.msra.mxu0 %v10818_v43  ;;  %v10253_v31 = vld [vmem:[#allocation10 + $0x7a8] sm:$0xf]  ;;  %v12443_v43 = vld [vmem:[#allocation10 + $0x9a4] sm:$0xf]  ;;  %v6045_v37 = vpop.f32.mrf.mxu0 }
 0x301   :  { %6325 = vmatpush.bf16.msra.mxu1 %v10058_v29  ;;  %6290 = vmatpush.bf16.msrb.mxu2 %v10310_v61  ;;  %v12388_v29 = vld [vmem:[#allocation10 + $0x7e4] sm:$0xf0]  ;;  %v13337_v53 = vadd.f32 %v6045_v37, %v13329_v17  ;;  %v10949_v61 = vld [vmem:[#allocation10 + $0xd20] sm:$0xf]  ;;  %v10506_v35 = vor.u32 %v12443_v43, %v10503_v7  ;;  %v11274_v7 = vor.u32 %v12635_v51, %v11271_v38  ;;  %v9679_v37 = vld [vmem:[#allocation10 + $0x368] sm:$0xf0] }
 0x302   :  { %v10950_v33 = vor.u32 %v12563_v54, %v10949_v61  ;;  %v10885_v17 = vld [vmem:[#allocation10 + $0xca0] sm:$0xf]  ;;  %v12619_v48 = vld [vmem:[#allocation10 + $0xf24] sm:$0xf]  ;;  %v12468_v51 = vld [vmem:[#allocation10 + $0xa64] sm:$0xf0] }
 0x303   :  { %6317 = vmatmul.bf16.vlgmr.msra.gmra.mxu3 %v13246_v22  ;;  %6252 = vmatmul.bf16.vlgmr.msra.gmra.mxu0 %v13268_v1  ;;  %v10886_v56 = vor.u32 %v12547_v8, %v10885_v17  ;;  %v11207_v50 = vld [vmem:[#allocation10 + $0xf60] sm:$0xf0]  ;;  %v12188_v38 = vld [vmem:[#allocation10 + $0x1ac] sm:$0xf] }
 0x304   :  { %6361 = vmatpush.bf16.msrb.mxu3 %v9742_v42  ;;  %6296 = vmatpush.bf16.msrb.mxu0 %v11270_v47  ;;  %v10254_v42 = vor.u32 %v12388_v29, %v10253_v31  ;;  %v12180_v47 = vld [vmem:[#allocation10 + $0x164] sm:$0xf0]  ;;  %v10311_v29 = vld [vmem:[#allocation10 + $0x860] sm:$0xf0] }
 0x305   :  { %6326 = vmatpush.bf16.msra.mxu1 %v9994_v5  ;;  %6335 = vmatpush.bf16.msra.mxu2 %v10762_v60  ;;  %v9422_v60 = vor.u32 %v12180_v47, %v9421_v10  ;;  %v12236_v10 = vld [vmem:[#allocation10 + $0x32c] sm:$0xf]  ;;  %v12603_v46 = vld [vmem:[#allocation10 + $0xea4] sm:$0xf] }
 0x306   :  { %6291 = vmatmul.bf16.vlgmr.msrb.gmra.mxu2 %v13259_v6  ;;  %v6110_v5 = vpop.f32.mrf.mxu3  ;;  %v11143_v17 = vld [vmem:[#allocation10 + $0xee0] sm:$0xf0] }
 0x307   :  { %v11146_v45 = vor.u32 %v12603_v46, %v11143_v17  ;;  %v12348_v46 = vld [vmem:[#allocation10 + $0x6ac] sm:$0xf] }
 0x308   :  { %6362 = vmatpush.bf16.msrb.mxu3 %v9678_v28  ;;  %6297 = vmatpush.bf16.msrb.mxu0 %v11206_v0  ;;  %v12427_v28 = vld [vmem:[#allocation10 + $0x924] sm:$0xf]  ;;  %v12164_v0 = vld [vmem:[#allocation10 + $0xe4] sm:$0xf0]  ;;  %v6047_v4 = vpop.f32.mrf.mxu0  ;;  %v10127_v17 = vld [vmem:[#allocation10 + $0x6e8] sm:$0xf0] }
 0x309   :  { %6327 = vmatpush.bf16.msra.mxu1 %v9930_v11  ;;  %6336 = vmatpush.bf16.msra.mxu2 %v10698_v19  ;;  %v3254_v11 = vperm.slane %v13340_v9, 5  ;;  %v10442_v19 = vor.u32 %v12427_v28, %v10439_v27  ;;  %v9358_v14 = vor.u32 %v12164_v0, %v9357_v55  ;;  %v9682_v28 = vor.u32 %v12236_v10, %v9679_v37  ;;  %v10701_v27 = vld [vmem:[#allocation10 + $0xb28] sm:$0xf]  ;;  %v12220_v0 = vld [vmem:[#allocation10 + $0x2ac] sm:$0xf] }
 0x30a   :  { %v12500_v55 = vld [vmem:[#allocation10 + $0xb64] sm:$0xf0]  ;;  %v9618_v12 = vor.u32 %v12220_v0, %v9615_v3  ;;  %v9359_v3 = vld [vmem:[#allocation10 + $0xe8] sm:$0xf0] }
 0x30b   :  { %v6111_v43 = vadd.f32 %v6110_v5, %v3254_v11  ;;  %v12308_v5 = vld [vmem:[#allocation10 + $0x564] sm:$0xf0]  ;;  %v10702_v11 = vor.u32 %v12500_v55, %v10701_v27  ;;  %v12156_v55 = vld [vmem:[#allocation10 + $0xac] sm:$0xf] }
 0x30c   :  { %6363 = vmatpush.bf16.msrb.mxu3 %v9614_v13  ;;  %6298 = vmatpush.bf16.msrb.mxu0 %v11142_v18  ;;  %v6084_v13 = vpop.f32.mrf.mxu2  ;;  %v12148_v18 = vld [vmem:[#allocation10 + $0x64] sm:$0xf0] }
 0x30d   :  { %6328 = vmatpush.bf16.msra.mxu1 %v9866_v21  ;;  %6337 = vmatpush.bf16.msra.mxu2 %v10634_v23  ;;  %v13344_v57 = vadd.f32 %v6084_v13, %v13331_v34  ;;  %v12340_v21 = vld [vmem:[#allocation10 + $0x664] sm:$0xf0]  ;;  %v12252_v23 = vld [vmem:[#allocation10 + $0x3ac] sm:$0xf]  ;;  %v9294_v2 = vor.u32 %v12148_v18, %v9293_v62  ;;  %v12395_v34 = vld [vmem:[#allocation10 + $0x824] sm:$0xf] }
 0x30e   :  { %v10062_v31 = vor.u32 %v12340_v21, %v10061_v20  ;;  %v9746_v36 = vor.u32 %v12252_v23, %v9743_v24  ;;  %v10314_v47 = vor.u32 %v12395_v34, %v10311_v29  ;;  %v12292_v13 = vld [vmem:[#allocation10 + $0x4e4] sm:$0xf0]  ;;  %v12204_v62 = vld [vmem:[#allocation10 + $0x22c] sm:$0xf]  ;;  %v11079_v20 = vld [vmem:[#allocation10 + $0xe60] sm:$0xf0] }
 0x30f   :  { %v9551_v18 = vld [vmem:[#allocation10 + $0x268] sm:$0xf0]  ;;  %v9805_v24 = vld [vmem:[#allocation10 + $0x428] sm:$0xf]  ;;  %v12571_v29 = vld [vmem:[#allocation10 + $0xda4] sm:$0xf] }
 0x310   :  { %6364 = vmatpush.bf16.msrb.mxu3 %v9550_v49  ;;  %6299 = vmatpush.bf16.msrb.mxu0 %v11078_v30  ;;  %v12531_v49 = vld [vmem:[#allocation10 + $0xc5c] sm:$0xf0]  ;;  %v6112_v30 = vpop.f32.mrf.mxu3  ;;  %v10255_v34 = vld [vmem:[#allocation10 + $0x7e8] sm:$0xf0]  ;;  %v12436_v27 = vld [vmem:[#allocation10 + $0x964] sm:$0xf0] }
 0x311   :  { %6329 = vmatpush.bf16.msra.mxu1 %v9802_v25  ;;  %6338 = vmatpush.bf16.msra.mxu2 %v10570_v40  ;;  %v10822_v25 = vor.u32 %v12531_v49, %v10821_v59  ;;  %v12324_v40 = vld [vmem:[#allocation10 + $0x5e4] sm:$0xf0]  ;;  %v9554_v49 = vor.u32 %v12204_v62, %v9551_v18  ;;  %v12140_v62 = vld [vmem:[#allocation10 + $0x2c] sm:$0xf] }
 0x312   :  { %v12276_v59 = vld [vmem:[#allocation10 + $0x464] sm:$0xf0]  ;;  %v9295_v18 = vld [vmem:[#allocation10 + $0x68] sm:$0xf0] }
 0x314   :  { %6365 = vmatpush.bf16.msrb.mxu3 %v9486_v41  ;;  %6300 = vmatpush.bf16.msrb.mxu0 %v11014_v44  ;;  %v10765_v41 = vld [vmem:[#allocation10 + $0xba8] sm:$0xf]  ;;  %v6123_v44 = vpop.f32.mrf.mxu1  ;;  %v6086_v54 = vpop.f32.mrf.mxu2 }
 0x315   :  { %6374 = vmatpush.bf16.msrb.mxu1 %v10254_v42  ;;  %6339 = vmatpush.bf16.msra.mxu2 %v10506_v35  ;;  %v12516_v42 = vld [vmem:[#allocation10 + $0xbe4] sm:$0xf0]  ;;  %v13346_v61 = vadd.f32 %v6123_v44, %v6111_v43  ;;  %v9998_v35 = vor.u32 %v12324_v40, %v9997_v32  ;;  %v11015_v32 = vld [vmem:[#allocation10 + $0xde0] sm:$0xf0]  ;;  %v9423_v44 = vld [vmem:[#allocation10 + $0x168] sm:$0xf0] }
 0x316   :  { %6330 = vmatmul.bf16.vlgmr.msra.gmra.mxu1 %v13251_v39  ;;  %v12452_v43 = vld [vmem:[#allocation10 + $0x9e4] sm:$0xf0]  ;;  %v11018_v37 = vor.u32 %v12571_v29, %v11015_v32  ;;  %v12555_v54 = vld [vmem:[#allocation10 + $0xd24] sm:$0xf]  ;;  %v12316_v29 = vld [vmem:[#allocation10 + $0x5ac] sm:$0xf] }
 0x318   :  { %6366 = vmatpush.bf16.msrb.mxu3 %v9422_v60  ;;  %6301 = vmatpush.bf16.msrb.mxu0 %v10950_v33  ;;  %v10766_v60 = vor.u32 %v12516_v42, %v10765_v41  ;;  %v11210_v33 = vor.u32 %v12619_v48, %v11207_v50  ;;  %v10509_v42 = vld [vmem:[#allocation10 + $0x9a8] sm:$0xf]  ;;  %v10191_v48 = vld [vmem:[#allocation10 + $0x768] sm:$0xf0] }
 0x319   :  { %6375 = vmatpush.bf16.msrb.mxu1 %v10190_v63  ;;  %6340 = vmatpush.bf16.msra.mxu2 %v10442_v19  ;;  %v9933_v63 = vld [vmem:[#allocation10 + $0x528] sm:$0xf] }
 0x31a   :  { %v9934_v8 = vor.u32 %v12308_v5, %v9933_v63  ;;  %v9869_v19 = vld [vmem:[#allocation10 + $0x4a8] sm:$0xf] }
 0x31b   :  { %v9870_v21 = vor.u32 %v12292_v13, %v9869_v19  ;;  %v10445_v5 = vld [vmem:[#allocation10 + $0x928] sm:$0xf] }
 0x31c   :  { %6367 = vmatpush.bf16.msrb.mxu3 %v9358_v14  ;;  %6302 = vmatpush.bf16.msrb.mxu0 %v10886_v56  ;;  %v10637_v14 = vld [vmem:[#allocation10 + $0xaa8] sm:$0xf]  ;;  %v6125_v4 = vpop.f32.mrf.mxu1  ;;  %v12587_v56 = vld [vmem:[#allocation10 + $0xe24] sm:$0xf]  ;;  %v10446_v19 = vor.u32 %v12436_v27, %v10445_v5  ;;  %v12300_v5 = vld [vmem:[#allocation10 + $0x52c] sm:$0xf] }
 0x31d   :  { %6376 = vmatpush.bf16.msrb.mxu1 %v10126_v15  ;;  %6341 = vmatpush.bf16.msra.mxu2 %v10378_v26  ;;  %v12484_v15 = vld [vmem:[#allocation10 + $0xae4] sm:$0xf0]  ;;  %v11082_v30 = vor.u32 %v12587_v56, %v11079_v20 }
 0x31e   :  { %v10638_v23 = vor.u32 %v12484_v15, %v10637_v14  ;;  %v10573_v26 = vld [vmem:[#allocation10 + $0xa28] sm:$0xf]  ;;  %v9362_v14 = vor.u32 %v12156_v55, %v9359_v3  ;;  %v10130_v15 = vor.u32 %v12348_v46, %v10127_v17  ;;  %v9935_v55 = vld [vmem:[#allocation10 + $0x568] sm:$0xf0]  ;;  %v9621_v46 = vld [vmem:[#allocation10 + $0x2b0] sm:$0xf] }
 0x31f   :  { %v12229_v17 = vld [vmem:[#allocation10 + $0x2ec] sm:$0xf0] }
 0x320   :  { %6368 = vmatpush.bf16.msrb.mxu3 %v9294_v2  ;;  %6303 = vmatpush.bf16.msrb.mxu0 %v10822_v25  ;;  %v9487_v2 = vld [vmem:[#allocation10 + $0x1e8] sm:$0xf0]  ;;  %v10574_v25 = vor.u32 %v12468_v51, %v10573_v26  ;;  %v6097_v10 = vpop.f32.mrf.mxu0  ;;  %v10823_v26 = vld [vmem:[#allocation10 + $0xc60] sm:$0xf0] }
 0x321   :  { %6377 = vmatpush.bf16.msrb.mxu1 %v10062_v31  ;;  %6342 = vmatpush.bf16.msra.mxu2 %v10314_v47  ;;  %v12380_v31 = vld [vmem:[#allocation10 + $0x7ac] sm:$0xf]  ;;  %v9490_v40 = vor.u32 %v12188_v38, %v9487_v2  ;;  %v13352_v50 = vadd.f32 %v6097_v10, %v13344_v57  ;;  %v12539_v57 = vld [vmem:[#allocation10 + $0xca4] sm:$0xf]  ;;  %v11277_v38 = vld [vmem:[#allocation10 + $0xfa8] sm:$0xf]  ;;  %v9298_v2 = vor.u32 %v12140_v62, %v9295_v18 }
 0x322   :  { %v10258_v41 = vor.u32 %v12380_v31, %v10255_v34  ;;  %v12364_v47 = vld [vmem:[#allocation10 + $0x72c] sm:$0xf]  ;;  %v10317_v34 = vld [vmem:[#allocation10 + $0x828] sm:$0xf]  ;;  %v9685_v10 = vld [vmem:[#allocation10 + $0x330] sm:$0xf] }
 0x323   :  { %6369 = vmatmul.bf16.vlgmr.msrb.gmra.mxu3 %v13246_v22  ;;  %6304 = vmatmul.bf16.vlgmr.msrb.gmra.mxu0 %v13268_v1  ;;  %v9557_v18 = vld [vmem:[#allocation10 + $0x230] sm:$0xf] }
 0x324   :  { %6413 = vmatpush.bf16.msra.mxu3 %v9746_v36  ;;  %6348 = vmatpush.bf16.msra.mxu0 %v11274_v7  ;;  %v9806_v36 = vor.u32 %v12276_v59, %v9805_v24  ;;  %v12172_v7 = vld [vmem:[#allocation10 + $0x12c] sm:$0xf]  ;;  %v9749_v24 = vld [vmem:[#allocation10 + $0x3b0] sm:$0xf] }
 0x325   :  { %6378 = vmatpush.bf16.msrb.mxu1 %v9998_v35  ;;  %6387 = vmatpush.bf16.msrb.mxu2 %v10766_v60  ;;  %v10951_v35 = vld [vmem:[#allocation10 + $0xd60] sm:$0xf0]  ;;  %v10510_v60 = vor.u32 %v12452_v43, %v10509_v42  ;;  %v9426_v63 = vor.u32 %v12172_v7, %v9423_v44  ;;  %v12261_v59 = vld [vmem:[#allocation10 + $0x3ec] sm:$0xf0]  ;;  %v10767_v42 = vld [vmem:[#allocation10 + $0xbe8] sm:$0xf0] }
 0x326   :  { %6343 = vmatmul.bf16.vlgmr.msra.gmra.mxu2 %v13259_v6  ;;  %v10954_v0 = vor.u32 %v12555_v54, %v10951_v35  ;;  %v12628_v54 = vld [vmem:[#allocation10 + $0xf64] sm:$0xf0] }
 0x328   :  { %6414 = vmatpush.bf16.msra.mxu3 %v9682_v28  ;;  %6349 = vmatpush.bf16.msra.mxu0 %v11210_v33  ;;  %v10194_v28 = vor.u32 %v12364_v47, %v10191_v48  ;;  %v6162_v33 = vpop.f32.mrf.mxu3  ;;  %v6099_v56 = vpop.f32.mrf.mxu0  ;;  %v11213_v48 = vld [vmem:[#allocation10 + $0xf28] sm:$0xf] }
 0x329   :  { %6379 = vmatpush.bf16.msrb.mxu1 %v9934_v8  ;;  %6388 = vmatpush.bf16.msrb.mxu2 %v10702_v11  ;;  %v10887_v8 = vld [vmem:[#allocation10 + $0xce0] sm:$0xf0]  ;;  %v3255_v11 = vperm.slane %v13340_v9, 6  ;;  %v6136_v13 = vpop.f32.mrf.mxu2  ;;  %v11214_v3 = vor.u32 %v12628_v54, %v11213_v48  ;;  %v12213_v56 = vld [vmem:[#allocation10 + $0x26c] sm:$0xf0] }
 0x32a   :  { %v13357_v4 = vadd.f32 %v6136_v13, %v13346_v61  ;;  %v10890_v20 = vor.u32 %v12539_v57, %v10887_v8  ;;  %v12404_v61 = vld [vmem:[#allocation10 + $0x864] sm:$0xf0]  ;;  %v9622_v13 = vor.u32 %v12229_v17, %v9621_v46  ;;  %v10197_v48 = vld [vmem:[#allocation10 + $0x730] sm:$0xf] }
 0x32b   :  { %v6163_v43 = vadd.f32 %v6162_v33, %v3255_v11  ;;  %v10318_v47 = vor.u32 %v12404_v61, %v10317_v34  ;;  %v12492_v33 = vld [vmem:[#allocation10 + $0xb2c] sm:$0xf]  ;;  %v11149_v57 = vld [vmem:[#allocation10 + $0xea8] sm:$0xf]  ;;  %v9938_v11 = vor.u32 %v12300_v5, %v9935_v55  ;;  %v12197_v34 = vld [vmem:[#allocation10 + $0x1ec] sm:$0xf0] }
 0x32c   :  { %6415 = vmatpush.bf16.msra.mxu3 %v9618_v12  ;;  %6350 = vmatpush.bf16.msra.mxu0 %v11146_v45  ;;  %v10381_v12 = vld [vmem:[#allocation10 + $0x8a8] sm:$0xf]  ;;  %v10261_v61 = vld [vmem:[#allocation10 + $0x7b0] sm:$0xf] }
 0x32d   :  { %6380 = vmatpush.bf16.msrb.mxu1 %v9870_v21  ;;  %6389 = vmatpush.bf16.msrb.mxu2 %v10638_v23  ;;  %v12420_v45 = vld [vmem:[#allocation10 + $0x8e4] sm:$0xf0]  ;;  %v12332_v21 = vld [vmem:[#allocation10 + $0x62c] sm:$0xf]  ;;  %v12373_v54 = vld [vmem:[#allocation10 + $0x76c] sm:$0xf0] }
 0x32e   :  { %v10063_v23 = vld [vmem:[#allocation10 + $0x668] sm:$0xf0]  ;;  %v10382_v51 = vor.u32 %v12420_v45, %v10381_v12  ;;  %v12612_v8 = vld [vmem:[#allocation10 + $0xee4] sm:$0xf0]  ;;  %v10198_v55 = vor.u32 %v12373_v54, %v10197_v48 }
 0x32f   :  { %v10066_v31 = vor.u32 %v12332_v21, %v10063_v23  ;;  %v12284_v12 = vld [vmem:[#allocation10 + $0x4ac] sm:$0xf]  ;;  %v11150_v62 = vor.u32 %v12612_v8, %v11149_v57  ;;  %v11085_v21 = vld [vmem:[#allocation10 + $0xe28] sm:$0xf]  ;;  %v12165_v57 = vld [vmem:[#allocation10 + $0xec] sm:$0xf0] }
 0x330   :  { %6416 = vmatpush.bf16.msra.mxu3 %v9554_v49  ;;  %6351 = vmatpush.bf16.msra.mxu0 %v11082_v30  ;;  %v12523_v49 = vld [vmem:[#allocation10 + $0xc24] sm:$0xf]  ;;  %v12644_v30 = vld [vmem:[#allocation10 + $0xfe4] sm:$0xf0]  ;;  %v6164_v32 = vpop.f32.mrf.mxu3  ;;  %v10639_v45 = vld [vmem:[#allocation10 + $0xae8] sm:$0xf0] }
 0x331   :  { %6381 = vmatpush.bf16.msrb.mxu1 %v9806_v36  ;;  %6390 = vmatpush.bf16.msrb.mxu2 %v10574_v25  ;;  %v9750_v36 = vor.u32 %v12261_v59, %v9749_v24  ;;  %v10826_v25 = vor.u32 %v12523_v49, %v10823_v26  ;;  %v11278_v7 = vor.u32 %v12644_v30, %v11277_v38  ;;  %v12596_v23 = vld [vmem:[#allocation10 + $0xe64] sm:$0xf0]  ;;  %v12268_v49 = vld [vmem:[#allocation10 + $0x42c] sm:$0xf]  ;;  %v10133_v8 = vld [vmem:[#allocation10 + $0x6b0] sm:$0xf] }
 0x332   :  { %v9807_v26 = vld [vmem:[#allocation10 + $0x468] sm:$0xf0]  ;;  %v11021_v32 = vld [vmem:[#allocation10 + $0xda8] sm:$0xf] }
 0x333   :  { %v6175_v44 = vpop.f32.mrf.mxu1  ;;  %v12460_v38 = vld [vmem:[#allocation10 + $0xa2c] sm:$0xf] }
 0x334   :  { %6417 = vmatpush.bf16.msra.mxu3 %v9490_v40  ;;  %6352 = vmatpush.bf16.msra.mxu0 %v11018_v37  ;;  %v9999_v40 = vld [vmem:[#allocation10 + $0x5e8] sm:$0xf0]  ;;  %v12245_v37 = vld [vmem:[#allocation10 + $0x36c] sm:$0xf0]  ;;  %v13359_v35 = vadd.f32 %v6175_v44, %v6163_v43 }
 0x335   :  { %6426 = vmatpush.bf16.msra.mxu1 %v10258_v41  ;;  %6391 = vmatpush.bf16.msrb.mxu2 %v10510_v60  ;;  %v12508_v41 = vld [vmem:[#allocation10 + $0xbac] sm:$0xf]  ;;  %v6138_v60 = vpop.f32.mrf.mxu2  ;;  %v9686_v27 = vor.u32 %v12245_v37, %v9685_v10  ;;  %v9429_v10 = vld [vmem:[#allocation10 + $0x130] sm:$0xf] }
 0x336   :  { %6382 = vmatmul.bf16.vlgmr.msrb.gmra.mxu1 %v13251_v39  ;;  %v10575_v30 = vld [vmem:[#allocation10 + $0xa68] sm:$0xf0] }
 0x337   :  { %v12444_v43 = vld [vmem:[#allocation10 + $0x9ac] sm:$0xf] }
 0x338   :  { %6418 = vmatpush.bf16.msra.mxu3 %v9426_v63  ;;  %6353 = vmatpush.bf16.msra.mxu0 %v10954_v0  ;;  %v10002_v63 = vor.u32 %v12316_v29, %v9999_v40  ;;  %v10703_v0 = vld [vmem:[#allocation10 + $0xb68] sm:$0xf0]  ;;  %v12389_v29 = vld [vmem:[#allocation10 + $0x7ec] sm:$0xf0]  ;;  %v10578_v40 = vor.u32 %v12460_v38, %v10575_v30  ;;  %v12532_v38 = vld [vmem:[#allocation10 + $0xc64] sm:$0xf0] }
 0x339   :  { %6427 = vmatpush.bf16.msra.mxu1 %v10194_v28  ;;  %6392 = vmatpush.bf16.msrb.mxu2 %v10446_v19  ;;  %v10770_v28 = vor.u32 %v12508_v41, %v10767_v42  ;;  %v10706_v19 = vor.u32 %v12492_v33, %v10703_v0  ;;  %v10262_v42 = vor.u32 %v12389_v29, %v10261_v61  ;;  %v12428_v33 = vld [vmem:[#allocation10 + $0x92c] sm:$0xf] }
 0x33a   :  { %v10447_v0 = vld [vmem:[#allocation10 + $0x968] sm:$0xf0] }
 0x33b   :  { %v12396_v29 = vld [vmem:[#allocation10 + $0x82c] sm:$0xf] }
 0x33c   :  { %6419 = vmatpush.bf16.msra.mxu3 %v9362_v14  ;;  %6354 = vmatpush.bf16.msra.mxu0 %v10890_v20  ;;  %v9871_v14 = vld [vmem:[#allocation10 + $0x4e8] sm:$0xf0]  ;;  %v6177_v20 = vpop.f32.mrf.mxu1 }
 0x33d   :  { %6428 = vmatpush.bf16.msra.mxu1 %v10130_v15  ;;  %6393 = vmatpush.bf16.msrb.mxu2 %v10382_v51  ;;  %v12476_v15 = vld [vmem:[#allocation10 + $0xaac] sm:$0xf]  ;;  %v9874_v24 = vor.u32 %v12284_v12, %v9871_v14  ;;  %v9558_v51 = vor.u32 %v12213_v56, %v9557_v18  ;;  %v3256_v12 = vperm.slane %v13340_v9, 7  ;;  %v9301_v56 = vld [vmem:[#allocation10 + $0x30] sm:$0xf] }
 0x33e   :  { %v10642_v59 = vor.u32 %v12476_v15, %v10639_v45  ;;  %v12412_v14 = vld [vmem:[#allocation10 + $0x8ac] sm:$0xf]  ;;  %v12149_v20 = vld [vmem:[#allocation10 + $0x6c] sm:$0xf0]  ;;  %v12253_v9 = vld [vmem:[#allocation10 + $0x3b4] sm:$0xf] }
 0x33f   :  { %v10383_v18 = vld [vmem:[#allocation10 + $0x8e8] sm:$0xf0] }
 0x340   :  { %6420 = vmatpush.bf16.msra.mxu3 %v9298_v2  ;;  %6355 = vmatpush.bf16.msra.mxu0 %v10826_v25  ;;  %v9493_v2 = vld [vmem:[#allocation10 + $0x1b0] sm:$0xf]  ;;  %v9810_v25 = vor.u32 %v12268_v49, %v9807_v26  ;;  %v6149_v37 = vpop.f32.mrf.mxu0  ;;  %v9751_v26 = vld [vmem:[#allocation10 + $0x3f0] sm:$0xf0]  ;;  %v10386_v30 = vor.u32 %v12412_v14, %v10383_v18  ;;  %v12620_v54 = vld [vmem:[#allocation10 + $0xf2c] sm:$0xf] }
 0x341   :  { %6429 = vmatpush.bf16.msra.mxu1 %v10066_v31  ;;  %6394 = vmatpush.bf16.msrb.mxu2 %v10318_v47  ;;  %v11086_v31 = vor.u32 %v12596_v23, %v11085_v21  ;;  %v9494_v41 = vor.u32 %v12197_v34, %v9493_v2  ;;  %v12181_v47 = vld [vmem:[#allocation10 + $0x16c] sm:$0xf0]  ;;  %v13365_v60 = vadd.f32 %v6149_v37, %v13357_v4  ;;  %v10893_v4 = vld [vmem:[#allocation10 + $0xca8] sm:$0xf]  ;;  %v12636_v2 = vld [vmem:[#allocation10 + $0xfac] sm:$0xf] }
 0x342   :  { %v12341_v49 = vld [vmem:[#allocation10 + $0x66c] sm:$0xf0]  ;;  %v9302_v34 = vor.u32 %v12149_v20, %v9301_v56  ;;  %v12237_v37 = vld [vmem:[#allocation10 + $0x334] sm:$0xf] }
 0x343   :  { %6421 = vmatmul.bf16.vlgmr.msra.gmra.mxu3 %v13246_v22  ;;  %6356 = vmatmul.bf16.vlgmr.msra.gmra.mxu0 %v13268_v1  ;;  %v9877_v14 = vld [vmem:[#allocation10 + $0x4b0] sm:$0xf]  ;;  %v12205_v20 = vld [vmem:[#allocation10 + $0x234] sm:$0xf] }
 0x344   :  { %6465 = vmatpush.bf16.msrb.mxu3 %v9750_v36  ;;  %6400 = vmatpush.bf16.msrb.mxu0 %v11278_v7  ;;  %v12580_v36 = vld [vmem:[#allocation10 + $0xde4] sm:$0xf0]  ;;  %v10511_v7 = vld [vmem:[#allocation10 + $0x9e8] sm:$0xf0]  ;;  %v12485_v18 = vld [vmem:[#allocation10 + $0xaec] sm:$0xf0] }
 0x345   :  { %6430 = vmatpush.bf16.msra.mxu1 %v10002_v63  ;;  %6439 = vmatpush.bf16.msra.mxu2 %v10770_v28  ;;  %v11022_v44 = vor.u32 %v12580_v36, %v11021_v32  ;;  %v10957_v63 = vld [vmem:[#allocation10 + $0xd28] sm:$0xf]  ;;  %v10514_v5 = vor.u32 %v12444_v43, %v10511_v7  ;;  %v10005_v32 = vld [vmem:[#allocation10 + $0x5b0] sm:$0xf] }
 0x346   :  { %6395 = vmatmul.bf16.vlgmr.msrb.gmra.mxu2 %v13259_v6  ;;  %v12564_v28 = vld [vmem:[#allocation10 + $0xd64] sm:$0xf0]  ;;  %v6214_v46 = vpop.f32.mrf.mxu3  ;;  %v12517_v43 = vld [vmem:[#allocation10 + $0xbec] sm:$0xf0] }
 0x347   :  { %v10958_v17 = vor.u32 %v12564_v28, %v10957_v63  ;;  %v6215_v7 = vadd.f32 %v6214_v46, %v3256_v12  ;;  %v11215_v63 = vld [vmem:[#allocation10 + $0xf68] sm:$0xf0]  ;;  %v10709_v46 = vld [vmem:[#allocation10 + $0xb30] sm:$0xf] }
 0x348   :  { %6466 = vmatpush.bf16.msrb.mxu3 %v9686_v27  ;;  %6401 = vmatpush.bf16.msrb.mxu0 %v11214_v3  ;;  %v9430_v27 = vor.u32 %v12181_v47, %v9429_v10  ;;  %v9365_v3 = vld [vmem:[#allocation10 + $0xb0] sm:$0xf]  ;;  %v6151_v23 = vpop.f32.mrf.mxu0 }
 0x349   :  { %6431 = vmatpush.bf16.msra.mxu1 %v9938_v11  ;;  %6440 = vmatpush.bf16.msra.mxu2 %v10706_v19  ;;  %v12357_v11 = vld [vmem:[#allocation10 + $0x6ec] sm:$0xf0]  ;;  %v12548_v19 = vld [vmem:[#allocation10 + $0xce4] sm:$0xf0]  ;;  %v6188_v15 = vpop.f32.mrf.mxu2  ;;  %v9366_v45 = vor.u32 %v12165_v57, %v9365_v3  ;;  %v11218_v57 = vor.u32 %v12620_v54, %v11215_v63  ;;  %v9559_v23 = vld [vmem:[#allocation10 + $0x270] sm:$0xf0] }
 0x34a   :  { %v13370_v21 = vadd.f32 %v6188_v15, %v13359_v35  ;;  %v10319_v35 = vld [vmem:[#allocation10 + $0x868] sm:$0xf0]  ;;  %v12309_v3 = vld [vmem:[#allocation10 + $0x56c] sm:$0xf0]  ;;  %v12365_v54 = vld [vmem:[#allocation10 + $0x734] sm:$0xf] }
 0x34b   :  { %v10322_v48 = vor.u32 %v12396_v29, %v10319_v35  ;;  %v9495_v29 = vld [vmem:[#allocation10 + $0x1f0] sm:$0xf0] }
 0x34c   :  { %6467 = vmatpush.bf16.msrb.mxu3 %v9622_v13  ;;  %6402 = vmatpush.bf16.msrb.mxu0 %v11150_v62  ;;  %v10450_v13 = vor.u32 %v12428_v33, %v10447_v0  ;;  %v10134_v62 = vor.u32 %v12357_v11, %v10133_v8  ;;  %v9941_v33 = vld [vmem:[#allocation10 + $0x530] sm:$0xf]  ;;  %v12221_v8 = vld [vmem:[#allocation10 + $0x2b4] sm:$0xf] }
 0x34d   :  { %6432 = vmatpush.bf16.msra.mxu1 %v9874_v24  ;;  %6441 = vmatpush.bf16.msra.mxu2 %v10642_v59  ;;  %v10894_v24 = vor.u32 %v12548_v19, %v10893_v4  ;;  %v10069_v59 = vld [vmem:[#allocation10 + $0x630] sm:$0xf]  ;;  %v9623_v11 = vld [vmem:[#allocation10 + $0x2f0] sm:$0xf0]  ;;  %v12604_v4 = vld [vmem:[#allocation10 + $0xeac] sm:$0xf]  ;;  %v9942_v12 = vor.u32 %v12309_v3, %v9941_v33 }
 0x34e   :  { %v10070_v61 = vor.u32 %v12341_v49, %v10069_v59  ;;  %v6216_v36 = vpop.f32.mrf.mxu3  ;;  %v11151_v19 = vld [vmem:[#allocation10 + $0xee8] sm:$0xf0]  ;;  %v9626_v15 = vor.u32 %v12221_v8, %v9623_v11  ;;  %v12381_v35 = vld [vmem:[#allocation10 + $0x7b4] sm:$0xf] }
 0x34f   :  { %v11154_v56 = vor.u32 %v12604_v4, %v11151_v19  ;;  %v12588_v59 = vld [vmem:[#allocation10 + $0xe2c] sm:$0xf]  ;;  %v10199_v63 = vld [vmem:[#allocation10 + $0x770] sm:$0xf0] }
 0x350   :  { %6468 = vmatpush.bf16.msrb.mxu3 %v9558_v51  ;;  %6403 = vmatpush.bf16.msrb.mxu0 %v11086_v31  ;;  %v10829_v51 = vld [vmem:[#allocation10 + $0xc28] sm:$0xf]  ;;  %v11279_v31 = vld [vmem:[#allocation10 + $0xfe8] sm:$0xf0]  ;;  %v12157_v8 = vld [vmem:[#allocation10 + $0xb4] sm:$0xf] }
 0x351   :  { %6433 = vmatpush.bf16.msra.mxu1 %v9810_v25  ;;  %6442 = vmatpush.bf16.msra.mxu2 %v10578_v40  ;;  %v9754_v25 = vor.u32 %v12253_v9, %v9751_v26  ;;  %v10830_v40 = vor.u32 %v12532_v38, %v10829_v51  ;;  %v11282_v10 = vor.u32 %v12636_v2, %v11279_v31  ;;  %v11087_v49 = vld [vmem:[#allocation10 + $0xe68] sm:$0xf0]  ;;  %v9813_v51 = vld [vmem:[#allocation10 + $0x430] sm:$0xf]  ;;  %v9367_v19 = vld [vmem:[#allocation10 + $0xf0] sm:$0xf0] }
 0x352   :  { %v12277_v38 = vld [vmem:[#allocation10 + $0x46c] sm:$0xf0]  ;;  %v12572_v36 = vld [vmem:[#allocation10 + $0xdac] sm:$0xf] }
 0x353   :  { %v6227_v47 = vpop.f32.mrf.mxu1  ;;  %v10581_v2 = vld [vmem:[#allocation10 + $0xa30] sm:$0xf]  ;;  %v13380_v33 = vld [vmem:[#allocation12 + $0x8] sm:$0xff] }
 0x354   :  { %6469 = vmatpush.bf16.msrb.mxu3 %v9494_v41  ;;  %6404 = vmatpush.bf16.msrb.mxu0 %v11022_v44  ;;  %v12325_v41 = vld [vmem:[#allocation10 + $0x5ec] sm:$0xf0]  ;;  %v9687_v44 = vld [vmem:[#allocation10 + $0x370] sm:$0xf0]  ;;  %v13372_v28 = vadd.f32 %v6227_v47, %v6215_v7 }
 0x355   :  { %6478 = vmatpush.bf16.msrb.mxu1 %v10262_v42  ;;  %6443 = vmatpush.bf16.msra.mxu2 %v10514_v5  ;;  %v10773_v42 = vld [vmem:[#allocation10 + $0xbb0] sm:$0xf]  ;;  %v6190_v5 = vpop.f32.mrf.mxu2  ;;  %v9690_v0 = vor.u32 %v12237_v37, %v9687_v44  ;;  %v12173_v37 = vld [vmem:[#allocation10 + $0x134] sm:$0xf] }
 0x356   :  { %6434 = vmatmul.bf16.vlgmr.msra.gmra.mxu1 %v13251_v39  ;;  %v12469_v31 = vld [vmem:[#allocation10 + $0xa6c] sm:$0xf0] }
 0x357   :  { %v10517_v7 = vld [vmem:[#allocation10 + $0x9b0] sm:$0xf] }
 0x358   :  { %6470 = vmatpush.bf16.msrb.mxu3 %v9430_v27  ;;  %6405 = vmatpush.bf16.msrb.mxu0 %v10958_v17  ;;  %v10006_v27 = vor.u32 %v12325_v41, %v10005_v32  ;;  %v12501_v17 = vld [vmem:[#allocation10 + $0xb6c] sm:$0xf0]  ;;  %v10263_v32 = vld [vmem:[#allocation10 + $0x7f0] sm:$0xf0]  ;;  %v10582_v41 = vor.u32 %v12469_v31, %v10581_v2  ;;  %v12262_v2 = vld [vmem:[#allocation10 + $0x3f4] sm:$0xf0] }
 0x359   :  { %6479 = vmatpush.bf16.msrb.mxu1 %v10198_v55  ;;  %6444 = vmatpush.bf16.msra.mxu2 %v10450_v13  ;;  %v10774_v55 = vor.u32 %v12517_v43, %v10773_v42  ;;  %v10710_v13 = vor.u32 %v12501_v17, %v10709_v46  ;;  %v10266_v43 = vor.u32 %v12381_v35, %v10263_v32  ;;  %v10453_v17 = vld [vmem:[#allocation10 + $0x930] sm:$0xf]  ;;  %v12524_v31 = vld [vmem:[#allocation10 + $0xc2c] sm:$0xf] }
 0x35a   :  { %v10202_v46 = vor.u32 %v12365_v54, %v10199_v63  ;;  %v12645_v35 = vld [vmem:[#allocation10 + $0xfec] sm:$0xf0]  ;;  %v12246_v54 = vld [vmem:[#allocation10 + $0x374] sm:$0xf0] }
 0x35c   :  { %6471 = vmatpush.bf16.msrb.mxu3 %v9366_v45  ;;  %6406 = vmatpush.bf16.msrb.mxu0 %v10894_v24  ;;  %v12293_v45 = vld [vmem:[#allocation10 + $0x4ec] sm:$0xf0]  ;;  %v6229_v24 = vpop.f32.mrf.mxu1 }
 0x35d   :  { %6480 = vmatpush.bf16.msrb.mxu1 %v10134_v62  ;;  %6445 = vmatpush.bf16.msra.mxu2 %v10386_v30  ;;  %v10645_v62 = vld [vmem:[#allocation10 + $0xab0] sm:$0xf]  ;;  %v9878_v9 = vor.u32 %v12293_v45, %v9877_v14  ;;  %v9562_v30 = vor.u32 %v12205_v20, %v9559_v23  ;;  %v10895_v14 = vld [vmem:[#allocation10 + $0xce8] sm:$0xf0]  ;;  %v12141_v24 = vld [vmem:[#allocation10 + $0x34] sm:$0xf] }
 0x35e   :  { %v10646_v26 = vor.u32 %v12485_v18, %v10645_v62  ;;  %v10389_v62 = vld [vmem:[#allocation10 + $0x8b0] sm:$0xf] }
 0x35f   :  { %v12421_v23 = vld [vmem:[#allocation10 + $0x8ec] sm:$0xf0] }
 0x360   :  { %6472 = vmatpush.bf16.msrb.mxu3 %v9302_v34  ;;  %6407 = vmatpush.bf16.msrb.mxu0 %v10830_v40  ;;  %v12189_v34 = vld [vmem:[#allocation10 + $0x1b4] sm:$0xf]  ;;  %v9814_v40 = vor.u32 %v12277_v38, %v9813_v51  ;;  %v6201_v44 = vpop.f32.mrf.mxu0 }
 0x361   :  { %6481 = vmatpush.bf16.msrb.mxu1 %v10070_v61  ;;  %6446 = vmatpush.bf16.msra.mxu2 %v10322_v48  ;;  %v11090_v61 = vor.u32 %v12588_v59, %v11087_v49  ;;  %v9498_v42 = vor.u32 %v12189_v34, %v9495_v29  ;;  %v9431_v48 = vld [vmem:[#allocation10 + $0x170] sm:$0xf0]  ;;  %v13378_v5 = vadd.f32 %v6201_v44, %v13370_v21  ;;  %v10831_v34 = vld [vmem:[#allocation10 + $0xc68] sm:$0xf0]  ;;  %v11285_v29 = vld [vmem:[#allocation10 + $0xfb0] sm:$0xf] }
 0x362   :  { %v9434_v3 = vor.u32 %v12173_v37, %v9431_v48  ;;  %v12349_v21 = vld [vmem:[#allocation10 + $0x6b4] sm:$0xf]  ;;  %v9693_v48 = vld [vmem:[#allocation10 + $0x338] sm:$0xf] }
 0x363   :  { %6473 = vmatmul.bf16.vlgmr.msrb.gmra.mxu3 %v13246_v22  ;;  %6408 = vmatmul.bf16.vlgmr.msrb.gmra.mxu0 %v13268_v1  ;;  %v9303_v59 = vld [vmem:[#allocation10 + $0x70] sm:$0xf0] }
 0x364   :  { %6517 = vmatpush.bf16.msra.mxu3 %v9754_v25  ;;  %6452 = vmatpush.bf16.msra.mxu0 %v11282_v10  ;;  %v11023_v25 = vld [vmem:[#allocation10 + $0xde8] sm:$0xf0]  ;;  %v12453_v10 = vld [vmem:[#allocation10 + $0x9ec] sm:$0xf0]  ;;  %v12333_v51 = vld [vmem:[#allocation10 + $0x634] sm:$0xf]  ;;  %v9306_v32 = vor.u32 %v12141_v24, %v9303_v59 }
 0x365   :  { %6482 = vmatpush.bf16.msrb.mxu1 %v10006_v27  ;;  %6491 = vmatpush.bf16.msrb.mxu2 %v10774_v55  ;;  %v11026_v47 = vor.u32 %v12572_v36, %v11023_v25  ;;  %v12556_v27 = vld [vmem:[#allocation10 + $0xd2c] sm:$0xf]  ;;  %v10071_v38 = vld [vmem:[#allocation10 + $0x670] sm:$0xf0]  ;;  %v10325_v25 = vld [vmem:[#allocation10 + $0x830] sm:$0xf] }
 0x366   :  { %6447 = vmatmul.bf16.vlgmr.msra.gmra.mxu2 %v13259_v6  ;;  %v10959_v55 = vld [vmem:[#allocation10 + $0xd68] sm:$0xf0]  ;;  %v6266_v11 = vpop.f32.mrf.mxu3  ;;  %v10074_v36 = vor.u32 %v12333_v51, %v10071_v38  ;;  %v10775_v37 = vld [vmem:[#allocation10 + $0xbf0] sm:$0xf0]  ;;  %v12214_v51 = vld [vmem:[#allocation10 + $0x274] sm:$0xf0] }
 0x367   :  { %v10962_v4 = vor.u32 %v12556_v27, %v10959_v55  ;;  %v11221_v55 = vld [vmem:[#allocation10 + $0xf30] sm:$0xf]  ;;  %v12477_v24 = vld [vmem:[#allocation10 + $0xab4] sm:$0xf] }
 0x368   :  { %6518 = vmatpush.bf16.msra.mxu3 %v9690_v0  ;;  %6453 = vmatpush.bf16.msra.mxu0 %v11218_v57  ;;  %v10518_v0 = vor.u32 %v12453_v10, %v10517_v7  ;;  %v12437_v57 = vld [vmem:[#allocation10 + $0x96c] sm:$0xf0]  ;;  %v10007_v7 = vld [vmem:[#allocation10 + $0x5f0] sm:$0xf0] }
 0x369   :  { %6483 = vmatpush.bf16.msrb.mxu1 %v9942_v12  ;;  %6492 = vmatpush.bf16.msrb.mxu2 %v10710_v13  ;;  %v10135_v12 = vld [vmem:[#allocation10 + $0x6f0] sm:$0xf0]  ;;  %v12540_v13 = vld [vmem:[#allocation10 + $0xcac] sm:$0xf]  ;;  %v10454_v45 = vor.u32 %v12437_v57, %v10453_v17  ;;  %v6240_v18 = vpop.f32.mrf.mxu2 }
 0x36a   :  { %v10138_v20 = vor.u32 %v12349_v21, %v10135_v12  ;;  %v13385_v49 = vadd.f32 %v6240_v18, %v13372_v28  ;;  %v12405_v28 = vld [vmem:[#allocation10 + $0x86c] sm:$0xf0]  ;;  %v12509_v10 = vld [vmem:[#allocation10 + $0xbb4] sm:$0xf] }
 0x36b   :  { %v10326_v27 = vor.u32 %v12405_v28, %v10325_v25  ;;  %v10778_v57 = vor.u32 %v12509_v10, %v10775_v37  ;;  %v10711_v21 = vld [vmem:[#allocation10 + $0xb70] sm:$0xf0]  ;;  %v9501_v25 = vld [vmem:[#allocation10 + $0x1b8] sm:$0xf] }
 0x36c   :  { %6519 = vmatpush.bf16.msra.mxu3 %v9626_v15  ;;  %6454 = vmatpush.bf16.msra.mxu0 %v11154_v56  ;;  %v3257_v15 = vperm.slane %v13380_v33, 0  ;;  %v9370_v56 = vor.u32 %v12157_v8, %v9367_v19  ;;  %v12301_v8 = vld [vmem:[#allocation10 + $0x534] sm:$0xf] }
 0x36d   :  { %6484 = vmatpush.bf16.msrb.mxu1 %v9878_v9  ;;  %6493 = vmatpush.bf16.msrb.mxu2 %v10646_v26  ;;  %v6203_v9 = vpop.f32.mrf.mxu0  ;;  %v10898_v26 = vor.u32 %v12540_v13, %v10895_v14  ;;  %v12493_v19 = vld [vmem:[#allocation10 + $0xb34] sm:$0xf]  ;;  %v9629_v13 = vld [vmem:[#allocation10 + $0x2b8] sm:$0xf] }
 0x36e   :  { %v6267_v44 = vadd.f32 %v6266_v11, %v3257_v15  ;;  %v9943_v11 = vld [vmem:[#allocation10 + $0x570] sm:$0xf0]  ;;  %v12230_v14 = vld [vmem:[#allocation10 + $0x2f4] sm:$0xf0]  ;;  %v11157_v15 = vld [vmem:[#allocation10 + $0xeb0] sm:$0xf]  ;;  %v10714_v18 = vor.u32 %v12493_v19, %v10711_v21 }
 0x36f   :  { %v10647_v59 = vld [vmem:[#allocation10 + $0xaf0] sm:$0xf0] }
 0x370   :  { %6520 = vmatpush.bf16.msra.mxu3 %v9562_v30  ;;  %6455 = vmatpush.bf16.msra.mxu0 %v11090_v61  ;;  %v9757_v30 = vld [vmem:[#allocation10 + $0x3b8] sm:$0xf]  ;;  %v10390_v61 = vor.u32 %v12421_v23, %v10389_v62  ;;  %v9946_v62 = vor.u32 %v12301_v8, %v9943_v11  ;;  %v9879_v23 = vld [vmem:[#allocation10 + $0x4f0] sm:$0xf0]  ;;  %v10965_v8 = vld [vmem:[#allocation10 + $0xd30] sm:$0xf] }
 0x371   :  { %6485 = vmatpush.bf16.msrb.mxu1 %v9814_v40  ;;  %6494 = vmatpush.bf16.msrb.mxu2 %v10582_v41  ;;  %v12317_v40 = vld [vmem:[#allocation10 + $0x5b4] sm:$0xf]  ;;  %v6268_v41 = vpop.f32.mrf.mxu3 }
 0x372   :  { %v10010_v17 = vor.u32 %v12317_v40, %v10007_v7  ;;  %v12198_v40 = vld [vmem:[#allocation10 + $0x1f4] sm:$0xf0]  ;;  %v12581_v7 = vld [vmem:[#allocation10 + $0xdec] sm:$0xf0] }
 0x373   :  { %v6279_v63 = vpop.f32.mrf.mxu1  ;;  %v10269_v41 = vld [vmem:[#allocation10 + $0x7b8] sm:$0xf] }
 0x374   :  { %6521 = vmatpush.bf16.msra.mxu3 %v9498_v42  ;;  %6456 = vmatpush.bf16.msra.mxu0 %v11026_v47  ;;  %v9758_v42 = vor.u32 %v12262_v2, %v9757_v30  ;;  %v11286_v47 = vor.u32 %v12645_v35, %v11285_v29  ;;  %v11093_v30 = vld [vmem:[#allocation10 + $0xe30] sm:$0xf]  ;;  %v9815_v29 = vld [vmem:[#allocation10 + $0x470] sm:$0xf0] }
 0x375   :  { %6530 = vmatpush.bf16.msra.mxu1 %v10266_v43  ;;  %6495 = vmatpush.bf16.msrb.mxu2 %v10518_v0  ;;  %v10834_v43 = vor.u32 %v12524_v31, %v10831_v34  ;;  %v12629_v0 = vld [vmem:[#allocation10 + $0xf6c] sm:$0xf0]  ;;  %v10650_v34 = vor.u32 %v12477_v24, %v10647_v59  ;;  %v12413_v59 = vld [vmem:[#allocation10 + $0x8b4] sm:$0xf] }
 0x376   :  { %6486 = vmatmul.bf16.vlgmr.msrb.gmra.mxu1 %v13251_v39  ;;  %v11222_v12 = vor.u32 %v12629_v0, %v11221_v55  ;;  %v12597_v2 = vld [vmem:[#allocation10 + $0xe6c] sm:$0xf0]  ;;  %v12182_v0 = vld [vmem:[#allocation10 + $0x174] sm:$0xf0] }
 0x377   :  { %v11094_v28 = vor.u32 %v12597_v2, %v11093_v30  ;;  %v9309_v30 = vld [vmem:[#allocation10 + $0x38] sm:$0xf] }
 0x378   :  { %6522 = vmatpush.bf16.msra.mxu3 %v9434_v3  ;;  %6457 = vmatpush.bf16.msra.mxu0 %v10962_v4  ;;  %v13387_v3 = vadd.f32 %v6279_v63, %v6267_v44  ;;  %v9694_v4 = vor.u32 %v12246_v54, %v9693_v48  ;;  %v9502_v44 = vor.u32 %v12198_v40, %v9501_v25  ;;  %v12445_v48 = vld [vmem:[#allocation10 + $0x9b4] sm:$0xf]  ;;  %v9437_v63 = vld [vmem:[#allocation10 + $0x138] sm:$0xf]  ;;  %v10837_v25 = vld [vmem:[#allocation10 + $0xc30] sm:$0xf] }
 0x379   :  { %6531 = vmatpush.bf16.msra.mxu1 %v10202_v46  ;;  %6496 = vmatpush.bf16.msrb.mxu2 %v10454_v45  ;;  %v6242_v46 = vpop.f32.mrf.mxu2  ;;  %v12613_v45 = vld [vmem:[#allocation10 + $0xeec] sm:$0xf0]  ;;  %v10519_v54 = vld [vmem:[#allocation10 + $0x9f0] sm:$0xf0]  ;;  %v9438_v19 = vor.u32 %v12182_v0, %v9437_v63  ;;  %v12150_v2 = vld [vmem:[#allocation10 + $0x74] sm:$0xf0] }
 0x37a   :  { %v11158_v9 = vor.u32 %v12613_v45, %v11157_v15  ;;  %v10205_v46 = vld [vmem:[#allocation10 + $0x738] sm:$0xf]  ;;  %v10522_v11 = vor.u32 %v12445_v48, %v10519_v54 }
 0x37b   :  { %v6281_v38 = vpop.f32.mrf.mxu1  ;;  %v12326_v54 = vld [vmem:[#allocation10 + $0x5f4] sm:$0xf0] }
 0x37c   :  { %6523 = vmatpush.bf16.msra.mxu3 %v9370_v56  ;;  %6458 = vmatpush.bf16.msra.mxu0 %v10898_v26  ;;  %v12285_v56 = vld [vmem:[#allocation10 + $0x4b4] sm:$0xf]  ;;  %v9565_v26 = vld [vmem:[#allocation10 + $0x238] sm:$0xf] }
 0x37d   :  { %6532 = vmatpush.bf16.msra.mxu1 %v10138_v20  ;;  %6497 = vmatpush.bf16.msrb.mxu2 %v10390_v61  ;;  %v9630_v20 = vor.u32 %v12230_v14, %v9629_v13  ;;  %v9882_v31 = vor.u32 %v12285_v56, %v9879_v23  ;;  %v12269_v61 = vld [vmem:[#allocation10 + $0x434] sm:$0xf]  ;;  %v9566_v35 = vor.u32 %v12214_v51, %v9565_v26  ;;  %v9373_v14 = vld [vmem:[#allocation10 + $0xb8] sm:$0xf]  ;;  %v3258_v23 = vperm.slane %v13380_v33, 1 }
 0x37e   :  { %v9818_v10 = vor.u32 %v12269_v61, %v9815_v29  ;;  %v10455_v13 = vld [vmem:[#allocation10 + $0x970] sm:$0xf0]  ;;  %v12358_v56 = vld [vmem:[#allocation10 + $0x6f4] sm:$0xf0] }
 0x37f   :  { %v10391_v38 = vld [vmem:[#allocation10 + $0x8f0] sm:$0xf0]  ;;  %v10077_v29 = vld [vmem:[#allocation10 + $0x638] sm:$0xf] }
 0x380   :  { %6524 = vmatpush.bf16.msra.mxu3 %v9306_v32  ;;  %6459 = vmatpush.bf16.msra.mxu0 %v10834_v43  ;;  %v12461_v32 = vld [vmem:[#allocation10 + $0xa34] sm:$0xf]  ;;  %v11029_v43 = vld [vmem:[#allocation10 + $0xdb0] sm:$0xf]  ;;  %v10394_v40 = vor.u32 %v12413_v59, %v10391_v38  ;;  %v10781_v63 = vld [vmem:[#allocation10 + $0xbb8] sm:$0xf] }
 0x381   :  { %6533 = vmatpush.bf16.msra.mxu1 %v10074_v36  ;;  %6498 = vmatpush.bf16.msrb.mxu2 %v10326_v27  ;;  %v10583_v36 = vld [vmem:[#allocation10 + $0xa70] sm:$0xf0]  ;;  %v6253_v27 = vpop.f32.mrf.mxu0  ;;  %v11030_v55 = vor.u32 %v12581_v7, %v11029_v43  ;;  %v9310_v43 = vor.u32 %v12150_v2, %v9309_v30  ;;  %v12294_v30 = vld [vmem:[#allocation10 + $0x4f4] sm:$0xf0] }
 0x382   :  { %v10586_v37 = vor.u32 %v12461_v32, %v10583_v36  ;;  %v12254_v32 = vld [vmem:[#allocation10 + $0x3bc] sm:$0xf]  ;;  %v11159_v59 = vld [vmem:[#allocation10 + $0xef0] sm:$0xf0]  ;;  %v10653_v2 = vld [vmem:[#allocation10 + $0xab8] sm:$0xf] }
 0x383   :  { %6525 = vmatmul.bf16.vlgmr.msra.gmra.mxu3 %v13246_v22  ;;  %6460 = vmatmul.bf16.vlgmr.msra.gmra.mxu0 %v13268_v1  ;;  %v9759_v36 = vld [vmem:[#allocation10 + $0x3f8] sm:$0xf0] }
 0x384   :  { %6569 = vmatpush.bf16.msrb.mxu3 %v9758_v42  ;;  %6504 = vmatpush.bf16.msrb.mxu0 %v11286_v47  ;;  %v12390_v42 = vld [vmem:[#allocation10 + $0x7f4] sm:$0xf0] }
 0x385   :  { %6534 = vmatpush.bf16.msra.mxu1 %v10010_v17  ;;  %6543 = vmatpush.bf16.msra.mxu2 %v10778_v57  ;;  %v10270_v47 = vor.u32 %v12390_v42, %v10269_v41  ;;  %v12374_v17 = vld [vmem:[#allocation10 + $0x774] sm:$0xf0]  ;;  %v13393_v57 = vadd.f32 %v6253_v27, %v13385_v49  ;;  %v10901_v49 = vld [vmem:[#allocation10 + $0xcb0] sm:$0xf]  ;;  %v12637_v41 = vld [vmem:[#allocation10 + $0xfb4] sm:$0xf] }
 0x386   :  { %6499 = vmatmul.bf16.vlgmr.msrb.gmra.mxu2 %v13259_v6  ;;  %v10206_v21 = vor.u32 %v12374_v17, %v10205_v46  ;;  %v6318_v15 = vpop.f32.mrf.mxu3  ;;  %v11287_v42 = vld [vmem:[#allocation10 + $0xff0] sm:$0xf0]  ;;  %v12518_v27 = vld [vmem:[#allocation10 + $0xbf4] sm:$0xf0]  ;;  %v12238_v46 = vld [vmem:[#allocation10 + $0x33c] sm:$0xf] }
 0x387   :  { %v11290_v0 = vor.u32 %v12637_v41, %v11287_v42  ;;  %v9695_v17 = vld [vmem:[#allocation10 + $0x378] sm:$0xf0]  ;;  %v9821_v41 = vld [vmem:[#allocation10 + $0x438] sm:$0xf] }
 0x388   :  { %6570 = vmatpush.bf16.msrb.mxu3 %v9694_v4  ;;  %6505 = vmatpush.bf16.msrb.mxu0 %v11222_v12  ;;  %v12565_v4 = vld [vmem:[#allocation10 + $0xd6c] sm:$0xf0]  ;;  %v12429_v12 = vld [vmem:[#allocation10 + $0x934] sm:$0xf]  ;;  %v12278_v42 = vld [vmem:[#allocation10 + $0x474] sm:$0xf0] }
 0x389   :  { %6535 = vmatpush.bf16.msra.mxu1 %v9946_v62  ;;  %6544 = vmatpush.bf16.msra.mxu2 %v10714_v18  ;;  %v10966_v45 = vor.u32 %v12565_v4, %v10965_v8  ;;  %v12166_v62 = vld [vmem:[#allocation10 + $0xf4] sm:$0xf0]  ;;  %v10458_v24 = vor.u32 %v12429_v12, %v10455_v13 }
 0x38a   :  { %v10141_v18 = vld [vmem:[#allocation10 + $0x6b8] sm:$0xf]  ;;  %v9374_v26 = vor.u32 %v12166_v62, %v9373_v14  ;;  %v10782_v14 = vor.u32 %v12518_v27, %v10781_v63  ;;  %v9698_v62 = vor.u32 %v12238_v46, %v9695_v17  ;;  %v11031_v63 = vld [vmem:[#allocation10 + $0xdf0] sm:$0xf0]  ;;  %v9822_v27 = vor.u32 %v12278_v42, %v9821_v41  ;;  %v9311_v41 = vld [vmem:[#allocation10 + $0x78] sm:$0xf0] }
 0x38b   :  { %v10142_v51 = vor.u32 %v12358_v56, %v10141_v18  ;;  %v10717_v18 = vld [vmem:[#allocation10 + $0xb38] sm:$0xf]  ;;  %v12334_v42 = vld [vmem:[#allocation10 + $0x63c] sm:$0xf] }
 0x38c   :  { %6571 = vmatpush.bf16.msrb.mxu3 %v9630_v20  ;;  %6506 = vmatpush.bf16.msrb.mxu0 %v11158_v9  ;;  %v12549_v20 = vld [vmem:[#allocation10 + $0xcec] sm:$0xf0]  ;;  %v6292_v9 = vpop.f32.mrf.mxu2  ;;  %v12502_v56 = vld [vmem:[#allocation10 + $0xb74] sm:$0xf0] }
 0x38d   :  { %6536 = vmatpush.bf16.msra.mxu1 %v9882_v31  ;;  %6545 = vmatpush.bf16.msra.mxu2 %v10650_v34  ;;  %v13398_v31 = vadd.f32 %v6292_v9, %v13387_v3  ;;  %v6255_v34 = vpop.f32.mrf.mxu0  ;;  %v10902_v61 = vor.u32 %v12549_v20, %v10901_v49  ;;  %v10327_v3 = vld [vmem:[#allocation10 + $0x870] sm:$0xf0]  ;;  %v12222_v20 = vld [vmem:[#allocation10 + $0x2bc] sm:$0xf]  ;;  %v10525_v17 = vld [vmem:[#allocation10 + $0x9b8] sm:$0xf] }
 0x38e   :  { %v12486_v34 = vld [vmem:[#allocation10 + $0xaf4] sm:$0xf0] }
 0x390   :  { %6572 = vmatpush.bf16.msrb.mxu3 %v9566_v35  ;;  %6507 = vmatpush.bf16.msrb.mxu0 %v11094_v28  ;;  %v12342_v35 = vld [vmem:[#allocation10 + $0x674] sm:$0xf0]  ;;  %v12533_v28 = vld [vmem:[#allocation10 + $0xc6c] sm:$0xf0] }
 0x391   :  { %6537 = vmatpush.bf16.msra.mxu1 %v9818_v10  ;;  %6546 = vmatpush.bf16.msra.mxu2 %v10586_v37  ;;  %v10078_v7 = vor.u32 %v12342_v35, %v10077_v29  ;;  %v12397_v10 = vld [vmem:[#allocation10 + $0x834] sm:$0xf]  ;;  %v10013_v37 = vld [vmem:[#allocation10 + $0x5b8] sm:$0xf]  ;;  %v10838_v48 = vor.u32 %v12533_v28, %v10837_v25  ;;  %v12206_v29 = vld [vmem:[#allocation10 + $0x23c] sm:$0xf] }
 0x392   :  { %v10330_v4 = vor.u32 %v12397_v10, %v10327_v3  ;;  %v10014_v13 = vor.u32 %v12326_v54, %v10013_v37  ;;  %v9567_v35 = vld [vmem:[#allocation10 + $0x278] sm:$0xf0]  ;;  %v11095_v25 = vld [vmem:[#allocation10 + $0xe70] sm:$0xf0]  ;;  %v12470_v10 = vld [vmem:[#allocation10 + $0xa74] sm:$0xf0] }
 0x393   :  { %v6331_v8 = vpop.f32.mrf.mxu1  ;;  %v12190_v3 = vld [vmem:[#allocation10 + $0x1bc] sm:$0xf]  ;;  %v12573_v54 = vld [vmem:[#allocation10 + $0xdb4] sm:$0xf] }
 0x394   :  { %6573 = vmatpush.bf16.msrb.mxu3 %v9502_v44  ;;  %6508 = vmatpush.bf16.msrb.mxu0 %v11030_v55  ;;  %v6320_v44 = vpop.f32.mrf.mxu3  ;;  %v6319_v55 = vadd.f32 %v6318_v15, %v3258_v23  ;;  %v6294_v12 = vpop.f32.mrf.mxu2  ;;  %v12310_v15 = vld [vmem:[#allocation10 + $0x574] sm:$0xf0]  ;;  %v9631_v23 = vld [vmem:[#allocation10 + $0x2f8] sm:$0xf0] }
 0x395   :  { %6582 = vmatpush.bf16.msrb.mxu1 %v10270_v47  ;;  %6547 = vmatpush.bf16.msra.mxu2 %v10522_v11  ;;  %v9762_v47 = vor.u32 %v12254_v32, %v9759_v36  ;;  %v12621_v11 = vld [vmem:[#allocation10 + $0xf34] sm:$0xf]  ;;  %v9634_v38 = vor.u32 %v12222_v20, %v9631_v23  ;;  %v9503_v44 = vld [vmem:[#allocation10 + $0x1f8] sm:$0xf0]  ;;  %v10461_v20 = vld [vmem:[#allocation10 + $0x938] sm:$0xf] }
 0x396   :  { %6538 = vmatmul.bf16.vlgmr.msra.gmra.mxu1 %v13251_v39  ;;  %v12589_v36 = vld [vmem:[#allocation10 + $0xe34] sm:$0xf]  ;;  %v9439_v12 = vld [vmem:[#allocation10 + $0x178] sm:$0xf0]  ;;  %v12438_v23 = vld [vmem:[#allocation10 + $0x974] sm:$0xf0] }
 0x397   :  { %v11098_v37 = vor.u32 %v12589_v36, %v11095_v25  ;;  %v12142_v36 = vld [vmem:[#allocation10 + $0x3c] sm:$0xf] }
 0x398   :  { %6574 = vmatpush.bf16.msrb.mxu3 %v9438_v19  ;;  %6509 = vmatpush.bf16.msrb.mxu0 %v10966_v45  ;;  %v11223_v19 = vld [vmem:[#allocation10 + $0xf70] sm:$0xf0]  ;;  %v9949_v45 = vld [vmem:[#allocation10 + $0x538] sm:$0xf] }
 0x399   :  { %6583 = vmatpush.bf16.msrb.mxu1 %v10206_v21  ;;  %6548 = vmatpush.bf16.msra.mxu2 %v10458_v24  ;;  %v13400_v21 = vadd.f32 %v6331_v8, %v6319_v55  ;;  %v11226_v49 = vor.u32 %v12621_v11, %v11223_v19  ;;  %v12605_v24 = vld [vmem:[#allocation10 + $0xeb4] sm:$0xf]  ;;  %v9950_v9 = vor.u32 %v12310_v15, %v9949_v45  ;;  %v12454_v8 = vld [vmem:[#allocation10 + $0x9f4] sm:$0xf0] }
 0x39a   :  { %v11034_v19 = vor.u32 %v12573_v54, %v11031_v63  ;;  %v10967_v15 = vld [vmem:[#allocation10 + $0xd70] sm:$0xf0]  ;;  %v9314_v54 = vor.u32 %v12142_v36, %v9311_v41  ;;  %v10333_v63 = vld [vmem:[#allocation10 + $0x838] sm:$0xf] }
 0x39b   :  { %v6333_v32 = vpop.f32.mrf.mxu1 }
 0x39c   :  { %6575 = vmatpush.bf16.msrb.mxu3 %v9374_v26  ;;  %6510 = vmatpush.bf16.msrb.mxu0 %v10902_v61  ;;  %v10718_v26 = vor.u32 %v12502_v56, %v10717_v18  ;;  %v11162_v61 = vor.u32 %v12605_v24, %v11159_v59  ;;  %v10526_v18 = vor.u32 %v12454_v8, %v10525_v17  ;;  %v12158_v24 = vld [vmem:[#allocation10 + $0xbc] sm:$0xf]  ;;  %v12422_v32 = vld [vmem:[#allocation10 + $0x8f4] sm:$0xf0] }
 0x39d   :  { %6584 = vmatpush.bf16.msrb.mxu1 %v10142_v51  ;;  %6549 = vmatpush.bf16.msra.mxu2 %v10394_v40  ;;  %v9885_v51 = vld [vmem:[#allocation10 + $0x4b8] sm:$0xf]  ;;  %v10654_v40 = vor.u32 %v12486_v34, %v10653_v2  ;;  %v10462_v2 = vor.u32 %v12438_v23, %v10461_v20  ;;  %v10015_v17 = vld [vmem:[#allocation10 + $0x5f8] sm:$0xf0]  ;;  %v12653_v20 = vld [vmem:[#allocation13 + $0x30] sm:$0xff] }
 0x39e   :  { %v9886_v28 = vor.u32 %v12294_v30, %v9885_v51  ;;  %v12350_v51 = vld [vmem:[#allocation10 + $0x6bc] sm:$0xf]  ;;  %v10903_v30 = vld [vmem:[#allocation10 + $0xcf0] sm:$0xf0] }
 0x39f   :  { %v12510_v8 = vld [vmem:[#allocation10 + $0xbbc] sm:$0xf] }
 0x3a0   :  { %6576 = vmatpush.bf16.msrb.mxu3 %v9310_v43  ;;  %6511 = vmatpush.bf16.msrb.mxu0 %v10838_v48  ;;  %v9570_v43 = vor.u32 %v12206_v29, %v9567_v35  ;;  %v10271_v48 = vld [vmem:[#allocation10 + $0x7f8] sm:$0xf0]  ;;  %v6305_v11 = vpop.f32.mrf.mxu0  ;;  %v10397_v35 = vld [vmem:[#allocation10 + $0x8b8] sm:$0xf] }
 0x3a1   :  { %6585 = vmatpush.bf16.msrb.mxu1 %v10078_v7  ;;  %6550 = vmatpush.bf16.msra.mxu2 %v10330_v4  ;;  %v10589_v7 = vld [vmem:[#allocation10 + $0xa38] sm:$0xf]  ;;  %v12174_v4 = vld [vmem:[#allocation10 + $0x13c] sm:$0xf]  ;;  %v13406_v45 = vadd.f32 %v6305_v11, %v13398_v31  ;;  %v12541_v31 = vld [vmem:[#allocation10 + $0xcb4] sm:$0xf] }
 0x3a2   :  { %v10590_v55 = vor.u32 %v12470_v10, %v10589_v7  ;;  %v9442_v56 = vor.u32 %v12174_v4, %v9439_v12  ;;  %v3259_v7 = vperm.slane %v13380_v33, 2  ;;  %v12525_v10 = vld [vmem:[#allocation10 + $0xc34] sm:$0xf]  ;;  %v10783_v4 = vld [vmem:[#allocation10 + $0xbf8] sm:$0xf0] }
 0x3a3   :  { %6577 = vmatmul.bf16.vlgmr.msrb.gmra.mxu3 %v13246_v22  ;;  %6512 = vmatmul.bf16.vlgmr.msrb.gmra.mxu0 %v13268_v1  ;;  %v12302_v23 = vld [vmem:[#allocation10 + $0x53c] sm:$0xf] }
 0x3a4   :  { %6621 = vmatpush.bf16.msra.mxu3 %v9762_v47  ;;  %6556 = vmatpush.bf16.msra.mxu0 %v11290_v0  ;;  %v12382_v47 = vld [vmem:[#allocation10 + $0x7bc] sm:$0xf]  ;;  %v9506_v0 = vor.u32 %v12190_v3, %v9503_v44  ;;  %v10839_v3 = vld [vmem:[#allocation10 + $0xc70] sm:$0xf0]  ;;  %v12654_v44 = vld [vmem:[#allocation13 + $0x38] sm:$0xff] }
 0x3a5   :  { %6586 = vmatpush.bf16.msrb.mxu1 %v10014_v13  ;;  %6595 = vmatpush.bf16.msrb.mxu2 %v10782_v14  ;;  %v10274_v46 = vor.u32 %v12382_v47, %v10271_v48  ;;  %v12366_v13 = vld [vmem:[#allocation10 + $0x73c] sm:$0xf]  ;;  %v11293_v47 = vld [vmem:[#allocation10 + $0xfb8] sm:$0xf] }
 0x3a6   :  { %6551 = vmatmul.bf16.vlgmr.msra.gmra.mxu2 %v13259_v6  ;;  %v10207_v14 = vld [vmem:[#allocation10 + $0x778] sm:$0xf0]  ;;  %v6370_v59 = vpop.f32.mrf.mxu3  ;;  %v12646_v48 = vld [vmem:[#allocation10 + $0xff4] sm:$0xf0] }
 0x3a7   :  { %v6371_v11 = vadd.f32 %v6370_v59, %v3259_v7  ;;  %v10719_v59 = vld [vmem:[#allocation10 + $0xb78] sm:$0xf0] }
 0x3a8   :  { %6622 = vmatpush.bf16.msra.mxu3 %v9698_v62  ;;  %6557 = vmatpush.bf16.msra.mxu0 %v11226_v49  ;;  %v12557_v62 = vld [vmem:[#allocation10 + $0xd34] sm:$0xf]  ;;  %v10210_v49 = vor.u32 %v12366_v13, %v10207_v14  ;;  %v11229_v14 = vld [vmem:[#allocation10 + $0xf38] sm:$0xf]  ;;  %v9823_v7 = vld [vmem:[#allocation10 + $0x478] sm:$0xf0] }
 0x3a9   :  { %6587 = vmatpush.bf16.msrb.mxu1 %v9950_v9  ;;  %6596 = vmatpush.bf16.msrb.mxu2 %v10718_v26  ;;  %v10970_v9 = vor.u32 %v12557_v62, %v10967_v15  ;;  %v9375_v26 = vld [vmem:[#allocation10 + $0xf8] sm:$0xf0]  ;;  %v6344_v34 = vpop.f32.mrf.mxu2  ;;  %v12630_v62 = vld [vmem:[#allocation10 + $0xf74] sm:$0xf0] }
 0x3aa   :  { %v13410_v25 = vadd.f32 %v6344_v34, %v13400_v21  ;;  %v12286_v34 = vld [vmem:[#allocation10 + $0x4bc] sm:$0xf] }
 0x3ac   :  { %6623 = vmatpush.bf16.msra.mxu3 %v9634_v38  ;;  %6558 = vmatpush.bf16.msra.mxu0 %v11162_v61  ;;  %v10143_v38 = vld [vmem:[#allocation10 + $0x6f8] sm:$0xf0]  ;;  %v9378_v61 = vor.u32 %v12158_v24, %v9375_v26  ;;  %v11230_v26 = vor.u32 %v12630_v62, %v11229_v14 }
 0x3ad   :  { %6588 = vmatpush.bf16.msrb.mxu1 %v9886_v28  ;;  %6597 = vmatpush.bf16.msrb.mxu2 %v10654_v40  ;;  %v10146_v29 = vor.u32 %v12350_v51, %v10143_v38  ;;  %v6307_v28 = vpop.f32.mrf.mxu0  ;;  %v10906_v40 = vor.u32 %v12541_v31, %v10903_v30  ;;  %v9951_v24 = vld [vmem:[#allocation10 + $0x578] sm:$0xf0]  ;;  %v11165_v51 = vld [vmem:[#allocation10 + $0xeb8] sm:$0xf] }
 0x3ae   :  { %v12614_v38 = vld [vmem:[#allocation10 + $0xef4] sm:$0xf0]  ;;  %v9954_v31 = vor.u32 %v12302_v23, %v9951_v24  ;;  %v10463_v14 = vld [vmem:[#allocation10 + $0x978] sm:$0xf0] }
 0x3af   :  { %v12598_v28 = vld [vmem:[#allocation10 + $0xe74] sm:$0xf0] }
 0x3b0   :  { %6624 = vmatpush.bf16.msra.mxu3 %v9570_v43  ;;  %6559 = vmatpush.bf16.msra.mxu0 %v11098_v37  ;;  %v10079_v43 = vld [vmem:[#allocation10 + $0x678] sm:$0xf0]  ;;  %v10398_v37 = vor.u32 %v12422_v32, %v10397_v35  ;;  %v11166_v32 = vor.u32 %v12614_v38, %v11165_v51 }
 0x3b1   :  { %6589 = vmatpush.bf16.msrb.mxu1 %v9822_v27  ;;  %6598 = vmatpush.bf16.msrb.mxu2 %v10590_v55  ;;  %v10082_v21 = vor.u32 %v12334_v42, %v10079_v43  ;;  %v12406_v27 = vld [vmem:[#allocation10 + $0x874] sm:$0xf0]  ;;  %v12318_v55 = vld [vmem:[#allocation10 + $0x5bc] sm:$0xf]  ;;  %v12651_v42 = vld [vmem:[#allocation13 + $0x20] sm:$0xff] }
 0x3b2   :  { %v10334_v13 = vor.u32 %v12406_v27, %v10333_v63  ;;  %v10655_v35 = vld [vmem:[#allocation10 + $0xaf8] sm:$0xf0]  ;;  %v12662_v63 = vld [vmem:[#allocation13 + $0x78] sm:$0xff] }
 0x3b3   :  { %v6383_v12 = vpop.f32.mrf.mxu1  ;;  %v12270_v43 = vld [vmem:[#allocation10 + $0x43c] sm:$0xf] }
 0x3b4   :  { %6625 = vmatpush.bf16.msra.mxu3 %v9506_v0  ;;  %6560 = vmatpush.bf16.msra.mxu0 %v11034_v19  ;;  %v6372_v0 = vpop.f32.mrf.mxu3  ;;  %v11294_v19 = vor.u32 %v12646_v48, %v11293_v47  ;;  %v13413_v15 = vadd.f32 %v6383_v12, %v6371_v11  ;;  %v12582_v47 = vld [vmem:[#allocation10 + $0xdf4] sm:$0xf0]  ;;  %v9826_v48 = vor.u32 %v12270_v43, %v9823_v7  ;;  %v12446_v27 = vld [vmem:[#allocation10 + $0x9bc] sm:$0xf]  ;;  %v12661_v12 = vld [vmem:[#allocation13 + $0x70] sm:$0xff] }
 0x3b5   :  { %6634 = vmatpush.bf16.msra.mxu1 %v10274_v46  ;;  %6599 = vmatpush.bf16.msrb.mxu2 %v10526_v18  ;;  %v10842_v46 = vor.u32 %v12525_v10, %v10839_v3  ;;  %v6346_v18 = vpop.f32.mrf.mxu2  ;;  %v12462_v10 = vld [vmem:[#allocation10 + $0xa3c] sm:$0xf] }
 0x3b6   :  { %6590 = vmatmul.bf16.vlgmr.msrb.gmra.mxu1 %v13251_v39  ;;  %v10591_v3 = vld [vmem:[#allocation10 + $0xa78] sm:$0xf0] }
 0x3b7   :  { %v12660_v24 = vld [vmem:[#allocation13 + $0x68] sm:$0xff] }
 0x3b8   :  { %6626 = vmatpush.bf16.msra.mxu3 %v9442_v56  ;;  %6561 = vmatpush.bf16.msra.mxu0 %v10970_v9  ;;  %v10018_v56 = vor.u32 %v12318_v55, %v10015_v17  ;;  %v12494_v9 = vld [vmem:[#allocation10 + $0xb3c] sm:$0xf] }
 0x3b9   :  { %6635 = vmatpush.bf16.msra.mxu1 %v10210_v49  ;;  %6600 = vmatpush.bf16.msrb.mxu2 %v10462_v2  ;;  %v10786_v49 = vor.u32 %v12510_v8, %v10783_v4  ;;  %v10722_v30 = vor.u32 %v12494_v9, %v10719_v59  ;;  %v12652_v2 = vld [vmem:[#allocation13 + $0x28] sm:$0xff] }
 0x3ba   :  { %v10527_v55 = vld [vmem:[#allocation10 + $0x9f8] sm:$0xf0]  ;;  %v10973_v8 = vld [vmem:[#allocation10 + $0xd38] sm:$0xf] }
 0x3bb   :  { %v6385_v36 = vpop.f32.mrf.mxu1  ;;  %v12566_v4 = vld [vmem:[#allocation10 + $0xd74] sm:$0xf0]  ;;  %v10530_v11 = vor.u32 %v12446_v27, %v10527_v55  ;;  %v12414_v9 = vld [vmem:[#allocation10 + $0x8bc] sm:$0xf]  ;;  %v12657_v27 = vld [vmem:[#allocation13 + $0x50] sm:$0xff] }
 0x3bc   :  { %6627 = vmatpush.bf16.msra.mxu3 %v9378_v61  ;;  %6562 = vmatpush.bf16.msra.mxu0 %v10906_v40  ;;  %v9887_v61 = vld [vmem:[#allocation10 + $0x4f8] sm:$0xf0]  ;;  %v10974_v18 = vor.u32 %v12566_v4, %v10973_v8  ;;  %v12669_v55 = vld [vmem:[#allocation13 + $0xb0] sm:$0xff] }
 0x3bd   :  { %6636 = vmatpush.bf16.msra.mxu1 %v10146_v29  ;;  %6601 = vmatpush.bf16.msrb.mxu2 %v10398_v37  ;;  %v12478_v29 = vld [vmem:[#allocation10 + $0xabc] sm:$0xf]  ;;  %v9890_v40 = vor.u32 %v12286_v34, %v9887_v61  ;;  %v12647_v34 = vld [vmem:[#allocation13] sm:$0xff] }
 0x3be   :  { %v10658_v41 = vor.u32 %v12478_v29, %v10655_v35  ;;  %v10399_v59 = vld [vmem:[#allocation10 + $0x8f8] sm:$0xf0]  ;;  %v12659_v35 = vld [vmem:[#allocation13 + $0x60] sm:$0xff] }
 0x3bf   :  { %v12638_v61 = vld [vmem:[#allocation10 + $0xfbc] sm:$0xf] }
 0x3c0   :  { %6628 = vmatpush.bf16.msra.mxu3 %v9314_v54  ;;  %6563 = vmatpush.bf16.msra.mxu0 %v10842_v46  ;;  %v10594_v54 = vor.u32 %v12462_v10, %v10591_v3  ;;  %v6357_v0 = vpop.f32.mrf.mxu0  ;;  %v11295_v29 = vld [vmem:[#allocation10 + $0xff8] sm:$0xf0] }
 0x3c1   :  { %6637 = vmatpush.bf16.msra.mxu1 %v10082_v21  ;;  %6602 = vmatpush.bf16.msrb.mxu2 %v10334_v13  ;;  %v12650_v21 = vld [vmem:[#allocation13 + $0x18] sm:$0xff]  ;;  %v13419_v17 = vadd.f32 %v6357_v0, %v13410_v25  ;;  %v12430_v13 = vld [vmem:[#allocation10 + $0x93c] sm:$0xf] }
 0x3c2   :  { %v10466_v25 = vor.u32 %v12430_v13, %v10463_v14  ;;  %v10335_v36 = vld [vmem:[#allocation10 + $0x878] sm:$0xf0]  ;;  %v12683_v13 = vld [vmem:[#allocation13 + $0x120] sm:$0xff] }
 0x3c3   :  { %6629 = vmatmul.bf16.vlgmr.msra.gmra.mxu3 %v13246_v22  ;;  %6564 = vmatmul.bf16.vlgmr.msra.gmra.mxu0 %v13268_v1  ;;  %v11101_v22 = vld [vmem:[#allocation10 + $0xe38] sm:$0xf]  ;;  %v12622_v7 = vld [vmem:[#allocation10 + $0xf3c] sm:$0xf] }
 0x3c4   :  { %7733 = vmatpush.bf16.msrb.mxu3 %v12654_v44  ;;  %6608 = vmatpush.bf16.msrb.mxu0 %v11294_v19  ;;  %v11102_v37 = vor.u32 %v12598_v28, %v11101_v22  ;;  %v11037_v44 = vld [vmem:[#allocation10 + $0xdb8] sm:$0xf]  ;;  %v12649_v19 = vld [vmem:[#allocation13 + $0x10] sm:$0xff]  ;;  %v12686_v28 = vld [vmem:[#allocation13 + $0x138] sm:$0xff] }
 0x3c5   :  { %6638 = vmatpush.bf16.msra.mxu1 %v10018_v56  ;;  %6647 = vmatpush.bf16.msra.mxu2 %v10786_v49  ;;  %v11038_v46 = vor.u32 %v12582_v47, %v11037_v44  ;;  %v10909_v56 = vld [vmem:[#allocation10 + $0xcb8] sm:$0xf]  ;;  %v11231_v10 = vld [vmem:[#allocation10 + $0xf78] sm:$0xf0]  ;;  %v12658_v44 = vld [vmem:[#allocation13 + $0x58] sm:$0xff] }
 0x3c6   :  { %6603 = vmatmul.bf16.vlgmr.msrb.gmra.mxu2 %v13259_v6  ;;  %v6422_v62 = vpop.f32.mrf.mxu3  ;;  %v12550_v49 = vld [vmem:[#allocation10 + $0xcf4] sm:$0xf0]  ;;  %v12670_v47 = vld [vmem:[#allocation13 + $0xb8] sm:$0xff]  ;;  %v12590_v4 = vld [vmem:[#allocation10 + $0xe3c] sm:$0xf] }
 0x3c7   :  { %v10910_v38 = vor.u32 %v12550_v49, %v10909_v56  ;;  %v12684_v0 = vld [vmem:[#allocation13 + $0x128] sm:$0xff]  ;;  %v12655_v56 = vld [vmem:[#allocation13 + $0x40] sm:$0xff] }
 0x3c8   :  { %7734 = vmatpush.bf16.msrb.mxu3 %v12653_v20  ;;  %6609 = vmatpush.bf16.msrb.mxu0 %v11230_v26  ;;  %v12648_v20 = vld [vmem:[#allocation13 + $0x8] sm:$0xff]  ;;  %v6359_v51 = vpop.f32.mrf.mxu0  ;;  %v12667_v49 = vld [vmem:[#allocation13 + $0xa0] sm:$0xff] }
 0x3c9   :  { %6639 = vmatpush.bf16.msra.mxu1 %v9954_v31  ;;  %6648 = vmatpush.bf16.msra.mxu2 %v10722_v30  ;;  %v6396_v23 = vpop.f32.mrf.mxu2  ;;  %v3260_v31 = vperm.slane %v13380_v33, 3  ;;  %v12534_v30 = vld [vmem:[#allocation10 + $0xc74] sm:$0xf0]  ;;  %v11298_v33 = vor.u32 %v12638_v61, %v11295_v29  ;;  %v10975_v51 = vld [vmem:[#allocation10 + $0xd78] sm:$0xf0] }
 0x3ca   :  { %v13423_v26 = vadd.f32 %v6396_v23, %v13413_v15  ;;  %v6673_v15 = vmax.f32 %v13308_v16, 0.0  ;;  %v12685_v16 = vld [vmem:[#allocation13 + $0x130] sm:$0xff]  ;;  %v10911_v61 = vld [vmem:[#allocation10 + $0xcf8] sm:$0xf0] }
 0x3cc   :  { %7735 = vmatpush.bf16.msrb.mxu3 %v12652_v2  ;;  %6610 = vmatpush.bf16.msrb.mxu0 %v11166_v32  ;;  %v10402_v2 = vor.u32 %v12414_v9, %v10399_v59  ;;  %v12398_v32 = vld [vmem:[#allocation10 + $0x83c] sm:$0xf] }
 0x3cd   :  { %6640 = vmatpush.bf16.msra.mxu1 %v9890_v40  ;;  %6649 = vmatpush.bf16.msra.mxu2 %v10658_v41  ;;  %v6423_v41 = vadd.f32 %v6422_v62, %v3260_v31  ;;  %v10338_v43 = vor.u32 %v12398_v32, %v10335_v36  ;;  %v12574_v62 = vld [vmem:[#allocation10 + $0xdbc] sm:$0xf] }
 0x3ce   :  { %v6424_v22 = vpop.f32.mrf.mxu3  ;;  %v12558_v59 = vld [vmem:[#allocation10 + $0xd3c] sm:$0xf] }
 0x3cf   :  { %v12692_v32 = vld [vmem:[#allocation13 + $0x168] sm:$0xff] }
 0x3d0   :  { %7736 = vmatpush.bf16.msrb.mxu3 %v12651_v42  ;;  %6611 = vmatpush.bf16.msrb.mxu0 %v11102_v37 }
 0x3d1   :  { %6641 = vmatpush.bf16.msra.mxu1 %v9826_v48  ;;  %6650 = vmatpush.bf16.msra.mxu2 %v10594_v54  ;;  %v6398_v37 = vpop.f32.mrf.mxu2  ;;  %v6946_v48 = vpack.c.bf16 %v6673_v15, %v6673_v15  ;;  %v11234_v54 = vor.u32 %v12622_v7, %v11231_v10  ;;  %v12718_v10 = vld [vmem:[#allocation13 + $0x238] sm:$0xff] }
 0x3d3   :  { %v6435_v42 = vpop.f32.mrf.mxu1 }
 0x3d4   :  { %7737 = vmatpush.bf16.msrb.mxu3 %v12650_v21  ;;  %6612 = vmatpush.bf16.msrb.mxu0 %v11038_v46  ;;  %v13427_v3 = vadd.f32 %v6435_v42, %v6423_v41  ;;  %v12606_v21 = vld [vmem:[#allocation10 + $0xebc] sm:$0xf]  ;;  %v12691_v42 = vld [vmem:[#allocation13 + $0x160] sm:$0xff] }
 0x3d5   :  { %7746 = vmatpush.bf16.msrb.mxu1 %v12662_v63  ;;  %6651 = vmatpush.bf16.msra.mxu2 %v10530_v11  ;;  %v11167_v63 = vld [vmem:[#allocation10 + $0xef8] sm:$0xf0] }
 0x3d6   :  { %6642 = vmatmul.bf16.vlgmr.msra.gmra.mxu1 %v13251_v39  ;;  %v10845_v39 = vld [vmem:[#allocation10 + $0xc38] sm:$0xf]  ;;  %v11170_v46 = vor.u32 %v12606_v21, %v11167_v63  ;;  %v11103_v11 = vld [vmem:[#allocation10 + $0xe78] sm:$0xf0]  ;;  %v12702_v21 = vld [vmem:[#allocation13 + $0x1b8] sm:$0xff] }
 0x3d7   :  { %v10846_v40 = vor.u32 %v12534_v30, %v10845_v39  ;;  %v11106_v14 = vor.u32 %v12590_v4, %v11103_v11  ;;  %v12681_v39 = vld [vmem:[#allocation13 + $0x110] sm:$0xff]  ;;  %v12664_v41 = vld [vmem:[#allocation13 + $0x88] sm:$0xff] }
 0x3d8   :  { %7738 = vmatpush.bf16.msrb.mxu3 %v12649_v19  ;;  %6613 = vmatpush.bf16.msrb.mxu0 %v10974_v18  ;;  %v12656_v19 = vld [vmem:[#allocation13 + $0x48] sm:$0xff]  ;;  %v12693_v30 = vld [vmem:[#allocation13 + $0x170] sm:$0xff] }
 0x3d9   :  { %7747 = vmatpush.bf16.msrb.mxu1 %v12661_v12  ;;  %6652 = vmatpush.bf16.msra.mxu2 %v10466_v25  ;;  %v12668_v12 = vld [vmem:[#allocation13 + $0xa8] sm:$0xff]  ;;  %v12682_v25 = vld [vmem:[#allocation13 + $0x118] sm:$0xff] }
 0x3da   :  { %v11039_v18 = vld [vmem:[#allocation10 + $0xdf8] sm:$0xf0] }
 0x3db   :  { %v6437_v8 = vpop.f32.mrf.mxu1  ;;  %v12688_v11 = vld [vmem:[#allocation13 + $0x148] sm:$0xff] }
 0x3dc   :  { %7739 = vmatpush.bf16.msrb.mxu3 %v12648_v20  ;;  %6614 = vmatpush.bf16.msrb.mxu0 %v10910_v38  ;;  %v12694_v20 = vld [vmem:[#allocation13 + $0x178] sm:$0xff]  ;;  %v12676_v8 = vld [vmem:[#allocation13 + $0xe8] sm:$0xff] }
 0x3dd   :  { %7748 = vmatpush.bf16.msrb.mxu1 %v12660_v24  ;;  %6653 = vmatpush.bf16.msra.mxu2 %v10402_v2  ;;  %v11042_v24 = vor.u32 %v12574_v62, %v11039_v18  ;;  %v12666_v38 = vld [vmem:[#allocation13 + $0x98] sm:$0xff]  ;;  %v10978_v2 = vor.u32 %v12558_v59, %v10975_v51  ;;  %v12699_v62 = vld [vmem:[#allocation13 + $0x1a0] sm:$0xff]  ;;  %v12725_v59 = vld [vmem:[#allocation13 + $0x270] sm:$0xff] }
 0x3de   :  { %v12714_v18 = vld [vmem:[#allocation13 + $0x218] sm:$0xff] }
 0x3e0   :  { %7740 = vmatpush.bf16.msrb.mxu3 %v12647_v34  ;;  %6615 = vmatpush.bf16.msrb.mxu0 %v10846_v40  ;;  %v6409_v23 = vpop.f32.mrf.mxu0  ;;  %v12542_v34 = vld [vmem:[#allocation10 + $0xcbc] sm:$0xf] }
 0x3e1   :  { %7749 = vmatpush.bf16.msrb.mxu1 %v12659_v35  ;;  %6654 = vmatpush.bf16.msra.mxu2 %v10338_v43  ;;  %v13433_v9 = vadd.f32 %v6409_v23, %v13423_v26  ;;  %v12665_v26 = vld [vmem:[#allocation13 + $0x90] sm:$0xff]  ;;  %v12680_v35 = vld [vmem:[#allocation13 + $0x108] sm:$0xff]  ;;  %v10914_v22 = vor.u32 %v12542_v34, %v10911_v61  ;;  %v6677_v43 = vmax.f32 %v13352_v50, 0.0 }
 0x3e2   :  { %v10847_v40 = vld [vmem:[#allocation10 + $0xc78] sm:$0xf0]  ;;  %v12717_v50 = vld [vmem:[#allocation13 + $0x230] sm:$0xff] }
 0x3e3   :  { %7741 = vmatmul.bf16.vlgmr.msrb.gmra.mxu3 %v6946_v48  ;;  %6616 = vmatmul.bf16.vlgmr.msrb.gmra.mxu0 %v13268_v1  ;;  %v6675_v48 = vmax.f32 %v13324_v58, 0.0  ;;  %v6950_v63 = vpack.c.bf16 %v6677_v43, %v6677_v43  ;;  %v12716_v58 = vld [vmem:[#allocation13 + $0x228] sm:$0xff]  ;;  %v12722_v43 = vld [vmem:[#allocation13 + $0x258] sm:$0xff] }
 0x3e4   :  { %7785 = vmatpush.bf16.msra.mxu3 %v12686_v28  ;;  %6660 = vmatpush.bf16.msra.mxu0 %v11298_v33  ;;  %v12526_v28 = vld [vmem:[#allocation10 + $0xc3c] sm:$0xf]  ;;  %v12679_v33 = vld [vmem:[#allocation13 + $0x100] sm:$0xff] }
 0x3e5   :  { %7750 = vmatpush.bf16.msrb.mxu1 %v12658_v44  ;;  %7759 = vmatpush.bf16.msrb.mxu2 %v12670_v47  ;;  %v10850_v37 = vor.u32 %v12526_v28, %v10847_v40  ;;  %v12678_v44 = vld [vmem:[#allocation13 + $0xf8] sm:$0xff]  ;;  %v12663_v47 = vld [vmem:[#allocation13 + $0x80] sm:$0xff]  ;;  %v12672_v34 = vld [vmem:[#allocation13 + $0xc8] sm:$0xff]  ;;  %v6676_v28 = vmax.f32 %v13337_v53, 0.0 }
 0x3e6   :  { %6655 = vmatmul.bf16.vlgmr.msra.gmra.mxu2 %v13259_v6  ;;  %v6674_v6 = vmax.f32 %v13316_v52, 0.0  ;;  %v13435_v52 = vpop.f32.mrf.mxu3  ;;  %v12696_v61 = vld [vmem:[#allocation13 + $0x188] sm:$0xff] }
 0x3e8   :  { %7786 = vmatpush.bf16.msra.mxu3 %v12685_v16  ;;  %6661 = vmatpush.bf16.msra.mxu0 %v11234_v54  ;;  %v6947_v31 = vpack.c.bf16 %v6674_v6, %v6674_v6  ;;  %v6411_v15 = vpop.f32.mrf.mxu0  ;;  %v12690_v54 = vld [vmem:[#allocation13 + $0x158] sm:$0xff] }
 0x3e9   :  { %7751 = vmatpush.bf16.msrb.mxu1 %v12657_v27  ;;  %7760 = vmatpush.bf16.msrb.mxu2 %v12669_v55  ;;  %v6448_v29 = vpop.f32.mrf.mxu2  ;;  %v12677_v27 = vld [vmem:[#allocation13 + $0xf0] sm:$0xff]  ;;  %v6948_v55 = vpack.c.bf16 %v6675_v48, %v6675_v48  ;;  %v12674_v6 = vld [vmem:[#allocation13 + $0xd8] sm:$0xff]  ;;  %v12671_v15 = vld [vmem:[#allocation13 + $0xc0] sm:$0xff] }
 0x3ea   :  { %v13438_v36 = vadd.f32 %v6448_v29, %v13427_v3  ;;  %v12723_v29 = vld [vmem:[#allocation13 + $0x260] sm:$0xff]  ;;  %v12733_v48 = vld [vmem:[#allocation13 + $0x2b0] sm:$0xff] }
 0x3ec   :  { %7787 = vmatpush.bf16.msra.mxu3 %v12684_v0  ;;  %6662 = vmatpush.bf16.msra.mxu0 %v11170_v46  ;;  %v12689_v0 = vld [vmem:[#allocation13 + $0x150] sm:$0xff] }
 0x3ed   :  { %7752 = vmatpush.bf16.msrb.mxu1 %v12656_v19  ;;  %7761 = vmatpush.bf16.msrb.mxu2 %v12668_v12  ;;  %v12701_v46 = vld [vmem:[#allocation13 + $0x1b0] sm:$0xff]  ;;  %v12700_v19 = vld [vmem:[#allocation13 + $0x1a8] sm:$0xff]  ;;  %v12715_v12 = vld [vmem:[#allocation13 + $0x220] sm:$0xff] }
 0x3ee   :  { %v6476_v7 = vpop.f32.mrf.mxu3 }
 0x3ef   :  { %v12734_v7 = vld [vmem:[#allocation13 + $0x2b8] sm:$0xff] }
 0x3f0   :  { %7788 = vmatpush.bf16.msra.mxu3 %v12683_v13  ;;  %6663 = vmatpush.bf16.msra.mxu0 %v11106_v14  ;;  %v12675_v13 = vld [vmem:[#allocation13 + $0xe0] sm:$0xff] }
 0x3f1   :  { %7753 = vmatpush.bf16.msrb.mxu1 %v12655_v56  ;;  %7762 = vmatpush.bf16.msrb.mxu2 %v12667_v49  ;;  %v6450_v16 = vpop.f32.mrf.mxu2  ;;  %v12687_v14 = vld [vmem:[#allocation13 + $0x140] sm:$0xff]  ;;  %v12726_v56 = vld [vmem:[#allocation13 + $0x278] sm:$0xff] }
 0x3f2   :  { %v12708_v16 = vld [vmem:[#allocation13 + $0x1e8] sm:$0xff] }
 0x3f3   :  { %v13441_v3 = vpop.f32.mrf.mxu1 }
 0x3f4   :  { %7789 = vmatpush.bf16.msra.mxu3 %v12682_v25  ;;  %6664 = vmatpush.bf16.msra.mxu0 %v11042_v24  ;;  %v12713_v24 = vld [vmem:[#allocation13 + $0x210] sm:$0xff] }
 0x3f5   :  { %7798 = vmatpush.bf16.msra.mxu1 %v12694_v20  ;;  %7763 = vmatpush.bf16.msrb.mxu2 %v12666_v38  ;;  %v12698_v20 = vld [vmem:[#allocation13 + $0x198] sm:$0xff]  ;;  %v12697_v38 = vld [vmem:[#allocation13 + $0x190] sm:$0xff] }
 0x3f6   :  { %7754 = vmatmul.bf16.vlgmr.msrb.gmra.mxu1 %v6947_v31 }
 0x3f8   :  { %7790 = vmatpush.bf16.msra.mxu3 %v12681_v39  ;;  %6665 = vmatpush.bf16.msra.mxu0 %v10978_v2  ;;  %v12712_v39 = vld [vmem:[#allocation13 + $0x208] sm:$0xff] }
 0x3f9   :  { %7799 = vmatpush.bf16.msra.mxu1 %v12693_v30  ;;  %7764 = vmatpush.bf16.msrb.mxu2 %v12665_v26  ;;  %v12724_v30 = vld [vmem:[#allocation13 + $0x268] sm:$0xff]  ;;  %v12711_v26 = vld [vmem:[#allocation13 + $0x200] sm:$0xff] }
 0x3fb   :  { %v6489_v4 = vpop.f32.mrf.mxu1 }
 0x3fc   :  { %7791 = vmatpush.bf16.msra.mxu3 %v12680_v35  ;;  %6666 = vmatpush.bf16.msra.mxu0 %v10914_v22  ;;  %v6681_v35 = vmax.f32 %v13406_v45, 0.0  ;;  %v12710_v22 = vld [vmem:[#allocation13 + $0x1f8] sm:$0xff]  ;;  %v12749_v45 = vld [vmem:[#allocation13 + $0x330] sm:$0xff] }
 0x3fd   :  { %7800 = vmatpush.bf16.msra.mxu1 %v12692_v32  ;;  %7765 = vmatpush.bf16.msrb.mxu2 %v12664_v41  ;;  %v12695_v41 = vld [vmem:[#allocation13 + $0x180] sm:$0xff]  ;;  %v12746_v4 = vld [vmem:[#allocation13 + $0x318] sm:$0xff] }
 0x400   :  { %7792 = vmatpush.bf16.msra.mxu3 %v12679_v33  ;;  %6667 = vmatpush.bf16.msra.mxu0 %v10850_v37  ;;  %v6461_v49 = vpop.f32.mrf.mxu0  ;;  %v6679_v33 = vmax.f32 %v13378_v5, 0.0  ;;  %v12709_v37 = vld [vmem:[#allocation13 + $0x1f0] sm:$0xff]  ;;  %v12748_v5 = vld [vmem:[#allocation13 + $0x328] sm:$0xff] }
 0x401   :  { %7801 = vmatpush.bf16.msra.mxu1 %v12691_v42  ;;  %7766 = vmatpush.bf16.msrb.mxu2 %v12663_v47  ;;  %v13447_v25 = vadd.f32 %v6461_v49, %v13438_v36  ;;  %v12750_v36 = vld [vmem:[#allocation13 + $0x338] sm:$0xff]  ;;  %v12721_v47 = vld [vmem:[#allocation13 + $0x250] sm:$0xff] }
 0x402   :  { %v6952_v53 = vpack.c.bf16 %v6679_v33, %v6679_v33  ;;  %v12741_v33 = vld [vmem:[#allocation13 + $0x2f0] sm:$0xff] }
 0x403   :  { %7793 = vmatmul.bf16.vlgmr.msra.gmra.mxu3 %v6950_v63  ;;  %6668 = vmatmul.bf16.vlgmr.msra.gmra.mxu0 %v13268_v1  ;;  %v6678_v1 = vmax.f32 %v13365_v60, 0.0  ;;  %v12673_v60 = vld [vmem:[#allocation13 + $0xd0] sm:$0xff]  ;;  %v12732_v63 = vld [vmem:[#allocation13 + $0x2a8] sm:$0xff] }
 0x404   :  { %7837 = vmatpush.bf16.msrb.mxu3 %v12718_v10  ;;  %7772 = vmatpush.bf16.msrb.mxu0 %v12678_v44  ;;  %v6954_v10 = vpack.c.bf16 %v6681_v35, %v6681_v35  ;;  %v6949_v44 = vpack.c.bf16 %v6676_v28, %v6676_v28  ;;  %v12727_v35 = vld [vmem:[#allocation13 + $0x280] sm:$0xff]  ;;  %v12766_v28 = vld [vmem:[#allocation13 + $0x3b8] sm:$0xff] }
 0x405   :  { %7802 = vmatpush.bf16.msra.mxu1 %v12690_v54  ;;  %7811 = vmatpush.bf16.msra.mxu2 %v12702_v21  ;;  %v6951_v23 = vpack.c.bf16 %v6678_v1, %v6678_v1  ;;  %v12720_v21 = vld [vmem:[#allocation13 + $0x248] sm:$0xff]  ;;  %v12745_v1 = vld [vmem:[#allocation13 + $0x310] sm:$0xff] }
 0x406   :  { %7767 = vmatmul.bf16.vlgmr.msrb.gmra.mxu2 %v6948_v55  ;;  %v13449_v51 = vpop.f32.mrf.mxu3  ;;  %v13458_v55 = vld [vmem:[#allocation12 + $0x8] sm:$0xff] }
 0x408   :  { %7838 = vmatpush.bf16.msrb.mxu3 %v12717_v50  ;;  %7773 = vmatpush.bf16.msrb.mxu0 %v12677_v27  ;;  %v6463_v2 = vpop.f32.mrf.mxu0  ;;  %v12747_v50 = vld [vmem:[#allocation13 + $0x320] sm:$0xff] }
 0x409   :  { %7803 = vmatpush.bf16.msra.mxu1 %v12689_v0  ;;  %7812 = vmatpush.bf16.msra.mxu2 %v12701_v46  ;;  %v13451_v31 = vpop.f32.mrf.mxu2  ;;  %v12707_v27 = vld [vmem:[#allocation13 + $0x1e0] sm:$0xff]  ;;  %v3261_v0 = vperm.slane %v13458_v55, 4 }
 0x40a   :  { %v12719_v46 = vld [vmem:[#allocation13 + $0x240] sm:$0xff] }
 0x40c   :  { %7839 = vmatpush.bf16.msrb.mxu3 %v12716_v58  ;;  %7774 = vmatpush.bf16.msrb.mxu0 %v12676_v8  ;;  %v12731_v58 = vld [vmem:[#allocation13 + $0x2a0] sm:$0xff]  ;;  %v6682_v8 = vmax.f32 %v13419_v17, 0.0  ;;  %v12705_v17 = vld [vmem:[#allocation13 + $0x1d0] sm:$0xff] }
 0x40d   :  { %7804 = vmatpush.bf16.msra.mxu1 %v12688_v11  ;;  %7813 = vmatpush.bf16.msra.mxu2 %v12700_v19  ;;  %v12758_v11 = vld [vmem:[#allocation13 + $0x378] sm:$0xff] }
 0x40e   :  { %v6528_v32 = vpop.f32.mrf.mxu3 }
 0x40f   :  { %v6683_v32 = vmax.f32 %v13433_v9, 0.0  ;;  %v12765_v9 = vld [vmem:[#allocation13 + $0x3b0] sm:$0xff] }
 0x410   :  { %7840 = vmatpush.bf16.msrb.mxu3 %v12715_v12  ;;  %7775 = vmatpush.bf16.msrb.mxu0 %v12675_v13  ;;  %v12706_v12 = vld [vmem:[#allocation13 + $0x1d8] sm:$0xff]  ;;  %v6475_v13 = vadd.f32 %v13435_v52, %v3261_v0  ;;  %v12737_v0 = vld [vmem:[#allocation13 + $0x2d0] sm:$0xff] }
 0x411   :  { %7805 = vmatpush.bf16.msra.mxu1 %v12687_v14  ;;  %7814 = vmatpush.bf16.msra.mxu2 %v12699_v62  ;;  %v6502_v42 = vpop.f32.mrf.mxu2  ;;  %v12730_v14 = vld [vmem:[#allocation13 + $0x298] sm:$0xff]  ;;  %v6955_v62 = vpack.c.bf16 %v6682_v8, %v6682_v8 }
 0x412   :  { %v12753_v42 = vld [vmem:[#allocation13 + $0x350] sm:$0xff] }
 0x413   :  { %v13455_v40 = vpop.f32.mrf.mxu1 }
 0x414   :  { %7841 = vmatpush.bf16.msrb.mxu3 %v12714_v18  ;;  %7776 = vmatpush.bf16.msrb.mxu0 %v12674_v6  ;;  %v12757_v18 = vld [vmem:[#allocation13 + $0x370] sm:$0xff] }
 0x415   :  { %7850 = vmatpush.bf16.msrb.mxu1 %v12726_v56  ;;  %7815 = vmatpush.bf16.msra.mxu2 %v12698_v20  ;;  %v6488_v56 = vadd.f32 %v13441_v3, %v6475_v13  ;;  %v12729_v20 = vld [vmem:[#allocation13 + $0x290] sm:$0xff]  ;;  %v12728_v3 = vld [vmem:[#allocation13 + $0x288] sm:$0xff]  ;;  %v6684_v13 = vmax.f32 %v13447_v25, 0.0  ;;  %v12771_v25 = vld [vmem:[#allocation13 + $0x3e0] sm:$0xff] }
 0x416   :  { %7806 = vmatmul.bf16.vlgmr.msra.gmra.mxu1 %v6951_v23  ;;  %v12744_v23 = vld [vmem:[#allocation13 + $0x308] sm:$0xff] }
 0x417   :  { %v6501_v6 = vadd.f32 %v13451_v31, %v6488_v56  ;;  %v12703_v31 = vld [vmem:[#allocation13 + $0x1c0] sm:$0xff]  ;;  %v6957_v56 = vpack.c.bf16 %v6684_v13, %v6684_v13 }
 0x418   :  { %7842 = vmatpush.bf16.msrb.mxu3 %v12713_v24  ;;  %7777 = vmatpush.bf16.msrb.mxu0 %v12673_v60  ;;  %v12756_v24 = vld [vmem:[#allocation13 + $0x368] sm:$0xff] }
 0x419   :  { %7851 = vmatpush.bf16.msrb.mxu1 %v12725_v59  ;;  %7816 = vmatpush.bf16.msra.mxu2 %v12697_v38  ;;  %v12704_v38 = vld [vmem:[#allocation13 + $0x1c8] sm:$0xff] }
 0x41b   :  { %v6541_v54 = vpop.f32.mrf.mxu1 }
 0x41c   :  { %7843 = vmatpush.bf16.msrb.mxu3 %v12712_v39  ;;  %7778 = vmatpush.bf16.msrb.mxu0 %v12672_v34  ;;  %v12743_v39 = vld [vmem:[#allocation13 + $0x300] sm:$0xff] }
 0x41d   :  { %7852 = vmatpush.bf16.msrb.mxu1 %v12724_v30  ;;  %7817 = vmatpush.bf16.msra.mxu2 %v12696_v61  ;;  %v12755_v30 = vld [vmem:[#allocation13 + $0x360] sm:$0xff]  ;;  %v6680_v61 = vmax.f32 %v13393_v57, 0.0  ;;  %v6956_v57 = vpack.c.bf16 %v6683_v32, %v6683_v32 }
 0x41e   :  { %v12767_v32 = vld [vmem:[#allocation13 + $0x3c0] sm:$0xff] }
 0x420   :  { %7844 = vmatpush.bf16.msrb.mxu3 %v12711_v26  ;;  %7779 = vmatpush.bf16.msrb.mxu0 %v12671_v15  ;;  %v6513_v19 = vpop.f32.mrf.mxu0  ;;  %v12742_v26 = vld [vmem:[#allocation13 + $0x2f8] sm:$0xff] }
 0x421   :  { %7853 = vmatpush.bf16.msrb.mxu1 %v12723_v29  ;;  %7818 = vmatpush.bf16.msra.mxu2 %v12695_v41  ;;  %v6514_v59 = vadd.f32 %v6513_v19, %v6501_v6  ;;  %v12754_v15 = vld [vmem:[#allocation13 + $0x358] sm:$0xff]  ;;  %v6953_v41 = vpack.c.bf16 %v6680_v61, %v6680_v61  ;;  %v3263_v6 = vperm.slane %v13458_v55, 6 }
 0x423   :  { %7845 = vmatmul.bf16.vlgmr.msrb.gmra.mxu3 %v6954_v10  ;;  %7780 = vmatmul.bf16.vlgmr.msrb.gmra.mxu0 %v6949_v44  ;;  %v6685_v2 = vmax.f32 %v6514_v59, 0.0  ;;  %v12764_v44 = vld [vmem:[#allocation13 + $0x3a8] sm:$0xff] }
 0x424   :  { %7889 = vmatpush.bf16.msra.mxu3 %v12750_v36  ;;  %7824 = vmatpush.bf16.msra.mxu0 %v12710_v22 }
 0x425   :  { %7854 = vmatpush.bf16.msrb.mxu1 %v12722_v43  ;;  %7863 = vmatpush.bf16.msrb.mxu2 %v12734_v7  ;;  %v6958_v22 = vpack.c.bf16 %v6685_v2, %v6685_v2  ;;  %v3262_v43 = vperm.slane %v13458_v55, 5  ;;  %v12740_v7 = vld [vmem:[#allocation13 + $0x2e8] sm:$0xff]  ;;  %v12769_v2 = vld [vmem:[#allocation13 + $0x3d0] sm:$0xff] }
 0x426   :  { %7819 = vmatmul.bf16.vlgmr.msra.gmra.mxu2 %v6952_v53  ;;  %v13464_v49 = vpop.f32.mrf.mxu3  ;;  %v12739_v53 = vld [vmem:[#allocation13 + $0x2e0] sm:$0xff] }
 0x428   :  { %7890 = vmatpush.bf16.msra.mxu3 %v12749_v45  ;;  %7825 = vmatpush.bf16.msra.mxu0 %v12709_v37  ;;  %v6515_v60 = vpop.f32.mrf.mxu0  ;;  %v12752_v45 = vld [vmem:[#allocation13 + $0x348] sm:$0xff]  ;;  %v6527_v37 = vadd.f32 %v13449_v51, %v3262_v43 }
 0x429   :  { %7855 = vmatpush.bf16.msrb.mxu1 %v12721_v47  ;;  %7864 = vmatpush.bf16.msrb.mxu2 %v12733_v48  ;;  %v6552_v52 = vpop.f32.mrf.mxu2  ;;  %v12751_v48 = vld [vmem:[#allocation13 + $0x340] sm:$0xff] }
 0x42a   :  { %v6540_v47 = vadd.f32 %v13455_v40, %v6527_v37  ;;  %v12761_v40 = vld [vmem:[#allocation13 + $0x390] sm:$0xff] }
 0x42c   :  { %7891 = vmatpush.bf16.msra.mxu3 %v12748_v5  ;;  %7826 = vmatpush.bf16.msra.mxu0 %v12708_v16  ;;  %v6553_v5 = vadd.f32 %v6552_v52, %v6540_v47  ;;  %v12763_v16 = vld [vmem:[#allocation13 + $0x3a0] sm:$0xff] }
 0x42d   :  { %7856 = vmatpush.bf16.msrb.mxu1 %v12720_v21  ;;  %7865 = vmatpush.bf16.msrb.mxu2 %v12732_v63  ;;  %v12738_v21 = vld [vmem:[#allocation13 + $0x2d8] sm:$0xff] }
 0x42e   :  { %v6580_v34 = vpop.f32.mrf.mxu3 }
 0x430   :  { %7892 = vmatpush.bf16.msra.mxu3 %v12747_v50  ;;  %7827 = vmatpush.bf16.msra.mxu0 %v12707_v27  ;;  %v12762_v27 = vld [vmem:[#allocation13 + $0x398] sm:$0xff] }
 0x431   :  { %7857 = vmatpush.bf16.msrb.mxu1 %v12719_v46  ;;  %7866 = vmatpush.bf16.msrb.mxu2 %v12731_v58  ;;  %v6554_v36 = vpop.f32.mrf.mxu2 }
 0x433   :  { %v13468_v29 = vpop.f32.mrf.mxu1 }
 0x434   :  { %7893 = vmatpush.bf16.msra.mxu3 %v12746_v4  ;;  %7828 = vmatpush.bf16.msra.mxu0 %v12706_v12  ;;  %v12736_v4 = vld [vmem:[#allocation13 + $0x2c8] sm:$0xff]  ;;  %v12735_v12 = vld [vmem:[#allocation13 + $0x2c0] sm:$0xff] }
 0x435   :  { %7902 = vmatpush.bf16.msra.mxu1 %v12758_v11  ;;  %7867 = vmatpush.bf16.msrb.mxu2 %v12730_v14  ;;  %v12760_v11 = vld [vmem:[#allocation13 + $0x388] sm:$0xff]  ;;  %v12774_v14 = vld [vmem:[#allocation13 + $0x3f8] sm:$0xff] }
 0x436   :  { %7858 = vmatmul.bf16.vlgmr.msrb.gmra.mxu1 %v6955_v62 }
 0x438   :  { %7894 = vmatpush.bf16.msra.mxu3 %v12745_v1  ;;  %7829 = vmatpush.bf16.msra.mxu0 %v12705_v17  ;;  %v12773_v17 = vld [vmem:[#allocation13 + $0x3f0] sm:$0xff] }
 0x439   :  { %7903 = vmatpush.bf16.msra.mxu1 %v12757_v18  ;;  %7868 = vmatpush.bf16.msrb.mxu2 %v12729_v20  ;;  %v12759_v18 = vld [vmem:[#allocation13 + $0x380] sm:$0xff]  ;;  %v12772_v20 = vld [vmem:[#allocation13 + $0x3e8] sm:$0xff] }
 0x43b   :  { %v6593_v10 = vpop.f32.mrf.mxu1 }
 0x43c   :  { %7895 = vmatpush.bf16.msra.mxu3 %v12744_v23  ;;  %7830 = vmatpush.bf16.msra.mxu0 %v12704_v38  ;;  %v6579_v23 = vadd.f32 %v13464_v49, %v3263_v6  ;;  %v12770_v38 = vld [vmem:[#allocation13 + $0x3d8] sm:$0xff]  ;;  %v12789_v49 = vld [vmem:[#allocation15] ss:$0 sm:$0xff] }
 0x43d   :  { %7904 = vmatpush.bf16.msra.mxu1 %v12756_v24  ;;  %7869 = vmatpush.bf16.msrb.mxu2 %v12728_v3 }
 0x43e   :  { %v6592_v24 = vadd.f32 %v13468_v29, %v6579_v23 }
 0x440   :  { %7896 = vmatpush.bf16.msra.mxu3 %v12743_v39  ;;  %7831 = vmatpush.bf16.msra.mxu0 %v12703_v31  ;;  %v6565_v54 = vpop.f32.mrf.mxu0 }
 0x441   :  { %7905 = vmatpush.bf16.msra.mxu1 %v12755_v30  ;;  %7870 = vmatpush.bf16.msrb.mxu2 %v12727_v35  ;;  %v6566_v63 = vadd.f32 %v6565_v54, %v6553_v5 }
 0x443   :  { %7897 = vmatmul.bf16.vlgmr.msra.gmra.mxu3 %v6958_v22  ;;  %7832 = vmatmul.bf16.vlgmr.msra.gmra.mxu0 %v6953_v41  ;;  %v6686_v50 = vmax.f32 %v6566_v63, 0.0 }
 0x444   :  { %7876 = vmatpush.bf16.msrb.mxu0 %v12742_v26  ;;  %7871 = vmatmul.bf16.vlgmr.msrb.gmra.mxu2 %v6956_v57  ;;  %v12768_v26 = vld [vmem:[#allocation13 + $0x3c8] sm:$0xff] }
 0x445   :  { %7906 = vmatpush.bf16.msra.mxu1 %v12754_v15  ;;  %7915 = vmatpush.bf16.msra.mxu2 %v12766_v28  ;;  %v6959_v46 = vpack.c.bf16 %v6686_v50, %v6686_v50  ;;  %v3264_v28 = vperm.slane %v13458_v55, 7 }
 0x446   :  { %v6630_v51 = vpop.f32.mrf.mxu3 }
 0x448   :  { %7877 = vmatpush.bf16.msrb.mxu0 %v12741_v33  ;;  %v6567_v8 = vpop.f32.mrf.mxu0  ;;  %v6631_v33 = vadd.f32 %v6630_v51, %v3264_v28 }
 0x449   :  { %7907 = vmatpush.bf16.msra.mxu1 %v12753_v42  ;;  %7916 = vmatpush.bf16.msra.mxu2 %v12765_v9  ;;  %v6604_v58 = vpop.f32.mrf.mxu2 }
 0x44a   :  { %v6605_v59 = vadd.f32 %v6604_v58, %v6592_v24 }
 0x44c   :  { %7878 = vmatpush.bf16.msrb.mxu0 %v12740_v7 }
 0x44d   :  { %7908 = vmatpush.bf16.msra.mxu1 %v12752_v45  ;;  %7917 = vmatpush.bf16.msra.mxu2 %v12764_v44 }
 0x44e   :  { %v6632_v19 = vpop.f32.mrf.mxu3 }
 0x450   :  { %7879 = vmatpush.bf16.msrb.mxu0 %v12739_v53 }
 0x451   :  { %7909 = vmatpush.bf16.msra.mxu1 %v12751_v48  ;;  %7918 = vmatpush.bf16.msra.mxu2 %v12763_v16  ;;  %v6606_v1 = vpop.f32.mrf.mxu2 }
 0x453   :  { %v6643_v62 = vpop.f32.mrf.mxu1 }
 0x454   :  { %7880 = vmatpush.bf16.msrb.mxu0 %v12738_v21  ;;  %7910 = vmatmul.bf16.vlgmr.msra.gmra.mxu1 %v6959_v46  ;;  %v6644_v57 = vadd.f32 %v6643_v62, %v6631_v33 }
 0x455   :  { %7919 = vmatpush.bf16.msra.mxu2 %v12762_v27 }
 0x458   :  { %7881 = vmatpush.bf16.msrb.mxu0 %v12737_v0 }
 0x459   :  { %7920 = vmatpush.bf16.msra.mxu2 %v12761_v40 }
 0x45b   :  { %v6645_v52 = vpop.f32.mrf.mxu1 }
 0x45c   :  { %7882 = vmatpush.bf16.msrb.mxu0 %v12736_v4 }
 0x45d   :  { %7921 = vmatpush.bf16.msra.mxu2 %v12760_v11 }
 0x460   :  { %7883 = vmatpush.bf16.msrb.mxu0 %v12735_v12  ;;  %v6617_v60 = vpop.f32.mrf.mxu0 }
 0x461   :  { %7922 = vmatpush.bf16.msra.mxu2 %v12759_v18  ;;  %v6618_v3 = vadd.f32 %v6617_v60, %v6605_v59 }
 0x463   :  { %7884 = vmatmul.bf16.vlgmr.msrb.gmra.mxu0 %v6957_v56  ;;  %v6687_v39 = vmax.f32 %v6618_v3, 0.0 }
 0x464   :  { %7928 = vmatpush.bf16.msra.mxu0 %v12774_v14 }
 0x465   :  { %v6960_v34 = vpack.c.bf16 %v6687_v39, %v6687_v39 }
 0x466   :  { %v7742_v30 = vpop.f32.mrf.mxu3 }
 0x467   :  { %7923 = vmatmul.bf16.vlgmr.msra.gmra.mxu2 %v6960_v34  ;;  %v7743_v29 = vadd.f32 %v12789_v49, %v7742_v30 }
 0x468   :  { %7929 = vmatpush.bf16.msra.mxu0 %v12773_v17  ;;  %v6619_v61 = vpop.f32.mrf.mxu0 }
 0x469   :  { %v6656_v31 = vpop.f32.mrf.mxu2 }
 0x46a   :  { %v6657_v42 = vadd.f32 %v6656_v31, %v6644_v57 }
 0x46c   :  { %7930 = vmatpush.bf16.msra.mxu0 %v12772_v20 }
 0x46e   :  { %v7744_v35 = vpop.f32.mrf.mxu3 }
 0x470   :  { %7931 = vmatpush.bf16.msra.mxu0 %v12771_v25 }
 0x471   :  { %v6658_v22 = vpop.f32.mrf.mxu2 }
 0x473   :  { %v7755_v36 = vpop.f32.mrf.mxu1 }
 0x474   :  { %7932 = vmatpush.bf16.msra.mxu0 %v12770_v38  ;;  %v7756_v15 = vadd.f32 %v7755_v36, %v7743_v29 }
 0x478   :  { %7933 = vmatpush.bf16.msra.mxu0 %v12769_v2 }
 0x47b   :  { %v7757_v41 = vpop.f32.mrf.mxu1 }
 0x47c   :  { %7934 = vmatpush.bf16.msra.mxu0 %v12768_v26 }
 0x480   :  { %7935 = vmatpush.bf16.msra.mxu0 %v12767_v32  ;;  %v6669_v43 = vpop.f32.mrf.mxu0 }
 0x481   :  { %v6670_v9 = vadd.f32 %v6669_v43, %v6657_v42 }
 0x483   :  { %v6688_v7 = vmax.f32 %v6670_v9, 0.0 }
 0x485   :  { %v6961_v45 = vpack.c.bf16 %v6688_v7, %v6688_v7 }
 0x486   :  { %v7794_v10 = vpop.f32.mrf.mxu3 }
 0x487   :  { %7936 = vmatmul.bf16.vlgmr.msra.gmra.mxu0 %v6961_v45 }
 0x488   :  { %v6671_v53 = vpop.f32.mrf.mxu0 }
 0x489   :  { %v7768_v37 = vpop.f32.mrf.mxu2 }
 0x48a   :  { %v7769_v44 = vadd.f32 %v7768_v37, %v7756_v15 }
 0x48e   :  { %v7796_v47 = vpop.f32.mrf.mxu3 }
 0x491   :  { %v7770_v5 = vpop.f32.mrf.mxu2 }
 0x493   :  { %v7807_v48 = vpop.f32.mrf.mxu1 }
 0x49b   :  { %v7809_v16 = vpop.f32.mrf.mxu1 }
 0x4a0   :  { %v7781_v54 = vpop.f32.mrf.mxu0 }
 0x4a1   :  { %v7782_v21 = vadd.f32 %v7781_v54, %v7769_v44 }
 0x4a3   :  { %v7795_v55 = vadd.f32 %v7794_v10, %v7782_v21 }
 0x4a5   :  { %v7808_v50 = vadd.f32 %v7807_v48, %v7795_v55 }
 0x4a6   :  { %v7846_v63 = vpop.f32.mrf.mxu3 }
 0x4a8   :  { %v7783_v0 = vpop.f32.mrf.mxu0 }
 0x4a9   :  { %v7820_v27 = vpop.f32.mrf.mxu2 }
 0x4aa   :  { %v7821_v51 = vadd.f32 %v7820_v27, %v7808_v50 }
 0x4ae   :  { %v7848_v46 = vpop.f32.mrf.mxu3 }
 0x4b1   :  { %v7822_v40 = vpop.f32.mrf.mxu2 }
 0x4b3   :  { %v7859_v58 = vpop.f32.mrf.mxu1 }
 0x4bb   :  { %v7861_v8 = vpop.f32.mrf.mxu1 }
 0x4c0   :  { %v7833_v4 = vpop.f32.mrf.mxu0 }
 0x4c1   :  { %v7834_v11 = vadd.f32 %v7833_v4, %v7821_v51 }
 0x4c3   :  { %v7847_v19 = vadd.f32 %v7846_v63, %v7834_v11 }
 0x4c5   :  { %v7860_v13 = vadd.f32 %v7859_v58, %v7847_v19 }
 0x4c6   :  { %v7898_v12 = vpop.f32.mrf.mxu3 }
 0x4c7   :  { %v7872_v14 = vpop.f32.mrf.mxu2 }
 0x4c8   :  { %v7835_v62 = vpop.f32.mrf.mxu0  ;;  %v7873_v6 = vadd.f32 %v7872_v14, %v7860_v13 }
 0x4ce   :  { %v7900_v1 = vpop.f32.mrf.mxu3 }
 0x4cf   :  { %v7874_v18 = vpop.f32.mrf.mxu2 }
 0x4d1   :  { %v7911_v56 = vpop.f32.mrf.mxu1 }
 0x4d9   :  { %v7913_v17 = vpop.f32.mrf.mxu1 }
 0x4e0   :  { %v7885_v20 = vpop.f32.mrf.mxu0 }
 0x4e1   :  { %v7886_v52 = vadd.f32 %v7885_v20, %v7873_v6 }
 0x4e3   :  { %v7899_v23 = vadd.f32 %v7898_v12, %v7886_v52 }
 0x4e5   :  { %v7912_v60 = vadd.f32 %v7911_v56, %v7899_v23 }
 0x4e8   :  { %v7887_v25 = vpop.f32.mrf.mxu0 }
 0x4ea   :  { %v7924_v24 = vpop.f32.mrf.mxu2 }
 0x4eb   :  { %v7925_v38 = vadd.f32 %v7924_v24, %v7912_v60 }
 0x4f2   :  { %v7926_v59 = vpop.f32.mrf.mxu2 }
 0x504   :  { %v7937_v3 = vpop.f32.mrf.mxu0 }
 0x505   :  { %v7938_v39 = vadd.f32 %v7937_v3, %v7925_v38 }
 0x507   :  { %7941 = vst [vmem:[%s13491_s9] sm:$0xff] %v7938_v39 }
 0x50c   :  { %v7939_v30 = vpop.f32.mrf.mxu0 }
 0x50d   :  { %7946 = vsyncpa [#allocation3], 1 }
 0x50e   :  { %7947 = vsyncpa [#allocation5], 1 }
 0x50f   :  { %7948 = vsyncpa [#allocation8], 1 }
 0x510   :  { %7949 = vsyncpa [#allocation11], 1 }
 0x511   :  { %7950 = vsyncpa [#allocation14], 1 }

</bundles_post_ra>
